<compile_context>
chip_gen: v7x
topology: tpu7x:2x2x1
jax: 0.10.0
libtpu: 0.0.40
codegen_flags: <defaults>
</compile_context>

<pallas_src>
import math
from functools import partial

import numpy as np
import jax
import jax.numpy as jnp
from jax.experimental import pallas as pl
from jax.experimental.pallas import tpu as pltpu

EPS = 1e-5                      # torch LayerNorm default
VMEM_LIMIT = 32 * 1024 * 1024   # explicit scoped-VMEM limit (safe on v5e/v6e/v7x)
ROW_TILE_CAP = 512              # cap on row-tile so big resolutions fit VMEM
ATTN_ROW_TARGET = 512           # target rows per attention grid step
INV_SQRT2 = 1.0 / math.sqrt(2.0)


def _compiler_params():
    return pltpu.CompilerParams(dimension_semantics=("parallel",),
                                vmem_limit_bytes=VMEM_LIMIT)


def _full_spec(shape):
    nd = len(shape)
    return pl.BlockSpec(shape, lambda i, _nd=nd: (0,) * _nd)


# --------------------------------------------------------------------------
# In-kernel math helpers
# --------------------------------------------------------------------------
def _layernorm_f32(x, g, b):
    mu = jnp.mean(x, axis=-1, keepdims=True)
    xc = x - mu
    var = jnp.mean(xc * xc, axis=-1, keepdims=True)
    return xc * jax.lax.rsqrt(var + EPS) * g + b


def _erf_f32(x):
    # Abramowitz & Stegun 7.1.26 rational approximation, |err| <= 1.5e-7.
    # TODO(synk): used instead of lax.erf so the GELU can live inside the fused
    # Mosaic kernel without relying on an erf_p lowering; f32-accurate.
    a1, a2, a3, a4, a5 = (0.254829592, -0.284496736, 1.421413741,
                          -1.453152027, 1.061405429)
    p = 0.3275911
    ax = jnp.abs(x)
    t = 1.0 / (1.0 + p * ax)
    poly = ((((a5 * t + a4) * t + a3) * t + a2) * t + a1) * t
    y = 1.0 - poly * jnp.exp(-ax * ax)
    return jnp.where(x < 0.0, -y, y)


def _gelu_f32(x):
    # exact GELU: x * 0.5 * (1 + erf(x / sqrt(2)))
    return 0.5 * x * (1.0 + _erf_f32(x * INV_SQRT2))


# --------------------------------------------------------------------------
# Pallas kernels
# --------------------------------------------------------------------------
def _linear_kernel(x_ref, w_ref, b_ref, o_ref):
    acc = jnp.dot(x_ref[...], w_ref[...], preferred_element_type=jnp.float32)
    o_ref[...] = (acc + b_ref[...]).astype(o_ref.dtype)


def _layernorm_kernel(x_ref, g_ref, b_ref, o_ref):
    x = x_ref[...].astype(jnp.float32)
    o_ref[...] = _layernorm_f32(x, g_ref[...], b_ref[...]).astype(o_ref.dtype)


def _ln_linear_kernel(x_ref, g_ref, b_ref, w_ref, o_ref):
    # fused LayerNorm + bias-free matmul (patch merging reduction)
    x = x_ref[...].astype(jnp.float32)
    xn = _layernorm_f32(x, g_ref[...], b_ref[...])
    o_ref[...] = jnp.dot(xn, w_ref[...],
                         preferred_element_type=jnp.float32).astype(o_ref.dtype)


def _mlp_kernel(x_ref, g_ref, b_ref, w1_ref, b1_ref, w2_ref, b2_ref, o_ref):
    # fused: out = x + fc2(gelu(fc1(LN(x))))
    x = x_ref[...].astype(jnp.float32)
    xn = _layernorm_f32(x, g_ref[...], b_ref[...])
    h = jnp.dot(xn, w1_ref[...], preferred_element_type=jnp.float32) + b1_ref[...]
    h = _gelu_f32(h)
    y = jnp.dot(h, w2_ref[...], preferred_element_type=jnp.float32) + b2_ref[...]
    o_ref[...] = (x + y).astype(o_ref.dtype)


def _make_win_attn_kernel(num_heads, scale, has_mask, fuse_ln, WB, N, C, mask_wb):
    """Fused window attention: [LN] -> qkv -> (qk^T + bias [+mask]) -> softmax
    -> @v -> proj(+bias).  One grid step processes WB windows (all heads).
    mask_wb = number of windows covered by the mask block (mask indexed w % mask_wb)."""
    hd = C // num_heads

    def kern(*refs):
        it = iter(refs)
        x_ref = next(it)
        if fuse_ln:
            g_ref = next(it)
            b_ref = next(it)
        qw_ref = next(it)
        qb_ref = next(it)
        bias_ref = next(it)
        pw_ref = next(it)
        pb_ref = next(it)
        mask_ref = next(it) if has_mask else None
        o_ref = next(it)

        x = x_ref[...].astype(jnp.float32)                       # (WB*N, C)
        if fuse_ln:
            x = _layernorm_f32(x, g_ref[...], b_ref[...])
        qkv = jnp.dot(x, qw_ref[...],
                      preferred_element_type=jnp.float32) + qb_ref[...]  # (WB*N, 3C)
        pw = pw_ref[...]                                         # (C, C)
        pb = pb_ref[...]                                         # (1, C)

        # unrolled over windows / heads: only 2-D matmuls + static slices,
        # output written lane-dense as (N, C) rows
        for w in range(WB):
            r0, r1 = w * N, (w + 1) * N
            out_rows = None
            for h in range(num_heads):
                c0 = h * hd
                q = qkv[r0:r1, c0:c0 + hd] * scale               # (N, hd)
                k = qkv[r0:r1, C + c0:C + c0 + hd]
                v = qkv[r0:r1, 2 * C + c0:2 * C + c0 + hd]
                attn = jax.lax.dot_general(                      # q @ k^T : (N, N)
                    q, k, (((1,), (1,)), ((), ())),
                    preferred_element_type=jnp.float32)
                attn = attn + bias_ref[h]
                if has_mask:
                    attn = attn + mask_ref[w % mask_wb]
                attn = attn - jnp.max(attn, axis=-1, keepdims=True)
                p = jnp.exp(attn)
                p = p / jnp.sum(p, axis=-1, keepdims=True)
                out_h = jnp.dot(p, v, preferred_element_type=jnp.float32)   # (N, hd)
                # fold the output projection per head: proj(concat_h) == sum_h
                contrib = jnp.dot(out_h, pw[c0:c0 + hd, :],
                                  preferred_element_type=jnp.float32)       # (N, C)
                out_rows = contrib if out_rows is None else out_rows + contrib
            o_ref[r0:r1, :] = (out_rows + pb).astype(o_ref.dtype)

    return kern


# --------------------------------------------------------------------------
# Kernel wrappers (row tiling, grid setup)
# --------------------------------------------------------------------------
def _row_tiles(M, cap=ROW_TILE_CAP):
    """Pick a row tile (multiple of 8 when tiling) targeting >= 2 grid steps."""
    if M <= 16:
        return M, M
    TM = min(cap, ((M + 1) // 2 + 7) // 8 * 8)
    Mp = ((M + TM - 1) // TM) * TM
    return TM, Mp


def _rowwise_call(kern, x, extra_arrays, extra_specs, n_out):
    M, K = x.shape
    TM, Mp = _row_tiles(M)
    if Mp != M:
        x = jnp.pad(x, ((0, Mp - M), (0, 0)))
    out = pl.pallas_call(
        kern,
        out_shape=jax.ShapeDtypeStruct((Mp, n_out), x.dtype),
        grid=(Mp // TM,),
        in_specs=[pl.BlockSpec((TM, K), lambda i: (i, 0))] + list(extra_specs),
        out_specs=pl.BlockSpec((TM, n_out), lambda i: (i, 0)),
        compiler_params=_compiler_params(),
    )(x, *extra_arrays)
    return out[:M] if Mp != M else out


def pallas_linear(x, w, b=None):
    K, N = w.shape
    if b is None:
        b = jnp.zeros((N,), x.dtype)
    return _rowwise_call(_linear_kernel, x, [w, b.reshape(1, N)],
                         [_full_spec((K, N)), _full_spec((1, N))], N)


def pallas_layernorm(x, g, b):
    M, C = x.shape
    return _rowwise_call(_layernorm_kernel, x,
                         [g.reshape(1, C), b.reshape(1, C)],
                         [_full_spec((1, C)), _full_spec((1, C))], C)


def pallas_ln_linear(x, g, b, w):
    C = x.shape[1]
    N = w.shape[1]
    return _rowwise_call(_ln_linear_kernel, x,
                         [g.reshape(1, C), b.reshape(1, C), w],
                         [_full_spec((1, C)), _full_spec((1, C)),
                          _full_spec((C, N))], N)


def pallas_mlp(x, g, b, w1, b1, w2, b2):
    C = x.shape[1]
    H = w1.shape[1]
    return _rowwise_call(
        _mlp_kernel, x,
        [g.reshape(1, C), b.reshape(1, C), w1, b1.reshape(1, H),
         w2, b2.reshape(1, C)],
        [_full_spec((1, C)), _full_spec((1, C)), _full_spec((C, H)),
         _full_spec((1, H)), _full_spec((H, C)), _full_spec((1, C))], C)


def pallas_window_attention(x_windows, bp, num_heads, mask, nW, fuse_ln):
    """x_windows: (B_, N, C); mask: (nW, N, N) or None; returns (B_, N, C)."""
    B_, N, C = x_windows.shape
    hd = C // num_heads
    scale = hd ** (-0.5)
    has_mask = mask is not None

    # batch WB windows per grid step; WB divides nW so one grid step never
    # straddles batch images and the mask block index is i % (nW // WB).
    cap = min(nW, max(1, ATTN_ROW_TARGET // max(N, 1)))
    WB = 1
    for d in range(1, cap + 1):
        if nW % d == 0 and (d * N) % 8 == 0:
            WB = d

    if (WB * N) % 8 != 0 and B_ > 1:
        # fallback: one grid step over all windows (block == full array, so the
        # (8,128) divisibility rule does not apply); mask indexed w % nW.
        WB = B_
        grid = 1
        mask_wb = nW
        mask_spec = _full_spec((nW, N, N)) if has_mask else None
    else:
        grid = B_ // WB
        mask_wb = WB
        nb = nW // WB
        mask_spec = (pl.BlockSpec((WB, N, N), lambda i, _nb=nb: (i % _nb, 0, 0))
                     if has_mask else None)

    kern = _make_win_attn_kernel(num_heads, scale, has_mask, fuse_ln,
                                 WB, N, C, mask_wb)

    arrays = [x_windows.reshape(B_ * N, C)]
    specs = [pl.BlockSpec((WB * N, C), lambda i: (i, 0))]
    if fuse_ln:
        arrays += [bp["norm1_g"].reshape(1, C), bp["norm1_b"].reshape(1, C)]
        specs += [_full_spec((1, C)), _full_spec((1, C))]
    arrays += [bp["qkv_w"], bp["qkv_b"].reshape(1, 3 * C), bp["rel_bias"],
               bp["proj_w"], bp["proj_b"].reshape(1, C)]
    specs += [_full_spec((C, 3 * C)), _full_spec((1, 3 * C)),
              _full_spec((num_heads, N, N)),
              _full_spec((C, C)), _full_spec((1, C))]
    if has_mask:
        arrays.append(mask)
        specs.append(mask_spec)

    out = pl.pallas_call(
        kern,
        out_shape=jax.ShapeDtypeStruct((B_ * N, C), x_windows.dtype),
        grid=(grid,),
        in_specs=specs,
        out_specs=pl.BlockSpec((WB * N, C), lambda i: (i, 0)),
        compiler_params=_compiler_params(),
    )(*arrays)
    return out.reshape(B_, N, C)


# --------------------------------------------------------------------------
# Swin-3D helpers (glue; plain JAX / numpy, fused by XLA under jit)
# --------------------------------------------------------------------------
def get_window_size(x_size, window_size, shift_size=None):
    use_window_size = list(window_size)
    if shift_size is not None:
        use_shift_size = list(shift_size)
    for i in range(len(x_size)):
        if x_size[i] <= window_size[i]:
            use_window_size[i] = x_size[i]
            if shift_size is not None:
                use_shift_size[i] = 0
    if shift_size is None:
        return tuple(use_window_size)
    return tuple(use_window_size), tuple(use_shift_size)


def window_partition(x, window_size):
    B, D, H, W, C = x.shape
    wd, wh, ww = window_size
    x = x.reshape(B, D // wd, wd, H // wh, wh, W // ww, ww, C)
    windows = x.transpose((0, 1, 3, 5, 2, 4, 6, 7)).reshape(-1, wd * wh * ww, C)
    return windows


def window_reverse(windows, window_size, B, D, H, W):
    wd, wh, ww = window_size
    C = windows.shape[-1]
    x = windows.reshape(B, D // wd, H // wh, W // ww, wd, wh, ww, C)
    x = x.transpose((0, 1, 4, 2, 5, 3, 6, 7)).reshape(B, D, H, W, C)
    return x


def compute_mask_np(D, H, W, window_size, shift_size):
    img_mask = np.zeros((1, D, H, W, 1), np.float32)
    cnt = 0
    for d in (slice(-window_size[0]), slice(-window_size[0], -shift_size[0]),
              slice(-shift_size[0], None)):
        for h in (slice(-window_size[1]), slice(-window_size[1], -shift_size[1]),
                  slice(-shift_size[1], None)):
            for w in (slice(-window_size[2]), slice(-window_size[2], -shift_size[2]),
                      slice(-shift_size[2], None)):
                img_mask[:, d, h, w, :] = cnt
                cnt += 1
    mask_windows = window_partition(img_mask, window_size)[..., 0]     # (nW, N)
    attn_mask = mask_windows[:, None, :] - mask_windows[:, :, None]    # (nW, N, N)
    attn_mask = np.where(attn_mask != 0, np.float32(-100.0), np.float32(0.0))
    return jnp.asarray(attn_mask)


def relative_position_index_np(window_size):
    wd, wh, ww = window_size
    coords = np.stack(np.meshgrid(np.arange(wd), np.arange(wh), np.arange(ww),
                                  indexing="ij"))
    coords_flatten = coords.reshape(3, -1)
    rel = coords_flatten[:, :, None] - coords_flatten[:, None, :]
    rel = rel.transpose((1, 2, 0)).copy()
    rel[:, :, 0] += wd - 1
    rel[:, :, 1] += wh - 1
    rel[:, :, 2] += ww - 1
    rel[:, :, 0] *= (2 * wh - 1) * (2 * ww - 1)
    rel[:, :, 1] *= (2 * ww - 1)
    return rel.sum(-1)  # (N, N) int


def effective_window_shift(input_resolution, window_size):
    # Mirrors the in-place mutation done in SwinTransformerBlock3D.__init__
    win = list(window_size)
    shift = [w // 2 for w in window_size]
    for i in range(3):
        if input_resolution[i] <= win[i]:
            shift[i] = 0
            win[i] = input_resolution[i]
    return win, shift


# --------------------------------------------------------------------------
# Modules (forward only)
# --------------------------------------------------------------------------
def patch_embed_forward(x, p, patch_size, embed_dim):
    # Conv3d with kernel==stride == patch-extract + matmul
    B, Cin, D, H, W = x.shape
    pd, ph, pw = patch_size
    if W % pw != 0:
        x = jnp.pad(x, ((0, 0), (0, 0), (0, 0), (0, 0), (0, pw - W % pw)))
    if H % ph != 0:
        x = jnp.pad(x, ((0, 0), (0, 0), (0, 0), (0, ph - H % ph), (0, 0)))
    if D % pd != 0:
        x = jnp.pad(x, ((0, 0), (0, 0), (0, pd - D % pd), (0, 0), (0, 0)))
    _, _, D2, H2, W2 = x.shape
    Do, Ho, Wo = D2 // pd, H2 // ph, W2 // pw
    xp = x.reshape(B, Cin, Do, pd, Ho, ph, Wo, pw)
    xp = xp.transpose((0, 2, 4, 6, 1, 3, 5, 7)).reshape(
        B * Do * Ho * Wo, Cin * pd * ph * pw)
    w = p["w"].reshape(embed_dim, Cin * pd * ph * pw).T
    y = pallas_linear(xp, w, p["b"])
    return y.reshape(B, Do, Ho, Wo, embed_dim)   # 'n d h w c'


def patch_merging_forward(x, p):
    B, D, H, W, C = x.shape
    if H % 2 == 1 or W % 2 == 1:
        x = jnp.pad(x, ((0, 0), (0, 0), (0, H % 2), (0, W % 2), (0, 0)))
    x0 = x[:, :, 0::2, 0::2, :]
    x1 = x[:, :, 1::2, 0::2, :]
    x2 = x[:, :, 0::2, 1::2, :]
    x3 = x[:, :, 1::2, 1::2, :]
    xc = jnp.concatenate([x0, x1, x2, x3], -1)
    Bn, Dn, Hn, Wn, C4 = xc.shape
    xf = pallas_ln_linear(xc.reshape(-1, C4), p["norm_g"], p["norm_b"], p["red_w"])
    return xf.reshape(Bn, Dn, Hn, Wn, C4 // 2)


def swin_block_forward(x, bp, bmeta, mask_matrix):
    B, D, H, W, C = x.shape
    shortcut = x
    window_size, shift_size = get_window_size(
        (D, H, W), bmeta["window_size"], bmeta["shift_size"])
    pad_d1 = (window_size[0] - D % window_size[0]) % window_size[0]
    pad_b = (window_size[1] - H % window_size[1]) % window_size[1]
    pad_r = (window_size[2] - W % window_size[2]) % window_size[2]
    need_pad = pad_d1 > 0 or pad_b > 0 or pad_r > 0

    if need_pad:
        # the reference pads with zeros *after* norm1, so LN cannot be fused
        # into the attention kernel here (padded tokens must stay 0, not beta).
        xn = pallas_layernorm(x.reshape(-1, C), bp["norm1_g"], bp["norm1_b"])
        xp = jnp.pad(xn.reshape(B, D, H, W, C),
                     ((0, 0), (0, pad_d1), (0, pad_b), (0, pad_r), (0, 0)))
        fuse_ln = False
    else:
        xp = x
        fuse_ln = True
    _, Dp, Hp, Wp, _ = xp.shape

    do_shift = any(s > 0 for s in shift_size)
    if do_shift:
        shifted_x = jnp.roll(
            xp, shift=(-shift_size[0], -shift_size[1], -shift_size[2]),
            axis=(1, 2, 3))
        attn_mask = mask_matrix
    else:
        shifted_x = xp
        attn_mask = None        # mask-free kernel variant for unshifted blocks

    nW = (Dp // window_size[0]) * (Hp // window_size[1]) * (Wp // window_size[2])
    x_windows = window_partition(shifted_x, window_size)        # (B_, N, C)
    attn_windows = pallas_window_attention(
        x_windows, bp, bmeta["num_heads"], attn_mask, nW, fuse_ln)
    attn_windows = attn_windows.reshape((-1,) + tuple(window_size) + (C,))
    shifted_x = window_reverse(attn_windows, window_size, B, Dp, Hp, Wp)

    if do_shift:
        xr = jnp.roll(shifted_x, shift=tuple(shift_size), axis=(1, 2, 3))
    else:
        xr = shifted_x
    if need_pad:
        xr = xr[:, :D, :H, :W, :]

    x = shortcut + xr           # drop_path == identity; fused by XLA under jit

    # fused MLP branch: x + fc2(gelu(fc1(LN(x))))
    xf = pallas_mlp(x.reshape(-1, C), bp["norm2_g"], bp["norm2_b"],
                    bp["fc1_w"], bp["fc1_b"], bp["fc2_w"], bp["fc2_b"])
    return xf.reshape(B, D, H, W, C)


def basic_layer_forward(x, lp, lmeta):
    if lmeta["has_downsample"]:
        x = patch_merging_forward(x, lp["downsample"])
    B, D, H, W, C = x.shape
    window_size, shift_size = get_window_size(
        (D, H, W), lmeta["window_size"], lmeta["shift_size"])
    Dp = int(np.ceil(D / window_size[0])) * window_size[0]
    Hp = int(np.ceil(H / window_size[1])) * window_size[1]
    Wp = int(np.ceil(W / window_size[2])) * window_size[2]
    attn_mask = compute_mask_np(Dp, Hp, Wp, window_size, shift_size)  # const under jit
    for bp, bmeta in zip(lp["blocks"], lmeta["blocks"]):
        x = swin_block_forward(x, bp, bmeta, attn_mask)
    return x.reshape(B, D, H, W, -1)


def swin_forward(params, x, cfg, meta):
    x = patch_embed_forward(x, params["patch_embed"], cfg["patch_size"],
                            cfg["embed_dim"])
    # ape=False, pos_drop rate 0 -> identity
    x_downsample = []
    for lp, lmeta in zip(params["layers"], meta["layers"]):
        x = basic_layer_forward(x, lp, lmeta)
        x_downsample.append(jnp.transpose(x, (0, 4, 1, 2, 3)))
    B, D, H, W, C = x.shape
    xf = pallas_layernorm(x.reshape(-1, C), params["norm"]["g"], params["norm"]["b"])
    x = jnp.transpose(xf.reshape(B, D, H, W, C), (0, 4, 1, 2, 3))
    return x, x_downsample


# --------------------------------------------------------------------------
# Deterministic parameter init (synthetic weights) + static architecture meta
# --------------------------------------------------------------------------
def trunc_normal(key, shape, std=0.02):
    return std * jax.random.truncated_normal(key, -2.0, 2.0, shape, jnp.float32)


def init_params(key, cfg):
    keys = iter(jax.random.split(key, 256))
    nxt = lambda: next(keys)
    embed_dim = cfg["embed_dim"]
    pd, ph, pw = cfg["patch_size"]
    Cin = cfg["in_channels"]
    params = {
        "patch_embed": {
            "w": trunc_normal(nxt(), (embed_dim, Cin, pd, ph, pw)),
            "b": jnp.zeros((embed_dim,), jnp.float32),
        },
        "layers": [],
    }
    meta = {"layers": []}
    pr = cfg["patches_resolution"]
    num_layers = len(cfg["depths"])
    for i in range(num_layers):
        dim = int(embed_dim * 2 ** i)
        in_res = (pr[0], pr[1] // 2 ** i, pr[2] // 2 ** i)
        win, shift = effective_window_shift(in_res, cfg["window_size"])
        nH = cfg["num_heads"][i]
        hidden = int(dim * cfg["mlp_ratio"])
        lp = {"blocks": []}
        lmeta = {"window_size": tuple(win), "shift_size": tuple(shift),
                 "has_downsample": i > 0, "blocks": []}
        if i > 0:
            dim_pm = dim // 2
            lp["downsample"] = {
                "norm_g": jnp.ones((4 * dim_pm,), jnp.float32),
                "norm_b": jnp.zeros((4 * dim_pm,), jnp.float32),
                "red_w": trunc_normal(nxt(), (4 * dim_pm, 2 * dim_pm)),
            }
        rel_index = relative_position_index_np(win)
        table_len = (2 * win[0] - 1) * (2 * win[1] - 1) * (2 * win[2] - 1)
        N = win[0] * win[1] * win[2]
        for j in range(cfg["depths"][i]):
            rel_table = trunc_normal(nxt(), (table_len, nH))
            # precompute the (nH, N, N) relative-position bias once at init
            rel_bias = rel_table[jnp.asarray(rel_index.reshape(-1))]
            rel_bias = rel_bias.reshape(N, N, nH).transpose(2, 0, 1)
            bp = {
                "rel_bias": rel_bias,
                "norm1_g": jnp.ones((dim,), jnp.float32),
                "norm1_b": jnp.zeros((dim,), jnp.float32),
                "qkv_w": trunc_normal(nxt(), (dim, 3 * dim)),
                "qkv_b": jnp.zeros((3 * dim,), jnp.float32),
                "proj_w": trunc_normal(nxt(), (dim, dim)),
                "proj_b": jnp.zeros((dim,), jnp.float32),
                "norm2_g": jnp.ones((dim,), jnp.float32),
                "norm2_b": jnp.zeros((dim,), jnp.float32),
                "fc1_w": trunc_normal(nxt(), (dim, hidden)),
                "fc1_b": jnp.zeros((hidden,), jnp.float32),
                "fc2_w": trunc_normal(nxt(), (hidden, dim)),
                "fc2_b": jnp.zeros((dim,), jnp.float32),
            }
            lp["blocks"].append(bp)
            lmeta["blocks"].append({
                "num_heads": nH,
                "window_size": tuple(win),
                "shift_size": (0, 0, 0) if j % 2 == 0 else tuple(shift),
            })
        params["layers"].append(lp)
        meta["layers"].append(lmeta)
    num_features = int(embed_dim * 2 ** (num_layers - 1))
    params["norm"] = {"g": jnp.ones((num_features,), jnp.float32),
                      "b": jnp.zeros((num_features,), jnp.float32)}
    return params, meta


# --------------------------------------------------------------------------
if __name__ == "__main__":
    cfg = dict(
        img_size=16,
        in_channels=3,
        temporal_dim=8,
        patch_size=(2, 4, 4),
        embed_dim=32,
        depths=[2, 2],
        num_heads=[2, 4],
        window_size=[2, 4, 4],
        mlp_ratio=2.0,
    )
    cfg["patches_resolution"] = [
        math.ceil(cfg["temporal_dim"] / cfg["patch_size"][0]),
        math.ceil(cfg["img_size"] / cfg["patch_size"][1]),
        math.ceil(cfg["img_size"] / cfg["patch_size"][2]),
    ]

    key = jax.random.PRNGKey(0)
    kp, kx = jax.random.split(key)
    params, meta = init_params(kp, cfg)

    x = jax.random.normal(
        kx, (2, cfg["in_channels"], cfg["temporal_dim"],
             cfg["img_size"], cfg["img_size"]), jnp.float32)

    # jit the whole forward: glue ops fuse, masks/bias become constants, and
    # the Pallas custom calls are scheduled by XLA instead of dispatched eagerly
    fwd = jax.jit(partial(swin_forward, cfg=cfg, meta=meta))
    out, x_downsample = fwd(params, x)
    jax.block_until_ready(out)
    for xd in x_downsample:
        jax.block_until_ready(xd)

    assert out.shape == (2, 64, 4, 2, 2), out.shape
    assert x_downsample[0].shape == (2, 32, 4, 4, 4)
    assert x_downsample[1].shape == (2, 64, 4, 2, 2)
    assert bool(jnp.all(jnp.isfinite(out)))
    print("KERNEL_OK")
</pallas_src>

<mosaic_0001>
module attributes {stable_mosaic.version = 11 : i64} {
  func.func @_linear_kernel(%arg0: i32, %arg1: memref<64x96xf32, #tpu.memory_space<vmem>>, %arg2: memref<96x32xf32, #tpu.memory_space<vmem>>, %arg3: memref<1x32xf32, #tpu.memory_space<vmem>>, %arg4: memref<64x32xf32, #tpu.memory_space<vmem>>) attributes {dimension_semantics = [#tpu.dimension_semantics<parallel>], iteration_bounds = array<i64: 2>, scalar_prefetch = 0 : i64, scratch_operands = 0 : i64, tpu.core_type = #tpu.core_type<tc>, window_params = [{transform_indices = @transform_0, window_bounds = array<i64: 64, 96>}, {pipeline_mode = #tpu.pipeline_mode<synchronous>, transform_indices = @transform_1, window_bounds = array<i64: 96, 32>}, {pipeline_mode = #tpu.pipeline_mode<synchronous>, transform_indices = @transform_2, window_bounds = array<i64: 1, 32>}, {transform_indices = @transform_3, window_bounds = array<i64: 64, 32>}]} {
    %c0 = arith.constant 0 : index
    %c0_0 = arith.constant 0 : index
    %0 = vector.load %arg1[%c0, %c0_0] : memref<64x96xf32, #tpu.memory_space<vmem>>, vector<64x96xf32>
    %c0_1 = arith.constant 0 : index
    %c0_2 = arith.constant 0 : index
    %1 = vector.load %arg2[%c0_1, %c0_2] : memref<96x32xf32, #tpu.memory_space<vmem>>, vector<96x32xf32>
    %cst = arith.constant dense<0.000000e+00> : vector<64x32xf32>
    %2 = tpu.matmul %0, %1, %cst {dimension_numbers = #tpu.dot_dimension_numbers<[1], [0], [0], [1], [0, 0, 1, 1], [], []>} : vector<64x96xf32>, vector<96x32xf32>, vector<64x32xf32> -> vector<64x32xf32>
    %c0_3 = arith.constant 0 : index
    %c0_4 = arith.constant 0 : index
    %3 = vector.load %arg3[%c0_3, %c0_4] : memref<1x32xf32, #tpu.memory_space<vmem>>, vector<1x32xf32>
    %4 = vector.broadcast %3 : vector<1x32xf32> to vector<64x32xf32>
    %5 = arith.addf %2, %4 : vector<64x32xf32>
    %c0_5 = arith.constant 0 : index
    %c0_6 = arith.constant 0 : index
    %6 = vector.load %arg4[%c0_5, %c0_6] : memref<64x32xf32, #tpu.memory_space<vmem>>, vector<64x32xf32>
    tpu.vector_store %arg4[%c0_5, %c0_6], %5 {strides = array<i32>} : memref<64x32xf32, #tpu.memory_space<vmem>>, vector<64x32xf32>,
    return
  }
  func.func @transform_0(%arg0: i32) -> (i32, i32) {
    %c0_i32 = arith.constant 0 : i32
    %c0_i32_0 = arith.constant 0 : i32
    return %arg0, %c0_i32 : i32, i32
  }
  func.func @transform_1(%arg0: i32) -> (i32, i32) {
    %c0_i32 = arith.constant 0 : i32
    %c0_i32_0 = arith.constant 0 : i32
    %c0_i32_1 = arith.constant 0 : i32
    return %c0_i32, %c0_i32_0 : i32, i32
  }
  func.func @transform_2(%arg0: i32) -> (i32, i32) {
    %c0_i32 = arith.constant 0 : i32
    %c0_i32_0 = arith.constant 0 : i32
    %c0_i32_1 = arith.constant 0 : i32
    return %c0_i32, %c0_i32_0 : i32, i32
  }
  func.func @transform_3(%arg0: i32) -> (i32, i32) {
    %c0_i32 = arith.constant 0 : i32
    %c0_i32_0 = arith.constant 0 : i32
    return %arg0, %c0_i32 : i32, i32
  }
}

module attributes {stable_mosaic.version = 11 : i64} {
  func.func @kern(%arg0: i32, %arg1: memref<64x32xf32, #tpu.memory_space<vmem>>, %arg2: memref<1x32xf32, #tpu.memory_space<vmem>>, %arg3: memref<1x32xf32, #tpu.memory_space<vmem>>, %arg4: memref<32x96xf32, #tpu.memory_space<vmem>>, %arg5: memref<1x96xf32, #tpu.memory_space<vmem>>, %arg6: memref<2x32x32xf32, #tpu.memory_space<vmem>>, %arg7: memref<32x32xf32, #tpu.memory_space<vmem>>, %arg8: memref<1x32xf32, #tpu.memory_space<vmem>>, %arg9: memref<64x32xf32, #tpu.memory_space<vmem>>) attributes {dimension_semantics = [#tpu.dimension_semantics<parallel>], iteration_bounds = array<i64: 2>, scalar_prefetch = 0 : i64, scratch_operands = 0 : i64, tpu.core_type = #tpu.core_type<tc>, window_params = [{transform_indices = @transform_0, window_bounds = array<i64: 64, 32>}, {pipeline_mode = #tpu.pipeline_mode<synchronous>, transform_indices = @transform_1, window_bounds = array<i64: 1, 32>}, {pipeline_mode = #tpu.pipeline_mode<synchronous>, transform_indices = @transform_2, window_bounds = array<i64: 1, 32>}, {pipeline_mode = #tpu.pipeline_mode<synchronous>, transform_indices = @transform_3, window_bounds = array<i64: 32, 96>}, {pipeline_mode = #tpu.pipeline_mode<synchronous>, transform_indices = @transform_4, window_bounds = array<i64: 1, 96>}, {pipeline_mode = #tpu.pipeline_mode<synchronous>, transform_indices = @transform_5, window_bounds = array<i64: 2, 32, 32>}, {pipeline_mode = #tpu.pipeline_mode<synchronous>, transform_indices = @transform_6, window_bounds = array<i64: 32, 32>}, {pipeline_mode = #tpu.pipeline_mode<synchronous>, transform_indices = @transform_7, window_bounds = array<i64: 1, 32>}, {transform_indices = @transform_8, window_bounds = array<i64: 64, 32>}]} {
    %c0 = arith.constant 0 : index
    %c0_0 = arith.constant 0 : index
    %0 = vector.load %arg1[%c0, %c0_0] : memref<64x32xf32, #tpu.memory_space<vmem>>, vector<64x32xf32>
    %c0_1 = arith.constant 0 : index
    %c0_2 = arith.constant 0 : index
    %1 = vector.load %arg2[%c0_1, %c0_2] : memref<1x32xf32, #tpu.memory_space<vmem>>, vector<1x32xf32>
    %c0_3 = arith.constant 0 : index
    %c0_4 = arith.constant 0 : index
    %2 = vector.load %arg3[%c0_3, %c0_4] : memref<1x32xf32, #tpu.memory_space<vmem>>, vector<1x32xf32>
    %cst = arith.constant dense<0.000000e+00> : vector<64xf32>
    %3 = vector.multi_reduction <add>, %0, %cst [1] : vector<64x32xf32> to vector<64xf32>
    %4 = vector.shape_cast %3 : vector<64xf32> to vector<64x1xf32>
    %cst_5 = arith.constant 3.200000e+01 : f32
    %5 = vector.broadcast %cst_5 : f32 to vector<64x1xf32>
    %6 = arith.divf %4, %5 : vector<64x1xf32>
    %7 = vector.broadcast %6 : vector<64x1xf32> to vector<64x32xf32>
    %8 = arith.subf %0, %7 : vector<64x32xf32>
    %9 = arith.mulf %8, %8 : vector<64x32xf32>
    %cst_6 = arith.constant dense<0.000000e+00> : vector<64xf32>
    %10 = vector.multi_reduction <add>, %9, %cst_6 [1] : vector<64x32xf32> to vector<64xf32>
    %11 = vector.shape_cast %10 : vector<64xf32> to vector<64x1xf32>
    %cst_7 = arith.constant 3.200000e+01 : f32
    %12 = vector.broadcast %cst_7 : f32 to vector<64x1xf32>
    %13 = arith.divf %11, %12 : vector<64x1xf32>
    %cst_8 = arith.constant 9.99999974E-6 : f32
    %14 = vector.broadcast %cst_8 : f32 to vector<64x1xf32>
    %15 = arith.addf %13, %14 : vector<64x1xf32>
    %16 = math.rsqrt %15 : vector<64x1xf32>
    %17 = vector.broadcast %16 : vector<64x1xf32> to vector<64x32xf32>
    %18 = arith.mulf %8, %17 : vector<64x32xf32>
    %19 = vector.broadcast %1 : vector<1x32xf32> to vector<64x32xf32>
    %20 = arith.mulf %18, %19 : vector<64x32xf32>
    %21 = vector.broadcast %2 : vector<1x32xf32> to vector<64x32xf32>
    %22 = arith.addf %20, %21 : vector<64x32xf32>
    %c0_9 = arith.constant 0 : index
    %c0_10 = arith.constant 0 : index
    %23 = vector.load %arg4[%c0_9, %c0_10] : memref<32x96xf32, #tpu.memory_space<vmem>>, vector<32x96xf32>
    %cst_11 = arith.constant dense<0.000000e+00> : vector<64x96xf32>
    %24 = tpu.matmul %22, %23, %cst_11 {dimension_numbers = #tpu.dot_dimension_numbers<[1], [0], [0], [1], [0, 0, 1, 1], [], []>} : vector<64x32xf32>, vector<32x96xf32>, vector<64x96xf32> -> vector<64x96xf32>
    %c0_12 = arith.constant 0 : index
    %c0_13 = arith.constant 0 : index
    %25 = vector.load %arg5[%c0_12, %c0_13] : memref<1x96xf32, #tpu.memory_space<vmem>>, vector<1x96xf32>
    %26 = vector.broadcast %25 : vector<1x96xf32> to vector<64x96xf32>
    %27 = arith.addf %24, %26 : vector<64x96xf32>
    %c0_14 = arith.constant 0 : index
    %c0_15 = arith.constant 0 : index
    %28 = vector.load %arg7[%c0_14, %c0_15] : memref<32x32xf32, #tpu.memory_space<vmem>>, vector<32x32xf32>
    %c0_16 = arith.constant 0 : index
    %c0_17 = arith.constant 0 : index
    %29 = vector.load %arg8[%c0_16, %c0_17] : memref<1x32xf32, #tpu.memory_space<vmem>>, vector<1x32xf32>
    %30 = vector.extract_strided_slice %27 {offsets = [0, 0], sizes = [32, 16], strides = [1, 1]} : vector<64x96xf32> to vector<32x16xf32>
    %cst_18 = arith.constant 2.500000e-01 : f32
    %31 = vector.broadcast %cst_18 : f32 to vector<32x16xf32>
    %32 = arith.mulf %30, %31 : vector<32x16xf32>
    %33 = vector.extract_strided_slice %27 {offsets = [0, 32], sizes = [32, 16], strides = [1, 1]} : vector<64x96xf32> to vector<32x16xf32>
    %34 = vector.extract_strided_slice %27 {offsets = [0, 64], sizes = [32, 16], strides = [1, 1]} : vector<64x96xf32> to vector<32x16xf32>
    %cst_19 = arith.constant dense<0.000000e+00> : vector<32x32xf32>
    %35 = tpu.matmul %32, %33, %cst_19 {dimension_numbers = #tpu.dot_dimension_numbers<[1], [1], [0], [0], [0, 0, 1, 0], [], []>} : vector<32x16xf32>, vector<32x16xf32>, vector<32x32xf32> -> vector<32x32xf32>
    %c0_20 = arith.constant 0 : index
    %c0_21 = arith.constant 0 : index
    %c0_22 = arith.constant 0 : index
    %36 = vector.load %arg6[%c0_20, %c0_21, %c0_22] : memref<2x32x32xf32, #tpu.memory_space<vmem>>, vector<1x32x32xf32>
    %37 = vector.shape_cast %36 : vector<1x32x32xf32> to vector<32x32xf32>
    %38 = arith.addf %35, %37 : vector<32x32xf32>
    %cst_23 = arith.constant dense<0xFF800000> : vector<32xf32>
    %39 = vector.multi_reduction <maximumf>, %38, %cst_23 [1] : vector<32x32xf32> to vector<32xf32>
    %40 = vector.shape_cast %39 : vector<32xf32> to vector<32x1xf32>
    %41 = vector.broadcast %40 : vector<32x1xf32> to vector<32x32xf32>
    %42 = arith.subf %38, %41 : vector<32x32xf32>
    %43 = math.exp %42 : vector<32x32xf32>
    %cst_24 = arith.constant dense<0.000000e+00> : vector<32xf32>
    %44 = vector.multi_reduction <add>, %43, %cst_24 [1] : vector<32x32xf32> to vector<32xf32>
    %45 = vector.shape_cast %44 : vector<32xf32> to vector<32x1xf32>
    %46 = vector.broadcast %45 : vector<32x1xf32> to vector<32x32xf32>
    %47 = arith.divf %43, %46 : vector<32x32xf32>
    %cst_25 = arith.constant dense<0.000000e+00> : vector<32x16xf32>
    %48 = tpu.matmul %47, %34, %cst_25 {dimension_numbers = #tpu.dot_dimension_numbers<[1], [0], [0], [1], [0, 0, 1, 1], [], []>} : vector<32x32xf32>, vector<32x16xf32>, vector<32x16xf32> -> vector<32x16xf32>
    %49 = vector.extract_strided_slice %28 {offsets = [0, 0], sizes = [16, 32], strides = [1, 1]} : vector<32x32xf32> to vector<16x32xf32>
    %cst_26 = arith.constant dense<0.000000e+00> : vector<32x32xf32>
    %50 = tpu.matmul %48, %49, %cst_26 {dimension_numbers = #tpu.dot_dimension_numbers<[1], [0], [0], [1], [0, 0, 1, 1], [], []>} : vector<32x16xf32>, vector<16x32xf32>, vector<32x32xf32> -> vector<32x32xf32>
    %51 = vector.extract_strided_slice %27 {offsets = [0, 16], sizes = [32, 16], strides = [1, 1]} : vector<64x96xf32> to vector<32x16xf32>
    %cst_27 = arith.constant 2.500000e-01 : f32
    %52 = vector.broadcast %cst_27 : f32 to vector<32x16xf32>
    %53 = arith.mulf %51, %52 : vector<32x16xf32>
    %54 = vector.extract_strided_slice %27 {offsets = [0, 48], sizes = [32, 16], strides = [1, 1]} : vector<64x96xf32> to vector<32x16xf32>
    %55 = vector.extract_strided_slice %27 {offsets = [0, 80], sizes = [32, 16], strides = [1, 1]} : vector<64x96xf32> to vector<32x16xf32>
    %cst_28 = arith.constant dense<0.000000e+00> : vector<32x32xf32>
    %56 = tpu.matmul %53, %54, %cst_28 {dimension_numbers = #tpu.dot_dimension_numbers<[1], [1], [0], [0], [0, 0, 1, 0], [], []>} : vector<32x16xf32>, vector<32x16xf32>, vector<32x32xf32> -> vector<32x32xf32>
    %c1 = arith.constant 1 : index
    %c0_29 = arith.constant 0 : index
    %c0_30 = arith.constant 0 : index
    %57 = vector.load %arg6[%c1, %c0_29, %c0_30] : memref<2x32x32xf32, #tpu.memory_space<vmem>>, vector<1x32x32xf32>
    %58 = vector.shape_cast %57 : vector<1x32x32xf32> to vector<32x32xf32>
    %59 = arith.addf %56, %58 : vector<32x32xf32>
    %cst_31 = arith.constant dense<0xFF800000> : vector<32xf32>
    %60 = vector.multi_reduction <maximumf>, %59, %cst_31 [1] : vector<32x32xf32> to vector<32xf32>
    %61 = vector.shape_cast %60 : vector<32xf32> to vector<32x1xf32>
    %62 = vector.broadcast %61 : vector<32x1xf32> to vector<32x32xf32>
    %63 = arith.subf %59, %62 : vector<32x32xf32>
    %64 = math.exp %63 : vector<32x32xf32>
    %cst_32 = arith.constant dense<0.000000e+00> : vector<32xf32>
    %65 = vector.multi_reduction <add>, %64, %cst_32 [1] : vector<32x32xf32> to vector<32xf32>
    %66 = vector.shape_cast %65 : vector<32xf32> to vector<32x1xf32>
    %67 = vector.broadcast %66 : vector<32x1xf32> to vector<32x32xf32>
    %68 = arith.divf %64, %67 : vector<32x32xf32>
    %cst_33 = arith.constant dense<0.000000e+00> : vector<32x16xf32>
    %69 = tpu.matmul %68, %55, %cst_33 {dimension_numbers = #tpu.dot_dimension_numbers<[1], [0], [0], [1], [0, 0, 1, 1], [], []>} : vector<32x32xf32>, vector<32x16xf32>, vector<32x16xf32> -> vector<32x16xf32>
    %70 = vector.extract_strided_slice %28 {offsets = [16, 0], sizes = [16, 32], strides = [1, 1]} : vector<32x32xf32> to vector<16x32xf32>
    %cst_34 = arith.constant dense<0.000000e+00> : vector<32x32xf32>
    %71 = tpu.matmul %69, %70, %cst_34 {dimension_numbers = #tpu.dot_dimension_numbers<[1], [0], [0], [1], [0, 0, 1, 1], [], []>} : vector<32x16xf32>, vector<16x32xf32>, vector<32x32xf32> -> vector<32x32xf32>
    %72 = arith.addf %50, %71 : vector<32x32xf32>
    %73 = vector.broadcast %29 : vector<1x32xf32> to vector<32x32xf32>
    %74 = arith.addf %72, %73 : vector<32x32xf32>
    %c0_35 = arith.constant 0 : index
    %c0_36 = arith.constant 0 : index
    %75 = vector.load %arg9[%c0_35, %c0_36] : memref<64x32xf32, #tpu.memory_space<vmem>>, vector<32x32xf32>
    tpu.vector_store %arg9[%c0_35, %c0_36], %74 {strides = array<i32>} : memref<64x32xf32, #tpu.memory_space<vmem>>, vector<32x32xf32>,
    %76 = vector.extract_strided_slice %27 {offsets = [32, 0], sizes = [32, 16], strides = [1, 1]} : vector<64x96xf32> to vector<32x16xf32>
    %cst_37 = arith.constant 2.500000e-01 : f32
    %77 = vector.broadcast %cst_37 : f32 to vector<32x16xf32>
    %78 = arith.mulf %76, %77 : vector<32x16xf32>
    %79 = vector.extract_strided_slice %27 {offsets = [32, 32], sizes = [32, 16], strides = [1, 1]} : vector<64x96xf32> to vector<32x16xf32>
    %80 = vector.extract_strided_slice %27 {offsets = [32, 64], sizes = [32, 16], strides = [1, 1]} : vector<64x96xf32> to vector<32x16xf32>
    %cst_38 = arith.constant dense<0.000000e+00> : vector<32x32xf32>
    %81 = tpu.matmul %78, %79, %cst_38 {dimension_numbers = #tpu.dot_dimension_numbers<[1], [1], [0], [0], [0, 0, 1, 0], [], []>} : vector<32x16xf32>, vector<32x16xf32>, vector<32x32xf32> -> vector<32x32xf32>
    %c0_39 = arith.constant 0 : index
    %c0_40 = arith.constant 0 : index
    %c0_41 = arith.constant 0 : index
    %82 = vector.load %arg6[%c0_39, %c0_40, %c0_41] : memref<2x32x32xf32, #tpu.memory_space<vmem>>, vector<1x32x32xf32>
    %83 = vector.shape_cast %82 : vector<1x32x32xf32> to vector<32x32xf32>
    %84 = arith.addf %81, %83 : vector<32x32xf32>
    %cst_42 = arith.constant dense<0xFF800000> : vector<32xf32>
    %85 = vector.multi_reduction <maximumf>, %84, %cst_42 [1] : vector<32x32xf32> to vector<32xf32>
    %86 = vector.shape_cast %85 : vector<32xf32> to vector<32x1xf32>
    %87 = vector.broadcast %86 : vector<32x1xf32> to vector<32x32xf32>
    %88 = arith.subf %84, %87 : vector<32x32xf32>
    %89 = math.exp %88 : vector<32x32xf32>
    %cst_43 = arith.constant dense<0.000000e+00> : vector<32xf32>
    %90 = vector.multi_reduction <add>, %89, %cst_43 [1] : vector<32x32xf32> to vector<32xf32>
    %91 = vector.shape_cast %90 : vector<32xf32> to vector<32x1xf32>
    %92 = vector.broadcast %91 : vector<32x1xf32> to vector<32x32xf32>
    %93 = arith.divf %89, %92 : vector<32x32xf32>
    %cst_44 = arith.constant dense<0.000000e+00> : vector<32x16xf32>
    %94 = tpu.matmul %93, %80, %cst_44 {dimension_numbers = #tpu.dot_dimension_numbers<[1], [0], [0], [1], [0, 0, 1, 1], [], []>} : vector<32x32xf32>, vector<32x16xf32>, vector<32x16xf32> -> vector<32x16xf32>
    %95 = vector.extract_strided_slice %28 {offsets = [0, 0], sizes = [16, 32], strides = [1, 1]} : vector<32x32xf32> to vector<16x32xf32>
    %cst_45 = arith.constant dense<0.000000e+00> : vector<32x32xf32>
    %96 = tpu.matmul %94, %95, %cst_45 {dimension_numbers = #tpu.dot_dimension_numbers<[1], [0], [0], [1], [0, 0, 1, 1], [], []>} : vector<32x16xf32>, vector<16x32xf32>, vector<32x32xf32> -> vector<32x32xf32>
    %97 = vector.extract_strided_slice %27 {offsets = [32, 16], sizes = [32, 16], strides = [1, 1]} : vector<64x96xf32> to vector<32x16xf32>
    %cst_46 = arith.constant 2.500000e-01 : f32
    %98 = vector.broadcast %cst_46 : f32 to vector<32x16xf32>
    %99 = arith.mulf %97, %98 : vector<32x16xf32>
    %100 = vector.extract_strided_slice %27 {offsets = [32, 48], sizes = [32, 16], strides = [1, 1]} : vector<64x96xf32> to vector<32x16xf32>
    %101 = vector.extract_strided_slice %27 {offsets = [32, 80], sizes = [32, 16], strides = [1, 1]} : vector<64x96xf32> to vector<32x16xf32>
    %cst_47 = arith.constant dense<0.000000e+00> : vector<32x32xf32>
    %102 = tpu.matmul %99, %100, %cst_47 {dimension_numbers = #tpu.dot_dimension_numbers<[1], [1], [0], [0], [0, 0, 1, 0], [], []>} : vector<32x16xf32>, vector<32x16xf32>, vector<32x32xf32> -> vector<32x32xf32>
    %c1_48 = arith.constant 1 : index
    %c0_49 = arith.constant 0 : index
    %c0_50 = arith.constant 0 : index
    %103 = vector.load %arg6[%c1_48, %c0_49, %c0_50] : memref<2x32x32xf32, #tpu.memory_space<vmem>>, vector<1x32x32xf32>
    %104 = vector.shape_cast %103 : vector<1x32x32xf32> to vector<32x32xf32>
    %105 = arith.addf %102, %104 : vector<32x32xf32>
    %cst_51 = arith.constant dense<0xFF800000> : vector<32xf32>
    %106 = vector.multi_reduction <maximumf>, %105, %cst_51 [1] : vector<32x32xf32> to vector<32xf32>
    %107 = vector.shape_cast %106 : vector<32xf32> to vector<32x1xf32>
    %108 = vector.broadcast %107 : vector<32x1xf32> to vector<32x32xf32>
    %109 = arith.subf %105, %108 : vector<32x32xf32>
    %110 = math.exp %109 : vector<32x32xf32>
    %cst_52 = arith.constant dense<0.000000e+00> : vector<32xf32>
    %111 = vector.multi_reduction <add>, %110, %cst_52 [1] : vector<32x32xf32> to vector<32xf32>
    %112 = vector.shape_cast %111 : vector<32xf32> to vector<32x1xf32>
    %113 = vector.broadcast %112 : vector<32x1xf32> to vector<32x32xf32>
    %114 = arith.divf %110, %113 : vector<32x32xf32>
    %cst_53 = arith.constant dense<0.000000e+00> : vector<32x16xf32>
    %115 = tpu.matmul %114, %101, %cst_53 {dimension_numbers = #tpu.dot_dimension_numbers<[1], [0], [0], [1], [0, 0, 1, 1], [], []>} : vector<32x32xf32>, vector<32x16xf32>, vector<32x16xf32> -> vector<32x16xf32>
    %116 = vector.extract_strided_slice %28 {offsets = [16, 0], sizes = [16, 32], strides = [1, 1]} : vector<32x32xf32> to vector<16x32xf32>
    %cst_54 = arith.constant dense<0.000000e+00> : vector<32x32xf32>
    %117 = tpu.matmul %115, %116, %cst_54 {dimension_numbers = #tpu.dot_dimension_numbers<[1], [0], [0], [1], [0, 0, 1, 1], [], []>} : vector<32x16xf32>, vector<16x32xf32>, vector<32x32xf32> -> vector<32x32xf32>
    %118 = arith.addf %96, %117 : vector<32x32xf32>
    %119 = vector.broadcast %29 : vector<1x32xf32> to vector<32x32xf32>
    %120 = arith.addf %118, %119 : vector<32x32xf32>
    %c32 = arith.constant 32 : index
    %c0_55 = arith.constant 0 : index
    %121 = vector.load %arg9[%c32, %c0_55] : memref<64x32xf32, #tpu.memory_space<vmem>>, vector<32x32xf32>
    tpu.vector_store %arg9[%c32, %c0_55], %120 {strides = array<i32>} : memref<64x32xf32, #tpu.memory_space<vmem>>, vector<32x32xf32>,
    return
  }
  func.func @transform_0(%arg0: i32) -> (i32, i32) {
    %c0_i32 = arith.constant 0 : i32
    %c0_i32_0 = arith.constant 0 : i32
    return %arg0, %c0_i32 : i32, i32
  }
  func.func @transform_1(%arg0: i32) -> (i32, i32) {
    %c0_i32 = arith.constant 0 : i32
    %c0_i32_0 = arith.constant 0 : i32
    %c0_i32_1 = arith.constant 0 : i32
    return %c0_i32, %c0_i32_0 : i32, i32
  }
  func.func @transform_2(%arg0: i32) -> (i32, i32) {
    %c0_i32 = arith.constant 0 : i32
    %c0_i32_0 = arith.constant 0 : i32
    %c0_i32_1 = arith.constant 0 : i32
    return %c0_i32, %c0_i32_0 : i32, i32
  }
  func.func @transform_3(%arg0: i32) -> (i32, i32) {
    %c0_i32 = arith.constant 0 : i32
    %c0_i32_0 = arith.constant 0 : i32
    %c0_i32_1 = arith.constant 0 : i32
    return %c0_i32, %c0_i32_0 : i32, i32
  }
  func.func @transform_4(%arg0: i32) -> (i32, i32) {
    %c0_i32 = arith.constant 0 : i32
    %c0_i32_0 = arith.constant 0 : i32
    %c0_i32_1 = arith.constant 0 : i32
    return %c0_i32, %c0_i32_0 : i32, i32
  }
  func.func @transform_5(%arg0: i32) -> (i32, i32, i32) {
    %c0_i32 = arith.constant 0 : i32
    %c0_i32_0 = arith.constant 0 : i32
    %c0_i32_1 = arith.constant 0 : i32
    %c0_i32_2 = arith.constant 0 : i32
    return %c0_i32, %c0_i32_0, %c0_i32_1 : i32, i32, i32
  }
  func.func @transform_6(%arg0: i32) -> (i32, i32) {
    %c0_i32 = arith.constant 0 : i32
    %c0_i32_0 = arith.constant 0 : i32
    %c0_i32_1 = arith.constant 0 : i32
    return %c0_i32, %c0_i32_0 : i32, i32
  }
  func.func @transform_7(%arg0: i32) -> (i32, i32) {
    %c0_i32 = arith.constant 0 : i32
    %c0_i32_0 = arith.constant 0 : i32
    %c0_i32_1 = arith.constant 0 : i32
    return %c0_i32, %c0_i32_0 : i32, i32
  }
  func.func @transform_8(%arg0: i32) -> (i32, i32) {
    %c0_i32 = arith.constant 0 : i32
    %c0_i32_0 = arith.constant 0 : i32
    return %arg0, %c0_i32 : i32, i32
  }
}

module attributes {stable_mosaic.version = 11 : i64} {
  func.func @_mlp_kernel(%arg0: i32, %arg1: memref<64x32xf32, #tpu.memory_space<vmem>>, %arg2: memref<1x32xf32, #tpu.memory_space<vmem>>, %arg3: memref<1x32xf32, #tpu.memory_space<vmem>>, %arg4: memref<32x64xf32, #tpu.memory_space<vmem>>, %arg5: memref<1x64xf32, #tpu.memory_space<vmem>>, %arg6: memref<64x32xf32, #tpu.memory_space<vmem>>, %arg7: memref<1x32xf32, #tpu.memory_space<vmem>>, %arg8: memref<64x32xf32, #tpu.memory_space<vmem>>) attributes {dimension_semantics = [#tpu.dimension_semantics<parallel>], iteration_bounds = array<i64: 2>, scalar_prefetch = 0 : i64, scratch_operands = 0 : i64, tpu.core_type = #tpu.core_type<tc>, window_params = [{transform_indices = @transform_0, window_bounds = array<i64: 64, 32>}, {pipeline_mode = #tpu.pipeline_mode<synchronous>, transform_indices = @transform_1, window_bounds = array<i64: 1, 32>}, {pipeline_mode = #tpu.pipeline_mode<synchronous>, transform_indices = @transform_2, window_bounds = array<i64: 1, 32>}, {pipeline_mode = #tpu.pipeline_mode<synchronous>, transform_indices = @transform_3, window_bounds = array<i64: 32, 64>}, {pipeline_mode = #tpu.pipeline_mode<synchronous>, transform_indices = @transform_4, window_bounds = array<i64: 1, 64>}, {pipeline_mode = #tpu.pipeline_mode<synchronous>, transform_indices = @transform_5, window_bounds = array<i64: 64, 32>}, {pipeline_mode = #tpu.pipeline_mode<synchronous>, transform_indices = @transform_6, window_bounds = array<i64: 1, 32>}, {transform_indices = @transform_7, window_bounds = array<i64: 64, 32>}]} {
    %c0 = arith.constant 0 : index
    %c0_0 = arith.constant 0 : index
    %0 = vector.load %arg1[%c0, %c0_0] : memref<64x32xf32, #tpu.memory_space<vmem>>, vector<64x32xf32>
    %c0_1 = arith.constant 0 : index
    %c0_2 = arith.constant 0 : index
    %1 = vector.load %arg2[%c0_1, %c0_2] : memref<1x32xf32, #tpu.memory_space<vmem>>, vector<1x32xf32>
    %c0_3 = arith.constant 0 : index
    %c0_4 = arith.constant 0 : index
    %2 = vector.load %arg3[%c0_3, %c0_4] : memref<1x32xf32, #tpu.memory_space<vmem>>, vector<1x32xf32>
    %cst = arith.constant dense<0.000000e+00> : vector<64xf32>
    %3 = vector.multi_reduction <add>, %0, %cst [1] : vector<64x32xf32> to vector<64xf32>
    %4 = vector.shape_cast %3 : vector<64xf32> to vector<64x1xf32>
    %cst_5 = arith.constant 3.200000e+01 : f32
    %5 = vector.broadcast %cst_5 : f32 to vector<64x1xf32>
    %6 = arith.divf %4, %5 : vector<64x1xf32>
    %7 = vector.broadcast %6 : vector<64x1xf32> to vector<64x32xf32>
    %8 = arith.subf %0, %7 : vector<64x32xf32>
    %9 = arith.mulf %8, %8 : vector<64x32xf32>
    %cst_6 = arith.constant dense<0.000000e+00> : vector<64xf32>
    %10 = vector.multi_reduction <add>, %9, %cst_6 [1] : vector<64x32xf32> to vector<64xf32>
    %11 = vector.shape_cast %10 : vector<64xf32> to vector<64x1xf32>
    %cst_7 = arith.constant 3.200000e+01 : f32
    %12 = vector.broadcast %cst_7 : f32 to vector<64x1xf32>
    %13 = arith.divf %11, %12 : vector<64x1xf32>
    %cst_8 = arith.constant 9.99999974E-6 : f32
    %14 = vector.broadcast %cst_8 : f32 to vector<64x1xf32>
    %15 = arith.addf %13, %14 : vector<64x1xf32>
    %16 = math.rsqrt %15 : vector<64x1xf32>
    %17 = vector.broadcast %16 : vector<64x1xf32> to vector<64x32xf32>
    %18 = arith.mulf %8, %17 : vector<64x32xf32>
    %19 = vector.broadcast %1 : vector<1x32xf32> to vector<64x32xf32>
    %20 = arith.mulf %18, %19 : vector<64x32xf32>
    %21 = vector.broadcast %2 : vector<1x32xf32> to vector<64x32xf32>
    %22 = arith.addf %20, %21 : vector<64x32xf32>
    %c0_9 = arith.constant 0 : index
    %c0_10 = arith.constant 0 : index
    %23 = vector.load %arg4[%c0_9, %c0_10] : memref<32x64xf32, #tpu.memory_space<vmem>>, vector<32x64xf32>
    %cst_11 = arith.constant dense<0.000000e+00> : vector<64x64xf32>
    %24 = tpu.matmul %22, %23, %cst_11 {dimension_numbers = #tpu.dot_dimension_numbers<[1], [0], [0], [1], [0, 0, 1, 1], [], []>} : vector<64x32xf32>, vector<32x64xf32>, vector<64x64xf32> -> vector<64x64xf32>
    %c0_12 = arith.constant 0 : index
    %c0_13 = arith.constant 0 : index
    %25 = vector.load %arg5[%c0_12, %c0_13] : memref<1x64xf32, #tpu.memory_space<vmem>>, vector<1x64xf32>
    %26 = vector.broadcast %25 : vector<1x64xf32> to vector<64x64xf32>
    %27 = arith.addf %24, %26 : vector<64x64xf32>
    %cst_14 = arith.constant 5.000000e-01 : f32
    %28 = vector.broadcast %cst_14 : f32 to vector<64x64xf32>
    %29 = arith.mulf %28, %27 : vector<64x64xf32>
    %cst_15 = arith.constant 0.707106769 : f32
    %30 = vector.broadcast %cst_15 : f32 to vector<64x64xf32>
    %31 = arith.mulf %27, %30 : vector<64x64xf32>
    %32 = math.absf %31 : vector<64x64xf32>
    %cst_16 = arith.constant 0.327591091 : f32
    %33 = vector.broadcast %cst_16 : f32 to vector<64x64xf32>
    %34 = arith.mulf %33, %32 : vector<64x64xf32>
    %cst_17 = arith.constant 1.000000e+00 : f32
    %35 = vector.broadcast %cst_17 : f32 to vector<64x64xf32>
    %36 = arith.addf %35, %34 : vector<64x64xf32>
    %cst_18 = arith.constant 1.000000e+00 : f32
    %37 = vector.broadcast %cst_18 : f32 to vector<64x64xf32>
    %38 = arith.divf %37, %36 : vector<64x64xf32>
    %cst_19 = arith.constant 1.06140542 : f32
    %39 = vector.broadcast %cst_19 : f32 to vector<64x64xf32>
    %40 = arith.mulf %39, %38 : vector<64x64xf32>
    %cst_20 = arith.constant -1.45315206 : f32
    %41 = vector.broadcast %cst_20 : f32 to vector<64x64xf32>
    %42 = arith.addf %40, %41 : vector<64x64xf32>
    %43 = arith.mulf %42, %38 : vector<64x64xf32>
    %cst_21 = arith.constant 1.42141378 : f32
    %44 = vector.broadcast %cst_21 : f32 to vector<64x64xf32>
    %45 = arith.addf %43, %44 : vector<64x64xf32>
    %46 = arith.mulf %45, %38 : vector<64x64xf32>
    %cst_22 = arith.constant -0.284496725 : f32
    %47 = vector.broadcast %cst_22 : f32 to vector<64x64xf32>
    %48 = arith.addf %46, %47 : vector<64x64xf32>
    %49 = arith.mulf %48, %38 : vector<64x64xf32>
    %cst_23 = arith.constant 0.254829586 : f32
    %50 = vector.broadcast %cst_23 : f32 to vector<64x64xf32>
    %51 = arith.addf %49, %50 : vector<64x64xf32>
    %52 = arith.mulf %51, %38 : vector<64x64xf32>
    %cst_24 = arith.constant 0.000000e+00 : f32
    %53 = vector.broadcast %cst_24 : f32 to vector<64x64xf32>
    %54 = arith.subf %53, %32 : vector<64x64xf32>
    %55 = arith.mulf %54, %32 : vector<64x64xf32>
    %56 = math.exp %55 : vector<64x64xf32>
    %57 = arith.mulf %52, %56 : vector<64x64xf32>
    %cst_25 = arith.constant 1.000000e+00 : f32
    %58 = vector.broadcast %cst_25 : f32 to vector<64x64xf32>
    %59 = arith.subf %58, %57 : vector<64x64xf32>
    %cst_26 = arith.constant 0.000000e+00 : f32
    %60 = vector.broadcast %cst_26 : f32 to vector<64x64xf32>
    %61 = arith.cmpf olt, %31, %60 : vector<64x64xf32>
    %cst_27 = arith.constant 0.000000e+00 : f32
    %62 = vector.broadcast %cst_27 : f32 to vector<64x64xf32>
    %63 = arith.subf %62, %59 : vector<64x64xf32>
    %64 = arith.select %61, %63, %59 : vector<64x64xi1>, vector<64x64xf32>
    %cst_28 = arith.constant 1.000000e+00 : f32
    %65 = vector.broadcast %cst_28 : f32 to vector<64x64xf32>
    %66 = arith.addf %65, %64 : vector<64x64xf32>
    %67 = arith.mulf %29, %66 : vector<64x64xf32>
    %c0_29 = arith.constant 0 : index
    %c0_30 = arith.constant 0 : index
    %68 = vector.load %arg6[%c0_29, %c0_30] : memref<64x32xf32, #tpu.memory_space<vmem>>, vector<64x32xf32>
    %cst_31 = arith.constant dense<0.000000e+00> : vector<64x32xf32>
    %69 = tpu.matmul %67, %68, %cst_31 {dimension_numbers = #tpu.dot_dimension_numbers<[1], [0], [0], [1], [0, 0, 1, 1], [], []>} : vector<64x64xf32>, vector<64x32xf32>, vector<64x32xf32> -> vector<64x32xf32>
    %c0_32 = arith.constant 0 : index
    %c0_33 = arith.constant 0 : index
    %70 = vector.load %arg7[%c0_32, %c0_33] : memref<1x32xf32, #tpu.memory_space<vmem>>, vector<1x32xf32>
    %71 = vector.broadcast %70 : vector<1x32xf32> to vector<64x32xf32>
    %72 = arith.addf %69, %71 : vector<64x32xf32>
    %73 = arith.addf %0, %72 : vector<64x32xf32>
    %c0_34 = arith.constant 0 : index
    %c0_35 = arith.constant 0 : index
    %74 = vector.load %arg8[%c0_34, %c0_35] : memref<64x32xf32, #tpu.memory_space<vmem>>, vector<64x32xf32>
    tpu.vector_store %arg8[%c0_34, %c0_35], %73 {strides = array<i32>} : memref<64x32xf32, #tpu.memory_space<vmem>>, vector<64x32xf32>,
    return
  }
  func.func @transform_0(%arg0: i32) -> (i32, i32) {
    %c0_i32 = arith.constant 0 : i32
    %c0_i32_0 = arith.constant 0 : i32
    return %arg0, %c0_i32 : i32, i32
  }
  func.func @transform_1(%arg0: i32) -> (i32, i32) {
    %c0_i32 = arith.constant 0 : i32
    %c0_i32_0 = arith.constant 0 : i32
    %c0_i32_1 = arith.constant 0 : i32
    return %c0_i32, %c0_i32_0 : i32, i32
  }
  func.func @transform_2(%arg0: i32) -> (i32, i32) {
    %c0_i32 = arith.constant 0 : i32
    %c0_i32_0 = arith.constant 0 : i32
    %c0_i32_1 = arith.constant 0 : i32
    return %c0_i32, %c0_i32_0 : i32, i32
  }
  func.func @transform_3(%arg0: i32) -> (i32, i32) {
    %c0_i32 = arith.constant 0 : i32
    %c0_i32_0 = arith.constant 0 : i32
    %c0_i32_1 = arith.constant 0 : i32
    return %c0_i32, %c0_i32_0 : i32, i32
  }
  func.func @transform_4(%arg0: i32) -> (i32, i32) {
    %c0_i32 = arith.constant 0 : i32
    %c0_i32_0 = arith.constant 0 : i32
    %c0_i32_1 = arith.constant 0 : i32
    return %c0_i32, %c0_i32_0 : i32, i32
  }
  func.func @transform_5(%arg0: i32) -> (i32, i32) {
    %c0_i32 = arith.constant 0 : i32
    %c0_i32_0 = arith.constant 0 : i32
    %c0_i32_1 = arith.constant 0 : i32
    return %c0_i32, %c0_i32_0 : i32, i32
  }
  func.func @transform_6(%arg0: i32) -> (i32, i32) {
    %c0_i32 = arith.constant 0 : i32
    %c0_i32_0 = arith.constant 0 : i32
    %c0_i32_1 = arith.constant 0 : i32
    return %c0_i32, %c0_i32_0 : i32, i32
  }
  func.func @transform_7(%arg0: i32) -> (i32, i32) {
    %c0_i32 = arith.constant 0 : i32
    %c0_i32_0 = arith.constant 0 : i32
    return %arg0, %c0_i32 : i32, i32
  }
}

module attributes {stable_mosaic.version = 11 : i64} {
  func.func @kern(%arg0: i32, %arg1: memref<64x32xf32, #tpu.memory_space<vmem>>, %arg2: memref<1x32xf32, #tpu.memory_space<vmem>>, %arg3: memref<1x32xf32, #tpu.memory_space<vmem>>, %arg4: memref<32x96xf32, #tpu.memory_space<vmem>>, %arg5: memref<1x96xf32, #tpu.memory_space<vmem>>, %arg6: memref<2x32x32xf32, #tpu.memory_space<vmem>>, %arg7: memref<32x32xf32, #tpu.memory_space<vmem>>, %arg8: memref<1x32xf32, #tpu.memory_space<vmem>>, %arg9: memref<2x32x32xf32, #tpu.memory_space<vmem>>, %arg10: memref<64x32xf32, #tpu.memory_space<vmem>>) attributes {dimension_semantics = [#tpu.dimension_semantics<parallel>], iteration_bounds = array<i64: 2>, scalar_prefetch = 0 : i64, scratch_operands = 0 : i64, tpu.core_type = #tpu.core_type<tc>, window_params = [{transform_indices = @transform_0, window_bounds = array<i64: 64, 32>}, {pipeline_mode = #tpu.pipeline_mode<synchronous>, transform_indices = @transform_1, window_bounds = array<i64: 1, 32>}, {pipeline_mode = #tpu.pipeline_mode<synchronous>, transform_indices = @transform_2, window_bounds = array<i64: 1, 32>}, {pipeline_mode = #tpu.pipeline_mode<synchronous>, transform_indices = @transform_3, window_bounds = array<i64: 32, 96>}, {pipeline_mode = #tpu.pipeline_mode<synchronous>, transform_indices = @transform_4, window_bounds = array<i64: 1, 96>}, {pipeline_mode = #tpu.pipeline_mode<synchronous>, transform_indices = @transform_5, window_bounds = array<i64: 2, 32, 32>}, {pipeline_mode = #tpu.pipeline_mode<synchronous>, transform_indices = @transform_6, window_bounds = array<i64: 32, 32>}, {pipeline_mode = #tpu.pipeline_mode<synchronous>, transform_indices = @transform_7, window_bounds = array<i64: 1, 32>}, {transform_indices = @transform_8, window_bounds = array<i64: 2, 32, 32>}, {transform_indices = @transform_9, window_bounds = array<i64: 64, 32>}]} {
    %c0 = arith.constant 0 : index
    %c0_0 = arith.constant 0 : index
    %0 = vector.load %arg1[%c0, %c0_0] : memref<64x32xf32, #tpu.memory_space<vmem>>, vector<64x32xf32>
    %c0_1 = arith.constant 0 : index
    %c0_2 = arith.constant 0 : index
    %1 = vector.load %arg2[%c0_1, %c0_2] : memref<1x32xf32, #tpu.memory_space<vmem>>, vector<1x32xf32>
    %c0_3 = arith.constant 0 : index
    %c0_4 = arith.constant 0 : index
    %2 = vector.load %arg3[%c0_3, %c0_4] : memref<1x32xf32, #tpu.memory_space<vmem>>, vector<1x32xf32>
    %cst = arith.constant dense<0.000000e+00> : vector<64xf32>
    %3 = vector.multi_reduction <add>, %0, %cst [1] : vector<64x32xf32> to vector<64xf32>
    %4 = vector.shape_cast %3 : vector<64xf32> to vector<64x1xf32>
    %cst_5 = arith.constant 3.200000e+01 : f32
    %5 = vector.broadcast %cst_5 : f32 to vector<64x1xf32>
    %6 = arith.divf %4, %5 : vector<64x1xf32>
    %7 = vector.broadcast %6 : vector<64x1xf32> to vector<64x32xf32>
    %8 = arith.subf %0, %7 : vector<64x32xf32>
    %9 = arith.mulf %8, %8 : vector<64x32xf32>
    %cst_6 = arith.constant dense<0.000000e+00> : vector<64xf32>
    %10 = vector.multi_reduction <add>, %9, %cst_6 [1] : vector<64x32xf32> to vector<64xf32>
    %11 = vector.shape_cast %10 : vector<64xf32> to vector<64x1xf32>
    %cst_7 = arith.constant 3.200000e+01 : f32
    %12 = vector.broadcast %cst_7 : f32 to vector<64x1xf32>
    %13 = arith.divf %11, %12 : vector<64x1xf32>
    %cst_8 = arith.constant 9.99999974E-6 : f32
    %14 = vector.broadcast %cst_8 : f32 to vector<64x1xf32>
    %15 = arith.addf %13, %14 : vector<64x1xf32>
    %16 = math.rsqrt %15 : vector<64x1xf32>
    %17 = vector.broadcast %16 : vector<64x1xf32> to vector<64x32xf32>
    %18 = arith.mulf %8, %17 : vector<64x32xf32>
    %19 = vector.broadcast %1 : vector<1x32xf32> to vector<64x32xf32>
    %20 = arith.mulf %18, %19 : vector<64x32xf32>
    %21 = vector.broadcast %2 : vector<1x32xf32> to vector<64x32xf32>
    %22 = arith.addf %20, %21 : vector<64x32xf32>
    %c0_9 = arith.constant 0 : index
    %c0_10 = arith.constant 0 : index
    %23 = vector.load %arg4[%c0_9, %c0_10] : memref<32x96xf32, #tpu.memory_space<vmem>>, vector<32x96xf32>
    %cst_11 = arith.constant dense<0.000000e+00> : vector<64x96xf32>
    %24 = tpu.matmul %22, %23, %cst_11 {dimension_numbers = #tpu.dot_dimension_numbers<[1], [0], [0], [1], [0, 0, 1, 1], [], []>} : vector<64x32xf32>, vector<32x96xf32>, vector<64x96xf32> -> vector<64x96xf32>
    %c0_12 = arith.constant 0 : index
    %c0_13 = arith.constant 0 : index
    %25 = vector.load %arg5[%c0_12, %c0_13] : memref<1x96xf32, #tpu.memory_space<vmem>>, vector<1x96xf32>
    %26 = vector.broadcast %25 : vector<1x96xf32> to vector<64x96xf32>
    %27 = arith.addf %24, %26 : vector<64x96xf32>
    %c0_14 = arith.constant 0 : index
    %c0_15 = arith.constant 0 : index
    %28 = vector.load %arg7[%c0_14, %c0_15] : memref<32x32xf32, #tpu.memory_space<vmem>>, vector<32x32xf32>
    %c0_16 = arith.constant 0 : index
    %c0_17 = arith.constant 0 : index
    %29 = vector.load %arg8[%c0_16, %c0_17] : memref<1x32xf32, #tpu.memory_space<vmem>>, vector<1x32xf32>
    %30 = vector.extract_strided_slice %27 {offsets = [0, 0], sizes = [32, 16], strides = [1, 1]} : vector<64x96xf32> to vector<32x16xf32>
    %cst_18 = arith.constant 2.500000e-01 : f32
    %31 = vector.broadcast %cst_18 : f32 to vector<32x16xf32>
    %32 = arith.mulf %30, %31 : vector<32x16xf32>
    %33 = vector.extract_strided_slice %27 {offsets = [0, 32], sizes = [32, 16], strides = [1, 1]} : vector<64x96xf32> to vector<32x16xf32>
    %34 = vector.extract_strided_slice %27 {offsets = [0, 64], sizes = [32, 16], strides = [1, 1]} : vector<64x96xf32> to vector<32x16xf32>
    %cst_19 = arith.constant dense<0.000000e+00> : vector<32x32xf32>
    %35 = tpu.matmul %32, %33, %cst_19 {dimension_numbers = #tpu.dot_dimension_numbers<[1], [1], [0], [0], [0, 0, 1, 0], [], []>} : vector<32x16xf32>, vector<32x16xf32>, vector<32x32xf32> -> vector<32x32xf32>
    %c0_20 = arith.constant 0 : index
    %c0_21 = arith.constant 0 : index
    %c0_22 = arith.constant 0 : index
    %36 = vector.load %arg6[%c0_20, %c0_21, %c0_22] : memref<2x32x32xf32, #tpu.memory_space<vmem>>, vector<1x32x32xf32>
    %37 = vector.shape_cast %36 : vector<1x32x32xf32> to vector<32x32xf32>
    %38 = arith.addf %35, %37 : vector<32x32xf32>
    %c0_23 = arith.constant 0 : index
    %c0_24 = arith.constant 0 : index
    %c0_25 = arith.constant 0 : index
    %39 = vector.load %arg9[%c0_23, %c0_24, %c0_25] : memref<2x32x32xf32, #tpu.memory_space<vmem>>, vector<1x32x32xf32>
    %40 = vector.shape_cast %39 : vector<1x32x32xf32> to vector<32x32xf32>
    %41 = arith.addf %38, %40 : vector<32x32xf32>
    %cst_26 = arith.constant dense<0xFF800000> : vector<32xf32>
    %42 = vector.multi_reduction <maximumf>, %41, %cst_26 [1] : vector<32x32xf32> to vector<32xf32>
    %43 = vector.shape_cast %42 : vector<32xf32> to vector<32x1xf32>
    %44 = vector.broadcast %43 : vector<32x1xf32> to vector<32x32xf32>
    %45 = arith.subf %41, %44 : vector<32x32xf32>
    %46 = math.exp %45 : vector<32x32xf32>
    %cst_27 = arith.constant dense<0.000000e+00> : vector<32xf32>
    %47 = vector.multi_reduction <add>, %46, %cst_27 [1] : vector<32x32xf32> to vector<32xf32>
    %48 = vector.shape_cast %47 : vector<32xf32> to vector<32x1xf32>
    %49 = vector.broadcast %48 : vector<32x1xf32> to vector<32x32xf32>
    %50 = arith.divf %46, %49 : vector<32x32xf32>
    %cst_28 = arith.constant dense<0.000000e+00> : vector<32x16xf32>
    %51 = tpu.matmul %50, %34, %cst_28 {dimension_numbers = #tpu.dot_dimension_numbers<[1], [0], [0], [1], [0, 0, 1, 1], [], []>} : vector<32x32xf32>, vector<32x16xf32>, vector<32x16xf32> -> vector<32x16xf32>
    %52 = vector.extract_strided_slice %28 {offsets = [0, 0], sizes = [16, 32], strides = [1, 1]} : vector<32x32xf32> to vector<16x32xf32>
    %cst_29 = arith.constant dense<0.000000e+00> : vector<32x32xf32>
    %53 = tpu.matmul %51, %52, %cst_29 {dimension_numbers = #tpu.dot_dimension_numbers<[1], [0], [0], [1], [0, 0, 1, 1], [], []>} : vector<32x16xf32>, vector<16x32xf32>, vector<32x32xf32> -> vector<32x32xf32>
    %54 = vector.extract_strided_slice %27 {offsets = [0, 16], sizes = [32, 16], strides = [1, 1]} : vector<64x96xf32> to vector<32x16xf32>
    %cst_30 = arith.constant 2.500000e-01 : f32
    %55 = vector.broadcast %cst_30 : f32 to vector<32x16xf32>
    %56 = arith.mulf %54, %55 : vector<32x16xf32>
    %57 = vector.extract_strided_slice %27 {offsets = [0, 48], sizes = [32, 16], strides = [1, 1]} : vector<64x96xf32> to vector<32x16xf32>
    %58 = vector.extract_strided_slice %27 {offsets = [0, 80], sizes = [32, 16], strides = [1, 1]} : vector<64x96xf32> to vector<32x16xf32>
    %cst_31 = arith.constant dense<0.000000e+00> : vector<32x32xf32>
    %59 = tpu.matmul %56, %57, %cst_31 {dimension_numbers = #tpu.dot_dimension_numbers<[1], [1], [0], [0], [0, 0, 1, 0], [], []>} : vector<32x16xf32>, vector<32x16xf32>, vector<32x32xf32> -> vector<32x32xf32>
    %c1 = arith.constant 1 : index
    %c0_32 = arith.constant 0 : index
    %c0_33 = arith.constant 0 : index
    %60 = vector.load %arg6[%c1, %c0_32, %c0_33] : memref<2x32x32xf32, #tpu.memory_space<vmem>>, vector<1x32x32xf32>
    %61 = vector.shape_cast %60 : vector<1x32x32xf32> to vector<32x32xf32>
    %62 = arith.addf %59, %61 : vector<32x32xf32>
    %c0_34 = arith.constant 0 : index
    %c0_35 = arith.constant 0 : index
    %c0_36 = arith.constant 0 : index
    %63 = vector.load %arg9[%c0_34, %c0_35, %c0_36] : memref<2x32x32xf32, #tpu.memory_space<vmem>>, vector<1x32x32xf32>
    %64 = vector.shape_cast %63 : vector<1x32x32xf32> to vector<32x32xf32>
    %65 = arith.addf %62, %64 : vector<32x32xf32>
    %cst_37 = arith.constant dense<0xFF800000> : vector<32xf32>
    %66 = vector.multi_reduction <maximumf>, %65, %cst_37 [1] : vector<32x32xf32> to vector<32xf32>
    %67 = vector.shape_cast %66 : vector<32xf32> to vector<32x1xf32>
    %68 = vector.broadcast %67 : vector<32x1xf32> to vector<32x32xf32>
    %69 = arith.subf %65, %68 : vector<32x32xf32>
    %70 = math.exp %69 : vector<32x32xf32>
    %cst_38 = arith.constant dense<0.000000e+00> : vector<32xf32>
    %71 = vector.multi_reduction <add>, %70, %cst_38 [1] : vector<32x32xf32> to vector<32xf32>
    %72 = vector.shape_cast %71 : vector<32xf32> to vector<32x1xf32>
    %73 = vector.broadcast %72 : vector<32x1xf32> to vector<32x32xf32>
    %74 = arith.divf %70, %73 : vector<32x32xf32>
    %cst_39 = arith.constant dense<0.000000e+00> : vector<32x16xf32>
    %75 = tpu.matmul %74, %58, %cst_39 {dimension_numbers = #tpu.dot_dimension_numbers<[1], [0], [0], [1], [0, 0, 1, 1], [], []>} : vector<32x32xf32>, vector<32x16xf32>, vector<32x16xf32> -> vector<32x16xf32>
    %76 = vector.extract_strided_slice %28 {offsets = [16, 0], sizes = [16, 32], strides = [1, 1]} : vector<32x32xf32> to vector<16x32xf32>
    %cst_40 = arith.constant dense<0.000000e+00> : vector<32x32xf32>
    %77 = tpu.matmul %75, %76, %cst_40 {dimension_numbers = #tpu.dot_dimension_numbers<[1], [0], [0], [1], [0, 0, 1, 1], [], []>} : vector<32x16xf32>, vector<16x32xf32>, vector<32x32xf32> -> vector<32x32xf32>
    %78 = arith.addf %53, %77 : vector<32x32xf32>
    %79 = vector.broadcast %29 : vector<1x32xf32> to vector<32x32xf32>
    %80 = arith.addf %78, %79 : vector<32x32xf32>
    %c0_41 = arith.constant 0 : index
    %c0_42 = arith.constant 0 : index
    %81 = vector.load %arg10[%c0_41, %c0_42] : memref<64x32xf32, #tpu.memory_space<vmem>>, vector<32x32xf32>
    tpu.vector_store %arg10[%c0_41, %c0_42], %80 {strides = array<i32>} : memref<64x32xf32, #tpu.memory_space<vmem>>, vector<32x32xf32>,
    %82 = vector.extract_strided_slice %27 {offsets = [32, 0], sizes = [32, 16], strides = [1, 1]} : vector<64x96xf32> to vector<32x16xf32>
    %cst_43 = arith.constant 2.500000e-01 : f32
    %83 = vector.broadcast %cst_43 : f32 to vector<32x16xf32>
    %84 = arith.mulf %82, %83 : vector<32x16xf32>
    %85 = vector.extract_strided_slice %27 {offsets = [32, 32], sizes = [32, 16], strides = [1, 1]} : vector<64x96xf32> to vector<32x16xf32>
    %86 = vector.extract_strided_slice %27 {offsets = [32, 64], sizes = [32, 16], strides = [1, 1]} : vector<64x96xf32> to vector<32x16xf32>
    %cst_44 = arith.constant dense<0.000000e+00> : vector<32x32xf32>
    %87 = tpu.matmul %84, %85, %cst_44 {dimension_numbers = #tpu.dot_dimension_numbers<[1], [1], [0], [0], [0, 0, 1, 0], [], []>} : vector<32x16xf32>, vector<32x16xf32>, vector<32x32xf32> -> vector<32x32xf32>
    %c0_45 = arith.constant 0 : index
    %c0_46 = arith.constant 0 : index
    %c0_47 = arith.constant 0 : index
    %88 = vector.load %arg6[%c0_45, %c0_46, %c0_47] : memref<2x32x32xf32, #tpu.memory_space<vmem>>, vector<1x32x32xf32>
    %89 = vector.shape_cast %88 : vector<1x32x32xf32> to vector<32x32xf32>
    %90 = arith.addf %87, %89 : vector<32x32xf32>
    %c1_48 = arith.constant 1 : index
    %c0_49 = arith.constant 0 : index
    %c0_50 = arith.constant 0 : index
    %91 = vector.load %arg9[%c1_48, %c0_49, %c0_50] : memref<2x32x32xf32, #tpu.memory_space<vmem>>, vector<1x32x32xf32>
    %92 = vector.shape_cast %91 : vector<1x32x32xf32> to vector<32x32xf32>
    %93 = arith.addf %90, %92 : vector<32x32xf32>
    %cst_51 = arith.constant dense<0xFF800000> : vector<32xf32>
    %94 = vector.multi_reduction <maximumf>, %93, %cst_51 [1] : vector<32x32xf32> to vector<32xf32>
    %95 = vector.shape_cast %94 : vector<32xf32> to vector<32x1xf32>
    %96 = vector.broadcast %95 : vector<32x1xf32> to vector<32x32xf32>
    %97 = arith.subf %93, %96 : vector<32x32xf32>
    %98 = math.exp %97 : vector<32x32xf32>
    %cst_52 = arith.constant dense<0.000000e+00> : vector<32xf32>
    %99 = vector.multi_reduction <add>, %98, %cst_52 [1] : vector<32x32xf32> to vector<32xf32>
    %100 = vector.shape_cast %99 : vector<32xf32> to vector<32x1xf32>
    %101 = vector.broadcast %100 : vector<32x1xf32> to vector<32x32xf32>
    %102 = arith.divf %98, %101 : vector<32x32xf32>
    %cst_53 = arith.constant dense<0.000000e+00> : vector<32x16xf32>
    %103 = tpu.matmul %102, %86, %cst_53 {dimension_numbers = #tpu.dot_dimension_numbers<[1], [0], [0], [1], [0, 0, 1, 1], [], []>} : vector<32x32xf32>, vector<32x16xf32>, vector<32x16xf32> -> vector<32x16xf32>
    %104 = vector.extract_strided_slice %28 {offsets = [0, 0], sizes = [16, 32], strides = [1, 1]} : vector<32x32xf32> to vector<16x32xf32>
    %cst_54 = arith.constant dense<0.000000e+00> : vector<32x32xf32>
    %105 = tpu.matmul %103, %104, %cst_54 {dimension_numbers = #tpu.dot_dimension_numbers<[1], [0], [0], [1], [0, 0, 1, 1], [], []>} : vector<32x16xf32>, vector<16x32xf32>, vector<32x32xf32> -> vector<32x32xf32>
    %106 = vector.extract_strided_slice %27 {offsets = [32, 16], sizes = [32, 16], strides = [1, 1]} : vector<64x96xf32> to vector<32x16xf32>
    %cst_55 = arith.constant 2.500000e-01 : f32
    %107 = vector.broadcast %cst_55 : f32 to vector<32x16xf32>
    %108 = arith.mulf %106, %107 : vector<32x16xf32>
    %109 = vector.extract_strided_slice %27 {offsets = [32, 48], sizes = [32, 16], strides = [1, 1]} : vector<64x96xf32> to vector<32x16xf32>
    %110 = vector.extract_strided_slice %27 {offsets = [32, 80], sizes = [32, 16], strides = [1, 1]} : vector<64x96xf32> to vector<32x16xf32>
    %cst_56 = arith.constant dense<0.000000e+00> : vector<32x32xf32>
    %111 = tpu.matmul %108, %109, %cst_56 {dimension_numbers = #tpu.dot_dimension_numbers<[1], [1], [0], [0], [0, 0, 1, 0], [], []>} : vector<32x16xf32>, vector<32x16xf32>, vector<32x32xf32> -> vector<32x32xf32>
    %c1_57 = arith.constant 1 : index
    %c0_58 = arith.constant 0 : index
    %c0_59 = arith.constant 0 : index
    %112 = vector.load %arg6[%c1_57, %c0_58, %c0_59] : memref<2x32x32xf32, #tpu.memory_space<vmem>>, vector<1x32x32xf32>
    %113 = vector.shape_cast %112 : vector<1x32x32xf32> to vector<32x32xf32>
    %114 = arith.addf %111, %113 : vector<32x32xf32>
    %c1_60 = arith.constant 1 : index
    %c0_61 = arith.constant 0 : index
    %c0_62 = arith.constant 0 : index
    %115 = vector.load %arg9[%c1_60, %c0_61, %c0_62] : memref<2x32x32xf32, #tpu.memory_space<vmem>>, vector<1x32x32xf32>
    %116 = vector.shape_cast %115 : vector<1x32x32xf32> to vector<32x32xf32>
    %117 = arith.addf %114, %116 : vector<32x32xf32>
    %cst_63 = arith.constant dense<0xFF800000> : vector<32xf32>
    %118 = vector.multi_reduction <maximumf>, %117, %cst_63 [1] : vector<32x32xf32> to vector<32xf32>
    %119 = vector.shape_cast %118 : vector<32xf32> to vector<32x1xf32>
    %120 = vector.broadcast %119 : vector<32x1xf32> to vector<32x32xf32>
    %121 = arith.subf %117, %120 : vector<32x32xf32>
    %122 = math.exp %121 : vector<32x32xf32>
    %cst_64 = arith.constant dense<0.000000e+00> : vector<32xf32>
    %123 = vector.multi_reduction <add>, %122, %cst_64 [1] : vector<32x32xf32> to vector<32xf32>
    %124 = vector.shape_cast %123 : vector<32xf32> to vector<32x1xf32>
    %125 = vector.broadcast %124 : vector<32x1xf32> to vector<32x32xf32>
    %126 = arith.divf %122, %125 : vector<32x32xf32>
    %cst_65 = arith.constant dense<0.000000e+00> : vector<32x16xf32>
    %127 = tpu.matmul %126, %110, %cst_65 {dimension_numbers = #tpu.dot_dimension_numbers<[1], [0], [0], [1], [0, 0, 1, 1], [], []>} : vector<32x32xf32>, vector<32x16xf32>, vector<32x16xf32> -> vector<32x16xf32>
    %128 = vector.extract_strided_slice %28 {offsets = [16, 0], sizes = [16, 32], strides = [1, 1]} : vector<32x32xf32> to vector<16x32xf32>
    %cst_66 = arith.constant dense<0.000000e+00> : vector<32x32xf32>
    %129 = tpu.matmul %127, %128, %cst_66 {dimension_numbers = #tpu.dot_dimension_numbers<[1], [0], [0], [1], [0, 0, 1, 1], [], []>} : vector<32x16xf32>, vector<16x32xf32>, vector<32x32xf32> -> vector<32x32xf32>
    %130 = arith.addf %105, %129 : vector<32x32xf32>
    %131 = vector.broadcast %29 : vector<1x32xf32> to vector<32x32xf32>
    %132 = arith.addf %130, %131 : vector<32x32xf32>
    %c32 = arith.constant 32 : index
    %c0_67 = arith.constant 0 : index
    %133 = vector.load %arg10[%c32, %c0_67] : memref<64x32xf32, #tpu.memory_space<vmem>>, vector<32x32xf32>
    tpu.vector_store %arg10[%c32, %c0_67], %132 {strides = array<i32>} : memref<64x32xf32, #tpu.memory_space<vmem>>, vector<32x32xf32>,
    return
  }
  func.func @transform_0(%arg0: i32) -> (i32, i32) {
    %c0_i32 = arith.constant 0 : i32
    %c0_i32_0 = arith.constant 0 : i32
    return %arg0, %c0_i32 : i32, i32
  }
  func.func @transform_1(%arg0: i32) -> (i32, i32) {
    %c0_i32 = arith.constant 0 : i32
    %c0_i32_0 = arith.constant 0 : i32
    %c0_i32_1 = arith.constant 0 : i32
    return %c0_i32, %c0_i32_0 : i32, i32
  }
  func.func @transform_2(%arg0: i32) -> (i32, i32) {
    %c0_i32 = arith.constant 0 : i32
    %c0_i32_0 = arith.constant 0 : i32
    %c0_i32_1 = arith.constant 0 : i32
    return %c0_i32, %c0_i32_0 : i32, i32
  }
  func.func @transform_3(%arg0: i32) -> (i32, i32) {
    %c0_i32 = arith.constant 0 : i32
    %c0_i32_0 = arith.constant 0 : i32
    %c0_i32_1 = arith.constant 0 : i32
    return %c0_i32, %c0_i32_0 : i32, i32
  }
  func.func @transform_4(%arg0: i32) -> (i32, i32) {
    %c0_i32 = arith.constant 0 : i32
    %c0_i32_0 = arith.constant 0 : i32
    %c0_i32_1 = arith.constant 0 : i32
    return %c0_i32, %c0_i32_0 : i32, i32
  }
  func.func @transform_5(%arg0: i32) -> (i32, i32, i32) {
    %c0_i32 = arith.constant 0 : i32
    %c0_i32_0 = arith.constant 0 : i32
    %c0_i32_1 = arith.constant 0 : i32
    %c0_i32_2 = arith.constant 0 : i32
    return %c0_i32, %c0_i32_0, %c0_i32_1 : i32, i32, i32
  }
  func.func @transform_6(%arg0: i32) -> (i32, i32) {
    %c0_i32 = arith.constant 0 : i32
    %c0_i32_0 = arith.constant 0 : i32
    %c0_i32_1 = arith.constant 0 : i32
    return %c0_i32, %c0_i32_0 : i32, i32
  }
  func.func @transform_7(%arg0: i32) -> (i32, i32) {
    %c0_i32 = arith.constant 0 : i32
    %c0_i32_0 = arith.constant 0 : i32
    %c0_i32_1 = arith.constant 0 : i32
    return %c0_i32, %c0_i32_0 : i32, i32
  }
  func.func @transform_8(%arg0: i32) -> (i32, i32, i32) {
    %c1_i32 = arith.constant 1 : i32
    %c0_i32 = arith.constant 0 : i32
    %0 = arith.cmpi eq, %c1_i32, %c0_i32 : i32
    %c1_i32_0 = arith.constant 1 : i32
    %1 = arith.select %0, %c1_i32_0, %c1_i32 : i32
    %2 = arith.remsi %arg0, %1 : i32
    %c0_i32_1 = arith.constant 0 : i32
    %3 = arith.cmpi ne, %2, %c0_i32_1 : i32
    %c0_i32_2 = arith.constant 0 : i32
    %4 = arith.cmpi slt, %2, %c0_i32_2 : i32
    %c0_i32_3 = arith.constant 0 : i32
    %5 = arith.cmpi slt, %1, %c0_i32_3 : i32
    %6 = arith.xori %4, %5 : i1
    %7 = arith.andi %6, %3 : i1
    %8 = arith.addi %2, %1 : i32
    %9 = arith.select %7, %8, %2 : i32
    %c0_i32_4 = arith.constant 0 : i32
    %c0_i32_5 = arith.constant 0 : i32
    %c0_i32_6 = arith.constant 0 : i32
    return %9, %c0_i32_4, %c0_i32_5 : i32, i32, i32
  }
  func.func @transform_9(%arg0: i32) -> (i32, i32) {
    %c0_i32 = arith.constant 0 : i32
    %c0_i32_0 = arith.constant 0 : i32
    return %arg0, %c0_i32 : i32, i32
  }
}

module attributes {stable_mosaic.version = 11 : i64} {
  func.func @_mlp_kernel(%arg0: i32, %arg1: memref<64x32xf32, #tpu.memory_space<vmem>>, %arg2: memref<1x32xf32, #tpu.memory_space<vmem>>, %arg3: memref<1x32xf32, #tpu.memory_space<vmem>>, %arg4: memref<32x64xf32, #tpu.memory_space<vmem>>, %arg5: memref<1x64xf32, #tpu.memory_space<vmem>>, %arg6: memref<64x32xf32, #tpu.memory_space<vmem>>, %arg7: memref<1x32xf32, #tpu.memory_space<vmem>>, %arg8: memref<64x32xf32, #tpu.memory_space<vmem>>) attributes {dimension_semantics = [#tpu.dimension_semantics<parallel>], iteration_bounds = array<i64: 2>, scalar_prefetch = 0 : i64, scratch_operands = 0 : i64, tpu.core_type = #tpu.core_type<tc>, window_params = [{transform_indices = @transform_0, window_bounds = array<i64: 64, 32>}, {pipeline_mode = #tpu.pipeline_mode<synchronous>, transform_indices = @transform_1, window_bounds = array<i64: 1, 32>}, {pipeline_mode = #tpu.pipeline_mode<synchronous>, transform_indices = @transform_2, window_bounds = array<i64: 1, 32>}, {pipeline_mode = #tpu.pipeline_mode<synchronous>, transform_indices = @transform_3, window_bounds = array<i64: 32, 64>}, {pipeline_mode = #tpu.pipeline_mode<synchronous>, transform_indices = @transform_4, window_bounds = array<i64: 1, 64>}, {pipeline_mode = #tpu.pipeline_mode<synchronous>, transform_indices = @transform_5, window_bounds = array<i64: 64, 32>}, {pipeline_mode = #tpu.pipeline_mode<synchronous>, transform_indices = @transform_6, window_bounds = array<i64: 1, 32>}, {transform_indices = @transform_7, window_bounds = array<i64: 64, 32>}]} {
    %c0 = arith.constant 0 : index
    %c0_0 = arith.constant 0 : index
    %0 = vector.load %arg1[%c0, %c0_0] : memref<64x32xf32, #tpu.memory_space<vmem>>, vector<64x32xf32>
    %c0_1 = arith.constant 0 : index
    %c0_2 = arith.constant 0 : index
    %1 = vector.load %arg2[%c0_1, %c0_2] : memref<1x32xf32, #tpu.memory_space<vmem>>, vector<1x32xf32>
    %c0_3 = arith.constant 0 : index
    %c0_4 = arith.constant 0 : index
    %2 = vector.load %arg3[%c0_3, %c0_4] : memref<1x32xf32, #tpu.memory_space<vmem>>, vector<1x32xf32>
    %cst = arith.constant dense<0.000000e+00> : vector<64xf32>
    %3 = vector.multi_reduction <add>, %0, %cst [1] : vector<64x32xf32> to vector<64xf32>
    %4 = vector.shape_cast %3 : vector<64xf32> to vector<64x1xf32>
    %cst_5 = arith.constant 3.200000e+01 : f32
    %5 = vector.broadcast %cst_5 : f32 to vector<64x1xf32>
    %6 = arith.divf %4, %5 : vector<64x1xf32>
    %7 = vector.broadcast %6 : vector<64x1xf32> to vector<64x32xf32>
    %8 = arith.subf %0, %7 : vector<64x32xf32>
    %9 = arith.mulf %8, %8 : vector<64x32xf32>
    %cst_6 = arith.constant dense<0.000000e+00> : vector<64xf32>
    %10 = vector.multi_reduction <add>, %9, %cst_6 [1] : vector<64x32xf32> to vector<64xf32>
    %11 = vector.shape_cast %10 : vector<64xf32> to vector<64x1xf32>
    %cst_7 = arith.constant 3.200000e+01 : f32
    %12 = vector.broadcast %cst_7 : f32 to vector<64x1xf32>
    %13 = arith.divf %11, %12 : vector<64x1xf32>
    %cst_8 = arith.constant 9.99999974E-6 : f32
    %14 = vector.broadcast %cst_8 : f32 to vector<64x1xf32>
    %15 = arith.addf %13, %14 : vector<64x1xf32>
    %16 = math.rsqrt %15 : vector<64x1xf32>
    %17 = vector.broadcast %16 : vector<64x1xf32> to vector<64x32xf32>
    %18 = arith.mulf %8, %17 : vector<64x32xf32>
    %19 = vector.broadcast %1 : vector<1x32xf32> to vector<64x32xf32>
    %20 = arith.mulf %18, %19 : vector<64x32xf32>
    %21 = vector.broadcast %2 : vector<1x32xf32> to vector<64x32xf32>
    %22 = arith.addf %20, %21 : vector<64x32xf32>
    %c0_9 = arith.constant 0 : index
    %c0_10 = arith.constant 0 : index
    %23 = vector.load %arg4[%c0_9, %c0_10] : memref<32x64xf32, #tpu.memory_space<vmem>>, vector<32x64xf32>
    %cst_11 = arith.constant dense<0.000000e+00> : vector<64x64xf32>
    %24 = tpu.matmul %22, %23, %cst_11 {dimension_numbers = #tpu.dot_dimension_numbers<[1], [0], [0], [1], [0, 0, 1, 1], [], []>} : vector<64x32xf32>, vector<32x64xf32>, vector<64x64xf32> -> vector<64x64xf32>
    %c0_12 = arith.constant 0 : index
    %c0_13 = arith.constant 0 : index
    %25 = vector.load %arg5[%c0_12, %c0_13] : memref<1x64xf32, #tpu.memory_space<vmem>>, vector<1x64xf32>
    %26 = vector.broadcast %25 : vector<1x64xf32> to vector<64x64xf32>
    %27 = arith.addf %24, %26 : vector<64x64xf32>
    %cst_14 = arith.constant 5.000000e-01 : f32
    %28 = vector.broadcast %cst_14 : f32 to vector<64x64xf32>
    %29 = arith.mulf %28, %27 : vector<64x64xf32>
    %cst_15 = arith.constant 0.707106769 : f32
    %30 = vector.broadcast %cst_15 : f32 to vector<64x64xf32>
    %31 = arith.mulf %27, %30 : vector<64x64xf32>
    %32 = math.absf %31 : vector<64x64xf32>
    %cst_16 = arith.constant 0.327591091 : f32
    %33 = vector.broadcast %cst_16 : f32 to vector<64x64xf32>
    %34 = arith.mulf %33, %32 : vector<64x64xf32>
    %cst_17 = arith.constant 1.000000e+00 : f32
    %35 = vector.broadcast %cst_17 : f32 to vector<64x64xf32>
    %36 = arith.addf %35, %34 : vector<64x64xf32>
    %cst_18 = arith.constant 1.000000e+00 : f32
    %37 = vector.broadcast %cst_18 : f32 to vector<64x64xf32>
    %38 = arith.divf %37, %36 : vector<64x64xf32>
    %cst_19 = arith.constant 1.06140542 : f32
    %39 = vector.broadcast %cst_19 : f32 to vector<64x64xf32>
    %40 = arith.mulf %39, %38 : vector<64x64xf32>
    %cst_20 = arith.constant -1.45315206 : f32
    %41 = vector.broadcast %cst_20 : f32 to vector<64x64xf32>
    %42 = arith.addf %40, %41 : vector<64x64xf32>
    %43 = arith.mulf %42, %38 : vector<64x64xf32>
    %cst_21 = arith.constant 1.42141378 : f32
    %44 = vector.broadcast %cst_21 : f32 to vector<64x64xf32>
    %45 = arith.addf %43, %44 : vector<64x64xf32>
    %46 = arith.mulf %45, %38 : vector<64x64xf32>
    %cst_22 = arith.constant -0.284496725 : f32
    %47 = vector.broadcast %cst_22 : f32 to vector<64x64xf32>
    %48 = arith.addf %46, %47 : vector<64x64xf32>
    %49 = arith.mulf %48, %38 : vector<64x64xf32>
    %cst_23 = arith.constant 0.254829586 : f32
    %50 = vector.broadcast %cst_23 : f32 to vector<64x64xf32>
    %51 = arith.addf %49, %50 : vector<64x64xf32>
    %52 = arith.mulf %51, %38 : vector<64x64xf32>
    %cst_24 = arith.constant 0.000000e+00 : f32
    %53 = vector.broadcast %cst_24 : f32 to vector<64x64xf32>
    %54 = arith.subf %53, %32 : vector<64x64xf32>
    %55 = arith.mulf %54, %32 : vector<64x64xf32>
    %56 = math.exp %55 : vector<64x64xf32>
    %57 = arith.mulf %52, %56 : vector<64x64xf32>
    %cst_25 = arith.constant 1.000000e+00 : f32
    %58 = vector.broadcast %cst_25 : f32 to vector<64x64xf32>
    %59 = arith.subf %58, %57 : vector<64x64xf32>
    %cst_26 = arith.constant 0.000000e+00 : f32
    %60 = vector.broadcast %cst_26 : f32 to vector<64x64xf32>
    %61 = arith.cmpf olt, %31, %60 : vector<64x64xf32>
    %cst_27 = arith.constant 0.000000e+00 : f32
    %62 = vector.broadcast %cst_27 : f32 to vector<64x64xf32>
    %63 = arith.subf %62, %59 : vector<64x64xf32>
    %64 = arith.select %61, %63, %59 : vector<64x64xi1>, vector<64x64xf32>
    %cst_28 = arith.constant 1.000000e+00 : f32
    %65 = vector.broadcast %cst_28 : f32 to vector<64x64xf32>
    %66 = arith.addf %65, %64 : vector<64x64xf32>
    %67 = arith.mulf %29, %66 : vector<64x64xf32>
    %c0_29 = arith.constant 0 : index
    %c0_30 = arith.constant 0 : index
    %68 = vector.load %arg6[%c0_29, %c0_30] : memref<64x32xf32, #tpu.memory_space<vmem>>, vector<64x32xf32>
    %cst_31 = arith.constant dense<0.000000e+00> : vector<64x32xf32>
    %69 = tpu.matmul %67, %68, %cst_31 {dimension_numbers = #tpu.dot_dimension_numbers<[1], [0], [0], [1], [0, 0, 1, 1], [], []>} : vector<64x64xf32>, vector<64x32xf32>, vector<64x32xf32> -> vector<64x32xf32>
    %c0_32 = arith.constant 0 : index
    %c0_33 = arith.constant 0 : index
    %70 = vector.load %arg7[%c0_32, %c0_33] : memref<1x32xf32, #tpu.memory_space<vmem>>, vector<1x32xf32>
    %71 = vector.broadcast %70 : vector<1x32xf32> to vector<64x32xf32>
    %72 = arith.addf %69, %71 : vector<64x32xf32>
    %73 = arith.addf %0, %72 : vector<64x32xf32>
    %c0_34 = arith.constant 0 : index
    %c0_35 = arith.constant 0 : index
    %74 = vector.load %arg8[%c0_34, %c0_35] : memref<64x32xf32, #tpu.memory_space<vmem>>, vector<64x32xf32>
    tpu.vector_store %arg8[%c0_34, %c0_35], %73 {strides = array<i32>} : memref<64x32xf32, #tpu.memory_space<vmem>>, vector<64x32xf32>,
    return
  }
  func.func @transform_0(%arg0: i32) -> (i32, i32) {
    %c0_i32 = arith.constant 0 : i32
    %c0_i32_0 = arith.constant 0 : i32
    return %arg0, %c0_i32 : i32, i32
  }
  func.func @transform_1(%arg0: i32) -> (i32, i32) {
    %c0_i32 = arith.constant 0 : i32
    %c0_i32_0 = arith.constant 0 : i32
    %c0_i32_1 = arith.constant 0 : i32
    return %c0_i32, %c0_i32_0 : i32, i32
  }
  func.func @transform_2(%arg0: i32) -> (i32, i32) {
    %c0_i32 = arith.constant 0 : i32
    %c0_i32_0 = arith.constant 0 : i32
    %c0_i32_1 = arith.constant 0 : i32
    return %c0_i32, %c0_i32_0 : i32, i32
  }
  func.func @transform_3(%arg0: i32) -> (i32, i32) {
    %c0_i32 = arith.constant 0 : i32
    %c0_i32_0 = arith.constant 0 : i32
    %c0_i32_1 = arith.constant 0 : i32
    return %c0_i32, %c0_i32_0 : i32, i32
  }
  func.func @transform_4(%arg0: i32) -> (i32, i32) {
    %c0_i32 = arith.constant 0 : i32
    %c0_i32_0 = arith.constant 0 : i32
    %c0_i32_1 = arith.constant 0 : i32
    return %c0_i32, %c0_i32_0 : i32, i32
  }
  func.func @transform_5(%arg0: i32) -> (i32, i32) {
    %c0_i32 = arith.constant 0 : i32
    %c0_i32_0 = arith.constant 0 : i32
    %c0_i32_1 = arith.constant 0 : i32
    return %c0_i32, %c0_i32_0 : i32, i32
  }
  func.func @transform_6(%arg0: i32) -> (i32, i32) {
    %c0_i32 = arith.constant 0 : i32
    %c0_i32_0 = arith.constant 0 : i32
    %c0_i32_1 = arith.constant 0 : i32
    return %c0_i32, %c0_i32_0 : i32, i32
  }
  func.func @transform_7(%arg0: i32) -> (i32, i32) {
    %c0_i32 = arith.constant 0 : i32
    %c0_i32_0 = arith.constant 0 : i32
    return %arg0, %c0_i32 : i32, i32
  }
}

module attributes {stable_mosaic.version = 11 : i64} {
  func.func @_ln_linear_kernel(%arg0: i32, %arg1: memref<16x128xf32, #tpu.memory_space<vmem>>, %arg2: memref<1x128xf32, #tpu.memory_space<vmem>>, %arg3: memref<1x128xf32, #tpu.memory_space<vmem>>, %arg4: memref<128x64xf32, #tpu.memory_space<vmem>>, %arg5: memref<16x64xf32, #tpu.memory_space<vmem>>) attributes {dimension_semantics = [#tpu.dimension_semantics<parallel>], iteration_bounds = array<i64: 2>, scalar_prefetch = 0 : i64, scratch_operands = 0 : i64, tpu.core_type = #tpu.core_type<tc>, window_params = [{transform_indices = @transform_0, window_bounds = array<i64: 16, 128>}, {pipeline_mode = #tpu.pipeline_mode<synchronous>, transform_indices = @transform_1, window_bounds = array<i64: 1, 128>}, {pipeline_mode = #tpu.pipeline_mode<synchronous>, transform_indices = @transform_2, window_bounds = array<i64: 1, 128>}, {pipeline_mode = #tpu.pipeline_mode<synchronous>, transform_indices = @transform_3, window_bounds = array<i64: 128, 64>}, {transform_indices = @transform_4, window_bounds = array<i64: 16, 64>}]} {
    %c0 = arith.constant 0 : index
    %c0_0 = arith.constant 0 : index
    %0 = vector.load %arg1[%c0, %c0_0] : memref<16x128xf32, #tpu.memory_space<vmem>>, vector<16x128xf32>
    %c0_1 = arith.constant 0 : index
    %c0_2 = arith.constant 0 : index
    %1 = vector.load %arg2[%c0_1, %c0_2] : memref<1x128xf32, #tpu.memory_space<vmem>>, vector<1x128xf32>
    %c0_3 = arith.constant 0 : index
    %c0_4 = arith.constant 0 : index
    %2 = vector.load %arg3[%c0_3, %c0_4] : memref<1x128xf32, #tpu.memory_space<vmem>>, vector<1x128xf32>
    %cst = arith.constant dense<0.000000e+00> : vector<16xf32>
    %3 = vector.multi_reduction <add>, %0, %cst [1] : vector<16x128xf32> to vector<16xf32>
    %4 = vector.shape_cast %3 : vector<16xf32> to vector<16x1xf32>
    %cst_5 = arith.constant 1.280000e+02 : f32
    %5 = vector.broadcast %cst_5 : f32 to vector<16x1xf32>
    %6 = arith.divf %4, %5 : vector<16x1xf32>
    %7 = vector.broadcast %6 : vector<16x1xf32> to vector<16x128xf32>
    %8 = arith.subf %0, %7 : vector<16x128xf32>
    %9 = arith.mulf %8, %8 : vector<16x128xf32>
    %cst_6 = arith.constant dense<0.000000e+00> : vector<16xf32>
    %10 = vector.multi_reduction <add>, %9, %cst_6 [1] : vector<16x128xf32> to vector<16xf32>
    %11 = vector.shape_cast %10 : vector<16xf32> to vector<16x1xf32>
    %cst_7 = arith.constant 1.280000e+02 : f32
    %12 = vector.broadcast %cst_7 : f32 to vector<16x1xf32>
    %13 = arith.divf %11, %12 : vector<16x1xf32>
    %cst_8 = arith.constant 9.99999974E-6 : f32
    %14 = vector.broadcast %cst_8 : f32 to vector<16x1xf32>
    %15 = arith.addf %13, %14 : vector<16x1xf32>
    %16 = math.rsqrt %15 : vector<16x1xf32>
    %17 = vector.broadcast %16 : vector<16x1xf32> to vector<16x128xf32>
    %18 = arith.mulf %8, %17 : vector<16x128xf32>
    %19 = vector.broadcast %1 : vector<1x128xf32> to vector<16x128xf32>
    %20 = arith.mulf %18, %19 : vector<16x128xf32>
    %21 = vector.broadcast %2 : vector<1x128xf32> to vector<16x128xf32>
    %22 = arith.addf %20, %21 : vector<16x128xf32>
    %c0_9 = arith.constant 0 : index
    %c0_10 = arith.constant 0 : index
    %23 = vector.load %arg4[%c0_9, %c0_10] : memref<128x64xf32, #tpu.memory_space<vmem>>, vector<128x64xf32>
    %cst_11 = arith.constant dense<0.000000e+00> : vector<16x64xf32>
    %24 = tpu.matmul %22, %23, %cst_11 {dimension_numbers = #tpu.dot_dimension_numbers<[1], [0], [0], [1], [0, 0, 1, 1], [], []>} : vector<16x128xf32>, vector<128x64xf32>, vector<16x64xf32> -> vector<16x64xf32>
    %c0_12 = arith.constant 0 : index
    %c0_13 = arith.constant 0 : index
    %25 = vector.load %arg5[%c0_12, %c0_13] : memref<16x64xf32, #tpu.memory_space<vmem>>, vector<16x64xf32>
    tpu.vector_store %arg5[%c0_12, %c0_13], %24 {strides = array<i32>} : memref<16x64xf32, #tpu.memory_space<vmem>>, vector<16x64xf32>,
    return
  }
  func.func @transform_0(%arg0: i32) -> (i32, i32) {
    %c0_i32 = arith.constant 0 : i32
    %c0_i32_0 = arith.constant 0 : i32
    return %arg0, %c0_i32 : i32, i32
  }
  func.func @transform_1(%arg0: i32) -> (i32, i32) {
    %c0_i32 = arith.constant 0 : i32
    %c0_i32_0 = arith.constant 0 : i32
    %c0_i32_1 = arith.constant 0 : i32
    return %c0_i32, %c0_i32_0 : i32, i32
  }
  func.func @transform_2(%arg0: i32) -> (i32, i32) {
    %c0_i32 = arith.constant 0 : i32
    %c0_i32_0 = arith.constant 0 : i32
    %c0_i32_1 = arith.constant 0 : i32
    return %c0_i32, %c0_i32_0 : i32, i32
  }
  func.func @transform_3(%arg0: i32) -> (i32, i32) {
    %c0_i32 = arith.constant 0 : i32
    %c0_i32_0 = arith.constant 0 : i32
    %c0_i32_1 = arith.constant 0 : i32
    return %c0_i32, %c0_i32_0 : i32, i32
  }
  func.func @transform_4(%arg0: i32) -> (i32, i32) {
    %c0_i32 = arith.constant 0 : i32
    %c0_i32_0 = arith.constant 0 : i32
    return %arg0, %c0_i32 : i32, i32
  }
}

module attributes {stable_mosaic.version = 11 : i64} {
  func.func @kern(%arg0: i32, %arg1: memref<16x64xf32, #tpu.memory_space<vmem>>, %arg2: memref<1x64xf32, #tpu.memory_space<vmem>>, %arg3: memref<1x64xf32, #tpu.memory_space<vmem>>, %arg4: memref<64x192xf32, #tpu.memory_space<vmem>>, %arg5: memref<1x192xf32, #tpu.memory_space<vmem>>, %arg6: memref<4x8x8xf32, #tpu.memory_space<vmem>>, %arg7: memref<64x64xf32, #tpu.memory_space<vmem>>, %arg8: memref<1x64xf32, #tpu.memory_space<vmem>>, %arg9: memref<16x64xf32, #tpu.memory_space<vmem>>) attributes {dimension_semantics = [#tpu.dimension_semantics<parallel>], iteration_bounds = array<i64: 2>, scalar_prefetch = 0 : i64, scratch_operands = 0 : i64, tpu.core_type = #tpu.core_type<tc>, window_params = [{transform_indices = @transform_0, window_bounds = array<i64: 16, 64>}, {pipeline_mode = #tpu.pipeline_mode<synchronous>, transform_indices = @transform_1, window_bounds = array<i64: 1, 64>}, {pipeline_mode = #tpu.pipeline_mode<synchronous>, transform_indices = @transform_2, window_bounds = array<i64: 1, 64>}, {pipeline_mode = #tpu.pipeline_mode<synchronous>, transform_indices = @transform_3, window_bounds = array<i64: 64, 192>}, {pipeline_mode = #tpu.pipeline_mode<synchronous>, transform_indices = @transform_4, window_bounds = array<i64: 1, 192>}, {pipeline_mode = #tpu.pipeline_mode<synchronous>, transform_indices = @transform_5, window_bounds = array<i64: 4, 8, 8>}, {pipeline_mode = #tpu.pipeline_mode<synchronous>, transform_indices = @transform_6, window_bounds = array<i64: 64, 64>}, {pipeline_mode = #tpu.pipeline_mode<synchronous>, transform_indices = @transform_7, window_bounds = array<i64: 1, 64>}, {transform_indices = @transform_8, window_bounds = array<i64: 16, 64>}]} {
    %c0 = arith.constant 0 : index
    %c0_0 = arith.constant 0 : index
    %0 = vector.load %arg1[%c0, %c0_0] : memref<16x64xf32, #tpu.memory_space<vmem>>, vector<16x64xf32>
    %c0_1 = arith.constant 0 : index
    %c0_2 = arith.constant 0 : index
    %1 = vector.load %arg2[%c0_1, %c0_2] : memref<1x64xf32, #tpu.memory_space<vmem>>, vector<1x64xf32>
    %c0_3 = arith.constant 0 : index
    %c0_4 = arith.constant 0 : index
    %2 = vector.load %arg3[%c0_3, %c0_4] : memref<1x64xf32, #tpu.memory_space<vmem>>, vector<1x64xf32>
    %cst = arith.constant dense<0.000000e+00> : vector<16xf32>
    %3 = vector.multi_reduction <add>, %0, %cst [1] : vector<16x64xf32> to vector<16xf32>
    %4 = vector.shape_cast %3 : vector<16xf32> to vector<16x1xf32>
    %cst_5 = arith.constant 6.400000e+01 : f32
    %5 = vector.broadcast %cst_5 : f32 to vector<16x1xf32>
    %6 = arith.divf %4, %5 : vector<16x1xf32>
    %7 = vector.broadcast %6 : vector<16x1xf32> to vector<16x64xf32>
    %8 = arith.subf %0, %7 : vector<16x64xf32>
    %9 = arith.mulf %8, %8 : vector<16x64xf32>
    %cst_6 = arith.constant dense<0.000000e+00> : vector<16xf32>
    %10 = vector.multi_reduction <add>, %9, %cst_6 [1] : vector<16x64xf32> to vector<16xf32>
    %11 = vector.shape_cast %10 : vector<16xf32> to vector<16x1xf32>
    %cst_7 = arith.constant 6.400000e+01 : f32
    %12 = vector.broadcast %cst_7 : f32 to vector<16x1xf32>
    %13 = arith.divf %11, %12 : vector<16x1xf32>
    %cst_8 = arith.constant 9.99999974E-6 : f32
    %14 = vector.broadcast %cst_8 : f32 to vector<16x1xf32>
    %15 = arith.addf %13, %14 : vector<16x1xf32>
    %16 = math.rsqrt %15 : vector<16x1xf32>
    %17 = vector.broadcast %16 : vector<16x1xf32> to vector<16x64xf32>
    %18 = arith.mulf %8, %17 : vector<16x64xf32>
    %19 = vector.broadcast %1 : vector<1x64xf32> to vector<16x64xf32>
    %20 = arith.mulf %18, %19 : vector<16x64xf32>
    %21 = vector.broadcast %2 : vector<1x64xf32> to vector<16x64xf32>
    %22 = arith.addf %20, %21 : vector<16x64xf32>
    %c0_9 = arith.constant 0 : index
    %c0_10 = arith.constant 0 : index
    %23 = vector.load %arg4[%c0_9, %c0_10] : memref<64x192xf32, #tpu.memory_space<vmem>>, vector<64x192xf32>
    %cst_11 = arith.constant dense<0.000000e+00> : vector<16x192xf32>
    %24 = tpu.matmul %22, %23, %cst_11 {dimension_numbers = #tpu.dot_dimension_numbers<[1], [0], [0], [1], [0, 0, 1, 1], [], []>} : vector<16x64xf32>, vector<64x192xf32>, vector<16x192xf32> -> vector<16x192xf32>
    %c0_12 = arith.constant 0 : index
    %c0_13 = arith.constant 0 : index
    %25 = vector.load %arg5[%c0_12, %c0_13] : memref<1x192xf32, #tpu.memory_space<vmem>>, vector<1x192xf32>
    %26 = vector.broadcast %25 : vector<1x192xf32> to vector<16x192xf32>
    %27 = arith.addf %24, %26 : vector<16x192xf32>
    %c0_14 = arith.constant 0 : index
    %c0_15 = arith.constant 0 : index
    %28 = vector.load %arg7[%c0_14, %c0_15] : memref<64x64xf32, #tpu.memory_space<vmem>>, vector<64x64xf32>
    %c0_16 = arith.constant 0 : index
    %c0_17 = arith.constant 0 : index
    %29 = vector.load %arg8[%c0_16, %c0_17] : memref<1x64xf32, #tpu.memory_space<vmem>>, vector<1x64xf32>
    %30 = vector.extract_strided_slice %27 {offsets = [0, 0], sizes = [8, 16], strides = [1, 1]} : vector<16x192xf32> to vector<8x16xf32>
    %cst_18 = arith.constant 2.500000e-01 : f32
    %31 = vector.broadcast %cst_18 : f32 to vector<8x16xf32>
    %32 = arith.mulf %30, %31 : vector<8x16xf32>
    %33 = vector.extract_strided_slice %27 {offsets = [0, 64], sizes = [8, 16], strides = [1, 1]} : vector<16x192xf32> to vector<8x16xf32>
    %34 = vector.extract_strided_slice %27 {offsets = [0, 128], sizes = [8, 16], strides = [1, 1]} : vector<16x192xf32> to vector<8x16xf32>
    %cst_19 = arith.constant dense<0.000000e+00> : vector<8x8xf32>
    %35 = tpu.matmul %32, %33, %cst_19 {dimension_numbers = #tpu.dot_dimension_numbers<[1], [1], [0], [0], [0, 0, 1, 0], [], []>} : vector<8x16xf32>, vector<8x16xf32>, vector<8x8xf32> -> vector<8x8xf32>
    %c0_20 = arith.constant 0 : index
    %c0_21 = arith.constant 0 : index
    %c0_22 = arith.constant 0 : index
    %36 = vector.load %arg6[%c0_20, %c0_21, %c0_22] : memref<4x8x8xf32, #tpu.memory_space<vmem>>, vector<1x8x8xf32>
    %37 = vector.shape_cast %36 : vector<1x8x8xf32> to vector<8x8xf32>
    %38 = arith.addf %35, %37 : vector<8x8xf32>
    %cst_23 = arith.constant dense<0xFF800000> : vector<8xf32>
    %39 = vector.multi_reduction <maximumf>, %38, %cst_23 [1] : vector<8x8xf32> to vector<8xf32>
    %40 = vector.shape_cast %39 : vector<8xf32> to vector<8x1xf32>
    %41 = vector.broadcast %40 : vector<8x1xf32> to vector<8x8xf32>
    %42 = arith.subf %38, %41 : vector<8x8xf32>
    %43 = math.exp %42 : vector<8x8xf32>
    %cst_24 = arith.constant dense<0.000000e+00> : vector<8xf32>
    %44 = vector.multi_reduction <add>, %43, %cst_24 [1] : vector<8x8xf32> to vector<8xf32>
    %45 = vector.shape_cast %44 : vector<8xf32> to vector<8x1xf32>
    %46 = vector.broadcast %45 : vector<8x1xf32> to vector<8x8xf32>
    %47 = arith.divf %43, %46 : vector<8x8xf32>
    %cst_25 = arith.constant dense<0.000000e+00> : vector<8x16xf32>
    %48 = tpu.matmul %47, %34, %cst_25 {dimension_numbers = #tpu.dot_dimension_numbers<[1], [0], [0], [1], [0, 0, 1, 1], [], []>} : vector<8x8xf32>, vector<8x16xf32>, vector<8x16xf32> -> vector<8x16xf32>
    %49 = vector.extract_strided_slice %28 {offsets = [0, 0], sizes = [16, 64], strides = [1, 1]} : vector<64x64xf32> to vector<16x64xf32>
    %cst_26 = arith.constant dense<0.000000e+00> : vector<8x64xf32>
    %50 = tpu.matmul %48, %49, %cst_26 {dimension_numbers = #tpu.dot_dimension_numbers<[1], [0], [0], [1], [0, 0, 1, 1], [], []>} : vector<8x16xf32>, vector<16x64xf32>, vector<8x64xf32> -> vector<8x64xf32>
    %51 = vector.extract_strided_slice %27 {offsets = [0, 16], sizes = [8, 16], strides = [1, 1]} : vector<16x192xf32> to vector<8x16xf32>
    %cst_27 = arith.constant 2.500000e-01 : f32
    %52 = vector.broadcast %cst_27 : f32 to vector<8x16xf32>
    %53 = arith.mulf %51, %52 : vector<8x16xf32>
    %54 = vector.extract_strided_slice %27 {offsets = [0, 80], sizes = [8, 16], strides = [1, 1]} : vector<16x192xf32> to vector<8x16xf32>
    %55 = vector.extract_strided_slice %27 {offsets = [0, 144], sizes = [8, 16], strides = [1, 1]} : vector<16x192xf32> to vector<8x16xf32>
    %cst_28 = arith.constant dense<0.000000e+00> : vector<8x8xf32>
    %56 = tpu.matmul %53, %54, %cst_28 {dimension_numbers = #tpu.dot_dimension_numbers<[1], [1], [0], [0], [0, 0, 1, 0], [], []>} : vector<8x16xf32>, vector<8x16xf32>, vector<8x8xf32> -> vector<8x8xf32>
    %c1 = arith.constant 1 : index
    %c0_29 = arith.constant 0 : index
    %c0_30 = arith.constant 0 : index
    %57 = vector.load %arg6[%c1, %c0_29, %c0_30] : memref<4x8x8xf32, #tpu.memory_space<vmem>>, vector<1x8x8xf32>
    %58 = vector.shape_cast %57 : vector<1x8x8xf32> to vector<8x8xf32>
    %59 = arith.addf %56, %58 : vector<8x8xf32>
    %cst_31 = arith.constant dense<0xFF800000> : vector<8xf32>
    %60 = vector.multi_reduction <maximumf>, %59, %cst_31 [1] : vector<8x8xf32> to vector<8xf32>
    %61 = vector.shape_cast %60 : vector<8xf32> to vector<8x1xf32>
    %62 = vector.broadcast %61 : vector<8x1xf32> to vector<8x8xf32>
    %63 = arith.subf %59, %62 : vector<8x8xf32>
    %64 = math.exp %63 : vector<8x8xf32>
    %cst_32 = arith.constant dense<0.000000e+00> : vector<8xf32>
    %65 = vector.multi_reduction <add>, %64, %cst_32 [1] : vector<8x8xf32> to vector<8xf32>
    %66 = vector.shape_cast %65 : vector<8xf32> to vector<8x1xf32>
    %67 = vector.broadcast %66 : vector<8x1xf32> to vector<8x8xf32>
    %68 = arith.divf %64, %67 : vector<8x8xf32>
    %cst_33 = arith.constant dense<0.000000e+00> : vector<8x16xf32>
    %69 = tpu.matmul %68, %55, %cst_33 {dimension_numbers = #tpu.dot_dimension_numbers<[1], [0], [0], [1], [0, 0, 1, 1], [], []>} : vector<8x8xf32>, vector<8x16xf32>, vector<8x16xf32> -> vector<8x16xf32>
    %70 = vector.extract_strided_slice %28 {offsets = [16, 0], sizes = [16, 64], strides = [1, 1]} : vector<64x64xf32> to vector<16x64xf32>
    %cst_34 = arith.constant dense<0.000000e+00> : vector<8x64xf32>
    %71 = tpu.matmul %69, %70, %cst_34 {dimension_numbers = #tpu.dot_dimension_numbers<[1], [0], [0], [1], [0, 0, 1, 1], [], []>} : vector<8x16xf32>, vector<16x64xf32>, vector<8x64xf32> -> vector<8x64xf32>
    %72 = arith.addf %50, %71 : vector<8x64xf32>
    %73 = vector.extract_strided_slice %27 {offsets = [0, 32], sizes = [8, 16], strides = [1, 1]} : vector<16x192xf32> to vector<8x16xf32>
    %cst_35 = arith.constant 2.500000e-01 : f32
    %74 = vector.broadcast %cst_35 : f32 to vector<8x16xf32>
    %75 = arith.mulf %73, %74 : vector<8x16xf32>
    %76 = vector.extract_strided_slice %27 {offsets = [0, 96], sizes = [8, 16], strides = [1, 1]} : vector<16x192xf32> to vector<8x16xf32>
    %77 = vector.extract_strided_slice %27 {offsets = [0, 160], sizes = [8, 16], strides = [1, 1]} : vector<16x192xf32> to vector<8x16xf32>
    %cst_36 = arith.constant dense<0.000000e+00> : vector<8x8xf32>
    %78 = tpu.matmul %75, %76, %cst_36 {dimension_numbers = #tpu.dot_dimension_numbers<[1], [1], [0], [0], [0, 0, 1, 0], [], []>} : vector<8x16xf32>, vector<8x16xf32>, vector<8x8xf32> -> vector<8x8xf32>
    %c2 = arith.constant 2 : index
    %c0_37 = arith.constant 0 : index
    %c0_38 = arith.constant 0 : index
    %79 = vector.load %arg6[%c2, %c0_37, %c0_38] : memref<4x8x8xf32, #tpu.memory_space<vmem>>, vector<1x8x8xf32>
    %80 = vector.shape_cast %79 : vector<1x8x8xf32> to vector<8x8xf32>
    %81 = arith.addf %78, %80 : vector<8x8xf32>
    %cst_39 = arith.constant dense<0xFF800000> : vector<8xf32>
    %82 = vector.multi_reduction <maximumf>, %81, %cst_39 [1] : vector<8x8xf32> to vector<8xf32>
    %83 = vector.shape_cast %82 : vector<8xf32> to vector<8x1xf32>
    %84 = vector.broadcast %83 : vector<8x1xf32> to vector<8x8xf32>
    %85 = arith.subf %81, %84 : vector<8x8xf32>
    %86 = math.exp %85 : vector<8x8xf32>
    %cst_40 = arith.constant dense<0.000000e+00> : vector<8xf32>
    %87 = vector.multi_reduction <add>, %86, %cst_40 [1] : vector<8x8xf32> to vector<8xf32>
    %88 = vector.shape_cast %87 : vector<8xf32> to vector<8x1xf32>
    %89 = vector.broadcast %88 : vector<8x1xf32> to vector<8x8xf32>
    %90 = arith.divf %86, %89 : vector<8x8xf32>
    %cst_41 = arith.constant dense<0.000000e+00> : vector<8x16xf32>
    %91 = tpu.matmul %90, %77, %cst_41 {dimension_numbers = #tpu.dot_dimension_numbers<[1], [0], [0], [1], [0, 0, 1, 1], [], []>} : vector<8x8xf32>, vector<8x16xf32>, vector<8x16xf32> -> vector<8x16xf32>
    %92 = vector.extract_strided_slice %28 {offsets = [32, 0], sizes = [16, 64], strides = [1, 1]} : vector<64x64xf32> to vector<16x64xf32>
    %cst_42 = arith.constant dense<0.000000e+00> : vector<8x64xf32>
    %93 = tpu.matmul %91, %92, %cst_42 {dimension_numbers = #tpu.dot_dimension_numbers<[1], [0], [0], [1], [0, 0, 1, 1], [], []>} : vector<8x16xf32>, vector<16x64xf32>, vector<8x64xf32> -> vector<8x64xf32>
    %94 = arith.addf %72, %93 : vector<8x64xf32>
    %95 = vector.extract_strided_slice %27 {offsets = [0, 48], sizes = [8, 16], strides = [1, 1]} : vector<16x192xf32> to vector<8x16xf32>
    %cst_43 = arith.constant 2.500000e-01 : f32
    %96 = vector.broadcast %cst_43 : f32 to vector<8x16xf32>
    %97 = arith.mulf %95, %96 : vector<8x16xf32>
    %98 = vector.extract_strided_slice %27 {offsets = [0, 112], sizes = [8, 16], strides = [1, 1]} : vector<16x192xf32> to vector<8x16xf32>
    %99 = vector.extract_strided_slice %27 {offsets = [0, 176], sizes = [8, 16], strides = [1, 1]} : vector<16x192xf32> to vector<8x16xf32>
    %cst_44 = arith.constant dense<0.000000e+00> : vector<8x8xf32>
    %100 = tpu.matmul %97, %98, %cst_44 {dimension_numbers = #tpu.dot_dimension_numbers<[1], [1], [0], [0], [0, 0, 1, 0], [], []>} : vector<8x16xf32>, vector<8x16xf32>, vector<8x8xf32> -> vector<8x8xf32>
    %c3 = arith.constant 3 : index
    %c0_45 = arith.constant 0 : index
    %c0_46 = arith.constant 0 : index
    %101 = vector.load %arg6[%c3, %c0_45, %c0_46] : memref<4x8x8xf32, #tpu.memory_space<vmem>>, vector<1x8x8xf32>
    %102 = vector.shape_cast %101 : vector<1x8x8xf32> to vector<8x8xf32>
    %103 = arith.addf %100, %102 : vector<8x8xf32>
    %cst_47 = arith.constant dense<0xFF800000> : vector<8xf32>
    %104 = vector.multi_reduction <maximumf>, %103, %cst_47 [1] : vector<8x8xf32> to vector<8xf32>
    %105 = vector.shape_cast %104 : vector<8xf32> to vector<8x1xf32>
    %106 = vector.broadcast %105 : vector<8x1xf32> to vector<8x8xf32>
    %107 = arith.subf %103, %106 : vector<8x8xf32>
    %108 = math.exp %107 : vector<8x8xf32>
    %cst_48 = arith.constant dense<0.000000e+00> : vector<8xf32>
    %109 = vector.multi_reduction <add>, %108, %cst_48 [1] : vector<8x8xf32> to vector<8xf32>
    %110 = vector.shape_cast %109 : vector<8xf32> to vector<8x1xf32>
    %111 = vector.broadcast %110 : vector<8x1xf32> to vector<8x8xf32>
    %112 = arith.divf %108, %111 : vector<8x8xf32>
    %cst_49 = arith.constant dense<0.000000e+00> : vector<8x16xf32>
    %113 = tpu.matmul %112, %99, %cst_49 {dimension_numbers = #tpu.dot_dimension_numbers<[1], [0], [0], [1], [0, 0, 1, 1], [], []>} : vector<8x8xf32>, vector<8x16xf32>, vector<8x16xf32> -> vector<8x16xf32>
    %114 = vector.extract_strided_slice %28 {offsets = [48, 0], sizes = [16, 64], strides = [1, 1]} : vector<64x64xf32> to vector<16x64xf32>
    %cst_50 = arith.constant dense<0.000000e+00> : vector<8x64xf32>
    %115 = tpu.matmul %113, %114, %cst_50 {dimension_numbers = #tpu.dot_dimension_numbers<[1], [0], [0], [1], [0, 0, 1, 1], [], []>} : vector<8x16xf32>, vector<16x64xf32>, vector<8x64xf32> -> vector<8x64xf32>
    %116 = arith.addf %94, %115 : vector<8x64xf32>
    %117 = vector.broadcast %29 : vector<1x64xf32> to vector<8x64xf32>
    %118 = arith.addf %116, %117 : vector<8x64xf32>
    %c0_51 = arith.constant 0 : index
    %c0_52 = arith.constant 0 : index
    %119 = vector.load %arg9[%c0_51, %c0_52] : memref<16x64xf32, #tpu.memory_space<vmem>>, vector<8x64xf32>
    tpu.vector_store %arg9[%c0_51, %c0_52], %118 {strides = array<i32>} : memref<16x64xf32, #tpu.memory_space<vmem>>, vector<8x64xf32>,
    %120 = vector.extract_strided_slice %27 {offsets = [8, 0], sizes = [8, 16], strides = [1, 1]} : vector<16x192xf32> to vector<8x16xf32>
    %cst_53 = arith.constant 2.500000e-01 : f32
    %121 = vector.broadcast %cst_53 : f32 to vector<8x16xf32>
    %122 = arith.mulf %120, %121 : vector<8x16xf32>
    %123 = vector.extract_strided_slice %27 {offsets = [8, 64], sizes = [8, 16], strides = [1, 1]} : vector<16x192xf32> to vector<8x16xf32>
    %124 = vector.extract_strided_slice %27 {offsets = [8, 128], sizes = [8, 16], strides = [1, 1]} : vector<16x192xf32> to vector<8x16xf32>
    %cst_54 = arith.constant dense<0.000000e+00> : vector<8x8xf32>
    %125 = tpu.matmul %122, %123, %cst_54 {dimension_numbers = #tpu.dot_dimension_numbers<[1], [1], [0], [0], [0, 0, 1, 0], [], []>} : vector<8x16xf32>, vector<8x16xf32>, vector<8x8xf32> -> vector<8x8xf32>
    %c0_55 = arith.constant 0 : index
    %c0_56 = arith.constant 0 : index
    %c0_57 = arith.constant 0 : index
    %126 = vector.load %arg6[%c0_55, %c0_56, %c0_57] : memref<4x8x8xf32, #tpu.memory_space<vmem>>, vector<1x8x8xf32>
    %127 = vector.shape_cast %126 : vector<1x8x8xf32> to vector<8x8xf32>
    %128 = arith.addf %125, %127 : vector<8x8xf32>
    %cst_58 = arith.constant dense<0xFF800000> : vector<8xf32>
    %129 = vector.multi_reduction <maximumf>, %128, %cst_58 [1] : vector<8x8xf32> to vector<8xf32>
    %130 = vector.shape_cast %129 : vector<8xf32> to vector<8x1xf32>
    %131 = vector.broadcast %130 : vector<8x1xf32> to vector<8x8xf32>
    %132 = arith.subf %128, %131 : vector<8x8xf32>
    %133 = math.exp %132 : vector<8x8xf32>
    %cst_59 = arith.constant dense<0.000000e+00> : vector<8xf32>
    %134 = vector.multi_reduction <add>, %133, %cst_59 [1] : vector<8x8xf32> to vector<8xf32>
    %135 = vector.shape_cast %134 : vector<8xf32> to vector<8x1xf32>
    %136 = vector.broadcast %135 : vector<8x1xf32> to vector<8x8xf32>
    %137 = arith.divf %133, %136 : vector<8x8xf32>
    %cst_60 = arith.constant dense<0.000000e+00> : vector<8x16xf32>
    %138 = tpu.matmul %137, %124, %cst_60 {dimension_numbers = #tpu.dot_dimension_numbers<[1], [0], [0], [1], [0, 0, 1, 1], [], []>} : vector<8x8xf32>, vector<8x16xf32>, vector<8x16xf32> -> vector<8x16xf32>
    %139 = vector.extract_strided_slice %28 {offsets = [0, 0], sizes = [16, 64], strides = [1, 1]} : vector<64x64xf32> to vector<16x64xf32>
    %cst_61 = arith.constant dense<0.000000e+00> : vector<8x64xf32>
    %140 = tpu.matmul %138, %139, %cst_61 {dimension_numbers = #tpu.dot_dimension_numbers<[1], [0], [0], [1], [0, 0, 1, 1], [], []>} : vector<8x16xf32>, vector<16x64xf32>, vector<8x64xf32> -> vector<8x64xf32>
    %141 = vector.extract_strided_slice %27 {offsets = [8, 16], sizes = [8, 16], strides = [1, 1]} : vector<16x192xf32> to vector<8x16xf32>
    %cst_62 = arith.constant 2.500000e-01 : f32
    %142 = vector.broadcast %cst_62 : f32 to vector<8x16xf32>
    %143 = arith.mulf %141, %142 : vector<8x16xf32>
    %144 = vector.extract_strided_slice %27 {offsets = [8, 80], sizes = [8, 16], strides = [1, 1]} : vector<16x192xf32> to vector<8x16xf32>
    %145 = vector.extract_strided_slice %27 {offsets = [8, 144], sizes = [8, 16], strides = [1, 1]} : vector<16x192xf32> to vector<8x16xf32>
    %cst_63 = arith.constant dense<0.000000e+00> : vector<8x8xf32>
    %146 = tpu.matmul %143, %144, %cst_63 {dimension_numbers = #tpu.dot_dimension_numbers<[1], [1], [0], [0], [0, 0, 1, 0], [], []>} : vector<8x16xf32>, vector<8x16xf32>, vector<8x8xf32> -> vector<8x8xf32>
    %c1_64 = arith.constant 1 : index
    %c0_65 = arith.constant 0 : index
    %c0_66 = arith.constant 0 : index
    %147 = vector.load %arg6[%c1_64, %c0_65, %c0_66] : memref<4x8x8xf32, #tpu.memory_space<vmem>>, vector<1x8x8xf32>
    %148 = vector.shape_cast %147 : vector<1x8x8xf32> to vector<8x8xf32>
    %149 = arith.addf %146, %148 : vector<8x8xf32>
    %cst_67 = arith.constant dense<0xFF800000> : vector<8xf32>
    %150 = vector.multi_reduction <maximumf>, %149, %cst_67 [1] : vector<8x8xf32> to vector<8xf32>
    %151 = vector.shape_cast %150 : vector<8xf32> to vector<8x1xf32>
    %152 = vector.broadcast %151 : vector<8x1xf32> to vector<8x8xf32>
    %153 = arith.subf %149, %152 : vector<8x8xf32>
    %154 = math.exp %153 : vector<8x8xf32>
    %cst_68 = arith.constant dense<0.000000e+00> : vector<8xf32>
    %155 = vector.multi_reduction <add>, %154, %cst_68 [1] : vector<8x8xf32> to vector<8xf32>
    %156 = vector.shape_cast %155 : vector<8xf32> to vector<8x1xf32>
    %157 = vector.broadcast %156 : vector<8x1xf32> to vector<8x8xf32>
    %158 = arith.divf %154, %157 : vector<8x8xf32>
    %cst_69 = arith.constant dense<0.000000e+00> : vector<8x16xf32>
    %159 = tpu.matmul %158, %145, %cst_69 {dimension_numbers = #tpu.dot_dimension_numbers<[1], [0], [0], [1], [0, 0, 1, 1], [], []>} : vector<8x8xf32>, vector<8x16xf32>, vector<8x16xf32> -> vector<8x16xf32>
    %160 = vector.extract_strided_slice %28 {offsets = [16, 0], sizes = [16, 64], strides = [1, 1]} : vector<64x64xf32> to vector<16x64xf32>
    %cst_70 = arith.constant dense<0.000000e+00> : vector<8x64xf32>
    %161 = tpu.matmul %159, %160, %cst_70 {dimension_numbers = #tpu.dot_dimension_numbers<[1], [0], [0], [1], [0, 0, 1, 1], [], []>} : vector<8x16xf32>, vector<16x64xf32>, vector<8x64xf32> -> vector<8x64xf32>
    %162 = arith.addf %140, %161 : vector<8x64xf32>
    %163 = vector.extract_strided_slice %27 {offsets = [8, 32], sizes = [8, 16], strides = [1, 1]} : vector<16x192xf32> to vector<8x16xf32>
    %cst_71 = arith.constant 2.500000e-01 : f32
    %164 = vector.broadcast %cst_71 : f32 to vector<8x16xf32>
    %165 = arith.mulf %163, %164 : vector<8x16xf32>
    %166 = vector.extract_strided_slice %27 {offsets = [8, 96], sizes = [8, 16], strides = [1, 1]} : vector<16x192xf32> to vector<8x16xf32>
    %167 = vector.extract_strided_slice %27 {offsets = [8, 160], sizes = [8, 16], strides = [1, 1]} : vector<16x192xf32> to vector<8x16xf32>
    %cst_72 = arith.constant dense<0.000000e+00> : vector<8x8xf32>
    %168 = tpu.matmul %165, %166, %cst_72 {dimension_numbers = #tpu.dot_dimension_numbers<[1], [1], [0], [0], [0, 0, 1, 0], [], []>} : vector<8x16xf32>, vector<8x16xf32>, vector<8x8xf32> -> vector<8x8xf32>
    %c2_73 = arith.constant 2 : index
    %c0_74 = arith.constant 0 : index
    %c0_75 = arith.constant 0 : index
    %169 = vector.load %arg6[%c2_73, %c0_74, %c0_75] : memref<4x8x8xf32, #tpu.memory_space<vmem>>, vector<1x8x8xf32>
    %170 = vector.shape_cast %169 : vector<1x8x8xf32> to vector<8x8xf32>
    %171 = arith.addf %168, %170 : vector<8x8xf32>
    %cst_76 = arith.constant dense<0xFF800000> : vector<8xf32>
    %172 = vector.multi_reduction <maximumf>, %171, %cst_76 [1] : vector<8x8xf32> to vector<8xf32>
    %173 = vector.shape_cast %172 : vector<8xf32> to vector<8x1xf32>
    %174 = vector.broadcast %173 : vector<8x1xf32> to vector<8x8xf32>
    %175 = arith.subf %171, %174 : vector<8x8xf32>
    %176 = math.exp %175 : vector<8x8xf32>
    %cst_77 = arith.constant dense<0.000000e+00> : vector<8xf32>
    %177 = vector.multi_reduction <add>, %176, %cst_77 [1] : vector<8x8xf32> to vector<8xf32>
    %178 = vector.shape_cast %177 : vector<8xf32> to vector<8x1xf32>
    %179 = vector.broadcast %178 : vector<8x1xf32> to vector<8x8xf32>
    %180 = arith.divf %176, %179 : vector<8x8xf32>
    %cst_78 = arith.constant dense<0.000000e+00> : vector<8x16xf32>
    %181 = tpu.matmul %180, %167, %cst_78 {dimension_numbers = #tpu.dot_dimension_numbers<[1], [0], [0], [1], [0, 0, 1, 1], [], []>} : vector<8x8xf32>, vector<8x16xf32>, vector<8x16xf32> -> vector<8x16xf32>
    %182 = vector.extract_strided_slice %28 {offsets = [32, 0], sizes = [16, 64], strides = [1, 1]} : vector<64x64xf32> to vector<16x64xf32>
    %cst_79 = arith.constant dense<0.000000e+00> : vector<8x64xf32>
    %183 = tpu.matmul %181, %182, %cst_79 {dimension_numbers = #tpu.dot_dimension_numbers<[1], [0], [0], [1], [0, 0, 1, 1], [], []>} : vector<8x16xf32>, vector<16x64xf32>, vector<8x64xf32> -> vector<8x64xf32>
    %184 = arith.addf %162, %183 : vector<8x64xf32>
    %185 = vector.extract_strided_slice %27 {offsets = [8, 48], sizes = [8, 16], strides = [1, 1]} : vector<16x192xf32> to vector<8x16xf32>
    %cst_80 = arith.constant 2.500000e-01 : f32
    %186 = vector.broadcast %cst_80 : f32 to vector<8x16xf32>
    %187 = arith.mulf %185, %186 : vector<8x16xf32>
    %188 = vector.extract_strided_slice %27 {offsets = [8, 112], sizes = [8, 16], strides = [1, 1]} : vector<16x192xf32> to vector<8x16xf32>
    %189 = vector.extract_strided_slice %27 {offsets = [8, 176], sizes = [8, 16], strides = [1, 1]} : vector<16x192xf32> to vector<8x16xf32>
    %cst_81 = arith.constant dense<0.000000e+00> : vector<8x8xf32>
    %190 = tpu.matmul %187, %188, %cst_81 {dimension_numbers = #tpu.dot_dimension_numbers<[1], [1], [0], [0], [0, 0, 1, 0], [], []>} : vector<8x16xf32>, vector<8x16xf32>, vector<8x8xf32> -> vector<8x8xf32>
    %c3_82 = arith.constant 3 : index
    %c0_83 = arith.constant 0 : index
    %c0_84 = arith.constant 0 : index
    %191 = vector.load %arg6[%c3_82, %c0_83, %c0_84] : memref<4x8x8xf32, #tpu.memory_space<vmem>>, vector<1x8x8xf32>
    %192 = vector.shape_cast %191 : vector<1x8x8xf32> to vector<8x8xf32>
    %193 = arith.addf %190, %192 : vector<8x8xf32>
    %cst_85 = arith.constant dense<0xFF800000> : vector<8xf32>
    %194 = vector.multi_reduction <maximumf>, %193, %cst_85 [1] : vector<8x8xf32> to vector<8xf32>
    %195 = vector.shape_cast %194 : vector<8xf32> to vector<8x1xf32>
    %196 = vector.broadcast %195 : vector<8x1xf32> to vector<8x8xf32>
    %197 = arith.subf %193, %196 : vector<8x8xf32>
    %198 = math.exp %197 : vector<8x8xf32>
    %cst_86 = arith.constant dense<0.000000e+00> : vector<8xf32>
    %199 = vector.multi_reduction <add>, %198, %cst_86 [1] : vector<8x8xf32> to vector<8xf32>
    %200 = vector.shape_cast %199 : vector<8xf32> to vector<8x1xf32>
    %201 = vector.broadcast %200 : vector<8x1xf32> to vector<8x8xf32>
    %202 = arith.divf %198, %201 : vector<8x8xf32>
    %cst_87 = arith.constant dense<0.000000e+00> : vector<8x16xf32>
    %203 = tpu.matmul %202, %189, %cst_87 {dimension_numbers = #tpu.dot_dimension_numbers<[1], [0], [0], [1], [0, 0, 1, 1], [], []>} : vector<8x8xf32>, vector<8x16xf32>, vector<8x16xf32> -> vector<8x16xf32>
    %204 = vector.extract_strided_slice %28 {offsets = [48, 0], sizes = [16, 64], strides = [1, 1]} : vector<64x64xf32> to vector<16x64xf32>
    %cst_88 = arith.constant dense<0.000000e+00> : vector<8x64xf32>
    %205 = tpu.matmul %203, %204, %cst_88 {dimension_numbers = #tpu.dot_dimension_numbers<[1], [0], [0], [1], [0, 0, 1, 1], [], []>} : vector<8x16xf32>, vector<16x64xf32>, vector<8x64xf32> -> vector<8x64xf32>
    %206 = arith.addf %184, %205 : vector<8x64xf32>
    %207 = vector.broadcast %29 : vector<1x64xf32> to vector<8x64xf32>
    %208 = arith.addf %206, %207 : vector<8x64xf32>
    %c8 = arith.constant 8 : index
    %c0_89 = arith.constant 0 : index
    %209 = vector.load %arg9[%c8, %c0_89] : memref<16x64xf32, #tpu.memory_space<vmem>>, vector<8x64xf32>
    tpu.vector_store %arg9[%c8, %c0_89], %208 {strides = array<i32>} : memref<16x64xf32, #tpu.memory_space<vmem>>, vector<8x64xf32>,
    return
  }
  func.func @transform_0(%arg0: i32) -> (i32, i32) {
    %c0_i32 = arith.constant 0 : i32
    %c0_i32_0 = arith.constant 0 : i32
    return %arg0, %c0_i32 : i32, i32
  }
  func.func @transform_1(%arg0: i32) -> (i32, i32) {
    %c0_i32 = arith.constant 0 : i32
    %c0_i32_0 = arith.constant 0 : i32
    %c0_i32_1 = arith.constant 0 : i32
    return %c0_i32, %c0_i32_0 : i32, i32
  }
  func.func @transform_2(%arg0: i32) -> (i32, i32) {
    %c0_i32 = arith.constant 0 : i32
    %c0_i32_0 = arith.constant 0 : i32
    %c0_i32_1 = arith.constant 0 : i32
    return %c0_i32, %c0_i32_0 : i32, i32
  }
  func.func @transform_3(%arg0: i32) -> (i32, i32) {
    %c0_i32 = arith.constant 0 : i32
    %c0_i32_0 = arith.constant 0 : i32
    %c0_i32_1 = arith.constant 0 : i32
    return %c0_i32, %c0_i32_0 : i32, i32
  }
  func.func @transform_4(%arg0: i32) -> (i32, i32) {
    %c0_i32 = arith.constant 0 : i32
    %c0_i32_0 = arith.constant 0 : i32
    %c0_i32_1 = arith.constant 0 : i32
    return %c0_i32, %c0_i32_0 : i32, i32
  }
  func.func @transform_5(%arg0: i32) -> (i32, i32, i32) {
    %c0_i32 = arith.constant 0 : i32
    %c0_i32_0 = arith.constant 0 : i32
    %c0_i32_1 = arith.constant 0 : i32
    %c0_i32_2 = arith.constant 0 : i32
    return %c0_i32, %c0_i32_0, %c0_i32_1 : i32, i32, i32
  }
  func.func @transform_6(%arg0: i32) -> (i32, i32) {
    %c0_i32 = arith.constant 0 : i32
    %c0_i32_0 = arith.constant 0 : i32
    %c0_i32_1 = arith.constant 0 : i32
    return %c0_i32, %c0_i32_0 : i32, i32
  }
  func.func @transform_7(%arg0: i32) -> (i32, i32) {
    %c0_i32 = arith.constant 0 : i32
    %c0_i32_0 = arith.constant 0 : i32
    %c0_i32_1 = arith.constant 0 : i32
    return %c0_i32, %c0_i32_0 : i32, i32
  }
  func.func @transform_8(%arg0: i32) -> (i32, i32) {
    %c0_i32 = arith.constant 0 : i32
    %c0_i32_0 = arith.constant 0 : i32
    return %arg0, %c0_i32 : i32, i32
  }
}

module attributes {stable_mosaic.version = 11 : i64} {
  func.func @_mlp_kernel(%arg0: i32, %arg1: memref<16x64xf32, #tpu.memory_space<vmem>>, %arg2: memref<1x64xf32, #tpu.memory_space<vmem>>, %arg3: memref<1x64xf32, #tpu.memory_space<vmem>>, %arg4: memref<64x128xf32, #tpu.memory_space<vmem>>, %arg5: memref<1x128xf32, #tpu.memory_space<vmem>>, %arg6: memref<128x64xf32, #tpu.memory_space<vmem>>, %arg7: memref<1x64xf32, #tpu.memory_space<vmem>>, %arg8: memref<16x64xf32, #tpu.memory_space<vmem>>) attributes {dimension_semantics = [#tpu.dimension_semantics<parallel>], iteration_bounds = array<i64: 2>, scalar_prefetch = 0 : i64, scratch_operands = 0 : i64, tpu.core_type = #tpu.core_type<tc>, window_params = [{transform_indices = @transform_0, window_bounds = array<i64: 16, 64>}, {pipeline_mode = #tpu.pipeline_mode<synchronous>, transform_indices = @transform_1, window_bounds = array<i64: 1, 64>}, {pipeline_mode = #tpu.pipeline_mode<synchronous>, transform_indices = @transform_2, window_bounds = array<i64: 1, 64>}, {pipeline_mode = #tpu.pipeline_mode<synchronous>, transform_indices = @transform_3, window_bounds = array<i64: 64, 128>}, {pipeline_mode = #tpu.pipeline_mode<synchronous>, transform_indices = @transform_4, window_bounds = array<i64: 1, 128>}, {pipeline_mode = #tpu.pipeline_mode<synchronous>, transform_indices = @transform_5, window_bounds = array<i64: 128, 64>}, {pipeline_mode = #tpu.pipeline_mode<synchronous>, transform_indices = @transform_6, window_bounds = array<i64: 1, 64>}, {transform_indices = @transform_7, window_bounds = array<i64: 16, 64>}]} {
    %c0 = arith.constant 0 : index
    %c0_0 = arith.constant 0 : index
    %0 = vector.load %arg1[%c0, %c0_0] : memref<16x64xf32, #tpu.memory_space<vmem>>, vector<16x64xf32>
    %c0_1 = arith.constant 0 : index
    %c0_2 = arith.constant 0 : index
    %1 = vector.load %arg2[%c0_1, %c0_2] : memref<1x64xf32, #tpu.memory_space<vmem>>, vector<1x64xf32>
    %c0_3 = arith.constant 0 : index
    %c0_4 = arith.constant 0 : index
    %2 = vector.load %arg3[%c0_3, %c0_4] : memref<1x64xf32, #tpu.memory_space<vmem>>, vector<1x64xf32>
    %cst = arith.constant dense<0.000000e+00> : vector<16xf32>
    %3 = vector.multi_reduction <add>, %0, %cst [1] : vector<16x64xf32> to vector<16xf32>
    %4 = vector.shape_cast %3 : vector<16xf32> to vector<16x1xf32>
    %cst_5 = arith.constant 6.400000e+01 : f32
    %5 = vector.broadcast %cst_5 : f32 to vector<16x1xf32>
    %6 = arith.divf %4, %5 : vector<16x1xf32>
    %7 = vector.broadcast %6 : vector<16x1xf32> to vector<16x64xf32>
    %8 = arith.subf %0, %7 : vector<16x64xf32>
    %9 = arith.mulf %8, %8 : vector<16x64xf32>
    %cst_6 = arith.constant dense<0.000000e+00> : vector<16xf32>
    %10 = vector.multi_reduction <add>, %9, %cst_6 [1] : vector<16x64xf32> to vector<16xf32>
    %11 = vector.shape_cast %10 : vector<16xf32> to vector<16x1xf32>
    %cst_7 = arith.constant 6.400000e+01 : f32
    %12 = vector.broadcast %cst_7 : f32 to vector<16x1xf32>
    %13 = arith.divf %11, %12 : vector<16x1xf32>
    %cst_8 = arith.constant 9.99999974E-6 : f32
    %14 = vector.broadcast %cst_8 : f32 to vector<16x1xf32>
    %15 = arith.addf %13, %14 : vector<16x1xf32>
    %16 = math.rsqrt %15 : vector<16x1xf32>
    %17 = vector.broadcast %16 : vector<16x1xf32> to vector<16x64xf32>
    %18 = arith.mulf %8, %17 : vector<16x64xf32>
    %19 = vector.broadcast %1 : vector<1x64xf32> to vector<16x64xf32>
    %20 = arith.mulf %18, %19 : vector<16x64xf32>
    %21 = vector.broadcast %2 : vector<1x64xf32> to vector<16x64xf32>
    %22 = arith.addf %20, %21 : vector<16x64xf32>
    %c0_9 = arith.constant 0 : index
    %c0_10 = arith.constant 0 : index
    %23 = vector.load %arg4[%c0_9, %c0_10] : memref<64x128xf32, #tpu.memory_space<vmem>>, vector<64x128xf32>
    %cst_11 = arith.constant dense<0.000000e+00> : vector<16x128xf32>
    %24 = tpu.matmul %22, %23, %cst_11 {dimension_numbers = #tpu.dot_dimension_numbers<[1], [0], [0], [1], [0, 0, 1, 1], [], []>} : vector<16x64xf32>, vector<64x128xf32>, vector<16x128xf32> -> vector<16x128xf32>
    %c0_12 = arith.constant 0 : index
    %c0_13 = arith.constant 0 : index
    %25 = vector.load %arg5[%c0_12, %c0_13] : memref<1x128xf32, #tpu.memory_space<vmem>>, vector<1x128xf32>
    %26 = vector.broadcast %25 : vector<1x128xf32> to vector<16x128xf32>
    %27 = arith.addf %24, %26 : vector<16x128xf32>
    %cst_14 = arith.constant 5.000000e-01 : f32
    %28 = vector.broadcast %cst_14 : f32 to vector<16x128xf32>
    %29 = arith.mulf %28, %27 : vector<16x128xf32>
    %cst_15 = arith.constant 0.707106769 : f32
    %30 = vector.broadcast %cst_15 : f32 to vector<16x128xf32>
    %31 = arith.mulf %27, %30 : vector<16x128xf32>
    %32 = math.absf %31 : vector<16x128xf32>
    %cst_16 = arith.constant 0.327591091 : f32
    %33 = vector.broadcast %cst_16 : f32 to vector<16x128xf32>
    %34 = arith.mulf %33, %32 : vector<16x128xf32>
    %cst_17 = arith.constant 1.000000e+00 : f32
    %35 = vector.broadcast %cst_17 : f32 to vector<16x128xf32>
    %36 = arith.addf %35, %34 : vector<16x128xf32>
    %cst_18 = arith.constant 1.000000e+00 : f32
    %37 = vector.broadcast %cst_18 : f32 to vector<16x128xf32>
    %38 = arith.divf %37, %36 : vector<16x128xf32>
    %cst_19 = arith.constant 1.06140542 : f32
    %39 = vector.broadcast %cst_19 : f32 to vector<16x128xf32>
    %40 = arith.mulf %39, %38 : vector<16x128xf32>
    %cst_20 = arith.constant -1.45315206 : f32
    %41 = vector.broadcast %cst_20 : f32 to vector<16x128xf32>
    %42 = arith.addf %40, %41 : vector<16x128xf32>
    %43 = arith.mulf %42, %38 : vector<16x128xf32>
    %cst_21 = arith.constant 1.42141378 : f32
    %44 = vector.broadcast %cst_21 : f32 to vector<16x128xf32>
    %45 = arith.addf %43, %44 : vector<16x128xf32>
    %46 = arith.mulf %45, %38 : vector<16x128xf32>
    %cst_22 = arith.constant -0.284496725 : f32
    %47 = vector.broadcast %cst_22 : f32 to vector<16x128xf32>
    %48 = arith.addf %46, %47 : vector<16x128xf32>
    %49 = arith.mulf %48, %38 : vector<16x128xf32>
    %cst_23 = arith.constant 0.254829586 : f32
    %50 = vector.broadcast %cst_23 : f32 to vector<16x128xf32>
    %51 = arith.addf %49, %50 : vector<16x128xf32>
    %52 = arith.mulf %51, %38 : vector<16x128xf32>
    %cst_24 = arith.constant 0.000000e+00 : f32
    %53 = vector.broadcast %cst_24 : f32 to vector<16x128xf32>
    %54 = arith.subf %53, %32 : vector<16x128xf32>
    %55 = arith.mulf %54, %32 : vector<16x128xf32>
    %56 = math.exp %55 : vector<16x128xf32>
    %57 = arith.mulf %52, %56 : vector<16x128xf32>
    %cst_25 = arith.constant 1.000000e+00 : f32
    %58 = vector.broadcast %cst_25 : f32 to vector<16x128xf32>
    %59 = arith.subf %58, %57 : vector<16x128xf32>
    %cst_26 = arith.constant 0.000000e+00 : f32
    %60 = vector.broadcast %cst_26 : f32 to vector<16x128xf32>
    %61 = arith.cmpf olt, %31, %60 : vector<16x128xf32>
    %cst_27 = arith.constant 0.000000e+00 : f32
    %62 = vector.broadcast %cst_27 : f32 to vector<16x128xf32>
    %63 = arith.subf %62, %59 : vector<16x128xf32>
    %64 = arith.select %61, %63, %59 : vector<16x128xi1>, vector<16x128xf32>
    %cst_28 = arith.constant 1.000000e+00 : f32
    %65 = vector.broadcast %cst_28 : f32 to vector<16x128xf32>
    %66 = arith.addf %65, %64 : vector<16x128xf32>
    %67 = arith.mulf %29, %66 : vector<16x128xf32>
    %c0_29 = arith.constant 0 : index
    %c0_30 = arith.constant 0 : index
    %68 = vector.load %arg6[%c0_29, %c0_30] : memref<128x64xf32, #tpu.memory_space<vmem>>, vector<128x64xf32>
    %cst_31 = arith.constant dense<0.000000e+00> : vector<16x64xf32>
    %69 = tpu.matmul %67, %68, %cst_31 {dimension_numbers = #tpu.dot_dimension_numbers<[1], [0], [0], [1], [0, 0, 1, 1], [], []>} : vector<16x128xf32>, vector<128x64xf32>, vector<16x64xf32> -> vector<16x64xf32>
    %c0_32 = arith.constant 0 : index
    %c0_33 = arith.constant 0 : index
    %70 = vector.load %arg7[%c0_32, %c0_33] : memref<1x64xf32, #tpu.memory_space<vmem>>, vector<1x64xf32>
    %71 = vector.broadcast %70 : vector<1x64xf32> to vector<16x64xf32>
    %72 = arith.addf %69, %71 : vector<16x64xf32>
    %73 = arith.addf %0, %72 : vector<16x64xf32>
    %c0_34 = arith.constant 0 : index
    %c0_35 = arith.constant 0 : index
    %74 = vector.load %arg8[%c0_34, %c0_35] : memref<16x64xf32, #tpu.memory_space<vmem>>, vector<16x64xf32>
    tpu.vector_store %arg8[%c0_34, %c0_35], %73 {strides = array<i32>} : memref<16x64xf32, #tpu.memory_space<vmem>>, vector<16x64xf32>,
    return
  }
  func.func @transform_0(%arg0: i32) -> (i32, i32) {
    %c0_i32 = arith.constant 0 : i32
    %c0_i32_0 = arith.constant 0 : i32
    return %arg0, %c0_i32 : i32, i32
  }
  func.func @transform_1(%arg0: i32) -> (i32, i32) {
    %c0_i32 = arith.constant 0 : i32
    %c0_i32_0 = arith.constant 0 : i32
    %c0_i32_1 = arith.constant 0 : i32
    return %c0_i32, %c0_i32_0 : i32, i32
  }
  func.func @transform_2(%arg0: i32) -> (i32, i32) {
    %c0_i32 = arith.constant 0 : i32
    %c0_i32_0 = arith.constant 0 : i32
    %c0_i32_1 = arith.constant 0 : i32
    return %c0_i32, %c0_i32_0 : i32, i32
  }
  func.func @transform_3(%arg0: i32) -> (i32, i32) {
    %c0_i32 = arith.constant 0 : i32
    %c0_i32_0 = arith.constant 0 : i32
    %c0_i32_1 = arith.constant 0 : i32
    return %c0_i32, %c0_i32_0 : i32, i32
  }
  func.func @transform_4(%arg0: i32) -> (i32, i32) {
    %c0_i32 = arith.constant 0 : i32
    %c0_i32_0 = arith.constant 0 : i32
    %c0_i32_1 = arith.constant 0 : i32
    return %c0_i32, %c0_i32_0 : i32, i32
  }
  func.func @transform_5(%arg0: i32) -> (i32, i32) {
    %c0_i32 = arith.constant 0 : i32
    %c0_i32_0 = arith.constant 0 : i32
    %c0_i32_1 = arith.constant 0 : i32
    return %c0_i32, %c0_i32_0 : i32, i32
  }
  func.func @transform_6(%arg0: i32) -> (i32, i32) {
    %c0_i32 = arith.constant 0 : i32
    %c0_i32_0 = arith.constant 0 : i32
    %c0_i32_1 = arith.constant 0 : i32
    return %c0_i32, %c0_i32_0 : i32, i32
  }
  func.func @transform_7(%arg0: i32) -> (i32, i32) {
    %c0_i32 = arith.constant 0 : i32
    %c0_i32_0 = arith.constant 0 : i32
    return %arg0, %c0_i32 : i32, i32
  }
}

module attributes {stable_mosaic.version = 11 : i64} {
  func.func @kern(%arg0: i32, %arg1: memref<16x64xf32, #tpu.memory_space<vmem>>, %arg2: memref<1x64xf32, #tpu.memory_space<vmem>>, %arg3: memref<1x64xf32, #tpu.memory_space<vmem>>, %arg4: memref<64x192xf32, #tpu.memory_space<vmem>>, %arg5: memref<1x192xf32, #tpu.memory_space<vmem>>, %arg6: memref<4x8x8xf32, #tpu.memory_space<vmem>>, %arg7: memref<64x64xf32, #tpu.memory_space<vmem>>, %arg8: memref<1x64xf32, #tpu.memory_space<vmem>>, %arg9: memref<2x8x8xf32, #tpu.memory_space<vmem>>, %arg10: memref<16x64xf32, #tpu.memory_space<vmem>>) attributes {dimension_semantics = [#tpu.dimension_semantics<parallel>], iteration_bounds = array<i64: 2>, scalar_prefetch = 0 : i64, scratch_operands = 0 : i64, tpu.core_type = #tpu.core_type<tc>, window_params = [{transform_indices = @transform_0, window_bounds = array<i64: 16, 64>}, {pipeline_mode = #tpu.pipeline_mode<synchronous>, transform_indices = @transform_1, window_bounds = array<i64: 1, 64>}, {pipeline_mode = #tpu.pipeline_mode<synchronous>, transform_indices = @transform_2, window_bounds = array<i64: 1, 64>}, {pipeline_mode = #tpu.pipeline_mode<synchronous>, transform_indices = @transform_3, window_bounds = array<i64: 64, 192>}, {pipeline_mode = #tpu.pipeline_mode<synchronous>, transform_indices = @transform_4, window_bounds = array<i64: 1, 192>}, {pipeline_mode = #tpu.pipeline_mode<synchronous>, transform_indices = @transform_5, window_bounds = array<i64: 4, 8, 8>}, {pipeline_mode = #tpu.pipeline_mode<synchronous>, transform_indices = @transform_6, window_bounds = array<i64: 64, 64>}, {pipeline_mode = #tpu.pipeline_mode<synchronous>, transform_indices = @transform_7, window_bounds = array<i64: 1, 64>}, {transform_indices = @transform_8, window_bounds = array<i64: 2, 8, 8>}, {transform_indices = @transform_9, window_bounds = array<i64: 16, 64>}]} {
    %c0 = arith.constant 0 : index
    %c0_0 = arith.constant 0 : index
    %0 = vector.load %arg1[%c0, %c0_0] : memref<16x64xf32, #tpu.memory_space<vmem>>, vector<16x64xf32>
    %c0_1 = arith.constant 0 : index
    %c0_2 = arith.constant 0 : index
    %1 = vector.load %arg2[%c0_1, %c0_2] : memref<1x64xf32, #tpu.memory_space<vmem>>, vector<1x64xf32>
    %c0_3 = arith.constant 0 : index
    %c0_4 = arith.constant 0 : index
    %2 = vector.load %arg3[%c0_3, %c0_4] : memref<1x64xf32, #tpu.memory_space<vmem>>, vector<1x64xf32>
    %cst = arith.constant dense<0.000000e+00> : vector<16xf32>
    %3 = vector.multi_reduction <add>, %0, %cst [1] : vector<16x64xf32> to vector<16xf32>
    %4 = vector.shape_cast %3 : vector<16xf32> to vector<16x1xf32>
    %cst_5 = arith.constant 6.400000e+01 : f32
    %5 = vector.broadcast %cst_5 : f32 to vector<16x1xf32>
    %6 = arith.divf %4, %5 : vector<16x1xf32>
    %7 = vector.broadcast %6 : vector<16x1xf32> to vector<16x64xf32>
    %8 = arith.subf %0, %7 : vector<16x64xf32>
    %9 = arith.mulf %8, %8 : vector<16x64xf32>
    %cst_6 = arith.constant dense<0.000000e+00> : vector<16xf32>
    %10 = vector.multi_reduction <add>, %9, %cst_6 [1] : vector<16x64xf32> to vector<16xf32>
    %11 = vector.shape_cast %10 : vector<16xf32> to vector<16x1xf32>
    %cst_7 = arith.constant 6.400000e+01 : f32
    %12 = vector.broadcast %cst_7 : f32 to vector<16x1xf32>
    %13 = arith.divf %11, %12 : vector<16x1xf32>
    %cst_8 = arith.constant 9.99999974E-6 : f32
    %14 = vector.broadcast %cst_8 : f32 to vector<16x1xf32>
    %15 = arith.addf %13, %14 : vector<16x1xf32>
    %16 = math.rsqrt %15 : vector<16x1xf32>
    %17 = vector.broadcast %16 : vector<16x1xf32> to vector<16x64xf32>
    %18 = arith.mulf %8, %17 : vector<16x64xf32>
    %19 = vector.broadcast %1 : vector<1x64xf32> to vector<16x64xf32>
    %20 = arith.mulf %18, %19 : vector<16x64xf32>
    %21 = vector.broadcast %2 : vector<1x64xf32> to vector<16x64xf32>
    %22 = arith.addf %20, %21 : vector<16x64xf32>
    %c0_9 = arith.constant 0 : index
    %c0_10 = arith.constant 0 : index
    %23 = vector.load %arg4[%c0_9, %c0_10] : memref<64x192xf32, #tpu.memory_space<vmem>>, vector<64x192xf32>
    %cst_11 = arith.constant dense<0.000000e+00> : vector<16x192xf32>
    %24 = tpu.matmul %22, %23, %cst_11 {dimension_numbers = #tpu.dot_dimension_numbers<[1], [0], [0], [1], [0, 0, 1, 1], [], []>} : vector<16x64xf32>, vector<64x192xf32>, vector<16x192xf32> -> vector<16x192xf32>
    %c0_12 = arith.constant 0 : index
    %c0_13 = arith.constant 0 : index
    %25 = vector.load %arg5[%c0_12, %c0_13] : memref<1x192xf32, #tpu.memory_space<vmem>>, vector<1x192xf32>
    %26 = vector.broadcast %25 : vector<1x192xf32> to vector<16x192xf32>
    %27 = arith.addf %24, %26 : vector<16x192xf32>
    %c0_14 = arith.constant 0 : index
    %c0_15 = arith.constant 0 : index
    %28 = vector.load %arg7[%c0_14, %c0_15] : memref<64x64xf32, #tpu.memory_space<vmem>>, vector<64x64xf32>
    %c0_16 = arith.constant 0 : index
    %c0_17 = arith.constant 0 : index
    %29 = vector.load %arg8[%c0_16, %c0_17] : memref<1x64xf32, #tpu.memory_space<vmem>>, vector<1x64xf32>
    %30 = vector.extract_strided_slice %27 {offsets = [0, 0], sizes = [8, 16], strides = [1, 1]} : vector<16x192xf32> to vector<8x16xf32>
    %cst_18 = arith.constant 2.500000e-01 : f32
    %31 = vector.broadcast %cst_18 : f32 to vector<8x16xf32>
    %32 = arith.mulf %30, %31 : vector<8x16xf32>
    %33 = vector.extract_strided_slice %27 {offsets = [0, 64], sizes = [8, 16], strides = [1, 1]} : vector<16x192xf32> to vector<8x16xf32>
    %34 = vector.extract_strided_slice %27 {offsets = [0, 128], sizes = [8, 16], strides = [1, 1]} : vector<16x192xf32> to vector<8x16xf32>
    %cst_19 = arith.constant dense<0.000000e+00> : vector<8x8xf32>
    %35 = tpu.matmul %32, %33, %cst_19 {dimension_numbers = #tpu.dot_dimension_numbers<[1], [1], [0], [0], [0, 0, 1, 0], [], []>} : vector<8x16xf32>, vector<8x16xf32>, vector<8x8xf32> -> vector<8x8xf32>
    %c0_20 = arith.constant 0 : index
    %c0_21 = arith.constant 0 : index
    %c0_22 = arith.constant 0 : index
    %36 = vector.load %arg6[%c0_20, %c0_21, %c0_22] : memref<4x8x8xf32, #tpu.memory_space<vmem>>, vector<1x8x8xf32>
    %37 = vector.shape_cast %36 : vector<1x8x8xf32> to vector<8x8xf32>
    %38 = arith.addf %35, %37 : vector<8x8xf32>
    %c0_23 = arith.constant 0 : index
    %c0_24 = arith.constant 0 : index
    %c0_25 = arith.constant 0 : index
    %39 = vector.load %arg9[%c0_23, %c0_24, %c0_25] : memref<2x8x8xf32, #tpu.memory_space<vmem>>, vector<1x8x8xf32>
    %40 = vector.shape_cast %39 : vector<1x8x8xf32> to vector<8x8xf32>
    %41 = arith.addf %38, %40 : vector<8x8xf32>
    %cst_26 = arith.constant dense<0xFF800000> : vector<8xf32>
    %42 = vector.multi_reduction <maximumf>, %41, %cst_26 [1] : vector<8x8xf32> to vector<8xf32>
    %43 = vector.shape_cast %42 : vector<8xf32> to vector<8x1xf32>
    %44 = vector.broadcast %43 : vector<8x1xf32> to vector<8x8xf32>
    %45 = arith.subf %41, %44 : vector<8x8xf32>
    %46 = math.exp %45 : vector<8x8xf32>
    %cst_27 = arith.constant dense<0.000000e+00> : vector<8xf32>
    %47 = vector.multi_reduction <add>, %46, %cst_27 [1] : vector<8x8xf32> to vector<8xf32>
    %48 = vector.shape_cast %47 : vector<8xf32> to vector<8x1xf32>
    %49 = vector.broadcast %48 : vector<8x1xf32> to vector<8x8xf32>
    %50 = arith.divf %46, %49 : vector<8x8xf32>
    %cst_28 = arith.constant dense<0.000000e+00> : vector<8x16xf32>
    %51 = tpu.matmul %50, %34, %cst_28 {dimension_numbers = #tpu.dot_dimension_numbers<[1], [0], [0], [1], [0, 0, 1, 1], [], []>} : vector<8x8xf32>, vector<8x16xf32>, vector<8x16xf32> -> vector<8x16xf32>
    %52 = vector.extract_strided_slice %28 {offsets = [0, 0], sizes = [16, 64], strides = [1, 1]} : vector<64x64xf32> to vector<16x64xf32>
    %cst_29 = arith.constant dense<0.000000e+00> : vector<8x64xf32>
    %53 = tpu.matmul %51, %52, %cst_29 {dimension_numbers = #tpu.dot_dimension_numbers<[1], [0], [0], [1], [0, 0, 1, 1], [], []>} : vector<8x16xf32>, vector<16x64xf32>, vector<8x64xf32> -> vector<8x64xf32>
    %54 = vector.extract_strided_slice %27 {offsets = [0, 16], sizes = [8, 16], strides = [1, 1]} : vector<16x192xf32> to vector<8x16xf32>
    %cst_30 = arith.constant 2.500000e-01 : f32
    %55 = vector.broadcast %cst_30 : f32 to vector<8x16xf32>
    %56 = arith.mulf %54, %55 : vector<8x16xf32>
    %57 = vector.extract_strided_slice %27 {offsets = [0, 80], sizes = [8, 16], strides = [1, 1]} : vector<16x192xf32> to vector<8x16xf32>
    %58 = vector.extract_strided_slice %27 {offsets = [0, 144], sizes = [8, 16], strides = [1, 1]} : vector<16x192xf32> to vector<8x16xf32>
    %cst_31 = arith.constant dense<0.000000e+00> : vector<8x8xf32>
    %59 = tpu.matmul %56, %57, %cst_31 {dimension_numbers = #tpu.dot_dimension_numbers<[1], [1], [0], [0], [0, 0, 1, 0], [], []>} : vector<8x16xf32>, vector<8x16xf32>, vector<8x8xf32> -> vector<8x8xf32>
    %c1 = arith.constant 1 : index
    %c0_32 = arith.constant 0 : index
    %c0_33 = arith.constant 0 : index
    %60 = vector.load %arg6[%c1, %c0_32, %c0_33] : memref<4x8x8xf32, #tpu.memory_space<vmem>>, vector<1x8x8xf32>
    %61 = vector.shape_cast %60 : vector<1x8x8xf32> to vector<8x8xf32>
    %62 = arith.addf %59, %61 : vector<8x8xf32>
    %c0_34 = arith.constant 0 : index
    %c0_35 = arith.constant 0 : index
    %c0_36 = arith.constant 0 : index
    %63 = vector.load %arg9[%c0_34, %c0_35, %c0_36] : memref<2x8x8xf32, #tpu.memory_space<vmem>>, vector<1x8x8xf32>
    %64 = vector.shape_cast %63 : vector<1x8x8xf32> to vector<8x8xf32>
    %65 = arith.addf %62, %64 : vector<8x8xf32>
    %cst_37 = arith.constant dense<0xFF800000> : vector<8xf32>
    %66 = vector.multi_reduction <maximumf>, %65, %cst_37 [1] : vector<8x8xf32> to vector<8xf32>
    %67 = vector.shape_cast %66 : vector<8xf32> to vector<8x1xf32>
    %68 = vector.broadcast %67 : vector<8x1xf32> to vector<8x8xf32>
    %69 = arith.subf %65, %68 : vector<8x8xf32>
    %70 = math.exp %69 : vector<8x8xf32>
    %cst_38 = arith.constant dense<0.000000e+00> : vector<8xf32>
    %71 = vector.multi_reduction <add>, %70, %cst_38 [1] : vector<8x8xf32> to vector<8xf32>
    %72 = vector.shape_cast %71 : vector<8xf32> to vector<8x1xf32>
    %73 = vector.broadcast %72 : vector<8x1xf32> to vector<8x8xf32>
    %74 = arith.divf %70, %73 : vector<8x8xf32>
    %cst_39 = arith.constant dense<0.000000e+00> : vector<8x16xf32>
    %75 = tpu.matmul %74, %58, %cst_39 {dimension_numbers = #tpu.dot_dimension_numbers<[1], [0], [0], [1], [0, 0, 1, 1], [], []>} : vector<8x8xf32>, vector<8x16xf32>, vector<8x16xf32> -> vector<8x16xf32>
    %76 = vector.extract_strided_slice %28 {offsets = [16, 0], sizes = [16, 64], strides = [1, 1]} : vector<64x64xf32> to vector<16x64xf32>
    %cst_40 = arith.constant dense<0.000000e+00> : vector<8x64xf32>
    %77 = tpu.matmul %75, %76, %cst_40 {dimension_numbers = #tpu.dot_dimension_numbers<[1], [0], [0], [1], [0, 0, 1, 1], [], []>} : vector<8x16xf32>, vector<16x64xf32>, vector<8x64xf32> -> vector<8x64xf32>
    %78 = arith.addf %53, %77 : vector<8x64xf32>
    %79 = vector.extract_strided_slice %27 {offsets = [0, 32], sizes = [8, 16], strides = [1, 1]} : vector<16x192xf32> to vector<8x16xf32>
    %cst_41 = arith.constant 2.500000e-01 : f32
    %80 = vector.broadcast %cst_41 : f32 to vector<8x16xf32>
    %81 = arith.mulf %79, %80 : vector<8x16xf32>
    %82 = vector.extract_strided_slice %27 {offsets = [0, 96], sizes = [8, 16], strides = [1, 1]} : vector<16x192xf32> to vector<8x16xf32>
    %83 = vector.extract_strided_slice %27 {offsets = [0, 160], sizes = [8, 16], strides = [1, 1]} : vector<16x192xf32> to vector<8x16xf32>
    %cst_42 = arith.constant dense<0.000000e+00> : vector<8x8xf32>
    %84 = tpu.matmul %81, %82, %cst_42 {dimension_numbers = #tpu.dot_dimension_numbers<[1], [1], [0], [0], [0, 0, 1, 0], [], []>} : vector<8x16xf32>, vector<8x16xf32>, vector<8x8xf32> -> vector<8x8xf32>
    %c2 = arith.constant 2 : index
    %c0_43 = arith.constant 0 : index
    %c0_44 = arith.constant 0 : index
    %85 = vector.load %arg6[%c2, %c0_43, %c0_44] : memref<4x8x8xf32, #tpu.memory_space<vmem>>, vector<1x8x8xf32>
    %86 = vector.shape_cast %85 : vector<1x8x8xf32> to vector<8x8xf32>
    %87 = arith.addf %84, %86 : vector<8x8xf32>
    %c0_45 = arith.constant 0 : index
    %c0_46 = arith.constant 0 : index
    %c0_47 = arith.constant 0 : index
    %88 = vector.load %arg9[%c0_45, %c0_46, %c0_47] : memref<2x8x8xf32, #tpu.memory_space<vmem>>, vector<1x8x8xf32>
    %89 = vector.shape_cast %88 : vector<1x8x8xf32> to vector<8x8xf32>
    %90 = arith.addf %87, %89 : vector<8x8xf32>
    %cst_48 = arith.constant dense<0xFF800000> : vector<8xf32>
    %91 = vector.multi_reduction <maximumf>, %90, %cst_48 [1] : vector<8x8xf32> to vector<8xf32>
    %92 = vector.shape_cast %91 : vector<8xf32> to vector<8x1xf32>
    %93 = vector.broadcast %92 : vector<8x1xf32> to vector<8x8xf32>
    %94 = arith.subf %90, %93 : vector<8x8xf32>
    %95 = math.exp %94 : vector<8x8xf32>
    %cst_49 = arith.constant dense<0.000000e+00> : vector<8xf32>
    %96 = vector.multi_reduction <add>, %95, %cst_49 [1] : vector<8x8xf32> to vector<8xf32>
    %97 = vector.shape_cast %96 : vector<8xf32> to vector<8x1xf32>
    %98 = vector.broadcast %97 : vector<8x1xf32> to vector<8x8xf32>
    %99 = arith.divf %95, %98 : vector<8x8xf32>
    %cst_50 = arith.constant dense<0.000000e+00> : vector<8x16xf32>
    %100 = tpu.matmul %99, %83, %cst_50 {dimension_numbers = #tpu.dot_dimension_numbers<[1], [0], [0], [1], [0, 0, 1, 1], [], []>} : vector<8x8xf32>, vector<8x16xf32>, vector<8x16xf32> -> vector<8x16xf32>
    %101 = vector.extract_strided_slice %28 {offsets = [32, 0], sizes = [16, 64], strides = [1, 1]} : vector<64x64xf32> to vector<16x64xf32>
    %cst_51 = arith.constant dense<0.000000e+00> : vector<8x64xf32>
    %102 = tpu.matmul %100, %101, %cst_51 {dimension_numbers = #tpu.dot_dimension_numbers<[1], [0], [0], [1], [0, 0, 1, 1], [], []>} : vector<8x16xf32>, vector<16x64xf32>, vector<8x64xf32> -> vector<8x64xf32>
    %103 = arith.addf %78, %102 : vector<8x64xf32>
    %104 = vector.extract_strided_slice %27 {offsets = [0, 48], sizes = [8, 16], strides = [1, 1]} : vector<16x192xf32> to vector<8x16xf32>
    %cst_52 = arith.constant 2.500000e-01 : f32
    %105 = vector.broadcast %cst_52 : f32 to vector<8x16xf32>
    %106 = arith.mulf %104, %105 : vector<8x16xf32>
    %107 = vector.extract_strided_slice %27 {offsets = [0, 112], sizes = [8, 16], strides = [1, 1]} : vector<16x192xf32> to vector<8x16xf32>
    %108 = vector.extract_strided_slice %27 {offsets = [0, 176], sizes = [8, 16], strides = [1, 1]} : vector<16x192xf32> to vector<8x16xf32>
    %cst_53 = arith.constant dense<0.000000e+00> : vector<8x8xf32>
    %109 = tpu.matmul %106, %107, %cst_53 {dimension_numbers = #tpu.dot_dimension_numbers<[1], [1], [0], [0], [0, 0, 1, 0], [], []>} : vector<8x16xf32>, vector<8x16xf32>, vector<8x8xf32> -> vector<8x8xf32>
    %c3 = arith.constant 3 : index
    %c0_54 = arith.constant 0 : index
    %c0_55 = arith.constant 0 : index
    %110 = vector.load %arg6[%c3, %c0_54, %c0_55] : memref<4x8x8xf32, #tpu.memory_space<vmem>>, vector<1x8x8xf32>
    %111 = vector.shape_cast %110 : vector<1x8x8xf32> to vector<8x8xf32>
    %112 = arith.addf %109, %111 : vector<8x8xf32>
    %c0_56 = arith.constant 0 : index
    %c0_57 = arith.constant 0 : index
    %c0_58 = arith.constant 0 : index
    %113 = vector.load %arg9[%c0_56, %c0_57, %c0_58] : memref<2x8x8xf32, #tpu.memory_space<vmem>>, vector<1x8x8xf32>
    %114 = vector.shape_cast %113 : vector<1x8x8xf32> to vector<8x8xf32>
    %115 = arith.addf %112, %114 : vector<8x8xf32>
    %cst_59 = arith.constant dense<0xFF800000> : vector<8xf32>
    %116 = vector.multi_reduction <maximumf>, %115, %cst_59 [1] : vector<8x8xf32> to vector<8xf32>
    %117 = vector.shape_cast %116 : vector<8xf32> to vector<8x1xf32>
    %118 = vector.broadcast %117 : vector<8x1xf32> to vector<8x8xf32>
    %119 = arith.subf %115, %118 : vector<8x8xf32>
    %120 = math.exp %119 : vector<8x8xf32>
    %cst_60 = arith.constant dense<0.000000e+00> : vector<8xf32>
    %121 = vector.multi_reduction <add>, %120, %cst_60 [1] : vector<8x8xf32> to vector<8xf32>
    %122 = vector.shape_cast %121 : vector<8xf32> to vector<8x1xf32>
    %123 = vector.broadcast %122 : vector<8x1xf32> to vector<8x8xf32>
    %124 = arith.divf %120, %123 : vector<8x8xf32>
    %cst_61 = arith.constant dense<0.000000e+00> : vector<8x16xf32>
    %125 = tpu.matmul %124, %108, %cst_61 {dimension_numbers = #tpu.dot_dimension_numbers<[1], [0], [0], [1], [0, 0, 1, 1], [], []>} : vector<8x8xf32>, vector<8x16xf32>, vector<8x16xf32> -> vector<8x16xf32>
    %126 = vector.extract_strided_slice %28 {offsets = [48, 0], sizes = [16, 64], strides = [1, 1]} : vector<64x64xf32> to vector<16x64xf32>
    %cst_62 = arith.constant dense<0.000000e+00> : vector<8x64xf32>
    %127 = tpu.matmul %125, %126, %cst_62 {dimension_numbers = #tpu.dot_dimension_numbers<[1], [0], [0], [1], [0, 0, 1, 1], [], []>} : vector<8x16xf32>, vector<16x64xf32>, vector<8x64xf32> -> vector<8x64xf32>
    %128 = arith.addf %103, %127 : vector<8x64xf32>
    %129 = vector.broadcast %29 : vector<1x64xf32> to vector<8x64xf32>
    %130 = arith.addf %128, %129 : vector<8x64xf32>
    %c0_63 = arith.constant 0 : index
    %c0_64 = arith.constant 0 : index
    %131 = vector.load %arg10[%c0_63, %c0_64] : memref<16x64xf32, #tpu.memory_space<vmem>>, vector<8x64xf32>
    tpu.vector_store %arg10[%c0_63, %c0_64], %130 {strides = array<i32>} : memref<16x64xf32, #tpu.memory_space<vmem>>, vector<8x64xf32>,
    %132 = vector.extract_strided_slice %27 {offsets = [8, 0], sizes = [8, 16], strides = [1, 1]} : vector<16x192xf32> to vector<8x16xf32>
    %cst_65 = arith.constant 2.500000e-01 : f32
    %133 = vector.broadcast %cst_65 : f32 to vector<8x16xf32>
    %134 = arith.mulf %132, %133 : vector<8x16xf32>
    %135 = vector.extract_strided_slice %27 {offsets = [8, 64], sizes = [8, 16], strides = [1, 1]} : vector<16x192xf32> to vector<8x16xf32>
    %136 = vector.extract_strided_slice %27 {offsets = [8, 128], sizes = [8, 16], strides = [1, 1]} : vector<16x192xf32> to vector<8x16xf32>
    %cst_66 = arith.constant dense<0.000000e+00> : vector<8x8xf32>
    %137 = tpu.matmul %134, %135, %cst_66 {dimension_numbers = #tpu.dot_dimension_numbers<[1], [1], [0], [0], [0, 0, 1, 0], [], []>} : vector<8x16xf32>, vector<8x16xf32>, vector<8x8xf32> -> vector<8x8xf32>
    %c0_67 = arith.constant 0 : index
    %c0_68 = arith.constant 0 : index
    %c0_69 = arith.constant 0 : index
    %138 = vector.load %arg6[%c0_67, %c0_68, %c0_69] : memref<4x8x8xf32, #tpu.memory_space<vmem>>, vector<1x8x8xf32>
    %139 = vector.shape_cast %138 : vector<1x8x8xf32> to vector<8x8xf32>
    %140 = arith.addf %137, %139 : vector<8x8xf32>
    %c1_70 = arith.constant 1 : index
    %c0_71 = arith.constant 0 : index
    %c0_72 = arith.constant 0 : index
    %141 = vector.load %arg9[%c1_70, %c0_71, %c0_72] : memref<2x8x8xf32, #tpu.memory_space<vmem>>, vector<1x8x8xf32>
    %142 = vector.shape_cast %141 : vector<1x8x8xf32> to vector<8x8xf32>
    %143 = arith.addf %140, %142 : vector<8x8xf32>
    %cst_73 = arith.constant dense<0xFF800000> : vector<8xf32>
    %144 = vector.multi_reduction <maximumf>, %143, %cst_73 [1] : vector<8x8xf32> to vector<8xf32>
    %145 = vector.shape_cast %144 : vector<8xf32> to vector<8x1xf32>
    %146 = vector.broadcast %145 : vector<8x1xf32> to vector<8x8xf32>
    %147 = arith.subf %143, %146 : vector<8x8xf32>
    %148 = math.exp %147 : vector<8x8xf32>
    %cst_74 = arith.constant dense<0.000000e+00> : vector<8xf32>
    %149 = vector.multi_reduction <add>, %148, %cst_74 [1] : vector<8x8xf32> to vector<8xf32>
    %150 = vector.shape_cast %149 : vector<8xf32> to vector<8x1xf32>
    %151 = vector.broadcast %150 : vector<8x1xf32> to vector<8x8xf32>
    %152 = arith.divf %148, %151 : vector<8x8xf32>
    %cst_75 = arith.constant dense<0.000000e+00> : vector<8x16xf32>
    %153 = tpu.matmul %152, %136, %cst_75 {dimension_numbers = #tpu.dot_dimension_numbers<[1], [0], [0], [1], [0, 0, 1, 1], [], []>} : vector<8x8xf32>, vector<8x16xf32>, vector<8x16xf32> -> vector<8x16xf32>
    %154 = vector.extract_strided_slice %28 {offsets = [0, 0], sizes = [16, 64], strides = [1, 1]} : vector<64x64xf32> to vector<16x64xf32>
    %cst_76 = arith.constant dense<0.000000e+00> : vector<8x64xf32>
    %155 = tpu.matmul %153, %154, %cst_76 {dimension_numbers = #tpu.dot_dimension_numbers<[1], [0], [0], [1], [0, 0, 1, 1], [], []>} : vector<8x16xf32>, vector<16x64xf32>, vector<8x64xf32> -> vector<8x64xf32>
    %156 = vector.extract_strided_slice %27 {offsets = [8, 16], sizes = [8, 16], strides = [1, 1]} : vector<16x192xf32> to vector<8x16xf32>
    %cst_77 = arith.constant 2.500000e-01 : f32
    %157 = vector.broadcast %cst_77 : f32 to vector<8x16xf32>
    %158 = arith.mulf %156, %157 : vector<8x16xf32>
    %159 = vector.extract_strided_slice %27 {offsets = [8, 80], sizes = [8, 16], strides = [1, 1]} : vector<16x192xf32> to vector<8x16xf32>
    %160 = vector.extract_strided_slice %27 {offsets = [8, 144], sizes = [8, 16], strides = [1, 1]} : vector<16x192xf32> to vector<8x16xf32>
    %cst_78 = arith.constant dense<0.000000e+00> : vector<8x8xf32>
    %161 = tpu.matmul %158, %159, %cst_78 {dimension_numbers = #tpu.dot_dimension_numbers<[1], [1], [0], [0], [0, 0, 1, 0], [], []>} : vector<8x16xf32>, vector<8x16xf32>, vector<8x8xf32> -> vector<8x8xf32>
    %c1_79 = arith.constant 1 : index
    %c0_80 = arith.constant 0 : index
    %c0_81 = arith.constant 0 : index
    %162 = vector.load %arg6[%c1_79, %c0_80, %c0_81] : memref<4x8x8xf32, #tpu.memory_space<vmem>>, vector<1x8x8xf32>
    %163 = vector.shape_cast %162 : vector<1x8x8xf32> to vector<8x8xf32>
    %164 = arith.addf %161, %163 : vector<8x8xf32>
    %c1_82 = arith.constant 1 : index
    %c0_83 = arith.constant 0 : index
    %c0_84 = arith.constant 0 : index
    %165 = vector.load %arg9[%c1_82, %c0_83, %c0_84] : memref<2x8x8xf32, #tpu.memory_space<vmem>>, vector<1x8x8xf32>
    %166 = vector.shape_cast %165 : vector<1x8x8xf32> to vector<8x8xf32>
    %167 = arith.addf %164, %166 : vector<8x8xf32>
    %cst_85 = arith.constant dense<0xFF800000> : vector<8xf32>
    %168 = vector.multi_reduction <maximumf>, %167, %cst_85 [1] : vector<8x8xf32> to vector<8xf32>
    %169 = vector.shape_cast %168 : vector<8xf32> to vector<8x1xf32>
    %170 = vector.broadcast %169 : vector<8x1xf32> to vector<8x8xf32>
    %171 = arith.subf %167, %170 : vector<8x8xf32>
    %172 = math.exp %171 : vector<8x8xf32>
    %cst_86 = arith.constant dense<0.000000e+00> : vector<8xf32>
    %173 = vector.multi_reduction <add>, %172, %cst_86 [1] : vector<8x8xf32> to vector<8xf32>
    %174 = vector.shape_cast %173 : vector<8xf32> to vector<8x1xf32>
    %175 = vector.broadcast %174 : vector<8x1xf32> to vector<8x8xf32>
    %176 = arith.divf %172, %175 : vector<8x8xf32>
    %cst_87 = arith.constant dense<0.000000e+00> : vector<8x16xf32>
    %177 = tpu.matmul %176, %160, %cst_87 {dimension_numbers = #tpu.dot_dimension_numbers<[1], [0], [0], [1], [0, 0, 1, 1], [], []>} : vector<8x8xf32>, vector<8x16xf32>, vector<8x16xf32> -> vector<8x16xf32>
    %178 = vector.extract_strided_slice %28 {offsets = [16, 0], sizes = [16, 64], strides = [1, 1]} : vector<64x64xf32> to vector<16x64xf32>
    %cst_88 = arith.constant dense<0.000000e+00> : vector<8x64xf32>
    %179 = tpu.matmul %177, %178, %cst_88 {dimension_numbers = #tpu.dot_dimension_numbers<[1], [0], [0], [1], [0, 0, 1, 1], [], []>} : vector<8x16xf32>, vector<16x64xf32>, vector<8x64xf32> -> vector<8x64xf32>
    %180 = arith.addf %155, %179 : vector<8x64xf32>
    %181 = vector.extract_strided_slice %27 {offsets = [8, 32], sizes = [8, 16], strides = [1, 1]} : vector<16x192xf32> to vector<8x16xf32>
    %cst_89 = arith.constant 2.500000e-01 : f32
    %182 = vector.broadcast %cst_89 : f32 to vector<8x16xf32>
    %183 = arith.mulf %181, %182 : vector<8x16xf32>
    %184 = vector.extract_strided_slice %27 {offsets = [8, 96], sizes = [8, 16], strides = [1, 1]} : vector<16x192xf32> to vector<8x16xf32>
    %185 = vector.extract_strided_slice %27 {offsets = [8, 160], sizes = [8, 16], strides = [1, 1]} : vector<16x192xf32> to vector<8x16xf32>
    %cst_90 = arith.constant dense<0.000000e+00> : vector<8x8xf32>
    %186 = tpu.matmul %183, %184, %cst_90 {dimension_numbers = #tpu.dot_dimension_numbers<[1], [1], [0], [0], [0, 0, 1, 0], [], []>} : vector<8x16xf32>, vector<8x16xf32>, vector<8x8xf32> -> vector<8x8xf32>
    %c2_91 = arith.constant 2 : index
    %c0_92 = arith.constant 0 : index
    %c0_93 = arith.constant 0 : index
    %187 = vector.load %arg6[%c2_91, %c0_92, %c0_93] : memref<4x8x8xf32, #tpu.memory_space<vmem>>, vector<1x8x8xf32>
    %188 = vector.shape_cast %187 : vector<1x8x8xf32> to vector<8x8xf32>
    %189 = arith.addf %186, %188 : vector<8x8xf32>
    %c1_94 = arith.constant 1 : index
    %c0_95 = arith.constant 0 : index
    %c0_96 = arith.constant 0 : index
    %190 = vector.load %arg9[%c1_94, %c0_95, %c0_96] : memref<2x8x8xf32, #tpu.memory_space<vmem>>, vector<1x8x8xf32>
    %191 = vector.shape_cast %190 : vector<1x8x8xf32> to vector<8x8xf32>
    %192 = arith.addf %189, %191 : vector<8x8xf32>
    %cst_97 = arith.constant dense<0xFF800000> : vector<8xf32>
    %193 = vector.multi_reduction <maximumf>, %192, %cst_97 [1] : vector<8x8xf32> to vector<8xf32>
    %194 = vector.shape_cast %193 : vector<8xf32> to vector<8x1xf32>
    %195 = vector.broadcast %194 : vector<8x1xf32> to vector<8x8xf32>
    %196 = arith.subf %192, %195 : vector<8x8xf32>
    %197 = math.exp %196 : vector<8x8xf32>
    %cst_98 = arith.constant dense<0.000000e+00> : vector<8xf32>
    %198 = vector.multi_reduction <add>, %197, %cst_98 [1] : vector<8x8xf32> to vector<8xf32>
    %199 = vector.shape_cast %198 : vector<8xf32> to vector<8x1xf32>
    %200 = vector.broadcast %199 : vector<8x1xf32> to vector<8x8xf32>
    %201 = arith.divf %197, %200 : vector<8x8xf32>
    %cst_99 = arith.constant dense<0.000000e+00> : vector<8x16xf32>
    %202 = tpu.matmul %201, %185, %cst_99 {dimension_numbers = #tpu.dot_dimension_numbers<[1], [0], [0], [1], [0, 0, 1, 1], [], []>} : vector<8x8xf32>, vector<8x16xf32>, vector<8x16xf32> -> vector<8x16xf32>
    %203 = vector.extract_strided_slice %28 {offsets = [32, 0], sizes = [16, 64], strides = [1, 1]} : vector<64x64xf32> to vector<16x64xf32>
    %cst_100 = arith.constant dense<0.000000e+00> : vector<8x64xf32>
    %204 = tpu.matmul %202, %203, %cst_100 {dimension_numbers = #tpu.dot_dimension_numbers<[1], [0], [0], [1], [0, 0, 1, 1], [], []>} : vector<8x16xf32>, vector<16x64xf32>, vector<8x64xf32> -> vector<8x64xf32>
    %205 = arith.addf %180, %204 : vector<8x64xf32>
    %206 = vector.extract_strided_slice %27 {offsets = [8, 48], sizes = [8, 16], strides = [1, 1]} : vector<16x192xf32> to vector<8x16xf32>
    %cst_101 = arith.constant 2.500000e-01 : f32
    %207 = vector.broadcast %cst_101 : f32 to vector<8x16xf32>
    %208 = arith.mulf %206, %207 : vector<8x16xf32>
    %209 = vector.extract_strided_slice %27 {offsets = [8, 112], sizes = [8, 16], strides = [1, 1]} : vector<16x192xf32> to vector<8x16xf32>
    %210 = vector.extract_strided_slice %27 {offsets = [8, 176], sizes = [8, 16], strides = [1, 1]} : vector<16x192xf32> to vector<8x16xf32>
    %cst_102 = arith.constant dense<0.000000e+00> : vector<8x8xf32>
    %211 = tpu.matmul %208, %209, %cst_102 {dimension_numbers = #tpu.dot_dimension_numbers<[1], [1], [0], [0], [0, 0, 1, 0], [], []>} : vector<8x16xf32>, vector<8x16xf32>, vector<8x8xf32> -> vector<8x8xf32>
    %c3_103 = arith.constant 3 : index
    %c0_104 = arith.constant 0 : index
    %c0_105 = arith.constant 0 : index
    %212 = vector.load %arg6[%c3_103, %c0_104, %c0_105] : memref<4x8x8xf32, #tpu.memory_space<vmem>>, vector<1x8x8xf32>
    %213 = vector.shape_cast %212 : vector<1x8x8xf32> to vector<8x8xf32>
    %214 = arith.addf %211, %213 : vector<8x8xf32>
    %c1_106 = arith.constant 1 : index
    %c0_107 = arith.constant 0 : index
    %c0_108 = arith.constant 0 : index
    %215 = vector.load %arg9[%c1_106, %c0_107, %c0_108] : memref<2x8x8xf32, #tpu.memory_space<vmem>>, vector<1x8x8xf32>
    %216 = vector.shape_cast %215 : vector<1x8x8xf32> to vector<8x8xf32>
    %217 = arith.addf %214, %216 : vector<8x8xf32>
    %cst_109 = arith.constant dense<0xFF800000> : vector<8xf32>
    %218 = vector.multi_reduction <maximumf>, %217, %cst_109 [1] : vector<8x8xf32> to vector<8xf32>
    %219 = vector.shape_cast %218 : vector<8xf32> to vector<8x1xf32>
    %220 = vector.broadcast %219 : vector<8x1xf32> to vector<8x8xf32>
    %221 = arith.subf %217, %220 : vector<8x8xf32>
    %222 = math.exp %221 : vector<8x8xf32>
    %cst_110 = arith.constant dense<0.000000e+00> : vector<8xf32>
    %223 = vector.multi_reduction <add>, %222, %cst_110 [1] : vector<8x8xf32> to vector<8xf32>
    %224 = vector.shape_cast %223 : vector<8xf32> to vector<8x1xf32>
    %225 = vector.broadcast %224 : vector<8x1xf32> to vector<8x8xf32>
    %226 = arith.divf %222, %225 : vector<8x8xf32>
    %cst_111 = arith.constant dense<0.000000e+00> : vector<8x16xf32>
    %227 = tpu.matmul %226, %210, %cst_111 {dimension_numbers = #tpu.dot_dimension_numbers<[1], [0], [0], [1], [0, 0, 1, 1], [], []>} : vector<8x8xf32>, vector<8x16xf32>, vector<8x16xf32> -> vector<8x16xf32>
    %228 = vector.extract_strided_slice %28 {offsets = [48, 0], sizes = [16, 64], strides = [1, 1]} : vector<64x64xf32> to vector<16x64xf32>
    %cst_112 = arith.constant dense<0.000000e+00> : vector<8x64xf32>
    %229 = tpu.matmul %227, %228, %cst_112 {dimension_numbers = #tpu.dot_dimension_numbers<[1], [0], [0], [1], [0, 0, 1, 1], [], []>} : vector<8x16xf32>, vector<16x64xf32>, vector<8x64xf32> -> vector<8x64xf32>
    %230 = arith.addf %205, %229 : vector<8x64xf32>
    %231 = vector.broadcast %29 : vector<1x64xf32> to vector<8x64xf32>
    %232 = arith.addf %230, %231 : vector<8x64xf32>
    %c8 = arith.constant 8 : index
    %c0_113 = arith.constant 0 : index
    %233 = vector.load %arg10[%c8, %c0_113] : memref<16x64xf32, #tpu.memory_space<vmem>>, vector<8x64xf32>
    tpu.vector_store %arg10[%c8, %c0_113], %232 {strides = array<i32>} : memref<16x64xf32, #tpu.memory_space<vmem>>, vector<8x64xf32>,
    return
  }
  func.func @transform_0(%arg0: i32) -> (i32, i32) {
    %c0_i32 = arith.constant 0 : i32
    %c0_i32_0 = arith.constant 0 : i32
    return %arg0, %c0_i32 : i32, i32
  }
  func.func @transform_1(%arg0: i32) -> (i32, i32) {
    %c0_i32 = arith.constant 0 : i32
    %c0_i32_0 = arith.constant 0 : i32
    %c0_i32_1 = arith.constant 0 : i32
    return %c0_i32, %c0_i32_0 : i32, i32
  }
  func.func @transform_2(%arg0: i32) -> (i32, i32) {
    %c0_i32 = arith.constant 0 : i32
    %c0_i32_0 = arith.constant 0 : i32
    %c0_i32_1 = arith.constant 0 : i32
    return %c0_i32, %c0_i32_0 : i32, i32
  }
  func.func @transform_3(%arg0: i32) -> (i32, i32) {
    %c0_i32 = arith.constant 0 : i32
    %c0_i32_0 = arith.constant 0 : i32
    %c0_i32_1 = arith.constant 0 : i32
    return %c0_i32, %c0_i32_0 : i32, i32
  }
  func.func @transform_4(%arg0: i32) -> (i32, i32) {
    %c0_i32 = arith.constant 0 : i32
    %c0_i32_0 = arith.constant 0 : i32
    %c0_i32_1 = arith.constant 0 : i32
    return %c0_i32, %c0_i32_0 : i32, i32
  }
  func.func @transform_5(%arg0: i32) -> (i32, i32, i32) {
    %c0_i32 = arith.constant 0 : i32
    %c0_i32_0 = arith.constant 0 : i32
    %c0_i32_1 = arith.constant 0 : i32
    %c0_i32_2 = arith.constant 0 : i32
    return %c0_i32, %c0_i32_0, %c0_i32_1 : i32, i32, i32
  }
  func.func @transform_6(%arg0: i32) -> (i32, i32) {
    %c0_i32 = arith.constant 0 : i32
    %c0_i32_0 = arith.constant 0 : i32
    %c0_i32_1 = arith.constant 0 : i32
    return %c0_i32, %c0_i32_0 : i32, i32
  }
  func.func @transform_7(%arg0: i32) -> (i32, i32) {
    %c0_i32 = arith.constant 0 : i32
    %c0_i32_0 = arith.constant 0 : i32
    %c0_i32_1 = arith.constant 0 : i32
    return %c0_i32, %c0_i32_0 : i32, i32
  }
  func.func @transform_8(%arg0: i32) -> (i32, i32, i32) {
    %c1_i32 = arith.constant 1 : i32
    %c0_i32 = arith.constant 0 : i32
    %0 = arith.cmpi eq, %c1_i32, %c0_i32 : i32
    %c1_i32_0 = arith.constant 1 : i32
    %1 = arith.select %0, %c1_i32_0, %c1_i32 : i32
    %2 = arith.remsi %arg0, %1 : i32
    %c0_i32_1 = arith.constant 0 : i32
    %3 = arith.cmpi ne, %2, %c0_i32_1 : i32
    %c0_i32_2 = arith.constant 0 : i32
    %4 = arith.cmpi slt, %2, %c0_i32_2 : i32
    %c0_i32_3 = arith.constant 0 : i32
    %5 = arith.cmpi slt, %1, %c0_i32_3 : i32
    %6 = arith.xori %4, %5 : i1
    %7 = arith.andi %6, %3 : i1
    %8 = arith.addi %2, %1 : i32
    %9 = arith.select %7, %8, %2 : i32
    %c0_i32_4 = arith.constant 0 : i32
    %c0_i32_5 = arith.constant 0 : i32
    %c0_i32_6 = arith.constant 0 : i32
    return %9, %c0_i32_4, %c0_i32_5 : i32, i32, i32
  }
  func.func @transform_9(%arg0: i32) -> (i32, i32) {
    %c0_i32 = arith.constant 0 : i32
    %c0_i32_0 = arith.constant 0 : i32
    return %arg0, %c0_i32 : i32, i32
  }
}

module attributes {stable_mosaic.version = 11 : i64} {
  func.func @_layernorm_kernel(%arg0: i32, %arg1: memref<16x64xf32, #tpu.memory_space<vmem>>, %arg2: memref<1x64xf32, #tpu.memory_space<vmem>>, %arg3: memref<1x64xf32, #tpu.memory_space<vmem>>, %arg4: memref<16x64xf32, #tpu.memory_space<vmem>>) attributes {dimension_semantics = [#tpu.dimension_semantics<parallel>], iteration_bounds = array<i64: 2>, scalar_prefetch = 0 : i64, scratch_operands = 0 : i64, tpu.core_type = #tpu.core_type<tc>, window_params = [{transform_indices = @transform_0, window_bounds = array<i64: 16, 64>}, {pipeline_mode = #tpu.pipeline_mode<synchronous>, transform_indices = @transform_1, window_bounds = array<i64: 1, 64>}, {pipeline_mode = #tpu.pipeline_mode<synchronous>, transform_indices = @transform_2, window_bounds = array<i64: 1, 64>}, {transform_indices = @transform_3, window_bounds = array<i64: 16, 64>}]} {
    %c0 = arith.constant 0 : index
    %c0_0 = arith.constant 0 : index
    %0 = vector.load %arg1[%c0, %c0_0] : memref<16x64xf32, #tpu.memory_space<vmem>>, vector<16x64xf32>
    %c0_1 = arith.constant 0 : index
    %c0_2 = arith.constant 0 : index
    %1 = vector.load %arg2[%c0_1, %c0_2] : memref<1x64xf32, #tpu.memory_space<vmem>>, vector<1x64xf32>
    %c0_3 = arith.constant 0 : index
    %c0_4 = arith.constant 0 : index
    %2 = vector.load %arg3[%c0_3, %c0_4] : memref<1x64xf32, #tpu.memory_space<vmem>>, vector<1x64xf32>
    %cst = arith.constant dense<0.000000e+00> : vector<16xf32>
    %3 = vector.multi_reduction <add>, %0, %cst [1] : vector<16x64xf32> to vector<16xf32>
    %4 = vector.shape_cast %3 : vector<16xf32> to vector<16x1xf32>
    %cst_5 = arith.constant 6.400000e+01 : f32
    %5 = vector.broadcast %cst_5 : f32 to vector<16x1xf32>
    %6 = arith.divf %4, %5 : vector<16x1xf32>
    %7 = vector.broadcast %6 : vector<16x1xf32> to vector<16x64xf32>
    %8 = arith.subf %0, %7 : vector<16x64xf32>
    %9 = arith.mulf %8, %8 : vector<16x64xf32>
    %cst_6 = arith.constant dense<0.000000e+00> : vector<16xf32>
    %10 = vector.multi_reduction <add>, %9, %cst_6 [1] : vector<16x64xf32> to vector<16xf32>
    %11 = vector.shape_cast %10 : vector<16xf32> to vector<16x1xf32>
    %cst_7 = arith.constant 6.400000e+01 : f32
    %12 = vector.broadcast %cst_7 : f32 to vector<16x1xf32>
    %13 = arith.divf %11, %12 : vector<16x1xf32>
    %cst_8 = arith.constant 9.99999974E-6 : f32
    %14 = vector.broadcast %cst_8 : f32 to vector<16x1xf32>
    %15 = arith.addf %13, %14 : vector<16x1xf32>
    %16 = math.rsqrt %15 : vector<16x1xf32>
    %17 = vector.broadcast %16 : vector<16x1xf32> to vector<16x64xf32>
    %18 = arith.mulf %8, %17 : vector<16x64xf32>
    %19 = vector.broadcast %1 : vector<1x64xf32> to vector<16x64xf32>
    %20 = arith.mulf %18, %19 : vector<16x64xf32>
    %21 = vector.broadcast %2 : vector<1x64xf32> to vector<16x64xf32>
    %22 = arith.addf %20, %21 : vector<16x64xf32>
    %c0_9 = arith.constant 0 : index
    %c0_10 = arith.constant 0 : index
    %23 = vector.load %arg4[%c0_9, %c0_10] : memref<16x64xf32, #tpu.memory_space<vmem>>, vector<16x64xf32>
    tpu.vector_store %arg4[%c0_9, %c0_10], %22 {strides = array<i32>} : memref<16x64xf32, #tpu.memory_space<vmem>>, vector<16x64xf32>,
    return
  }
  func.func @transform_0(%arg0: i32) -> (i32, i32) {
    %c0_i32 = arith.constant 0 : i32
    %c0_i32_0 = arith.constant 0 : i32
    return %arg0, %c0_i32 : i32, i32
  }
  func.func @transform_1(%arg0: i32) -> (i32, i32) {
    %c0_i32 = arith.constant 0 : i32
    %c0_i32_0 = arith.constant 0 : i32
    %c0_i32_1 = arith.constant 0 : i32
    return %c0_i32, %c0_i32_0 : i32, i32
  }
  func.func @transform_2(%arg0: i32) -> (i32, i32) {
    %c0_i32 = arith.constant 0 : i32
    %c0_i32_0 = arith.constant 0 : i32
    %c0_i32_1 = arith.constant 0 : i32
    return %c0_i32, %c0_i32_0 : i32, i32
  }
  func.func @transform_3(%arg0: i32) -> (i32, i32) {
    %c0_i32 = arith.constant 0 : i32
    %c0_i32_0 = arith.constant 0 : i32
    return %arg0, %c0_i32 : i32, i32
  }
}

</mosaic_0001>

<bundles_post_ra>
// kernel: swin_forward.11
= control target key start
LH: loop header
LB: loop body
LE: loop exit
PB: predicated region body
PF: predicated region fallthrough
CT: control target
= control target key end

     0   :  { %s544_s12 = smov 0   ;;  %s633_s0 = inlined_call_operand.vmem [shape: f32[128,96], index: 0, kind: input, shape index: {}]   ;;  %s634_s1 = inlined_call_operand.vmem [shape: f32[96,32], index: 1, kind: input, shape index: {}]   ;;  %s635_s2 = inlined_call_operand.vmem [shape: f32[1,32], index: 2, kind: input, shape index: {}]   ;;  %s636_s3 = inlined_call_operand.vmem [shape: f32[128,32], index: 3, kind: output, shape index: {}]  }
   0x1 LB: > { %s396_s13 = sadd.s32 4294967295, %s522_s12   ;;  %p400_p0 = scmp.ge.s32.totalorder %s522_s12, 1  ;;  %s522_s12 = sphi %s544_s12, %s13_s12  }
   0x2   : > { %p138_p1 = scmp.lt.s32.totalorder %s522_s12, 3 }
   0x4   : > { %p139_p2 = pnand %p400_p0, %p138_p1 }
   0x5   : > { %v182_v0 = vld [vmem:[%s634_s1] sm:$0xff] (!%p139_p2)  ;;  %v183_v1 = vld [vmem:[%s634_s1 + $0x8] sm:$0xff] (!%p139_p2)  ;;  %v184_v2 = vld [vmem:[%s634_s1 + $0x10] sm:$0xff] (!%p139_p2)  ;;  %s401_s20 = sshll.u32 (!%p139_p2), %s396_s13, 3  ;;  %vm201_vm0 = vcmask (!%p139_p2), 785408   ;;  %vm331_vm1 = vcmask (!%p139_p2), 261120  }
   0x6   : > { %142 = sbr.rel (%p139_p2) target bundleno = 253 (0xfd), region = 32  ;;  %v472_v3 = vpack.c.bf16 (!%p139_p2), %v183_v1, %v182_v0  ;;  %v185_v4 = vld [vmem:[%s634_s1 + $0x18] sm:$0xff] (!%p139_p2)  ;;  %p163_p3 = scmp.lt.s32.totalorder (!%p139_p2), %s401_s20, 15  ;;  %v186_v6 = vld [vmem:[%s634_s1 + $0x20] sm:$0xff] (!%p139_p2)  ;;  %v187_v7 = vld [vmem:[%s634_s1 + $0x28] sm:$0xff] (!%p139_p2) }
   0x7   : > { %v476_v5 = vpack.c.bf16 (!%p139_p2), %v185_v4, %v184_v2  ;;  %v480_v8 = vpack.c.bf16 (!%p139_p2), %v187_v7, %v186_v6  ;;  %v188_v9 = vld [vmem:[%s634_s1 + $0x30] sm:$0xff] (!%p139_p2)  ;;  %v189_v10 = vld [vmem:[%s634_s1 + $0x38] sm:$0xff] (!%p139_p2)  ;;  %v190_v14 = vld [vmem:[%s634_s1 + $0x40] sm:$0xff] (!%p139_p2) }
   0x8   : > { %473 = vmatprep.subr.bf16.mxu0 (!%p139_p2), %v472_v3  ;;  %496 = vmatprep.subr.bf16.mxu1 (!%p139_p2), %v472_v3  ;;  %v484_v13 = vpack.c.bf16 (!%p139_p2), %v189_v10, %v188_v9  ;;  %v191_v15 = vld [vmem:[%s634_s1 + $0x48] sm:$0xff] (!%p139_p2)  ;;  %v192_v17 = vld [vmem:[%s634_s1 + $0x50] sm:$0xff] (!%p139_p2)  ;;  %v193_v18 = vld [vmem:[%s634_s1 + $0x58] sm:$0xff] (!%p139_p2) }
   0x9   : > { %475 = vmatpush3.bf16.msra.mxu0 (!%p139_p2), %v472_v3  ;;  %502 = vmatpush3.bf16.msra.mxu1 (!%p139_p2), %v472_v3  ;;  %v488_v16 = vpack.c.bf16 (!%p139_p2), %v191_v15, %v190_v14  ;;  %v492_v19 = vpack.c.bf16 (!%p139_p2), %v193_v18, %v192_v17  ;;  %v405_v26 = vld [vmem:[%s635_s2] ss:$0 sm:$0xff] (!%p139_p2) }
   0xa   : > { %477 = vmatprep.subr.bf16.mxu0 (!%p139_p2), %v476_v5  ;;  %497 = vmatprep.subr.bf16.mxu1 (!%p139_p2), %v476_v5 }
   0xd   : > { %s638_s20 = smov (!%p163_p3, %s401_s20), 15  ;;  %479 = vmatpush3.bf16.msra.mxu0 %v476_v5  ;;  %503 = vmatpush3.bf16.msra.mxu1 %v476_v5 }
   0xe   : > { %s402_s27 = sshll.u32 %s638_s20, 3  ;;  %481 = vmatprep.subr.bf16.mxu0 %v480_v8  ;;  %498 = vmatprep.subr.bf16.mxu1 %v480_v8 }
   0xf   : > { %s584_s7 = scalar_lea.vmem %s633_s0, %s402_s27  ;;  %s172_s22 = scalar_lea.vmem %s636_s3, %s402_s27 }
  0x10   : > { %v174_v11 = vld [vmem:[%s584_s7] sm:$0xff]  ;;  %v175_v20 = vld [vmem:[%s584_s7 + $0x8] sm:$0xff]  ;;  %v176_v22 = vld [vmem:[%s584_s7 + $0x10] sm:$0xff] }
  0x11   : > { %v178_v12 = vld [vmem:[%s584_s7 + $0x20] sm:$0xff]  ;;  %460 = vmatprep.mubr.msk.f32.mxu0 %vm201_vm0, %v174_v11  ;;  %483 = vmatpush3.bf16.msra.mxu0 %v480_v8  ;;  %v179_v21 = vld [vmem:[%s584_s7 + $0x28] sm:$0xff]  ;;  %v180_v23 = vld [vmem:[%s584_s7 + $0x30] sm:$0xff] }
  0x12   : > { %466 = vmatprep.mubr.msk.f32.mxu1 %vm201_vm0, %v178_v12  ;;  %504 = vmatpush3.bf16.msra.mxu1 %v480_v8  ;;  %v177_v24 = vld [vmem:[%s584_s7 + $0x18] sm:$0xff] }
  0x13   : > { %485 = vmatprep.subr.bf16.mxu0 %v484_v13  ;;  %499 = vmatprep.subr.bf16.mxu1 %v484_v13  ;;  %v181_v25 = vld [vmem:[%s584_s7 + $0x38] sm:$0xff] }
  0x15   : > { %487 = vmatpush3.bf16.msra.mxu0 %v484_v13 }
  0x16   : > { %505 = vmatpush3.bf16.msra.mxu1 %v484_v13  ;;  %489 = vmatprep.subr.bf16.mxu0 %v488_v16 }
  0x17   : > { %500 = vmatprep.subr.bf16.mxu1 %v488_v16 }
  0x19   : > { %491 = vmatpush3.bf16.msra.mxu0 %v488_v16 }
  0x1a   : > { %506 = vmatpush3.bf16.msra.mxu1 %v488_v16  ;;  %493 = vmatprep.subr.bf16.mxu0 %v492_v19 }
  0x1b   : > { %501 = vmatprep.subr.bf16.mxu1 %v492_v19 }
  0x1d   : > { %495 = vmatpush3.bf16.msra.mxu0 %v492_v19 }
  0x1e   : > { %507 = vmatpush3.bf16.msra.mxu1 %v492_v19 }
  0x20   : > { %461 = vmatmul.mubr.msk.f32.vlgmr.msra.gmra.mrb[0].mxu0 %vm201_vm0, %v175_v20 }
  0x21   : > { %467 = vmatmul.mubr.msk.f32.vlgmr.msra.gmra.mrb[0].mxu1 %vm201_vm0, %v179_v21  ;;  %463 = vmatprep.mubr.msk.f32.mxu0 %vm201_vm0, %v176_v22 }
  0x22   : > { %469 = vmatprep.mubr.msk.f32.mxu1 %vm201_vm0, %v180_v23 }
  0x24   : > { %464 = vmatmul.mubr.msk.f32.gmra.mrb[2].mxu0 %vm201_vm0, %v177_v24 }
  0x25   : > { %470 = vmatmul.mubr.msk.f32.gmra.mrb[2].mxu1 %vm201_vm0, %v181_v25 }
  0xf3   : > { %v462_v27 = vpop.f32.mrb[0].mxu0 }
  0xf4   : > { %v468_v28 = vpop.f32.mrb[0].mxu1  ;;  %v298_v29 = vadd.f32 %v462_v27, %v405_v26  ;;  %v292_v31 = vpop.f32.mrb[1].mxu0 }
  0xf5   : > { %v318_v30 = vadd.f32 %v468_v28, %v405_v26  ;;  %v312_v32 = vpop.f32.mrb[1].mxu1  ;;  %v293_v33 = vadd.f32 %v405_v26, %v292_v31 }
  0xf6   : > { %v313_v34 = vadd.f32 %v405_v26, %v312_v32  ;;  %333 = vst.msk [vmem:[%s172_s22 + $0x8] sm:$0xff] %vm331_vm1, %v298_v29 }
  0xf7   : > { %337 = vst.msk [vmem:[%s172_s22 + $0x28] sm:$0xff] %vm331_vm1, %v318_v30  ;;  %332 = vst.msk [vmem:[%s172_s22] sm:$0xff] %vm331_vm1, %v293_v33  ;;  %v465_v35 = vpop.f32.mrb[2].mxu0 }
  0xf8   : > { %336 = vst.msk [vmem:[%s172_s22 + $0x20] sm:$0xff] %vm331_vm1, %v313_v34  ;;  %v471_v36 = vpop.f32.mrb[2].mxu1  ;;  %v308_v37 = vadd.f32 %v465_v35, %v405_v26  ;;  %v302_v39 = vpop.f32.mrb[3].mxu0 }
  0xf9   : > { %v328_v38 = vadd.f32 %v471_v36, %v405_v26  ;;  %v322_v40 = vpop.f32.mrb[3].mxu1  ;;  %v303_v41 = vadd.f32 %v405_v26, %v302_v39 }
  0xfa   : > { %v323_v42 = vadd.f32 %v405_v26, %v322_v40  ;;  %335 = vst.msk [vmem:[%s172_s22 + $0x18] sm:$0xff] %vm331_vm1, %v308_v37 }
  0xfb   : > { %339 = vst.msk [vmem:[%s172_s22 + $0x38] sm:$0xff] %vm331_vm1, %v328_v38  ;;  %334 = vst.msk [vmem:[%s172_s22 + $0x10] sm:$0xff] %vm331_vm1, %v303_v41 }
  0xfc   : > { %338 = vst.msk [vmem:[%s172_s22 + $0x30] sm:$0xff] %vm331_vm1, %v323_v42 }
  0xfd PF: > { %s13_s12 = sadd.s32 1, %s522_s12  }
  0xfe   : > { %p10_p4 = scmp.ge.s32.totalorder %s13_s12, 4  }
 0x100   :  { %12 = sbr.rel (!%p10_p4) target bundleno = 1 (0x1), region = 62 }

// kernel: swin_forward.12
= control target key start
LH: loop header
LB: loop body
LE: loop exit
PB: predicated region body
PF: predicated region fallthrough
CT: control target
= control target key end

     0   :  { %s2880_s27 = smov 0   ;;  %s3362_s0 = inlined_call_operand.vmem [shape: f32[128,32], index: 0, kind: input, shape index: {}]   ;;  %s3363_s1 = inlined_call_operand.vmem [shape: f32[1,32], index: 1, kind: input, shape index: {}]   ;;  %s3364_s2 = inlined_call_operand.vmem [shape: f32[1,32], index: 2, kind: input, shape index: {}]   ;;  %s3365_s3 = inlined_call_operand.vmem [shape: f32[32,96], index: 3, kind: input, shape index: {}]   ;;  %s3366_s4 = inlined_call_operand.vmem [shape: f32[1,96], index: 4, kind: input, shape index: {}]   ;;  %s3367_s5 = inlined_call_operand.vmem [shape: f32[2,32,32], index: 5, kind: input, shape index: {}]   ;;  %s3368_s6 = inlined_call_operand.vmem [shape: f32[32,32], index: 6, kind: input, shape index: {}]   ;;  %s3369_s7 = inlined_call_operand.vmem [shape: f32[1,32], index: 7, kind: input, shape index: {}]   ;;  %s3370_s8 = inlined_call_operand.vmem [shape: f32[128,32], index: 8, kind: output, shape index: {}]  }
   0x1 LB: > { %s2170_s28 = sadd.s32 4294967295, %s2828_s27   ;;  %p2174_p0 = scmp.ge.s32.totalorder %s2828_s27, 1  ;;  %s2828_s27 = sphi %s2880_s27, %s18_s27  }
   0x2   : > { %p263_p1 = scmp.lt.s32.totalorder %s2828_s27, 3 }
   0x4   : > { %p264_p2 = pnand %p2174_p0, %p263_p1 }
   0x5   : > { %s2175_s29 = sshll.u32 (!%p264_p2), %s2170_s28, 3  ;;  %vm319_vm0 = vcmask (!%p264_p2), 261120   ;;  %v453_v36 = vld [vmem:[%s3365_s3] sm:$0xff] (!%p264_p2)  ;;  %v454_v37 = vld [vmem:[%s3365_s3 + $0x8] sm:$0xff] (!%p264_p2)  ;;  %v455_v39 = vld [vmem:[%s3365_s3 + $0x10] sm:$0xff] (!%p264_p2)  ;;  %vm618_vm1 = vcmask (!%p264_p2), 130048  }
   0x6   : > { %267 = sbr.rel (%p264_p2) target bundleno = 1926 (0x786), region = 52  ;;  %p298_p3 = scmp.lt.s32.totalorder (!%p264_p2), %s2175_s29, 15  ;;  %v2537_v38 = vpack.c.bf16 (!%p264_p2), %v454_v37, %v453_v36  ;;  %v456_v40 = vld [vmem:[%s3365_s3 + $0x18] sm:$0xff] (!%p264_p2)  ;;  %vm3006_vm2 = vmpackc.low (!%p264_p2), %vm618_vm1, %vm618_vm1 }
   0x7   : > { %v2541_v41 = vpack.c.bf16 (!%p264_p2), %v456_v40, %v455_v39  ;;  %s2830_s26 = smov (!%p264_p2), 96   ;;  %s2831_s28 = smov (!%p264_p2), 112  }
   0x8   : > { %2538 = vmatprep.subr.bf16.mxu1 (!%p264_p2), %v2537_v38  ;;  %s2832_s9 = smov (!%p264_p2), 80  }
   0x9   : > { %2540 = vmatpush3.bf16.msra.mxu1 (!%p264_p2), %v2537_v38 }
   0xa   : > { %2542 = vmatprep.subr.bf16.mxu1 (!%p264_p2), %v2541_v41 }
   0xd   : > { %s3374_s29 = smov (!%p298_p3, %s2175_s29), 15  ;;  %2544 = vmatpush3.bf16.msra.mxu1 %v2541_v41 }
   0xe   : > { %s2176_s30 = sshll.u32 %s3374_s29, 3 }
   0xf   : > { %s2896_s11 = scalar_lea.vmem %s3362_s0, %s2176_s30  ;;  %s3332_s21 = scalar_lea.vmem %s3370_s8, %s2176_s30 }
  0x10   : > { %v309_v0 = vld [vmem:[%s2896_s11] sm:$0xff]  ;;  %v311_v1 = vld [vmem:[%s2896_s11 + $0x10] sm:$0xff]  ;;  %v310_v2 = vld [vmem:[%s2896_s11 + $0x8] sm:$0xff] }
  0x11   : > { %v320_v3 = vsel %vm319_vm0, %v309_v0, 0.0  ;;  %v326_v4 = vsel %vm319_vm0, %v311_v1, 0.0  ;;  %v312_v5 = vld [vmem:[%s2896_s11 + $0x18] sm:$0xff]  ;;  %v323_v6 = vsel %vm319_vm0, %v310_v2, 0.0  ;;  %v313_v26 = vld [vmem:[%s2896_s11 + $0x20] sm:$0xff]  ;;  %v315_v30 = vld [vmem:[%s2896_s11 + $0x30] sm:$0xff] }
  0x12   : > { %321 = vadd.xlane.f32.xlu0 %v320_v3  ;;  %327 = vadd.xlane.f32.xlu1 %v326_v4  ;;  %v329_v7 = vsel %vm319_vm0, %v312_v5, 0.0  ;;  %v332_v28 = vsel %vm319_vm0, %v313_v26, 0.0  ;;  %v314_v31 = vld [vmem:[%s2896_s11 + $0x28] sm:$0xff]  ;;  %v338_v32 = vsel %vm319_vm0, %v315_v30, 0.0  ;;  %v316_v34 = vld [vmem:[%s2896_s11 + $0x38] sm:$0xff] }
  0x13   : > { %v335_v33 = vsel %vm319_vm0, %v314_v31, 0.0  ;;  %v341_v35 = vsel %vm319_vm0, %v316_v34, 0.0 }
  0x16   : > { %324 = vadd.xlane.f32.xlu0 %v323_v6  ;;  %330 = vadd.xlane.f32.xlu1 %v329_v7 }
  0x9f   : > { %v322_v8 = vpop.xlane.xlu0 %321  ;;  %v328_v9 = vpop.xlane.xlu1 %327 }
  0xa0   : > { %v345_v10 = vmul.f32 0.03125, %v322_v8  ;;  %v347_v11 = vmul.f32 0.03125, %v328_v9  ;;  %v2180_v8 = vld [vmem:[%s3364_s2] ss:$0 sm:$0xff] }
  0xa2   : > { %v2906_v12 = vsub.f32 %v309_v0, %v345_v10  ;;  %v2908_v13 = vsub.f32 %v311_v1, %v347_v11 }
  0xa3   : > { %v325_v14 = vpop.xlane.xlu0 %324  ;;  %v331_v15 = vpop.xlane.xlu1 %330 }
  0xa4   : > { %v346_v16 = vmul.f32 0.03125, %v325_v14  ;;  %v348_v17 = vmul.f32 0.03125, %v331_v15  ;;  %v361_v18 = vmul.f32 %v2906_v12, %v2906_v12  ;;  %v363_v19 = vmul.f32 %v2908_v13, %v2908_v13 }
  0xa6   : > { %v2914_v20 = vsub.f32 %v310_v2, %v346_v16  ;;  %v2916_v21 = vsub.f32 %v312_v5, %v348_v17  ;;  %v369_v22 = vsel %vm319_vm0, %v361_v18, 0.0  ;;  %v375_v23 = vsel %vm319_vm0, %v363_v19, 0.0  ;;  %v2950_v2 = vld [vmem:[%s3363_s1] ss:$0 sm:$0xff] }
  0xa7   : > { %370 = vadd.xlane.f32.xlu0 %v369_v22 }
  0xa8   : > { %v362_v24 = vmul.f32 %v2914_v20, %v2914_v20  ;;  %v364_v25 = vmul.f32 %v2916_v21, %v2916_v21 }
  0xaa   : > { %v372_v27 = vsel %vm319_vm0, %v362_v24, 0.0  ;;  %v378_v29 = vsel %vm319_vm0, %v364_v25, 0.0 }
  0xab   : > { %376 = vadd.xlane.f32.xlu0 %v375_v23  ;;  %373 = vadd.xlane.f32.xlu1 %v372_v27 }
  0xaf   : > { %333 = vadd.xlane.f32.xlu0 %v332_v28  ;;  %379 = vadd.xlane.f32.xlu1 %v378_v29 }
  0xb3   : > { %339 = vadd.xlane.f32.xlu0 %v338_v32  ;;  %336 = vadd.xlane.f32.xlu1 %v335_v33 }
  0xb7   : > { %342 = vadd.xlane.f32.xlu1 %v341_v35 }
 0x134   : > { %v371_v42 = vpop.xlane.xlu0 %370 }
 0x135   : > { %v393_v43 = vmul.f32 0.03125, %v371_v42 }
 0x137   : > { %v401_v44 = vadd.f32 1e-05, %v393_v43 }
 0x138   : > { %v374_v45 = vpop.xlane.xlu1 %373  ;;  %v377_v46 = vpop.xlane.xlu0 %376 }
 0x139   : > { %2742 = vrsqrt.f32 %v401_v44  ;;  %v394_v47 = vmul.f32 0.03125, %v374_v45  ;;  %v395_v48 = vmul.f32 0.03125, %v377_v46 }
 0x13b   : > { %v402_v49 = vadd.f32 1e-05, %v394_v47  ;;  %v403_v50 = vadd.f32 1e-05, %v395_v48 }
 0x13c   : > { %v380_v51 = vpop.xlane.xlu1 %379  ;;  %v334_v52 = vpop.xlane.xlu0 %333 }
 0x13d   : > { %2744 = vrsqrt.f32 %v402_v49  ;;  %v396_v53 = vmul.f32 0.03125, %v380_v51  ;;  %v349_v54 = vmul.f32 0.03125, %v334_v52 }
 0x13e   : > { %2746 = vrsqrt.f32 %v403_v50 }
 0x13f   : > { %v404_v55 = vadd.f32 1e-05, %v396_v53  ;;  %v357_v56 = vsub.f32 %v313_v26, %v349_v54 }
 0x140   : > { %v337_v57 = vpop.xlane.xlu1 %336  ;;  %v340_v58 = vpop.xlane.xlu0 %339 }
 0x141   : > { %2748 = vrsqrt.f32 %v404_v55  ;;  %v350_v59 = vmul.f32 0.03125, %v337_v57  ;;  %v351_v60 = vmul.f32 0.03125, %v340_v58  ;;  %v365_v61 = vmul.f32 %v357_v56, %v357_v56 }
 0x143   : > { %v2743_v62 = vpop.eup %2742  ;;  %v358_v63 = vsub.f32 %v314_v31, %v350_v59  ;;  %v359_v0 = vsub.f32 %v315_v30, %v351_v60  ;;  %v381_v1 = vsel %vm319_vm0, %v365_v61, 0.0 }
 0x144   : > { %v343_v3 = vpop.xlane.xlu1 %342  ;;  %382 = vadd.xlane.f32.xlu0 %v381_v1  ;;  %v417_v4 = vmul.f32 %v2743_v62, %v2906_v12 }
 0x145   : > { %v352_v5 = vmul.f32 0.03125, %v343_v3  ;;  %v366_v6 = vmul.f32 %v358_v63, %v358_v63  ;;  %v367_v7 = vmul.f32 %v359_v0, %v359_v0 }
 0x146   : > { %v431_v9 = vmul.f32 %v2950_v2, %v417_v4 }
 0x147   : > { %v2745_v10 = vpop.eup %2744  ;;  %v360_v11 = vsub.f32 %v316_v34, %v352_v5  ;;  %v384_v14 = vsel %vm319_vm0, %v366_v6, 0.0  ;;  %v387_v15 = vsel %vm319_vm0, %v367_v7, 0.0 }
 0x148   : > { %v2747_v16 = vpop.eup %2746  ;;  %385 = vadd.xlane.f32.xlu1 %v384_v14  ;;  %388 = vadd.xlane.f32.xlu0 %v387_v15  ;;  %v445_v17 = vadd.f32 %v2180_v8, %v431_v9  ;;  %v418_v12 = vmul.f32 %v2745_v10, %v2914_v20 }
 0x149   : > { %v368_v18 = vmul.f32 %v360_v11, %v360_v11  ;;  %v419_v19 = vmul.f32 %v2747_v16, %v2908_v13 }
 0x14a   : > { %2373 = vmatprep.mubr.msk.f32.mxu1 %vm319_vm0, %v445_v17  ;;  %v432_v22 = vmul.f32 %v2950_v2, %v418_v12 }
 0x14b   : > { %v2749_v23 = vpop.eup %2748  ;;  %v390_v24 = vsel %vm319_vm0, %v368_v18, 0.0  ;;  %v433_v25 = vmul.f32 %v2950_v2, %v419_v19 }
 0x14c   : > { %391 = vadd.xlane.f32.xlu1 %v390_v24  ;;  %v446_v26 = vadd.f32 %v2180_v8, %v432_v22  ;;  %v420_v27 = vmul.f32 %v2749_v23, %v2916_v21 }
 0x14d   : > { %v447_v28 = vadd.f32 %v2180_v8, %v433_v25 }
 0x14e   : > { %2374 = vmatmul.mubr.msk.f32.vlgmr.msra.gmra.mrb[0].mxu1 %vm319_vm0, %v446_v26  ;;  %v434_v20 = vmul.f32 %v2950_v2, %v420_v27 }
 0x14f   : > { %2376 = vmatprep.mubr.msk.f32.mxu1 %vm319_vm0, %v447_v28 }
 0x150   : > { %v448_v13 = vadd.f32 %v2180_v8, %v434_v20 }
 0x152   : > { %2377 = vmatmul.mubr.msk.f32.gmra.mrb[2].mxu1 %vm319_vm0, %v448_v13 }
 0x1d1   : > { %v383_v29 = vpop.xlane.xlu0 %382 }
 0x1d2   : > { %v397_v30 = vmul.f32 0.03125, %v383_v29 }
 0x1d4   : > { %v405_v31 = vadd.f32 1e-05, %v397_v30 }
 0x1d5   : > { %v386_v32 = vpop.xlane.xlu1 %385  ;;  %v389_v33 = vpop.xlane.xlu0 %388 }
 0x1d6   : > { %2750 = vrsqrt.f32 %v405_v31  ;;  %v398_v34 = vmul.f32 0.03125, %v386_v32  ;;  %v399_v35 = vmul.f32 0.03125, %v389_v33 }
 0x1d8   : > { %v406_v36 = vadd.f32 1e-05, %v398_v34  ;;  %v407_v21 = vadd.f32 1e-05, %v399_v35 }
 0x1d9   : > { %v392_v37 = vpop.xlane.xlu1 %391 }
 0x1da   : > { %2752 = vrsqrt.f32 %v406_v36  ;;  %v400_v38 = vmul.f32 0.03125, %v392_v37 }
 0x1db   : > { %2754 = vrsqrt.f32 %v407_v21 }
 0x1dc   : > { %v408_v39 = vadd.f32 1e-05, %v400_v38 }
 0x1de   : > { %2756 = vrsqrt.f32 %v408_v39 }
 0x1e0   : > { %v2751_v40 = vpop.eup %2750 }
 0x1e1   : > { %v421_v41 = vmul.f32 %v2751_v40, %v357_v56  ;;  %v2981_v56 = vld [vmem:[%s3366_s4] ss:$0 sm:$0xff] }
 0x1e3   : > { %v435_v42 = vmul.f32 %v2950_v2, %v421_v41 }
 0x1e4   : > { %v2753_v43 = vpop.eup %2752 }
 0x1e5   : > { %v2755_v44 = vpop.eup %2754  ;;  %v449_v45 = vadd.f32 %v2180_v8, %v435_v42  ;;  %v422_v46 = vmul.f32 %v2753_v43, %v358_v63 }
 0x1e6   : > { %v423_v47 = vmul.f32 %v2755_v44, %v359_v0 }
 0x1e7   : > { %2379 = vmatprep.mubr.msk.f32.mxu1 %vm319_vm0, %v449_v45  ;;  %v436_v48 = vmul.f32 %v2950_v2, %v422_v46 }
 0x1e8   : > { %v2757_v49 = vpop.eup %2756  ;;  %v437_v50 = vmul.f32 %v2950_v2, %v423_v47 }
 0x1e9   : > { %v450_v51 = vadd.f32 %v2180_v8, %v436_v48  ;;  %v424_v52 = vmul.f32 %v2757_v49, %v360_v11 }
 0x1ea   : > { %v451_v53 = vadd.f32 %v2180_v8, %v437_v50 }
 0x1eb   : > { %2380 = vmatmul.mubr.msk.f32.gmra.mrb[4].mxu1 %vm319_vm0, %v450_v51  ;;  %v438_v54 = vmul.f32 %v2950_v2, %v424_v52 }
 0x1ec   : > { %2382 = vmatprep.mubr.msk.f32.mxu1 %vm319_vm0, %v451_v53 }
 0x1ed   : > { %v452_v55 = vadd.f32 %v2180_v8, %v438_v54 }
 0x1ef   : > { %2383 = vmatmul.mubr.msk.f32.gmra.mrb[6].mxu1 %vm319_vm0, %v452_v55 }
 0x221   : > { %v2375_v57 = vpop.f32.mrb[0].mxu1 }
 0x222   : > { %v560_v58 = vadd.f32 %v2375_v57, %v2981_v56  ;;  %v554_v59 = vpop.f32.mrb[1].mxu1 }
 0x223   : > { %v555_v60 = vadd.f32 %v2981_v56, %v554_v59 }
 0x224   : > { %v599_v5 = vmul.f32 0.25, %v560_v58 }
 0x225   : > { %v2378_v61 = vpop.f32.mrb[2].mxu1  ;;  %v2985_v62 = vpack.i.bf16 %v560_v58, %v555_v60  ;;  %v598_v63 = vmul.f32 0.25, %v555_v60 }
 0x226   : > { %v570_v0 = vadd.f32 %v2378_v61, %v2981_v56  ;;  %v564_v1 = vpop.f32.mrb[3].mxu1 }
 0x227   : > { %v565_v2 = vadd.f32 %v2981_v56, %v564_v1  ;;  %2663 = vrot.lane.b32.xlu0 %v2985_v62, %s2830_s26  ;;  %2393 = vmatprep.mubr.msk.f32.mxu1 %vm618_vm1, %v598_v63 }
 0x228   : > { %v601_v6 = vmul.f32 0.25, %v570_v0 }
 0x229   : > { %v2992_v3 = vpack.i.bf16 %v570_v0, %v565_v2  ;;  %v600_v4 = vmul.f32 0.25, %v565_v2  ;;  %v3085_v0 = vld [vmem:[%s3367_s5] sm:$0xff] }
 0x22b   : > { %2668 = vrot.lane.b32.xlu1 %v2992_v3, %s2830_s26  ;;  %882 = vrot.lane.b32.xlu0 %v598_v63, %s2831_s28  ;;  %v3080_v63 = vld [vmem:[%s3367_s5 + $0x8] sm:$0xff] }
 0x22f   : > { %2673 = vrot.lane.b32.xlu1 %v2985_v62, %s2832_s9  ;;  %886 = vrot.lane.b32.xlu0 %v600_v4, %s2831_s28 }
 0x233   : > { %2678 = vrot.lane.b32.xlu1 %v2992_v3, %s2832_s9 }
 0x237   : > { %884 = vrot.lane.b32.xlu1 %v599_v5, %s2831_s28 }
 0x23b   : > { %888 = vrot.lane.b32.xlu1 %v601_v6, %s2831_s28 }
 0x299   : > { %v2664_v7 = vpop.permute.xlu0 %2663 }
 0x29a   : > { %v2666_v8 = vunpack.i.h.bf16 %v2664_v7  ;;  %v2665_v9 = vunpack.i.l.bf16 %v2664_v7 }
 0x29c   : > { %v2545_v11 = vpack.c.bf16 %v2666_v8, %v2665_v9 }
 0x29d   : > { %v2669_v14 = vpop.permute.xlu1 %2668  ;;  %v883_v27 = vpop.permute.xlu0 %882 }
 0x29e   : > { %v2671_v15 = vunpack.i.h.bf16 %v2669_v14  ;;  %v2670_v16 = vunpack.i.l.bf16 %v2669_v14  ;;  %2547 = vmatprep.subr.msk.bf16.mxu1 %vm3006_vm2, %v2545_v11  ;;  %v3100_v14 = vld [vmem:[%s3367_s5 + $0x10] sm:$0xff] }
 0x29f   : > { %2550 = vmatpush3.bf16.xpose.msk.msra.mxu1 %vm3006_vm2, %v2545_v11 }
 0x2a0   : > { %v2551_v17 = vpack.c.bf16 %v2671_v15, %v2670_v16 }
 0x2a1   : > { %v2674_v12 = vpop.permute.xlu1 %2673  ;;  %v887_v20 = vpop.permute.xlu0 %886 }
 0x2a2   : > { %v2676_v18 = vunpack.i.h.bf16 %v2674_v12  ;;  %v2675_v19 = vunpack.i.l.bf16 %v2674_v12  ;;  %2553 = vmatprep.subr.msk.bf16.mxu1 %vm3006_vm2, %v2551_v17  ;;  %v3108_v12 = vld [vmem:[%s3367_s5 + $0x28] sm:$0xff] }
 0x2a4   : > { %v2565_v22 = vpack.c.bf16 %v2676_v18, %v2675_v19  ;;  %v3113_v18 = vld [vmem:[%s3367_s5 + $0x20] sm:$0xff] }
 0x2a5   : > { %v2679_v23 = vpop.permute.xlu1 %2678 }
 0x2a6   : > { %v2681_v24 = vunpack.i.h.bf16 %v2679_v23  ;;  %v2680_v25 = vunpack.i.l.bf16 %v2679_v23 }
 0x2a7   : > { %2556 = vmatpush3.bf16.xpose.msk.msra.mxu1 %vm3006_vm2, %v2551_v17 }
 0x2a8   : > { %2567 = vmatprep.subr.msk.bf16.mxu1 %vm3006_vm2, %v2565_v22  ;;  %v2571_v26 = vpack.c.bf16 %v2681_v24, %v2680_v25  ;;  %v3120_v25 = vld [vmem:[%s3367_s5 + $0x38] sm:$0xff] }
 0x2a9   : > { %v885_v28 = vpop.permute.xlu1 %884 }
 0x2ad   : > { %v889_v32 = vpop.permute.xlu1 %888 }
 0x2ae   : > { %2394 = vmatmul.mubr.msk.f32.vlgmr.msra.gmra.mrb[8].mxu1 %vm618_vm1, %v599_v5 }
 0x2af   : > { %2396 = vmatprep.mubr.msk.f32.mxu1 %vm618_vm1, %v600_v4  ;;  %2570 = vmatpush3.bf16.xpose.msk.msra.mxu1 %vm3006_vm2, %v2565_v22 }
 0x2b0   : > { %2573 = vmatprep.subr.msk.bf16.mxu1 %vm3006_vm2, %v2571_v26 }
 0x2b2   : > { %2397 = vmatmul.mubr.msk.f32.gmra.mrb[10].mxu1 %vm618_vm1, %v601_v6  ;;  %v3092_v6 = vld [vmem:[%s3367_s5 + $0x18] sm:$0xff] }
 0x2b3   : > { %2421 = vmatprep.mubr.msk.f32.mxu1 %vm618_vm1, %v883_v27  ;;  %v3126_v27 = vld [vmem:[%s3367_s5 + $0x30] sm:$0xff] }
 0x2b7   : > { %2576 = vmatpush3.bf16.xpose.msk.msra.mxu1 %vm3006_vm2, %v2571_v26 }
 0x2be   : > { %v2381_v13 = vpop.f32.mrb[4].mxu1  ;;  %2422 = vmatmul.mubr.msk.f32.vlgmr.msra.gmra.mrb[12].mxu1 %vm618_vm1, %v885_v28 }
 0x2bf   : > { %v580_v29 = vadd.f32 %v2381_v13, %v2981_v56  ;;  %v574_v30 = vpop.f32.mrb[5].mxu1  ;;  %2424 = vmatprep.mubr.msk.f32.mxu1 %vm618_vm1, %v887_v20 }
 0x2c0   : > { %v575_v31 = vadd.f32 %v2981_v56, %v574_v30 }
 0x2c1   : > { %v1361_v39 = vmul.f32 0.25, %v580_v29 }
 0x2c2   : > { %v2384_v33 = vpop.f32.mrb[6].mxu1  ;;  %2425 = vmatmul.mubr.msk.f32.gmra.mrb[14].mxu1 %vm618_vm1, %v889_v32  ;;  %v3035_v34 = vpack.i.bf16 %v580_v29, %v575_v31  ;;  %v1360_v35 = vmul.f32 0.25, %v575_v31 }
 0x2c3   : > { %v590_v36 = vadd.f32 %v2384_v33, %v2981_v56  ;;  %v584_v21 = vpop.f32.mrb[7].mxu1 }
 0x2c4   : > { %v585_v37 = vadd.f32 %v2981_v56, %v584_v21  ;;  %2683 = vrot.lane.b32.xlu0 %v3035_v34, %s2830_s26  ;;  %2469 = vmatprep.mubr.msk.f32.mxu1 %vm618_vm1, %v1360_v35 }
 0x2c5   : > { %v1363_v41 = vmul.f32 0.25, %v590_v36 }
 0x2c6   : > { %v3042_v38 = vpack.i.bf16 %v590_v36, %v585_v37  ;;  %v1362_v40 = vmul.f32 0.25, %v585_v37 }
 0x2c8   : > { %2693 = vrot.lane.b32.xlu0 %v3035_v34, %s2832_s9  ;;  %2688 = vrot.lane.b32.xlu1 %v3042_v38, %s2830_s26  ;;  %s2833_s26 = smov 64  }
 0x2cc   : > { %1642 = vrot.lane.b32.xlu0 %v1360_v35, %s2831_s28  ;;  %2698 = vrot.lane.b32.xlu1 %v3042_v38, %s2832_s9 }
 0x2d0   : > { %1644 = vrot.lane.b32.xlu1 %v1361_v39, %s2831_s28  ;;  %1646 = vrot.lane.b32.xlu0 %v1362_v40, %s2831_s28 }
 0x2d4   : > { %1648 = vrot.lane.b32.xlu1 %v1363_v41, %s2831_s28  ;;  %s2834_s28 = smov 48  }
 0x336   : > { %v2684_v42 = vpop.permute.xlu0 %2683 }
 0x337   : > { %v2686_v43 = vunpack.i.h.bf16 %v2684_v42  ;;  %v2685_v44 = vunpack.i.l.bf16 %v2684_v42 }
 0x339   : > { %v2593_v45 = vpack.c.bf16 %v2686_v43, %v2685_v44 }
 0x33a   : > { %v2689_v46 = vpop.permute.xlu1 %2688  ;;  %v2694_v49 = vpop.permute.xlu0 %2693 }
 0x33b   : > { %v2691_v47 = vunpack.i.h.bf16 %v2689_v46  ;;  %v2690_v48 = vunpack.i.l.bf16 %v2689_v46  ;;  %2595 = vmatprep.subr.msk.bf16.mxu1 %vm3006_vm2, %v2593_v45  ;;  %v2696_v51 = vunpack.i.h.bf16 %v2694_v49  ;;  %v2695_v52 = vunpack.i.l.bf16 %v2694_v49 }
 0x33c   : > { %2598 = vmatpush3.bf16.xpose.msk.msra.mxu1 %vm3006_vm2, %v2593_v45 }
 0x33d   : > { %v2599_v50 = vpack.c.bf16 %v2691_v47, %v2690_v48  ;;  %v2613_v53 = vpack.c.bf16 %v2696_v51, %v2695_v52 }
 0x33e   : > { %v2699_v54 = vpop.permute.xlu1 %2698  ;;  %v1643_v58 = vpop.permute.xlu0 %1642 }
 0x33f   : > { %2601 = vmatprep.subr.msk.bf16.mxu1 %vm3006_vm2, %v2599_v50  ;;  %v2701_v55 = vunpack.i.h.bf16 %v2699_v54  ;;  %v2700_v56 = vunpack.i.l.bf16 %v2699_v54 }
 0x341   : > { %v2619_v57 = vpack.c.bf16 %v2701_v55, %v2700_v56 }
 0x342   : > { %v1645_v59 = vpop.permute.xlu1 %1644  ;;  %v1647_v60 = vpop.permute.xlu0 %1646 }
 0x344   : > { %2604 = vmatpush3.bf16.xpose.msk.msra.mxu1 %vm3006_vm2, %v2599_v50 }
 0x345   : > { %2615 = vmatprep.subr.msk.bf16.mxu1 %vm3006_vm2, %v2613_v53 }
 0x346   : > { %v1649_v61 = vpop.permute.xlu1 %1648 }
 0x34b   : > { %2470 = vmatmul.mubr.msk.f32.vlgmr.msra.gmra.mrb[16].mxu1 %vm618_vm1, %v1361_v39 }
 0x34c   : > { %2472 = vmatprep.mubr.msk.f32.mxu1 %vm618_vm1, %v1362_v40  ;;  %2618 = vmatpush3.bf16.xpose.msk.msra.mxu1 %vm3006_vm2, %v2613_v53 }
 0x34d   : > { %2621 = vmatprep.subr.msk.bf16.mxu1 %vm3006_vm2, %v2619_v57 }
 0x34f   : > { %2473 = vmatmul.mubr.msk.f32.gmra.mrb[18].mxu1 %vm618_vm1, %v1363_v41 }
 0x350   : > { %2497 = vmatprep.mubr.msk.f32.mxu1 %vm618_vm1, %v1643_v58 }
 0x354   : > { %2624 = vmatpush3.bf16.xpose.msk.msra.mxu1 %vm3006_vm2, %v2619_v57 }
 0x35b   : > { %2498 = vmatmul.mubr.msk.f32.vlgmr.msra.gmra.mrb[20].mxu1 %vm618_vm1, %v1645_v59 }
 0x35c   : > { %2500 = vmatprep.mubr.msk.f32.mxu1 %vm618_vm1, %v1647_v60 }
 0x35f   : > { %2501 = vmatmul.mubr.msk.f32.gmra.mrb[22].mxu1 %vm618_vm1, %v1649_v61 }
 0x381   : > { %v2395_v1 = vpop.f32.mrb[8].mxu1 }
 0x382   : > { %v711_v2 = vadd.f32 %v2395_v1, %v3080_v63  ;;  %v705_v4 = vpop.f32.mrb[9].mxu1 }
 0x383   : > { %v706_v5 = vadd.f32 %v705_v4, %v3085_v0 }
 0x384   : > { %v727_v7 = vsel %vm319_vm0, %v711_v2, -inf }
 0x385   : > { %728 = vmax.xlane.f32.xlu1 %v727_v7  ;;  %v2398_v8 = vpop.f32.mrb[10].mxu1  ;;  %v724_v9 = vsel %vm319_vm0, %v706_v5, -inf }
 0x386   : > { %v721_v10 = vadd.f32 %v2398_v8, %v3092_v6  ;;  %v715_v11 = vpop.f32.mrb[11].mxu1  ;;  %725 = vmax.xlane.f32.xlu0 %v724_v9 }
 0x387   : > { %v716_v16 = vadd.f32 %v715_v11, %v3100_v14 }
 0x388   : > { %v733_v15 = vsel %vm319_vm0, %v721_v10, -inf }
 0x389   : > { %v730_v17 = vsel %vm319_vm0, %v716_v16, -inf }
 0x38a   : > { %734 = vmax.xlane.f32.xlu0 %v733_v15 }
 0x38e   : > { %731 = vmax.xlane.f32.xlu0 %v730_v17 }
 0x391   : > { %v2423_v19 = vpop.f32.mrb[12].mxu1 }
 0x392   : > { %v986_v22 = vadd.f32 %v2423_v19, %v3108_v12  ;;  %v980_v23 = vpop.f32.mrb[13].mxu1 }
 0x393   : > { %v981_v24 = vadd.f32 %v3113_v18, %v980_v23 }
 0x394   : > { %v1002_v26 = vsel %vm319_vm0, %v986_v22, -inf }
 0x395   : > { %1003 = vmax.xlane.f32.xlu1 %v1002_v26  ;;  %v2426_v28 = vpop.f32.mrb[14].mxu1  ;;  %v999_v20 = vsel %vm319_vm0, %v981_v24, -inf }
 0x396   : > { %v996_v13 = vadd.f32 %v2426_v28, %v3120_v25  ;;  %v990_v29 = vpop.f32.mrb[15].mxu1  ;;  %1000 = vmax.xlane.f32.xlu0 %v999_v20 }
 0x397   : > { %v991_v30 = vadd.f32 %v3126_v27, %v990_v29 }
 0x398   : > { %v1008_v31 = vsel %vm319_vm0, %v996_v13, -inf }
 0x399   : > { %1009 = vmax.xlane.f32.xlu1 %v1008_v31  ;;  %v1005_v32 = vsel %vm319_vm0, %v991_v30, -inf }
 0x39a   : > { %1006 = vmax.xlane.f32.xlu0 %v1005_v32 }
 0x412   : > { %v729_v33 = vpop.xlane.xlu1 %728 }
 0x413   : > { %v737_v35 = vsub.f32 %v711_v2, %v729_v33  ;;  %v726_v36 = vpop.xlane.xlu0 %725 }
 0x414   : > { %v736_v21 = vsub.f32 %v706_v5, %v726_v36 }
 0x415   : > { %v742_v37 = vmul.f32 1.442695, %v737_v35 }
 0x416   : > { %v740_v39 = vmul.f32 1.442695, %v736_v21 }
 0x417   : > { %2758 = vpow2.f32 %v742_v37  ;;  %v735_v40 = vpop.xlane.xlu0 %734 }
 0x418   : > { %2760 = vpow2.f32 %v740_v39  ;;  %v739_v41 = vsub.f32 %v721_v10, %v735_v40 }
 0x41a   : > { %v746_v42 = vmul.f32 1.442695, %v739_v41 }
 0x41b   : > { %v732_v43 = vpop.xlane.xlu0 %731 }
 0x41c   : > { %2762 = vpow2.f32 %v746_v42  ;;  %v738_v44 = vsub.f32 %v716_v16, %v732_v43 }
 0x41e   : > { %v744_v45 = vmul.f32 1.442695, %v738_v44  ;;  %v2471_v46 = vpop.f32.mrb[16].mxu1 }
 0x41f   : > { %v1466_v47 = vpop.f32.mrb[17].mxu1  ;;  %v3182_v32 = vadd.f32 %v2471_v46, %v3080_v63 }
 0x420   : > { %2764 = vpow2.f32 %v744_v45  ;;  %v3174_v29 = vadd.f32 %v1466_v47, %v3085_v0 }
 0x421   : > { %v3133_v48 = vpop.eup %2758  ;;  %v1488_v0 = vsel %vm319_vm0, %v3182_v32, -inf }
 0x422   : > { %v3135_v49 = vpop.eup %2760  ;;  %v1004_v50 = vpop.xlane.xlu1 %1003  ;;  %v751_v52 = vsel %vm319_vm0, %v3133_v48, 0.0  ;;  %v1485_v31 = vsel %vm319_vm0, %v3174_v29, -inf }
 0x423   : > { %v2474_v51 = vpop.f32.mrb[18].mxu1  ;;  %v1012_v53 = vsub.f32 %v986_v22, %v1004_v50  ;;  %752 = vadd.xlane.f32.xlu1 %v751_v52  ;;  %v1001_v55 = vpop.xlane.xlu0 %1000  ;;  %v748_v56 = vsel %vm319_vm0, %v3135_v49, 0.0 }
 0x424   : > { %v1476_v54 = vpop.f32.mrb[19].mxu1  ;;  %v1011_v57 = vsub.f32 %v981_v24, %v1001_v55  ;;  %749 = vadd.xlane.f32.xlu0 %v748_v56  ;;  %v3185_v33 = vadd.f32 %v2474_v51, %v3092_v6 }
 0x425   : > { %v1017_v58 = vmul.f32 1.442695, %v1012_v53 }
 0x426   : > { %v3141_v59 = vpop.eup %2762  ;;  %v1015_v60 = vmul.f32 1.442695, %v1011_v57  ;;  %v1010_v61 = vpop.xlane.xlu1 %1009  ;;  %v1494_v63 = vsel %vm319_vm0, %v3185_v33, -inf }
 0x427   : > { %2766 = vpow2.f32 %v1017_v58  ;;  %v1014_v1 = vsub.f32 %v996_v13, %v1010_v61  ;;  %v1007_v2 = vpop.xlane.xlu0 %1006  ;;  %v757_v4 = vsel %vm319_vm0, %v3141_v59, 0.0 }
 0x428   : > { %2768 = vpow2.f32 %v1015_v60  ;;  %v1013_v5 = vsub.f32 %v991_v30, %v1007_v2  ;;  %758 = vadd.xlane.f32.xlu1 %v757_v4  ;;  %v3177_v30 = vadd.f32 %v1476_v54, %v3100_v14 }
 0x429   : > { %v1021_v7 = vmul.f32 1.442695, %v1014_v1 }
 0x42a   : > { %v3145_v8 = vpop.eup %2764  ;;  %v1019_v9 = vmul.f32 1.442695, %v1013_v5 }
 0x42b   : > { %2770 = vpow2.f32 %v1021_v7  ;;  %v754_v10 = vsel %vm319_vm0, %v3145_v8, 0.0 }
 0x42c   : > { %2772 = vpow2.f32 %v1019_v9  ;;  %755 = vadd.xlane.f32.xlu0 %v754_v10 }
 0x42e   : > { %v2499_v11 = vpop.f32.mrb[20].mxu1 }
 0x42f   : > { %v1740_v15 = vpop.f32.mrb[21].mxu1 }
 0x430   : > { %v3195_v14 = vadd.f32 %v3113_v18, %v1740_v15 }
 0x431   : > { %v3149_v16 = vpop.eup %2766 }
 0x432   : > { %v3151_v17 = vpop.eup %2768  ;;  %v2502_v19 = vpop.f32.mrb[22].mxu1  ;;  %v1026_v22 = vsel %vm319_vm0, %v3149_v16, 0.0  ;;  %v1759_v36 = vsel %vm319_vm0, %v3195_v14, -inf }
 0x433   : > { %v1750_v23 = vpop.f32.mrb[23].mxu1  ;;  %1027 = vadd.xlane.f32.xlu1 %v1026_v22  ;;  %v1023_v24 = vsel %vm319_vm0, %v3151_v17, 0.0  ;;  %v3200_v6 = vadd.f32 %v2502_v19, %v3120_v25 }
 0x434   : > { %1024 = vadd.xlane.f32.xlu0 %v1023_v24 }
 0x435   : > { %v3157_v26 = vpop.eup %2770  ;;  %v1768_v18 = vsel %vm319_vm0, %v3200_v6, -inf }
 0x436   : > { %v3159_v28 = vpop.eup %2772  ;;  %v1032_v20 = vsel %vm319_vm0, %v3157_v26, 0.0 }
 0x437   : > { %1033 = vadd.xlane.f32.xlu1 %v1032_v20  ;;  %v1029_v13 = vsel %vm319_vm0, %v3159_v28, 0.0 }
 0x438   : > { %1030 = vadd.xlane.f32.xlu0 %v1029_v13 }
 0x448   : > { %2708 = vrot.lane.b32.xlu1 %v2992_v3, %s2833_s26 }
 0x44c   : > { %2713 = vrot.lane.b32.xlu1 %v2985_v62, %s2834_s28 }
 0x44e   : > { %2703 = vrot.lane.b32.xlu0 %v2985_v62, %s2833_s26  ;;  %v1491_v62 = vsel %vm319_vm0, %v3177_v30, -inf }
 0x450   : > { %2718 = vrot.lane.b32.xlu1 %v2992_v3, %s2834_s28  ;;  %v3190_v3 = vadd.f32 %v2499_v11, %v3108_v12  ;;  %v3205_v12 = vadd.f32 %v3126_v27, %v1750_v23 }
 0x452   : > { %v1762_v35 = vsel %vm319_vm0, %v3190_v3, -inf  ;;  %v1765_v21 = vsel %vm319_vm0, %v3205_v12, -inf }
 0x46d   : > { %1486 = vmax.xlane.f32.xlu0 %v1485_v31 }
 0x471   : > { %1492 = vmax.xlane.f32.xlu0 %v1491_v62 }
 0x474   : > { %1489 = vmax.xlane.f32.xlu1 %v1488_v0 }
 0x475   : > { %1495 = vmax.xlane.f32.xlu0 %v1494_v63 }
 0x478   : > { %1763 = vmax.xlane.f32.xlu1 %v1762_v35 }
 0x479   : > { %1760 = vmax.xlane.f32.xlu0 %v1759_v36 }
 0x47c   : > { %1769 = vmax.xlane.f32.xlu1 %v1768_v18 }
 0x47d   : > { %1766 = vmax.xlane.f32.xlu0 %v1765_v21 }
 0x4b0   : > { %v753_v37 = vpop.xlane.xlu1 %752 }
 0x4b1   : > { %v750_v25 = vpop.xlane.xlu0 %749 }
 0x4b2   : > { %2774 = vrcp.f32 %v750_v25 }
 0x4b3   : > { %2776 = vrcp.f32 %v753_v37 }
 0x4b5   : > { %v759_v40 = vpop.xlane.xlu1 %758 }
 0x4b9   : > { %v756_v27 = vpop.xlane.xlu0 %755 }
 0x4ba   : > { %2778 = vrcp.f32 %v756_v27 }
 0x4bb   : > { %2780 = vrcp.f32 %v759_v40 }
 0x4bc   : > { %v2775_v39 = vpop.eup %2774 }
 0x4bd   : > { %v761_v41 = vmul.f32 %v2775_v39, %v3135_v49  ;;  %v2777_v60 = vpop.eup %2776 }
 0x4be   : > { %v763_v5 = vmul.f32 %v2777_v60, %v3133_v48  ;;  %v594_v60 = vld [vmem:[%s3368_s6 + $0x8] sm:$0xff] }
 0x4bf   : > { %2407 = vmatprep.mubr.msk.f32.mxu0 %vm319_vm0, %v761_v41 }
 0x4c0   : > { %v1028_v42 = vpop.xlane.xlu1 %1027 }
 0x4c1   : > { %v1025_v43 = vpop.xlane.xlu0 %1024 }
 0x4c2   : > { %2782 = vrcp.f32 %v1025_v43 }
 0x4c3   : > { %2784 = vrcp.f32 %v1028_v42 }
 0x4c4   : > { %v1034_v44 = vpop.xlane.xlu1 %1033  ;;  %v2779_v61 = vpop.eup %2778 }
 0x4c5   : > { %v1031_v45 = vpop.xlane.xlu0 %1030  ;;  %v2781_v7 = vpop.eup %2780  ;;  %v765_v9 = vmul.f32 %v2779_v61, %v3145_v8 }
 0x4c6   : > { %2786 = vrcp.f32 %v1031_v45  ;;  %v767_v15 = vmul.f32 %v2781_v7, %v3141_v59 }
 0x4c7   : > { %2788 = vrcp.f32 %v1034_v44 }
 0x4c8   : > { %v2709_v46 = vpop.permute.xlu1 %2708 }
 0x4c9   : > { %v2704_v47 = vpop.permute.xlu0 %2703  ;;  %v2711_v50 = vunpack.i.h.bf16 %v2709_v46  ;;  %v2710_v51 = vunpack.i.l.bf16 %v2709_v46 }
 0x4ca   : > { %v2706_v52 = vunpack.i.h.bf16 %v2704_v47  ;;  %v2705_v53 = vunpack.i.l.bf16 %v2704_v47 }
 0x4cb   : > { %v2561_v56 = vpack.c.bf16 %v2711_v50, %v2710_v51 }
 0x4cc   : > { %v2714_v54 = vpop.permute.xlu1 %2713  ;;  %v2557_v55 = vpack.c.bf16 %v2706_v52, %v2705_v53  ;;  %v2783_v10 = vpop.eup %2782 }
 0x4cd   : > { %v2716_v49 = vunpack.i.h.bf16 %v2714_v54  ;;  %v2715_v57 = vunpack.i.l.bf16 %v2714_v54  ;;  %v2785_v19 = vpop.eup %2784  ;;  %v1036_v22 = vmul.f32 %v2783_v10, %v3151_v17 }
 0x4ce   : > { %2558 = vmatprep.subr.bf16.mxu0 %v2557_v55  ;;  %v1038_v48 = vmul.f32 %v2785_v19, %v3149_v16 }
 0x4cf   : > { %2560 = vmatpush3.bf16.msra.mxu0 %v2557_v55  ;;  %v2577_v1 = vpack.c.bf16 %v2716_v49, %v2715_v57  ;;  %v596_v49 = vld [vmem:[%s3368_s6 + $0x18] sm:$0xff] }
 0x4d0   : > { %v2719_v58 = vpop.permute.xlu1 %2718  ;;  %2562 = vmatprep.subr.bf16.mxu0 %v2561_v56  ;;  %v2787_v23 = vpop.eup %2786 }
 0x4d1   : > { %v2721_v2 = vunpack.i.h.bf16 %v2719_v58  ;;  %v2720_v4 = vunpack.i.l.bf16 %v2719_v58  ;;  %v2789_v8 = vpop.eup %2788  ;;  %v1040_v24 = vmul.f32 %v2787_v23, %v3159_v28  ;;  %v593_v58 = vld [vmem:[%s3368_s6] sm:$0xff] }
 0x4d2   : > { %v1042_v59 = vmul.f32 %v2789_v8, %v3157_v26  ;;  %v3289_v61 = vpack.c.bf16 %v594_v60, %v593_v58 }
 0x4d3   : > { %2564 = vmatpush3.bf16.msra.mxu0 %v2561_v56  ;;  %v2581_v11 = vpack.c.bf16 %v2721_v2, %v2720_v4  ;;  %v595_v56 = vld [vmem:[%s3368_s6 + $0x10] sm:$0xff] }
 0x4d4   : > { %2578 = vmatprep.subr.bf16.mxu0 %v2577_v1  ;;  %v3275_v57 = vpack.c.bf16 %v596_v49, %v595_v56 }
 0x4d6   : > { %2408 = vmatmul.mubr.msk.f32.vlgmr.msra.gmra.mrb[0].mxu0 %vm319_vm0, %v763_v5 }
 0x4d7   : > { %2410 = vmatprep.mubr.msk.f32.mxu0 %vm319_vm0, %v765_v9  ;;  %2580 = vmatpush3.bf16.msra.mxu0 %v2577_v1 }
 0x4d8   : > { %2582 = vmatprep.subr.bf16.mxu0 %v2581_v11 }
 0x4da   : > { %2411 = vmatmul.mubr.msk.f32.gmra.mrb[2].mxu0 %vm319_vm0, %v767_v15 }
 0x4db   : > { %2584 = vmatpush3.bf16.msra.mxu0 %v2581_v11  ;;  %2435 = vmatprep.mubr.msk.f32.mxu0 %vm319_vm0, %v1036_v22 }
 0x4dc   : > { %2586 = vmatprep.subr.bf16.mxu0 %v3275_v57 }
 0x4de   : > { %2436 = vmatmul.mubr.msk.f32.vlgmr.msra.gmra.mrb[4].mxu0 %vm319_vm0, %v1038_v48 }
 0x4df   : > { %2438 = vmatprep.mubr.msk.f32.mxu0 %vm319_vm0, %v1040_v24  ;;  %2588 = vmatpush3.bf16.msra.mxu0 %v3275_v57 }
 0x4e0   : > { %2590 = vmatprep.subr.bf16.mxu0 %v3289_v61 }
 0x4e2   : > { %2439 = vmatmul.mubr.msk.f32.gmra.mrb[6].mxu0 %vm319_vm0, %v1042_v59 }
 0x4fa   : > { %v1487_v17 = vpop.xlane.xlu0 %1486 }
 0x4fb   : > { %v1497_v20 = vsub.f32 %v3174_v29, %v1487_v17 }
 0x4fd   : > { %v1501_v13 = vmul.f32 1.442695, %v1497_v20 }
 0x4fe   : > { %v1493_v31 = vpop.xlane.xlu0 %1492 }
 0x4ff   : > { %2790 = vpow2.f32 %v1501_v13  ;;  %v1499_v62 = vsub.f32 %v3177_v30, %v1493_v31 }
 0x501   : > { %v1505_v16 = vmul.f32 1.442695, %v1499_v62  ;;  %v1490_v0 = vpop.xlane.xlu1 %1489 }
 0x502   : > { %v1498_v28 = vsub.f32 %v3182_v32, %v1490_v0  ;;  %v1496_v63 = vpop.xlane.xlu0 %1495 }
 0x503   : > { %2792 = vpow2.f32 %v1505_v16  ;;  %v1500_v35 = vsub.f32 %v3185_v33, %v1496_v63 }
 0x504   : > { %v1503_v36 = vmul.f32 1.442695, %v1498_v28 }
 0x505   : > { %v1507_v26 = vmul.f32 1.442695, %v1500_v35  ;;  %v1764_v18 = vpop.xlane.xlu1 %1763 }
 0x506   : > { %2794 = vpow2.f32 %v1503_v36  ;;  %v1772_v21 = vsub.f32 %v3190_v3, %v1764_v18  ;;  %v1761_v29 = vpop.xlane.xlu0 %1760 }
 0x507   : > { %v1771_v25 = vsub.f32 %v3195_v14, %v1761_v29  ;;  %2796 = vpow2.f32 %v1507_v26 }
 0x508   : > { %v1777_v37 = vmul.f32 1.442695, %v1772_v21 }
 0x509   : > { %v3235_v30 = vpop.eup %2790  ;;  %v1775_v39 = vmul.f32 1.442695, %v1771_v25  ;;  %v1770_v40 = vpop.xlane.xlu1 %1769 }
 0x50a   : > { %v1774_v32 = vsub.f32 %v3200_v6, %v1770_v40  ;;  %v1767_v27 = vpop.xlane.xlu0 %1766  ;;  %v1509_v33 = vsel %vm319_vm0, %v3235_v30, 0.0 }
 0x50b   : > { %2798 = vpow2.f32 %v1775_v39  ;;  %v1773_v41 = vsub.f32 %v3205_v12, %v1767_v27  ;;  %1510 = vadd.xlane.f32.xlu0 %v1509_v33 }
 0x50c   : > { %2800 = vpow2.f32 %v1777_v37  ;;  %v1781_v3 = vmul.f32 1.442695, %v1774_v32 }
 0x50d   : > { %v3241_v42 = vpop.eup %2792  ;;  %v1779_v14 = vmul.f32 1.442695, %v1773_v41 }
 0x50e   : > { %v1515_v43 = vsel %vm319_vm0, %v3241_v42, 0.0 }
 0x50f   : > { %2802 = vpow2.f32 %v1779_v14  ;;  %1516 = vadd.xlane.f32.xlu0 %v1515_v43 }
 0x510   : > { %v3245_v44 = vpop.eup %2794  ;;  %2804 = vpow2.f32 %v1781_v3 }
 0x511   : > { %v1512_v6 = vsel %vm319_vm0, %v3245_v44, 0.0  ;;  %v3249_v45 = vpop.eup %2796 }
 0x512   : > { %1513 = vadd.xlane.f32.xlu1 %v1512_v6  ;;  %v1518_v46 = vsel %vm319_vm0, %v3249_v45, 0.0 }
 0x515   : > { %v3251_v12 = vpop.eup %2798 }
 0x516   : > { %v3255_v47 = vpop.eup %2800  ;;  %1519 = vadd.xlane.f32.xlu1 %v1518_v46  ;;  %v1783_v50 = vsel %vm319_vm0, %v3251_v12, 0.0 }
 0x517   : > { %1784 = vadd.xlane.f32.xlu0 %v1783_v50  ;;  %v1786_v52 = vsel %vm319_vm0, %v3255_v47, 0.0 }
 0x519   : > { %v3259_v51 = vpop.eup %2802 }
 0x51a   : > { %v3263_v53 = vpop.eup %2804  ;;  %1787 = vadd.xlane.f32.xlu1 %v1786_v52  ;;  %v1789_v54 = vsel %vm319_vm0, %v3259_v51, 0.0 }
 0x51b   : > { %1790 = vadd.xlane.f32.xlu0 %v1789_v54  ;;  %v1792_v55 = vsel %vm319_vm0, %v3263_v53, 0.0 }
 0x51e   : > { %1793 = vadd.xlane.f32.xlu1 %v1792_v55 }
 0x52f   : > { %2728 = vrot.lane.b32.xlu1 %v3042_v38, %s2833_s26 }
 0x531   : > { %2723 = vrot.lane.b32.xlu0 %v3035_v34, %s2833_s26 }
 0x533   : > { %2733 = vrot.lane.b32.xlu1 %v3035_v34, %s2834_s28 }
 0x537   : > { %2738 = vrot.lane.b32.xlu1 %v3042_v38, %s2834_s28 }
 0x598   : > { %v1511_v1 = vpop.xlane.xlu0 %1510 }
 0x599   : > { %2806 = vrcp.f32 %v1511_v1 }
 0x59c   : > { %v1517_v4 = vpop.xlane.xlu0 %1516 }
 0x59f   : > { %v1514_v2 = vpop.xlane.xlu1 %1513 }
 0x5a0   : > { %2808 = vrcp.f32 %v1514_v2 }
 0x5a1   : > { %2810 = vrcp.f32 %v1517_v4 }
 0x5a3   : > { %v1520_v5 = vpop.xlane.xlu1 %1519  ;;  %v2807_v0 = vpop.eup %2806 }
 0x5a4   : > { %v1785_v7 = vpop.xlane.xlu0 %1784  ;;  %2812 = vrcp.f32 %v1520_v5  ;;  %v1522_v18 = vmul.f32 %v2807_v0, %v3235_v30 }
 0x5a5   : > { %2814 = vrcp.f32 %v1785_v7 }
 0x5a7   : > { %v1788_v9 = vpop.xlane.xlu1 %1787 }
 0x5a8   : > { %v1791_v10 = vpop.xlane.xlu0 %1790  ;;  %2816 = vrcp.f32 %v1788_v9 }
 0x5a9   : > { %v2409_v11 = vpop.f32.mrb[0].mxu0  ;;  %2818 = vrcp.f32 %v1791_v10 }
 0x5aa   : > { %v858_v15 = vpop.f32.mrb[1].mxu0  ;;  %v2809_v26 = vpop.eup %2808 }
 0x5ab   : > { %v1794_v19 = vpop.xlane.xlu1 %1793  ;;  %v2811_v21 = vpop.eup %2810  ;;  %v1524_v39 = vmul.f32 %v2809_v26, %v3245_v44 }
 0x5ac   : > { %v2724_v22 = vpop.permute.xlu0 %2723  ;;  %2820 = vrcp.f32 %v1794_v19  ;;  %v1526_v32 = vmul.f32 %v2811_v21, %v3241_v42 }
 0x5ad   : > { %v2412_v23 = vpop.f32.mrb[2].mxu0  ;;  %v2726_v8 = vunpack.i.h.bf16 %v2724_v22  ;;  %v2725_v34 = vunpack.i.l.bf16 %v2724_v22 }
 0x5ae   : > { %v868_v48 = vpop.f32.mrb[3].mxu0  ;;  %v2813_v40 = vpop.eup %2812 }
 0x5af   : > { %v2729_v24 = vpop.permute.xlu1 %2728  ;;  %v2605_v38 = vpack.c.bf16 %v2726_v8, %v2725_v34  ;;  %v2815_v27 = vpop.eup %2814  ;;  %v1528_v30 = vmul.f32 %v2813_v40, %v3249_v45  ;;  %v2226_v45 = vld [vmem:[%s3369_s7] ss:$0 sm:$0xff] }
 0x5b0   : > { %v2731_v62 = vunpack.i.h.bf16 %v2729_v24  ;;  %v2730_v16 = vunpack.i.l.bf16 %v2729_v24  ;;  %v1796_v3 = vmul.f32 %v2815_v27, %v3251_v12 }
 0x5b1   : > { %v2437_v59 = vpop.f32.mrb[4].mxu0 }
 0x5b2   : > { %v1133_v17 = vpop.f32.mrb[5].mxu0  ;;  %v2609_v28 = vpack.c.bf16 %v2731_v62, %v2730_v16  ;;  %v2817_v41 = vpop.eup %2816 }
 0x5b3   : > { %2445 = vmatprep.mubr.msk.f32.mxu0 %vm618_vm1, %v1133_v17  ;;  %v2734_v31 = vpop.permute.xlu1 %2733  ;;  %v2819_v14 = vpop.eup %2818  ;;  %v1798_v42 = vmul.f32 %v2817_v41, %v3255_v47 }
 0x5b4   : > { %2446 = vmatmul.mubr.msk.f32.vlgmr.msra.gmra.mrb[8].mxu0 %vm618_vm1, %v2437_v59  ;;  %v2736_v63 = vunpack.i.h.bf16 %v2734_v31  ;;  %v2735_v35 = vunpack.i.l.bf16 %v2734_v31  ;;  %v1800_v44 = vmul.f32 %v2819_v14, %v3259_v51 }
 0x5b5   : > { %2592 = vmatpush3.bf16.msra.mxu0 %v3289_v61  ;;  %v2440_v20 = vpop.f32.mrb[6].mxu0 }
 0x5b6   : > { %2606 = vmatprep.subr.bf16.mxu0 %v2605_v38  ;;  %v1143_v13 = vpop.f32.mrb[7].mxu0  ;;  %v2625_v29 = vpack.c.bf16 %v2736_v63, %v2735_v35  ;;  %v2821_v43 = vpop.eup %2820 }
 0x5b7   : > { %2448 = vmatprep.mubr.msk.f32.mxu0 %vm618_vm1, %v1143_v13  ;;  %v2739_v36 = vpop.permute.xlu1 %2738  ;;  %v1802_v6 = vmul.f32 %v2821_v43, %v3263_v53 }
 0x5b8   : > { %2449 = vmatmul.mubr.msk.f32.gmra.mrb[10].mxu0 %vm618_vm1, %v2440_v20  ;;  %v2741_v25 = vunpack.i.h.bf16 %v2739_v36  ;;  %v2740_v37 = vunpack.i.l.bf16 %v2739_v36 }
 0x5b9   : > { %2455 = vmatprep.mubr.msk.f32.mxu0 %vm618_vm1, %v858_v15 }
 0x5ba   : > { %v2629_v33 = vpack.c.bf16 %v2741_v25, %v2740_v37 }
 0x5bc   : > { %2456 = vmatmul.mubr.msk.f32.vlgmr.msra.gmra.mrb[8].mxu0 %vm618_vm1, %v2409_v11 }
 0x5bd   : > { %2608 = vmatpush3.bf16.msra.mxu0 %v2605_v38  ;;  %2458 = vmatprep.mubr.msk.f32.mxu0 %vm618_vm1, %v868_v48 }
 0x5be   : > { %2610 = vmatprep.subr.bf16.mxu0 %v2609_v28 }
 0x5c0   : > { %2459 = vmatmul.mubr.msk.f32.gmra.mrb[10].mxu0 %vm618_vm1, %v2412_v23 }
 0x5c1   : > { %2612 = vmatpush3.bf16.msra.mxu0 %v2609_v28  ;;  %2483 = vmatprep.mubr.msk.f32.mxu0 %vm319_vm0, %v1522_v18 }
 0x5c2   : > { %2626 = vmatprep.subr.bf16.mxu0 %v2625_v29 }
 0x5c4   : > { %2484 = vmatmul.mubr.msk.f32.vlgmr.msra.gmra.mrb[12].mxu0 %vm319_vm0, %v1524_v39 }
 0x5c5   : > { %2628 = vmatpush3.bf16.msra.mxu0 %v2625_v29  ;;  %2486 = vmatprep.mubr.msk.f32.mxu0 %vm319_vm0, %v1526_v32 }
 0x5c6   : > { %2630 = vmatprep.subr.bf16.mxu0 %v2629_v33 }
 0x5c8   : > { %2487 = vmatmul.mubr.msk.f32.gmra.mrb[14].mxu0 %vm319_vm0, %v1528_v30 }
 0x5c9   : > { %2632 = vmatpush3.bf16.msra.mxu0 %v2629_v33  ;;  %2511 = vmatprep.mubr.msk.f32.mxu0 %vm319_vm0, %v1796_v3 }
 0x5ca   : > { %2634 = vmatprep.subr.bf16.mxu0 %v3275_v57 }
 0x5cc   : > { %2512 = vmatmul.mubr.msk.f32.vlgmr.msra.gmra.mrb[16].mxu0 %vm319_vm0, %v1798_v42 }
 0x5cd   : > { %2514 = vmatprep.mubr.msk.f32.mxu0 %vm319_vm0, %v1800_v44  ;;  %2636 = vmatpush3.bf16.msra.mxu0 %v3275_v57 }
 0x5ce   : > { %2638 = vmatprep.subr.bf16.mxu0 %v3289_v61 }
 0x5d0   : > { %2515 = vmatmul.mubr.msk.f32.gmra.mrb[18].mxu0 %vm319_vm0, %v1802_v6 }
 0x68f   : > { %v2457_v12 = vpop.f32.mrb[8].mxu0 }
 0x690   : > { %v1353_v46 = vadd.f32 %v2457_v12, %v2226_v45  ;;  %v1327_v47 = vpop.f32.mrb[9].mxu0 }
 0x691   : > { %v1352_v50 = vadd.f32 %v2226_v45, %v1327_v47 }
 0x692   : > { %1357 = vst.msk [vmem:[%s3332_s21 + $0x8] sm:$0xff] %vm319_vm0, %v1353_v46 }
 0x693   : > { %1356 = vst.msk [vmem:[%s3332_s21] sm:$0xff] %vm319_vm0, %v1352_v50  ;;  %v2460_v51 = vpop.f32.mrb[10].mxu0 }
 0x694   : > { %v1355_v52 = vadd.f32 %v2460_v51, %v2226_v45  ;;  %v1337_v53 = vpop.f32.mrb[11].mxu0 }
 0x695   : > { %v1354_v54 = vadd.f32 %v2226_v45, %v1337_v53 }
 0x696   : > { %1359 = vst.msk [vmem:[%s3332_s21 + $0x18] sm:$0xff] %vm319_vm0, %v1355_v52 }
 0x697   : > { %1358 = vst.msk [vmem:[%s3332_s21 + $0x10] sm:$0xff] %vm319_vm0, %v1354_v54  ;;  %v2485_v55 = vpop.f32.mrb[12].mxu0 }
 0x698   : > { %v1619_v56 = vpop.f32.mrb[13].mxu0 }
 0x69b   : > { %v2488_v49 = vpop.f32.mrb[14].mxu0 }
 0x69c   : > { %v1629_v57 = vpop.f32.mrb[15].mxu0 }
 0x69f   : > { %v2513_v58 = vpop.f32.mrb[16].mxu0 }
 0x6a0   : > { %v1893_v60 = vpop.f32.mrb[17].mxu0 }
 0x6a1   : > { %2521 = vmatprep.mubr.msk.f32.mxu0 %vm618_vm1, %v1893_v60 }
 0x6a2   : > { %2522 = vmatmul.mubr.msk.f32.vlgmr.msra.gmra.mrb[20].mxu0 %vm618_vm1, %v2513_v58 }
 0x6a3   : > { %v2516_v1 = vpop.f32.mrb[18].mxu0  ;;  %2640 = vmatpush3.bf16.msra.mxu0 %v3289_v61 }
 0x6a4   : > { %v1903_v2 = vpop.f32.mrb[19].mxu0 }
 0x6a5   : > { %2524 = vmatprep.mubr.msk.f32.mxu0 %vm618_vm1, %v1903_v2 }
 0x6a6   : > { %2525 = vmatmul.mubr.msk.f32.gmra.mrb[22].mxu0 %vm618_vm1, %v2516_v1 }
 0x6a7   : > { %2531 = vmatprep.mubr.msk.f32.mxu0 %vm618_vm1, %v1619_v56 }
 0x6aa   : > { %2532 = vmatmul.mubr.msk.f32.vlgmr.msra.gmra.mrb[20].mxu0 %vm618_vm1, %v2485_v55 }
 0x6ab   : > { %2534 = vmatprep.mubr.msk.f32.mxu0 %vm618_vm1, %v1629_v57 }
 0x6ae   : > { %2535 = vmatmul.mubr.msk.f32.gmra.mrb[22].mxu0 %vm618_vm1, %v2488_v49 }
 0x77d   : > { %v2533_v4 = vpop.f32.mrb[20].mxu0 }
 0x77e   : > { %v2107_v5 = vadd.f32 %v2533_v4, %v2226_v45  ;;  %v2087_v7 = vpop.f32.mrb[21].mxu0 }
 0x77f   : > { %v2106_v9 = vadd.f32 %v2226_v45, %v2087_v7 }
 0x780   : > { %2111 = vst.msk [vmem:[%s3332_s21 + $0x28] sm:$0xff] %vm319_vm0, %v2107_v5 }
 0x781   : > { %2110 = vst.msk [vmem:[%s3332_s21 + $0x20] sm:$0xff] %vm319_vm0, %v2106_v9  ;;  %v2536_v61 = vpop.f32.mrb[22].mxu0 }
 0x782   : > { %v2109_v10 = vadd.f32 %v2536_v61, %v2226_v45  ;;  %v2097_v11 = vpop.f32.mrb[23].mxu0 }
 0x783   : > { %v2108_v15 = vadd.f32 %v2226_v45, %v2097_v11 }
 0x784   : > { %2113 = vst.msk [vmem:[%s3332_s21 + $0x38] sm:$0xff] %vm319_vm0, %v2109_v10 }
 0x785   : > { %2112 = vst.msk [vmem:[%s3332_s21 + $0x30] sm:$0xff] %vm319_vm0, %v2108_v15 }
 0x786 PF: > { %s18_s27 = sadd.s32 1, %s2828_s27  }
 0x787   : > { %p15_p4 = scmp.ge.s32.totalorder %s18_s27, 4  }
 0x789   :  { %17 = sbr.rel (!%p15_p4) target bundleno = 1 (0x1), region = 83 }

// kernel: swin_forward.13
= control target key start
LH: loop header
LB: loop body
LE: loop exit
PB: predicated region body
PF: predicated region fallthrough
CT: control target
= control target key end

     0   :  { %s1242_s24 = smov 0   ;;  %s1561_s0 = inlined_call_operand.vmem [shape: f32[128,32], index: 0, kind: input, shape index: {}]   ;;  %s1562_s1 = inlined_call_operand.vmem [shape: f32[1,32], index: 1, kind: input, shape index: {}]   ;;  %s1563_s2 = inlined_call_operand.vmem [shape: f32[1,32], index: 2, kind: input, shape index: {}]   ;;  %s1564_s3 = inlined_call_operand.vmem [shape: f32[32,64], index: 3, kind: input, shape index: {}]   ;;  %s1565_s4 = inlined_call_operand.vmem [shape: f32[1,64], index: 4, kind: input, shape index: {}]   ;;  %s1566_s5 = inlined_call_operand.vmem [shape: f32[64,32], index: 5, kind: input, shape index: {}]   ;;  %s1567_s6 = inlined_call_operand.vmem [shape: f32[1,32], index: 6, kind: input, shape index: {}]   ;;  %s1568_s7 = inlined_call_operand.vmem [shape: f32[128,32], index: 7, kind: output, shape index: {}]  }
   0x1 LB: > { %s999_s25 = sadd.s32 4294967295, %s1200_s24   ;;  %p1003_p0 = scmp.ge.s32.totalorder %s1200_s24, 1  ;;  %s1200_s24 = sphi %s1242_s24, %s17_s24  }
   0x2   : > { %p238_p1 = scmp.lt.s32.totalorder %s1200_s24, 3 }
   0x4   : > { %p239_p2 = pnand %p1003_p0, %p238_p1 }
   0x5   : > { %s1004_s26 = sshll.u32 (!%p239_p2), %s999_s25, 3  ;;  %vm292_vm0 = vcmask (!%p239_p2), 261120   ;;  %v426_v56 = vld [vmem:[%s1564_s3] sm:$0xff] (!%p239_p2)  ;;  %v427_v57 = vld [vmem:[%s1564_s3 + $0x8] sm:$0xff] (!%p239_p2)  ;;  %v428_v59 = vld [vmem:[%s1564_s3 + $0x10] sm:$0xff] (!%p239_p2)  ;;  %vm797_vm3 = vcmask (!%p239_p2), 523264  }
   0x6   : > { %242 = sbr.rel (%p239_p2) target bundleno = 832 (0x340), region = 48  ;;  %p271_p3 = scmp.lt.s32.totalorder (!%p239_p2), %s1004_s26, 15  ;;  %v1106_v58 = vpack.c.bf16 (!%p239_p2), %v427_v57, %v426_v56  ;;  %v429_v60 = vld [vmem:[%s1564_s3 + $0x18] sm:$0xff] (!%p239_p2) }
   0x7   : > { %v1110_v61 = vpack.c.bf16 (!%p239_p2), %v429_v60, %v428_v59 }
   0x8   : > { %1107 = vmatprep.subr.bf16.mxu0 (!%p239_p2), %v1106_v58 }
   0x9   : > { %1109 = vmatpush3.bf16.msra.mxu0 (!%p239_p2), %v1106_v58 }
   0xa   : > { %1111 = vmatprep.subr.bf16.mxu0 (!%p239_p2), %v1110_v61 }
   0xd   : > { %s1570_s26 = smov (!%p271_p3, %s1004_s26), 15  ;;  %1113 = vmatpush3.bf16.msra.mxu0 %v1110_v61 }
   0xe   : > { %s1005_s27 = sshll.u32 %s1570_s26, 3 }
   0xf   : > { %s274_s30 = scalar_lea.vmem %s1561_s0, %s1005_s27  ;;  %s280_s22 = scalar_lea.vmem %s1568_s7, %s1005_s27 }
  0x10   : > { %v1258_v0 = vld [vmem:[%s274_s30] sm:$0xff]  ;;  %v1260_v1 = vld [vmem:[%s274_s30 + $0x10] sm:$0xff]  ;;  %v1262_v2 = vld [vmem:[%s274_s30 + $0x8] sm:$0xff] }
  0x11   : > { %v293_v3 = vsel %vm292_vm0, %v1258_v0, 0.0  ;;  %v299_v4 = vsel %vm292_vm0, %v1260_v1, 0.0  ;;  %v1268_v5 = vld [vmem:[%s274_s30 + $0x18] sm:$0xff]  ;;  %v296_v6 = vsel %vm292_vm0, %v1262_v2, 0.0  ;;  %v1274_v8 = vld [vmem:[%s274_s30 + $0x20] sm:$0xff]  ;;  %v1276_v9 = vld [vmem:[%s274_s30 + $0x28] sm:$0xff] }
  0x12   : > { %294 = vadd.xlane.f32.xlu0 %v293_v3  ;;  %300 = vadd.xlane.f32.xlu1 %v299_v4  ;;  %v302_v7 = vsel %vm292_vm0, %v1268_v5, 0.0  ;;  %v305_v10 = vsel %vm292_vm0, %v1274_v8, 0.0  ;;  %v308_v11 = vsel %vm292_vm0, %v1276_v9, 0.0  ;;  %v1282_v12 = vld [vmem:[%s274_s30 + $0x30] sm:$0xff]  ;;  %v1284_v13 = vld [vmem:[%s274_s30 + $0x38] sm:$0xff] }
  0x13   : > { %v311_v14 = vsel %vm292_vm0, %v1282_v12, 0.0  ;;  %v314_v15 = vsel %vm292_vm0, %v1284_v13, 0.0 }
  0x16   : > { %297 = vadd.xlane.f32.xlu0 %v296_v6  ;;  %303 = vadd.xlane.f32.xlu1 %v302_v7 }
  0x1a   : > { %306 = vadd.xlane.f32.xlu0 %v305_v10  ;;  %309 = vadd.xlane.f32.xlu1 %v308_v11 }
  0x1e   : > { %312 = vadd.xlane.f32.xlu0 %v311_v14  ;;  %315 = vadd.xlane.f32.xlu1 %v314_v15 }
  0x9f   : > { %v295_v16 = vpop.xlane.xlu0 %294  ;;  %v301_v17 = vpop.xlane.xlu1 %300 }
  0xa0   : > { %v318_v18 = vmul.f32 0.03125, %v295_v16  ;;  %v320_v19 = vmul.f32 0.03125, %v301_v17 }
  0xa2   : > { %v1291_v20 = vsub.f32 %v1258_v0, %v318_v18  ;;  %v1294_v21 = vsub.f32 %v1260_v1, %v320_v19 }
  0xa3   : > { %v298_v22 = vpop.xlane.xlu0 %297  ;;  %v304_v23 = vpop.xlane.xlu1 %303 }
  0xa4   : > { %v319_v24 = vmul.f32 0.03125, %v298_v22  ;;  %v321_v25 = vmul.f32 0.03125, %v304_v23  ;;  %v334_v26 = vmul.f32 %v1291_v20, %v1291_v20  ;;  %v336_v27 = vmul.f32 %v1294_v21, %v1294_v21 }
  0xa6   : > { %v1301_v28 = vsub.f32 %v1262_v2, %v319_v24  ;;  %v1304_v29 = vsub.f32 %v1268_v5, %v321_v25  ;;  %v342_v30 = vsel %vm292_vm0, %v334_v26, 0.0  ;;  %v348_v33 = vsel %vm292_vm0, %v336_v27, 0.0 }
  0xa7   : > { %343 = vadd.xlane.f32.xlu0 %v342_v30  ;;  %v307_v31 = vpop.xlane.xlu0 %306  ;;  %v310_v32 = vpop.xlane.xlu1 %309 }
  0xa8   : > { %v322_v34 = vmul.f32 0.03125, %v307_v31  ;;  %v323_v35 = vmul.f32 0.03125, %v310_v32  ;;  %v335_v36 = vmul.f32 %v1301_v28, %v1301_v28  ;;  %v337_v37 = vmul.f32 %v1304_v29, %v1304_v29  ;;  %v1008_v32 = vld [vmem:[%s1562_s1] ss:$0 sm:$0xff] }
  0xaa   : > { %v1313_v38 = vsub.f32 %v1274_v8, %v322_v34  ;;  %v1316_v39 = vsub.f32 %v1276_v9, %v323_v35  ;;  %v345_v40 = vsel %vm292_vm0, %v335_v36, 0.0  ;;  %v351_v43 = vsel %vm292_vm0, %v337_v37, 0.0  ;;  %v1009_v36 = vld [vmem:[%s1563_s2] ss:$0 sm:$0xff] }
  0xab   : > { %349 = vadd.xlane.f32.xlu0 %v348_v33  ;;  %346 = vadd.xlane.f32.xlu1 %v345_v40  ;;  %v313_v41 = vpop.xlane.xlu0 %312  ;;  %v316_v42 = vpop.xlane.xlu1 %315 }
  0xac   : > { %v324_v44 = vmul.f32 0.03125, %v313_v41  ;;  %v325_v45 = vmul.f32 0.03125, %v316_v42  ;;  %v338_v46 = vmul.f32 %v1313_v38, %v1313_v38  ;;  %v339_v47 = vmul.f32 %v1316_v39, %v1316_v39 }
  0xae   : > { %v1325_v48 = vsub.f32 %v1282_v12, %v324_v44  ;;  %v1328_v49 = vsub.f32 %v1284_v13, %v325_v45  ;;  %v354_v50 = vsel %vm292_vm0, %v338_v46, 0.0  ;;  %v357_v51 = vsel %vm292_vm0, %v339_v47, 0.0 }
  0xaf   : > { %352 = vadd.xlane.f32.xlu1 %v351_v43  ;;  %355 = vadd.xlane.f32.xlu0 %v354_v50 }
  0xb0   : > { %v340_v52 = vmul.f32 %v1325_v48, %v1325_v48  ;;  %v341_v53 = vmul.f32 %v1328_v49, %v1328_v49 }
  0xb2   : > { %v360_v54 = vsel %vm292_vm0, %v340_v52, 0.0  ;;  %v363_v55 = vsel %vm292_vm0, %v341_v53, 0.0 }
  0xb3   : > { %358 = vadd.xlane.f32.xlu1 %v357_v51  ;;  %361 = vadd.xlane.f32.xlu0 %v360_v54 }
  0xb7   : > { %364 = vadd.xlane.f32.xlu1 %v363_v55 }
 0x134   : > { %v344_v62 = vpop.xlane.xlu0 %343 }
 0x135   : > { %v366_v63 = vmul.f32 0.03125, %v344_v62 }
 0x137   : > { %v374_v3 = vadd.f32 1e-05, %v366_v63 }
 0x138   : > { %v347_v4 = vpop.xlane.xlu1 %346  ;;  %v350_v6 = vpop.xlane.xlu0 %349 }
 0x139   : > { %1146 = vrsqrt.f32 %v374_v3  ;;  %v367_v7 = vmul.f32 0.03125, %v347_v4  ;;  %v368_v10 = vmul.f32 0.03125, %v350_v6  ;;  %v783_v6 = vld [vmem:[%s1566_s5 + $0x8] sm:$0xff] }
 0x13b   : > { %v375_v11 = vadd.f32 1e-05, %v367_v7  ;;  %v376_v14 = vadd.f32 1e-05, %v368_v10  ;;  %v785_v10 = vld [vmem:[%s1566_s5 + $0x18] sm:$0xff] }
 0x13c   : > { %v353_v15 = vpop.xlane.xlu1 %352  ;;  %v356_v16 = vpop.xlane.xlu0 %355 }
 0x13d   : > { %1148 = vrsqrt.f32 %v375_v11  ;;  %v369_v17 = vmul.f32 0.03125, %v353_v15  ;;  %v370_v18 = vmul.f32 0.03125, %v356_v16  ;;  %v787_v15 = vld [vmem:[%s1566_s5 + $0x28] sm:$0xff] }
 0x13e   : > { %1150 = vrsqrt.f32 %v376_v14  ;;  %v786_v14 = vld [vmem:[%s1566_s5 + $0x20] sm:$0xff] }
 0x13f   : > { %v377_v19 = vadd.f32 1e-05, %v369_v17  ;;  %v378_v22 = vadd.f32 1e-05, %v370_v18  ;;  %v1122_v16 = vpack.c.bf16 %v787_v15, %v786_v14  ;;  %v788_v17 = vld [vmem:[%s1566_s5 + $0x30] sm:$0xff]  ;;  %v789_v18 = vld [vmem:[%s1566_s5 + $0x38] sm:$0xff] }
 0x140   : > { %v359_v23 = vpop.xlane.xlu1 %358  ;;  %v362_v24 = vpop.xlane.xlu0 %361 }
 0x141   : > { %1152 = vrsqrt.f32 %v377_v19  ;;  %v371_v25 = vmul.f32 0.03125, %v359_v23  ;;  %v372_v26 = vmul.f32 0.03125, %v362_v24  ;;  %v1126_v19 = vpack.c.bf16 %v789_v18, %v788_v17 }
 0x142   : > { %1154 = vrsqrt.f32 %v378_v22  ;;  %v1010_v22 = vld [vmem:[%s1565_s4] ss:$0 sm:$0xff] }
 0x143   : > { %v1147_v27 = vpop.eup %1146  ;;  %v379_v30 = vadd.f32 1e-05, %v371_v25  ;;  %v380_v31 = vadd.f32 1e-05, %v372_v26 }
 0x144   : > { %v365_v33 = vpop.xlane.xlu1 %364  ;;  %v390_v34 = vmul.f32 %v1147_v27, %v1291_v20 }
 0x145   : > { %1156 = vrsqrt.f32 %v379_v30  ;;  %v373_v35 = vmul.f32 0.03125, %v365_v33 }
 0x146   : > { %1158 = vrsqrt.f32 %v380_v31  ;;  %v404_v37 = vmul.f32 %v1008_v32, %v390_v34 }
 0x147   : > { %v1149_v40 = vpop.eup %1148  ;;  %v381_v41 = vadd.f32 1e-05, %v373_v35 }
 0x148   : > { %v1151_v42 = vpop.eup %1150  ;;  %v418_v43 = vadd.f32 %v1009_v36, %v404_v37  ;;  %v391_v44 = vmul.f32 %v1149_v40, %v1301_v28 }
 0x149   : > { %1160 = vrsqrt.f32 %v381_v41  ;;  %v392_v45 = vmul.f32 %v1151_v42, %v1294_v21 }
 0x14a   : > { %1066 = vmatprep.mubr.msk.f32.mxu0 %vm292_vm0, %v418_v43  ;;  %v405_v20 = vmul.f32 %v1008_v32, %v391_v44 }
 0x14b   : > { %v1153_v46 = vpop.eup %1152  ;;  %v406_v47 = vmul.f32 %v1008_v32, %v392_v45 }
 0x14c   : > { %v1155_v50 = vpop.eup %1154  ;;  %v419_v51 = vadd.f32 %v1009_v36, %v405_v20  ;;  %v393_v52 = vmul.f32 %v1153_v46, %v1304_v29 }
 0x14d   : > { %v420_v53 = vadd.f32 %v1009_v36, %v406_v47  ;;  %v394_v54 = vmul.f32 %v1155_v50, %v1313_v38 }
 0x14e   : > { %1067 = vmatmul.mubr.msk.f32.vlgmr.msra.gmra.mrb[0].mxu0 %vm292_vm0, %v419_v51  ;;  %v407_v55 = vmul.f32 %v1008_v32, %v393_v52 }
 0x14f   : > { %v1157_v56 = vpop.eup %1156  ;;  %1069 = vmatprep.mubr.msk.f32.mxu0 %vm292_vm0, %v420_v53  ;;  %v408_v28 = vmul.f32 %v1008_v32, %v394_v54 }
 0x150   : > { %v1159_v21 = vpop.eup %1158  ;;  %v421_v57 = vadd.f32 %v1009_v36, %v407_v55  ;;  %v395_v58 = vmul.f32 %v1157_v56, %v1316_v39 }
 0x151   : > { %v422_v59 = vadd.f32 %v1009_v36, %v408_v28  ;;  %v396_v60 = vmul.f32 %v1159_v21, %v1325_v48  ;;  %v782_v48 = vld [vmem:[%s1566_s5] sm:$0xff] }
 0x152   : > { %1070 = vmatmul.mubr.msk.f32.gmra.mrb[2].mxu0 %vm292_vm0, %v421_v57  ;;  %v409_v29 = vmul.f32 %v1008_v32, %v395_v58  ;;  %v1114_v7 = vpack.c.bf16 %v783_v6, %v782_v48 }
 0x153   : > { %v1161_v61 = vpop.eup %1160  ;;  %1072 = vmatprep.mubr.msk.f32.mxu0 %vm292_vm0, %v422_v59  ;;  %v410_v38 = vmul.f32 %v1008_v32, %v396_v60 }
 0x154   : > { %v423_v62 = vadd.f32 %v1009_v36, %v409_v29  ;;  %v397_v63 = vmul.f32 %v1161_v61, %v1328_v49  ;;  %1115 = vmatprep.subr.bf16.mxu0 %v1114_v7  ;;  %1130 = vmatprep.subr.bf16.mxu1 %v1114_v7  ;;  %v784_v49 = vld [vmem:[%s1566_s5 + $0x10] sm:$0xff] }
 0x155   : > { %v424_v3 = vadd.f32 %v1009_v36, %v410_v38  ;;  %1117 = vmatpush3.bf16.msra.mxu0 %v1114_v7  ;;  %1134 = vmatpush3.bf16.msra.mxu1 %v1114_v7  ;;  %v1118_v11 = vpack.c.bf16 %v785_v10, %v784_v49 }
 0x156   : > { %1073 = vmatmul.mubr.msk.f32.gmra.mrb[4].mxu0 %vm292_vm0, %v423_v62  ;;  %v411_v4 = vmul.f32 %v1008_v32, %v397_v63 }
 0x157   : > { %1075 = vmatprep.mubr.msk.f32.mxu0 %vm292_vm0, %v424_v3  ;;  %1119 = vmatprep.subr.bf16.mxu0 %v1118_v11 }
 0x158   : > { %v425_v39 = vadd.f32 %v1009_v36, %v411_v4  ;;  %1131 = vmatprep.subr.bf16.mxu1 %v1118_v11 }
 0x159   : > { %1121 = vmatpush3.bf16.msra.mxu0 %v1118_v11  ;;  %1135 = vmatpush3.bf16.msra.mxu1 %v1118_v11 }
 0x15a   : > { %1076 = vmatmul.mubr.msk.f32.gmra.mrb[6].mxu0 %vm292_vm0, %v425_v39  ;;  %1123 = vmatprep.subr.bf16.mxu0 %v1122_v16 }
 0x15b   : > { %1132 = vmatprep.subr.bf16.mxu1 %v1122_v16 }
 0x15d   : > { %1125 = vmatpush3.bf16.msra.mxu0 %v1122_v16  ;;  %1136 = vmatpush3.bf16.msra.mxu1 %v1122_v16 }
 0x15e   : > { %1127 = vmatprep.subr.bf16.mxu0 %v1126_v19  ;;  %1133 = vmatprep.subr.bf16.mxu1 %v1126_v19 }
 0x161   : > { %1129 = vmatpush3.bf16.msra.mxu0 %v1126_v19  ;;  %1137 = vmatpush3.bf16.msra.mxu1 %v1126_v19 }
 0x221   : > { %v1068_v23 = vpop.f32.mrb[0].mxu0 }
 0x222   : > { %v1399_v24 = vadd.f32 %v1068_v23, %v1010_v22  ;;  %v527_v25 = vpop.f32.mrb[1].mxu0 }
 0x223   : > { %v1401_v26 = vadd.f32 %v1010_v22, %v527_v25 }
 0x224   : > { %v1404_v27 = vmul.f32 0.70710677, %v1399_v24 }
 0x225   : > { %v1407_v30 = vmul.f32 0.70710677, %v1401_v26  ;;  %v1071_v31 = vpop.f32.mrb[2].mxu0 }
 0x226   : > { %v583_v32 = vand.u32 2147483647, %v1404_v27  ;;  %v1410_v33 = vadd.f32 %v1071_v31, %v1010_v22  ;;  %v537_v34 = vpop.f32.mrb[3].mxu0  ;;  %vm743_vm1 = vcmp.lt.f32.partialorder %v1404_v27, 0.0  ;;  %v567_v27 = vmul.f32 0.5, %v1399_v24 }
 0x227   : > { %v582_v35 = vand.u32 2147483647, %v1407_v30  ;;  %v1413_v36 = vadd.f32 %v1010_v22, %v537_v34  ;;  %vm742_vm2 = vcmp.lt.f32.partialorder %v1407_v30, 0.0 }
 0x228   : > { %v591_v37 = vmul.f32 0.3275911, %v583_v32  ;;  %v1416_v40 = vmul.f32 0.70710677, %v1410_v33  ;;  %v695_v53 = vsub.f32 0.0, %v583_v32 }
 0x229   : > { %v590_v41 = vmul.f32 0.3275911, %v582_v35  ;;  %v1419_v42 = vmul.f32 0.70710677, %v1413_v36  ;;  %v1074_v45 = vpop.f32.mrb[4].mxu0  ;;  %v694_v58 = vsub.f32 0.0, %v582_v35 }
 0x22a   : > { %v599_v43 = vadd.f32 1.0, %v591_v37  ;;  %v585_v44 = vand.u32 2147483647, %v1416_v40  ;;  %v547_v47 = vpop.f32.mrb[5].mxu0  ;;  %v1423_v55 = vadd.f32 %v1074_v45, %v1010_v22  ;;  %v703_v60 = vmul.f32 %v695_v53, %v583_v32 }
 0x22b   : > { %v598_v20 = vadd.f32 1.0, %v590_v41  ;;  %v584_v46 = vand.u32 2147483647, %v1419_v42  ;;  %v1425_v21 = vadd.f32 %v1010_v22, %v547_v47  ;;  %v702_v10 = vmul.f32 %v694_v58, %v582_v35 }
 0x22c   : > { %1162 = vrcp.f32 %v599_v43  ;;  %v593_v50 = vmul.f32 0.3275911, %v585_v44  ;;  %v1428_v57 = vmul.f32 0.70710677, %v1423_v55  ;;  %v697_v4 = vsub.f32 0.0, %v585_v44 }
 0x22d   : > { %1164 = vrcp.f32 %v598_v20  ;;  %v592_v51 = vmul.f32 0.3275911, %v584_v46  ;;  %v1077_v52 = vpop.f32.mrb[6].mxu0  ;;  %v1431_v59 = vmul.f32 0.70710677, %v1425_v21  ;;  %v696_v39 = vsub.f32 0.0, %v584_v46 }
 0x22e   : > { %v601_v54 = vadd.f32 1.0, %v593_v50  ;;  %v557_v56 = vpop.f32.mrb[7].mxu0  ;;  %v587_v29 = vand.u32 2147483647, %v1428_v57  ;;  %v1434_v61 = vadd.f32 %v1077_v52, %v1010_v22  ;;  %v712_v49 = vmul.f32 1.442695, %v703_v60 }
 0x22f   : > { %v600_v28 = vadd.f32 1.0, %v592_v51  ;;  %v586_v38 = vand.u32 2147483647, %v1431_v59  ;;  %v1437_v62 = vadd.f32 %v1010_v22, %v557_v56  ;;  %v705_v32 = vmul.f32 %v697_v4, %v585_v44 }
 0x230   : > { %1166 = vrcp.f32 %v601_v54  ;;  %v595_v63 = vmul.f32 0.3275911, %v587_v29  ;;  %v1440_v3 = vmul.f32 0.70710677, %v1434_v61  ;;  %v699_v17 = vsub.f32 0.0, %v587_v29 }
 0x231   : > { %1168 = vrcp.f32 %v600_v28  ;;  %v594_v48 = vmul.f32 0.3275911, %v586_v38  ;;  %v1443_v6 = vmul.f32 0.70710677, %v1437_v62  ;;  %v698_v23 = vsub.f32 0.0, %v586_v38 }
 0x232   : > { %v603_v11 = vadd.f32 1.0, %v595_v63  ;;  %v589_v14 = vand.u32 2147483647, %v1440_v3  ;;  %v704_v34 = vmul.f32 %v696_v39, %v584_v46  ;;  %v710_v47 = vmul.f32 1.442695, %v702_v10 }
 0x233   : > { %v602_v18 = vadd.f32 1.0, %v594_v48  ;;  %v588_v19 = vand.u32 2147483647, %v1443_v6  ;;  %v707_v51 = vmul.f32 %v699_v17, %v587_v29  ;;  %v706_v54 = vmul.f32 %v698_v23, %v586_v38 }
 0x234   : > { %1170 = vrcp.f32 %v603_v11  ;;  %v597_v25 = vmul.f32 0.3275911, %v589_v14  ;;  %v701_v43 = vsub.f32 0.0, %v589_v14  ;;  %v716_v28 = vmul.f32 1.442695, %v705_v32 }
 0x235   : > { %1172 = vrcp.f32 %v602_v18  ;;  %v596_v45 = vmul.f32 0.3275911, %v588_v19  ;;  %v714_v60 = vmul.f32 1.442695, %v704_v34  ;;  %v720_v38 = vmul.f32 1.442695, %v707_v51 }
 0x236   : > { %v1445_v7 = vpop.eup %1162  ;;  %v605_v41 = vadd.f32 1.0, %v597_v25  ;;  %v709_v63 = vmul.f32 %v701_v43, %v589_v14  ;;  %v718_v10 = vmul.f32 1.442695, %v706_v54  ;;  %v700_v11 = vsub.f32 0.0, %v588_v19 }
 0x237   : > { %v1448_v15 = vpop.eup %1164  ;;  %v623_v16 = vmul.f32 1.0614054, %v1445_v7  ;;  %v604_v44 = vadd.f32 1.0, %v596_v45  ;;  %v1467_v14 = vmul.f32 0.5, %v1401_v26  ;;  %vm745_vm4 = vcmp.lt.f32.partialorder %v1416_v40, 0.0 }
 0x238   : > { %v622_v22 = vmul.f32 1.0614054, %v1448_v15  ;;  %1174 = vrcp.f32 %v605_v41  ;;  %v724_v23 = vmul.f32 1.442695, %v709_v63  ;;  %v708_v26 = vmul.f32 %v700_v11, %v588_v19 }
 0x239   : > { %v631_v31 = vadd.f32 -1.4531521, %v623_v16  ;;  %1176 = vpow2.f32 %v712_v49  ;;  %vm744_vm5 = vcmp.lt.f32.partialorder %v1419_v42, 0.0  ;;  %vm747_vm6 = vcmp.lt.f32.partialorder %v1428_v57, 0.0 }
 0x23a   : > { %v1453_v35 = vpop.eup %1166  ;;  %v630_v37 = vadd.f32 -1.4531521, %v622_v22  ;;  %1178 = vrcp.f32 %v604_v44  ;;  %vm746_vm7 = vcmp.lt.f32.partialorder %v1431_v59, 0.0  ;;  %v570_v42 = vmul.f32 0.5, %v1425_v21 }
 0x23b   : > { %v639_v20 = vmul.f32 %v1445_v7, %v631_v31  ;;  %v625_v50 = vmul.f32 1.0614054, %v1453_v35  ;;  %v1457_v52 = vpop.eup %1168  ;;  %1180 = vpow2.f32 %v710_v47  ;;  %vm749_vm8 = vcmp.lt.f32.partialorder %v1440_v3, 0.0 }
 0x23c   : > { %v638_v53 = vmul.f32 %v1448_v15, %v630_v37  ;;  %v624_v39 = vmul.f32 1.0614054, %v1457_v52  ;;  %1182 = vpow2.f32 %v716_v28  ;;  %v571_v59 = vmul.f32 0.5, %v1423_v55 }
 0x23d   : > { %v647_v46 = vadd.f32 1.4214138, %v639_v20  ;;  %v633_v56 = vadd.f32 -1.4531521, %v625_v50  ;;  %1184 = vpow2.f32 %v714_v60  ;;  %vm748_vm9 = vcmp.lt.f32.partialorder %v1443_v6, 0.0 }
 0x23e   : > { %v646_v58 = vadd.f32 1.4214138, %v638_v53  ;;  %v632_v17 = vadd.f32 -1.4531521, %v624_v39  ;;  %v1464_v18 = vpop.eup %1170  ;;  %1186 = vpow2.f32 %v720_v38  ;;  %v572_v3 = vmul.f32 0.5, %v1437_v62 }
 0x23f   : > { %v655_v4 = vmul.f32 %v1445_v7, %v647_v46  ;;  %v641_v29 = vmul.f32 %v1453_v35, %v633_v56  ;;  %v1469_v25 = vpop.eup %1172  ;;  %v627_v34 = vmul.f32 1.0614054, %v1464_v18  ;;  %1188 = vpow2.f32 %v718_v10  ;;  %v1019_v6 = vld [vmem:[%s1567_s6] ss:$0 sm:$0xff] }
 0x240   : > { %v654_v48 = vmul.f32 %v1448_v15, %v646_v58  ;;  %v640_v37 = vmul.f32 %v1457_v52, %v632_v17  ;;  %v626_v43 = vmul.f32 1.0614054, %v1469_v25  ;;  %1190 = vpow2.f32 %v724_v23 }
 0x241   : > { %v663_v16 = vadd.f32 -0.28449672, %v655_v4  ;;  %v649_v49 = vadd.f32 1.4214138, %v641_v29  ;;  %v635_v47 = vadd.f32 -1.4531521, %v627_v34 }
 0x242   : > { %v662_v22 = vadd.f32 -0.28449672, %v654_v48  ;;  %v1477_v50 = vpop.eup %1174  ;;  %v634_v53 = vadd.f32 -1.4531521, %v626_v43  ;;  %v648_v54 = vadd.f32 1.4214138, %v640_v37 }
 0x243   : > { %v671_v31 = vmul.f32 %v1445_v7, %v663_v16  ;;  %v657_v32 = vmul.f32 %v1453_v35, %v649_v49  ;;  %v1177_v44 = vpop.eup %1176  ;;  %v643_v19 = vmul.f32 %v1464_v18, %v635_v47  ;;  %v629_v28 = vmul.f32 1.0614054, %v1477_v50 }
 0x244   : > { %v670_v41 = vmul.f32 %v1448_v15, %v662_v22  ;;  %v1485_v58 = vpop.eup %1178  ;;  %v642_v63 = vmul.f32 %v1469_v25, %v634_v53  ;;  %v722_v4 = vmul.f32 1.442695, %v708_v26  ;;  %v656_v29 = vmul.f32 %v1457_v52, %v648_v54 }
 0x245   : > { %v679_v45 = vadd.f32 0.2548296, %v671_v31  ;;  %v665_v20 = vadd.f32 -0.28449672, %v657_v32  ;;  %v1181_v39 = vpop.eup %1180  ;;  %v651_v38 = vadd.f32 1.4214138, %v643_v19 }
 0x246   : > { %v678_v51 = vadd.f32 0.2548296, %v670_v41  ;;  %v637_v10 = vadd.f32 -1.4531521, %v629_v28  ;;  %v650_v16 = vadd.f32 1.4214138, %v642_v63  ;;  %v1183_v22 = vpop.eup %1182  ;;  %1192 = vpow2.f32 %v722_v4 }
 0x247   : > { %v687_v46 = vmul.f32 %v1445_v7, %v679_v45  ;;  %v673_v56 = vmul.f32 %v1453_v35, %v665_v20  ;;  %v628_v49 = vmul.f32 1.0614054, %v1485_v58  ;;  %v664_v17 = vadd.f32 -0.28449672, %v656_v29  ;;  %v1185_v34 = vpop.eup %1184 }
 0x248   : > { %v686_v60 = vmul.f32 %v1448_v15, %v678_v51  ;;  %v659_v31 = vmul.f32 %v1464_v18, %v651_v38  ;;  %v645_v32 = vmul.f32 %v1477_v50, %v637_v10  ;;  %v658_v41 = vmul.f32 %v1469_v25, %v650_v16  ;;  %v1187_v53 = vpop.eup %1186 }
 0x249   : > { %v727_v48 = vmul.f32 %v1177_v44, %v687_v46  ;;  %v681_v7 = vadd.f32 0.2548296, %v673_v56  ;;  %v636_v43 = vadd.f32 -1.4531521, %v628_v49  ;;  %v672_v26 = vmul.f32 %v1457_v52, %v664_v17  ;;  %v1189_v56 = vpop.eup %1188 }
 0x24a   : > { %v726_v11 = vmul.f32 %v1181_v39, %v686_v60  ;;  %v667_v47 = vadd.f32 -0.28449672, %v659_v31  ;;  %v653_v51 = vadd.f32 1.4214138, %v645_v32  ;;  %v666_v44 = vadd.f32 -0.28449672, %v658_v41  ;;  %v1191_v29 = vpop.eup %1190 }
 0x24b   : > { %v735_v23 = vsub.f32 1.0, %v727_v48  ;;  %v689_v15 = vmul.f32 %v1453_v35, %v681_v7  ;;  %v644_v35 = vmul.f32 %v1485_v58, %v636_v43  ;;  %v680_v46 = vadd.f32 0.2548296, %v672_v26 }
 0x24c   : > { %v734_v37 = vsub.f32 1.0, %v726_v11  ;;  %v675_v60 = vmul.f32 %v1464_v18, %v667_v47  ;;  %v661_v63 = vmul.f32 %v1477_v50, %v653_v51  ;;  %v674_v7 = vmul.f32 %v1469_v25, %v666_v44 }
 0x24d   : > { %v751_v45 = vsub.f32 0.0, %v735_v23  ;;  %v729_v20 = vmul.f32 %v1183_v22, %v689_v15  ;;  %v652_v38 = vadd.f32 1.4214138, %v644_v35  ;;  %v688_v22 = vmul.f32 %v1457_v52, %v680_v46 }
 0x24e   : > { %v750_v54 = vsub.f32 0.0, %v734_v37  ;;  %v683_v11 = vadd.f32 0.2548296, %v675_v60  ;;  %v669_v16 = vadd.f32 -0.28449672, %v661_v63 }
 0x24f   : > { %v759_v19 = vsel %vm743_vm1, %v751_v45, %v735_v23  ;;  %v737_v28 = vsub.f32 1.0, %v729_v20  ;;  %v682_v49 = vadd.f32 0.2548296, %v674_v7  ;;  %v660_v17 = vmul.f32 %v1485_v58, %v652_v38 }
 0x250   : > { %v767_v39 = vadd.f32 1.0, %v759_v19  ;;  %v758_v48 = vsel %vm742_vm2, %v750_v54, %v734_v37  ;;  %v691_v30 = vmul.f32 %v1464_v18, %v683_v11  ;;  %v677_v31 = vmul.f32 %v1477_v50, %v669_v16 }
 0x251   : > { %v766_v10 = vadd.f32 1.0, %v758_v48  ;;  %v753_v15 = vsub.f32 0.0, %v737_v28  ;;  %v690_v37 = vmul.f32 %v1469_v25, %v682_v49  ;;  %v668_v41 = vadd.f32 -0.28449672, %v660_v17 }
 0x252   : > { %v775_v32 = vmul.f32 %v767_v39, %v567_v27  ;;  %v728_v43 = vmul.f32 %v1185_v34, %v688_v22  ;;  %v731_v4 = vmul.f32 %v1187_v53, %v691_v30  ;;  %v685_v26 = vadd.f32 0.2548296, %v677_v31 }
 0x253   : > { %v774_v23 = vmul.f32 %v766_v10, %v1467_v14  ;;  %v730_v24 = vmul.f32 %v1189_v56, %v690_v37  ;;  %v676_v52 = vmul.f32 %v1485_v58, %v668_v41  ;;  %v761_v18 = vsel %vm745_vm4, %v753_v15, %v737_v28  ;;  %v1193_v56 = vpop.eup %1192 }
 0x254   : > { %v736_v14 = vsub.f32 1.0, %v728_v43  ;;  %v739_v45 = vsub.f32 1.0, %v731_v4  ;;  %v693_v20 = vmul.f32 %v1477_v50, %v685_v26  ;;  %v568_v25 = vmul.f32 0.5, %v1413_v36 }
 0x255   : > { %1094 = vmatprep.mubr.msk.f32.mxu0 %vm797_vm3, %v774_v23  ;;  %v738_v47 = vsub.f32 1.0, %v730_v24  ;;  %v684_v34 = vadd.f32 0.2548296, %v676_v52  ;;  %v769_v54 = vadd.f32 1.0, %v761_v18  ;;  %v569_v28 = vmul.f32 0.5, %v1410_v33 }
 0x256   : > { %1095 = vmatmul.mubr.msk.f32.vlgmr.msra.gmra.mrb[8].mxu0 %vm797_vm3, %v775_v32  ;;  %v752_v51 = vsub.f32 0.0, %v736_v14  ;;  %v755_v40 = vsub.f32 0.0, %v739_v45  ;;  %v733_v53 = vmul.f32 %v1191_v29, %v693_v20  ;;  %v573_v49 = vmul.f32 0.5, %v1434_v61 }
 0x257   : > { %v754_v44 = vsub.f32 0.0, %v738_v47  ;;  %v692_v35 = vmul.f32 %v1485_v58, %v684_v34  ;;  %v777_v48 = vmul.f32 %v769_v54, %v569_v28 }
 0x258   : > { %v760_v46 = vsel %vm744_vm5, %v752_v51, %v736_v14  ;;  %v763_v19 = vsel %vm747_vm6, %v755_v40, %v739_v45  ;;  %v741_v50 = vsub.f32 1.0, %v733_v53 }
 0x259   : > { %v768_v36 = vadd.f32 1.0, %v760_v46  ;;  %v762_v60 = vsel %vm746_vm7, %v754_v44, %v738_v47  ;;  %v732_v63 = vmul.f32 %v1193_v56, %v692_v35  ;;  %v771_v7 = vadd.f32 1.0, %v763_v19 }
 0x25a   : > { %v770_v57 = vadd.f32 1.0, %v762_v60  ;;  %v757_v39 = vsub.f32 0.0, %v741_v50 }
 0x25b   : > { %v776_v29 = vmul.f32 %v768_v36, %v568_v25  ;;  %v740_v58 = vsub.f32 1.0, %v732_v63  ;;  %v779_v33 = vmul.f32 %v771_v7, %v571_v59 }
 0x25c   : > { %v778_v38 = vmul.f32 %v770_v57, %v570_v42  ;;  %v765_v10 = vsel %vm749_vm8, %v757_v39, %v741_v50 }
 0x25d   : > { %1097 = vmatprep.mubr.msk.f32.mxu1 %vm797_vm3, %v776_v29  ;;  %v756_v11 = vsub.f32 0.0, %v740_v58  ;;  %v773_v21 = vadd.f32 1.0, %v765_v10 }
 0x25e   : > { %1098 = vmatmul.mubr.msk.f32.vlgmr.msra.gmra.mrb[0].mxu1 %vm797_vm3, %v777_v48 }
 0x25f   : > { %1100 = vmatprep.mubr.msk.f32.mxu1 %vm797_vm3, %v778_v38  ;;  %v764_v16 = vsel %vm748_vm9, %v756_v11, %v740_v58  ;;  %v781_v55 = vmul.f32 %v773_v21, %v573_v49 }
 0x260   : > { %v772_v27 = vadd.f32 1.0, %v764_v16 }
 0x262   : > { %1101 = vmatmul.mubr.msk.f32.gmra.mrb[2].mxu1 %vm797_vm3, %v779_v33  ;;  %v780_v17 = vmul.f32 %v772_v27, %v572_v3 }
 0x264   : > { %1103 = vmatprep.mubr.msk.f32.mxu1 %vm797_vm3, %v780_v17 }
 0x266   : > { %1104 = vmatmul.mubr.msk.f32.gmra.mrb[4].mxu1 %vm797_vm3, %v781_v55 }
 0x329   : > { %v1096_v22 = vpop.f32.mrb[8].mxu0 }
 0x32a   : > { %v894_v23 = vadd.f32 %v1096_v22, %v1019_v6  ;;  %v888_v15 = vpop.f32.mrb[9].mxu0 }
 0x32b   : > { %v889_v61 = vadd.f32 %v1019_v6, %v888_v15 }
 0x32c   : > { %v928_v62 = vadd.f32 %v894_v23, %v1262_v2 }
 0x32d   : > { %v927_v30 = vadd.f32 %v889_v61, %v1258_v0 }
 0x32e   : > { %936 = vst.msk [vmem:[%s280_s22 + $0x8] sm:$0xff] %vm292_vm0, %v928_v62 }
 0x32f   : > { %935 = vst.msk [vmem:[%s280_s22] sm:$0xff] %vm292_vm0, %v927_v30 }
 0x331   : > { %v1099_v31 = vpop.f32.mrb[0].mxu1 }
 0x332   : > { %v904_v32 = vadd.f32 %v1099_v31, %v1019_v6  ;;  %v898_v37 = vpop.f32.mrb[1].mxu1 }
 0x333   : > { %v899_v41 = vadd.f32 %v1019_v6, %v898_v37 }
 0x334   : > { %v930_v43 = vadd.f32 %v904_v32, %v1268_v5 }
 0x335   : > { %v929_v4 = vadd.f32 %v899_v41, %v1260_v1  ;;  %v1102_v26 = vpop.f32.mrb[2].mxu1 }
 0x336   : > { %938 = vst.msk [vmem:[%s280_s22 + $0x18] sm:$0xff] %vm292_vm0, %v930_v43  ;;  %v914_v24 = vadd.f32 %v1102_v26, %v1019_v6  ;;  %v908_v52 = vpop.f32.mrb[3].mxu1 }
 0x337   : > { %937 = vst.msk [vmem:[%s280_s22 + $0x10] sm:$0xff] %vm292_vm0, %v929_v4  ;;  %v909_v0 = vadd.f32 %v1019_v6, %v908_v52 }
 0x338   : > { %v932_v2 = vadd.f32 %v914_v24, %v1276_v9 }
 0x339   : > { %v931_v14 = vadd.f32 %v909_v0, %v1274_v8  ;;  %v1105_v18 = vpop.f32.mrb[4].mxu1 }
 0x33a   : > { %940 = vst.msk [vmem:[%s280_s22 + $0x28] sm:$0xff] %vm292_vm0, %v932_v2  ;;  %v924_v45 = vadd.f32 %v1105_v18, %v1019_v6  ;;  %v918_v20 = vpop.f32.mrb[5].mxu1 }
 0x33b   : > { %939 = vst.msk [vmem:[%s280_s22 + $0x20] sm:$0xff] %vm292_vm0, %v931_v14  ;;  %v919_v1 = vadd.f32 %v1019_v6, %v918_v20 }
 0x33c   : > { %v934_v5 = vadd.f32 %v924_v45, %v1284_v13 }
 0x33d   : > { %v933_v25 = vadd.f32 %v919_v1, %v1282_v12 }
 0x33e   : > { %942 = vst.msk [vmem:[%s280_s22 + $0x38] sm:$0xff] %vm292_vm0, %v934_v5 }
 0x33f   : > { %941 = vst.msk [vmem:[%s280_s22 + $0x30] sm:$0xff] %vm292_vm0, %v933_v25 }
 0x340 PF: > { %s17_s24 = sadd.s32 1, %s1200_s24  }
 0x341   : > { %p14_p4 = scmp.ge.s32.totalorder %s17_s24, 4  }
 0x343   :  { %16 = sbr.rel (!%p14_p4) target bundleno = 1 (0x1), region = 78 }

// kernel: swin_forward.14
= control target key start
LH: loop header
LB: loop body
LE: loop exit
PB: predicated region body
PF: predicated region fallthrough
CT: control target
= control target key end

     0   :  { %s2941_s30 = smov 0   ;;  %s3447_s0 = inlined_call_operand.vmem [shape: f32[128,32], index: 0, kind: input, shape index: {}]   ;;  %s3448_s1 = inlined_call_operand.vmem [shape: f32[1,32], index: 1, kind: input, shape index: {}]   ;;  %s3449_s2 = inlined_call_operand.vmem [shape: f32[1,32], index: 2, kind: input, shape index: {}]   ;;  %s3450_s3 = inlined_call_operand.vmem [shape: f32[32,96], index: 3, kind: input, shape index: {}]   ;;  %s3451_s4 = inlined_call_operand.vmem [shape: f32[1,96], index: 4, kind: input, shape index: {}]   ;;  %s3452_s5 = inlined_call_operand.vmem [shape: f32[2,32,32], index: 5, kind: input, shape index: {}]   ;;  %s3453_s6 = inlined_call_operand.vmem [shape: f32[32,32], index: 6, kind: input, shape index: {}]   ;;  %s3454_s7 = inlined_call_operand.vmem [shape: f32[1,32], index: 7, kind: input, shape index: {}]   ;;  %s3455_s8 = inlined_call_operand.vmem [shape: f32[2,32,32], index: 8, kind: input, shape index: {}]   ;;  %s3456_s9 = inlined_call_operand.vmem [shape: f32[128,32], index: 9, kind: output, shape index: {}]  }
   0x1 LB: > { %s2222_s10 = sadd.s32 4294967295, %s2884_s30   ;;  %p2226_p0 = scmp.ge.s32.totalorder %s2884_s30, 1  ;;  %s2884_s30 = sphi %s2941_s30, %s19_s30  }
   0x2   : > { %p288_p1 = scmp.lt.s32.totalorder %s2884_s30, 3 }
   0x4   : > { %p289_p2 = pnand %p2226_p0, %p288_p1 }
   0x5   : > { %s2227_s11 = sshll.u32 (!%p289_p2), %s2222_s10, 3  ;;  %vm346_vm0 = vcmask (!%p289_p2), 261120   ;;  %v480_v36 = vld [vmem:[%s3450_s3] sm:$0xff] (!%p289_p2)  ;;  %v481_v37 = vld [vmem:[%s3450_s3 + $0x8] sm:$0xff] (!%p289_p2)  ;;  %v482_v39 = vld [vmem:[%s3450_s3 + $0x10] sm:$0xff] (!%p289_p2)  ;;  %vm645_vm1 = vcmask (!%p289_p2), 130048  }
   0x6   : > { %292 = sbr.rel (%p289_p2) target bundleno = 1928 (0x788), region = 56  ;;  %p325_p3 = scmp.lt.s32.totalorder (!%p289_p2), %s2227_s11, 15  ;;  %v2593_v38 = vpack.c.bf16 (!%p289_p2), %v481_v37, %v480_v36  ;;  %v483_v40 = vld [vmem:[%s3450_s3 + $0x18] sm:$0xff] (!%p289_p2)  ;;  %vm3067_vm2 = vmpackc.low (!%p289_p2), %vm645_vm1, %vm645_vm1 }
   0x7   : > { %v2597_v41 = vpack.c.bf16 (!%p289_p2), %v483_v40, %v482_v39  ;;  %s2886_s10 = smov (!%p289_p2), 96   ;;  %s2887_s13 = smov (!%p289_p2), 112  }
   0x8   : > { %2594 = vmatprep.subr.bf16.mxu1 (!%p289_p2), %v2593_v38  ;;  %s2888_s14 = smov (!%p289_p2), 80   ;;  %s2889_s21 = smov (!%p289_p2), 64  }
   0x9   : > { %2596 = vmatpush3.bf16.msra.mxu1 (!%p289_p2), %v2593_v38  ;;  %s2890_s22 = smov (!%p289_p2), 48  }
   0xa   : > { %2598 = vmatprep.subr.bf16.mxu1 (!%p289_p2), %v2597_v41 }
   0xd   : > { %s3460_s11 = smov (!%p325_p3, %s2227_s11), 15  ;;  %2600 = vmatpush3.bf16.msra.mxu1 %v2597_v41 }
   0xe   : > { %s2228_s12 = sshll.u32 %s3460_s11, 3 }
   0xf   : > { %s2957_s15 = scalar_lea.vmem %s3447_s0, %s2228_s12  ;;  %s3417_s25 = scalar_lea.vmem %s3456_s9, %s2228_s12 }
  0x10   : > { %v336_v0 = vld [vmem:[%s2957_s15] sm:$0xff]  ;;  %v338_v1 = vld [vmem:[%s2957_s15 + $0x10] sm:$0xff]  ;;  %v337_v2 = vld [vmem:[%s2957_s15 + $0x8] sm:$0xff] }
  0x11   : > { %v347_v3 = vsel %vm346_vm0, %v336_v0, 0.0  ;;  %v353_v4 = vsel %vm346_vm0, %v338_v1, 0.0  ;;  %v339_v5 = vld [vmem:[%s2957_s15 + $0x18] sm:$0xff]  ;;  %v350_v6 = vsel %vm346_vm0, %v337_v2, 0.0  ;;  %v340_v26 = vld [vmem:[%s2957_s15 + $0x20] sm:$0xff]  ;;  %v342_v30 = vld [vmem:[%s2957_s15 + $0x30] sm:$0xff] }
  0x12   : > { %348 = vadd.xlane.f32.xlu0 %v347_v3  ;;  %354 = vadd.xlane.f32.xlu1 %v353_v4  ;;  %v356_v7 = vsel %vm346_vm0, %v339_v5, 0.0  ;;  %v359_v28 = vsel %vm346_vm0, %v340_v26, 0.0  ;;  %v341_v31 = vld [vmem:[%s2957_s15 + $0x28] sm:$0xff]  ;;  %v365_v32 = vsel %vm346_vm0, %v342_v30, 0.0  ;;  %v343_v34 = vld [vmem:[%s2957_s15 + $0x38] sm:$0xff] }
  0x13   : > { %v362_v33 = vsel %vm346_vm0, %v341_v31, 0.0  ;;  %v368_v35 = vsel %vm346_vm0, %v343_v34, 0.0 }
  0x16   : > { %351 = vadd.xlane.f32.xlu0 %v350_v6  ;;  %357 = vadd.xlane.f32.xlu1 %v356_v7 }
  0x9f   : > { %v349_v8 = vpop.xlane.xlu0 %348  ;;  %v355_v9 = vpop.xlane.xlu1 %354 }
  0xa0   : > { %v372_v10 = vmul.f32 0.03125, %v349_v8  ;;  %v374_v11 = vmul.f32 0.03125, %v355_v9  ;;  %v2232_v8 = vld [vmem:[%s3449_s2] ss:$0 sm:$0xff] }
  0xa2   : > { %v2967_v12 = vsub.f32 %v336_v0, %v372_v10  ;;  %v2969_v13 = vsub.f32 %v338_v1, %v374_v11 }
  0xa3   : > { %v352_v14 = vpop.xlane.xlu0 %351  ;;  %v358_v15 = vpop.xlane.xlu1 %357 }
  0xa4   : > { %v373_v16 = vmul.f32 0.03125, %v352_v14  ;;  %v375_v17 = vmul.f32 0.03125, %v358_v15  ;;  %v388_v18 = vmul.f32 %v2967_v12, %v2967_v12  ;;  %v390_v19 = vmul.f32 %v2969_v13, %v2969_v13 }
  0xa6   : > { %v2975_v20 = vsub.f32 %v337_v2, %v373_v16  ;;  %v2977_v21 = vsub.f32 %v339_v5, %v375_v17  ;;  %v396_v22 = vsel %vm346_vm0, %v388_v18, 0.0  ;;  %v402_v23 = vsel %vm346_vm0, %v390_v19, 0.0  ;;  %v3011_v2 = vld [vmem:[%s3448_s1] ss:$0 sm:$0xff] }
  0xa7   : > { %397 = vadd.xlane.f32.xlu0 %v396_v22 }
  0xa8   : > { %v389_v24 = vmul.f32 %v2975_v20, %v2975_v20  ;;  %v391_v25 = vmul.f32 %v2977_v21, %v2977_v21 }
  0xaa   : > { %v399_v27 = vsel %vm346_vm0, %v389_v24, 0.0  ;;  %v405_v29 = vsel %vm346_vm0, %v391_v25, 0.0 }
  0xab   : > { %403 = vadd.xlane.f32.xlu0 %v402_v23  ;;  %400 = vadd.xlane.f32.xlu1 %v399_v27 }
  0xaf   : > { %360 = vadd.xlane.f32.xlu0 %v359_v28  ;;  %406 = vadd.xlane.f32.xlu1 %v405_v29 }
  0xb3   : > { %366 = vadd.xlane.f32.xlu0 %v365_v32  ;;  %363 = vadd.xlane.f32.xlu1 %v362_v33 }
  0xb7   : > { %369 = vadd.xlane.f32.xlu1 %v368_v35 }
 0x134   : > { %v398_v42 = vpop.xlane.xlu0 %397 }
 0x135   : > { %v420_v43 = vmul.f32 0.03125, %v398_v42 }
 0x137   : > { %v428_v44 = vadd.f32 1e-05, %v420_v43 }
 0x138   : > { %v401_v45 = vpop.xlane.xlu1 %400  ;;  %v404_v46 = vpop.xlane.xlu0 %403 }
 0x139   : > { %2798 = vrsqrt.f32 %v428_v44  ;;  %v421_v47 = vmul.f32 0.03125, %v401_v45  ;;  %v422_v48 = vmul.f32 0.03125, %v404_v46 }
 0x13b   : > { %v429_v49 = vadd.f32 1e-05, %v421_v47  ;;  %v430_v50 = vadd.f32 1e-05, %v422_v48 }
 0x13c   : > { %v407_v51 = vpop.xlane.xlu1 %406  ;;  %v361_v52 = vpop.xlane.xlu0 %360 }
 0x13d   : > { %2800 = vrsqrt.f32 %v429_v49  ;;  %v423_v53 = vmul.f32 0.03125, %v407_v51  ;;  %v376_v54 = vmul.f32 0.03125, %v361_v52 }
 0x13e   : > { %2802 = vrsqrt.f32 %v430_v50 }
 0x13f   : > { %v431_v55 = vadd.f32 1e-05, %v423_v53  ;;  %v384_v56 = vsub.f32 %v340_v26, %v376_v54 }
 0x140   : > { %v364_v57 = vpop.xlane.xlu1 %363  ;;  %v367_v58 = vpop.xlane.xlu0 %366 }
 0x141   : > { %2804 = vrsqrt.f32 %v431_v55  ;;  %v377_v59 = vmul.f32 0.03125, %v364_v57  ;;  %v378_v60 = vmul.f32 0.03125, %v367_v58  ;;  %v392_v61 = vmul.f32 %v384_v56, %v384_v56 }
 0x143   : > { %v2799_v62 = vpop.eup %2798  ;;  %v385_v63 = vsub.f32 %v341_v31, %v377_v59  ;;  %v386_v0 = vsub.f32 %v342_v30, %v378_v60  ;;  %v408_v1 = vsel %vm346_vm0, %v392_v61, 0.0 }
 0x144   : > { %v370_v3 = vpop.xlane.xlu1 %369  ;;  %409 = vadd.xlane.f32.xlu0 %v408_v1  ;;  %v444_v4 = vmul.f32 %v2799_v62, %v2967_v12 }
 0x145   : > { %v379_v5 = vmul.f32 0.03125, %v370_v3  ;;  %v393_v6 = vmul.f32 %v385_v63, %v385_v63  ;;  %v394_v7 = vmul.f32 %v386_v0, %v386_v0 }
 0x146   : > { %v458_v9 = vmul.f32 %v3011_v2, %v444_v4 }
 0x147   : > { %v2801_v10 = vpop.eup %2800  ;;  %v387_v11 = vsub.f32 %v343_v34, %v379_v5  ;;  %v411_v14 = vsel %vm346_vm0, %v393_v6, 0.0  ;;  %v414_v15 = vsel %vm346_vm0, %v394_v7, 0.0 }
 0x148   : > { %v2803_v16 = vpop.eup %2802  ;;  %412 = vadd.xlane.f32.xlu1 %v411_v14  ;;  %415 = vadd.xlane.f32.xlu0 %v414_v15  ;;  %v472_v17 = vadd.f32 %v2232_v8, %v458_v9  ;;  %v445_v12 = vmul.f32 %v2801_v10, %v2975_v20 }
 0x149   : > { %v395_v18 = vmul.f32 %v387_v11, %v387_v11  ;;  %v446_v19 = vmul.f32 %v2803_v16, %v2969_v13 }
 0x14a   : > { %2429 = vmatprep.mubr.msk.f32.mxu1 %vm346_vm0, %v472_v17  ;;  %v459_v22 = vmul.f32 %v3011_v2, %v445_v12 }
 0x14b   : > { %v2805_v23 = vpop.eup %2804  ;;  %v417_v24 = vsel %vm346_vm0, %v395_v18, 0.0  ;;  %v460_v25 = vmul.f32 %v3011_v2, %v446_v19 }
 0x14c   : > { %418 = vadd.xlane.f32.xlu1 %v417_v24  ;;  %v473_v26 = vadd.f32 %v2232_v8, %v459_v22  ;;  %v447_v27 = vmul.f32 %v2805_v23, %v2977_v21 }
 0x14d   : > { %v474_v28 = vadd.f32 %v2232_v8, %v460_v25 }
 0x14e   : > { %2430 = vmatmul.mubr.msk.f32.vlgmr.msra.gmra.mrb[0].mxu1 %vm346_vm0, %v473_v26  ;;  %v461_v20 = vmul.f32 %v3011_v2, %v447_v27 }
 0x14f   : > { %2432 = vmatprep.mubr.msk.f32.mxu1 %vm346_vm0, %v474_v28 }
 0x150   : > { %v475_v13 = vadd.f32 %v2232_v8, %v461_v20 }
 0x152   : > { %2433 = vmatmul.mubr.msk.f32.gmra.mrb[2].mxu1 %vm346_vm0, %v475_v13 }
 0x1d1   : > { %v410_v29 = vpop.xlane.xlu0 %409 }
 0x1d2   : > { %v424_v30 = vmul.f32 0.03125, %v410_v29 }
 0x1d4   : > { %v432_v31 = vadd.f32 1e-05, %v424_v30 }
 0x1d5   : > { %v413_v32 = vpop.xlane.xlu1 %412  ;;  %v416_v33 = vpop.xlane.xlu0 %415 }
 0x1d6   : > { %2806 = vrsqrt.f32 %v432_v31  ;;  %v425_v34 = vmul.f32 0.03125, %v413_v32  ;;  %v426_v35 = vmul.f32 0.03125, %v416_v33 }
 0x1d8   : > { %v433_v36 = vadd.f32 1e-05, %v425_v34  ;;  %v434_v21 = vadd.f32 1e-05, %v426_v35 }
 0x1d9   : > { %v419_v37 = vpop.xlane.xlu1 %418 }
 0x1da   : > { %2808 = vrsqrt.f32 %v433_v36  ;;  %v427_v38 = vmul.f32 0.03125, %v419_v37 }
 0x1db   : > { %2810 = vrsqrt.f32 %v434_v21 }
 0x1dc   : > { %v435_v39 = vadd.f32 1e-05, %v427_v38 }
 0x1de   : > { %2812 = vrsqrt.f32 %v435_v39 }
 0x1e0   : > { %v2807_v40 = vpop.eup %2806 }
 0x1e1   : > { %v448_v41 = vmul.f32 %v2807_v40, %v384_v56  ;;  %v3042_v56 = vld [vmem:[%s3451_s4] ss:$0 sm:$0xff] }
 0x1e3   : > { %v462_v42 = vmul.f32 %v3011_v2, %v448_v41 }
 0x1e4   : > { %v2809_v43 = vpop.eup %2808 }
 0x1e5   : > { %v2811_v44 = vpop.eup %2810  ;;  %v476_v45 = vadd.f32 %v2232_v8, %v462_v42  ;;  %v449_v46 = vmul.f32 %v2809_v43, %v385_v63 }
 0x1e6   : > { %v450_v47 = vmul.f32 %v2811_v44, %v386_v0 }
 0x1e7   : > { %2435 = vmatprep.mubr.msk.f32.mxu1 %vm346_vm0, %v476_v45  ;;  %v463_v48 = vmul.f32 %v3011_v2, %v449_v46 }
 0x1e8   : > { %v2813_v49 = vpop.eup %2812  ;;  %v464_v50 = vmul.f32 %v3011_v2, %v450_v47 }
 0x1e9   : > { %v477_v51 = vadd.f32 %v2232_v8, %v463_v48  ;;  %v451_v52 = vmul.f32 %v2813_v49, %v387_v11 }
 0x1ea   : > { %v478_v53 = vadd.f32 %v2232_v8, %v464_v50 }
 0x1eb   : > { %2436 = vmatmul.mubr.msk.f32.gmra.mrb[4].mxu1 %vm346_vm0, %v477_v51  ;;  %v465_v54 = vmul.f32 %v3011_v2, %v451_v52 }
 0x1ec   : > { %2438 = vmatprep.mubr.msk.f32.mxu1 %vm346_vm0, %v478_v53 }
 0x1ed   : > { %v479_v55 = vadd.f32 %v2232_v8, %v465_v54 }
 0x1ef   : > { %2439 = vmatmul.mubr.msk.f32.gmra.mrb[6].mxu1 %vm346_vm0, %v479_v55 }
 0x221   : > { %v2431_v57 = vpop.f32.mrb[0].mxu1 }
 0x222   : > { %v587_v58 = vadd.f32 %v2431_v57, %v3042_v56  ;;  %v581_v59 = vpop.f32.mrb[1].mxu1 }
 0x223   : > { %v582_v60 = vadd.f32 %v3042_v56, %v581_v59 }
 0x224   : > { %v626_v5 = vmul.f32 0.25, %v587_v58 }
 0x225   : > { %v2434_v61 = vpop.f32.mrb[2].mxu1  ;;  %v3046_v62 = vpack.i.bf16 %v587_v58, %v582_v60  ;;  %v625_v63 = vmul.f32 0.25, %v582_v60 }
 0x226   : > { %v597_v0 = vadd.f32 %v2434_v61, %v3042_v56  ;;  %v591_v1 = vpop.f32.mrb[3].mxu1 }
 0x227   : > { %v592_v2 = vadd.f32 %v3042_v56, %v591_v1  ;;  %2719 = vrot.lane.b32.xlu0 %v3046_v62, %s2886_s10  ;;  %2449 = vmatprep.mubr.msk.f32.mxu1 %vm645_vm1, %v625_v63 }
 0x228   : > { %v628_v6 = vmul.f32 0.25, %v597_v0 }
 0x229   : > { %v3053_v3 = vpack.i.bf16 %v597_v0, %v592_v2  ;;  %v627_v4 = vmul.f32 0.25, %v592_v2  ;;  %v3146_v0 = vld [vmem:[%s3452_s5] sm:$0xff]  ;;  %v752_v2 = vld [vmem:[%s3455_s8 + $0x8] sm:$0xff] }
 0x22b   : > { %2724 = vrot.lane.b32.xlu1 %v3053_v3, %s2886_s10  ;;  %917 = vrot.lane.b32.xlu0 %v625_v63, %s2887_s13  ;;  %v3141_v63 = vld [vmem:[%s3452_s5 + $0x8] sm:$0xff] }
 0x22f   : > { %2729 = vrot.lane.b32.xlu1 %v3046_v62, %s2888_s14  ;;  %921 = vrot.lane.b32.xlu0 %v627_v4, %s2887_s13 }
 0x233   : > { %2734 = vrot.lane.b32.xlu1 %v3053_v3, %s2888_s14 }
 0x237   : > { %919 = vrot.lane.b32.xlu1 %v626_v5, %s2887_s13 }
 0x23b   : > { %923 = vrot.lane.b32.xlu1 %v628_v6, %s2887_s13 }
 0x299   : > { %v2720_v7 = vpop.permute.xlu0 %2719 }
 0x29a   : > { %v2722_v8 = vunpack.i.h.bf16 %v2720_v7  ;;  %v2721_v9 = vunpack.i.l.bf16 %v2720_v7 }
 0x29c   : > { %v2601_v11 = vpack.c.bf16 %v2722_v8, %v2721_v9  ;;  %v3159_v8 = vld [vmem:[%s3452_s5 + $0x18] sm:$0xff]  ;;  %v3164_v9 = vld [vmem:[%s3452_s5 + $0x10] sm:$0xff] }
 0x29d   : > { %v2725_v14 = vpop.permute.xlu1 %2724  ;;  %v918_v27 = vpop.permute.xlu0 %917 }
 0x29e   : > { %v2727_v15 = vunpack.i.h.bf16 %v2725_v14  ;;  %v2726_v16 = vunpack.i.l.bf16 %v2725_v14  ;;  %2603 = vmatprep.subr.msk.bf16.mxu1 %vm3067_vm2, %v2601_v11 }
 0x29f   : > { %2606 = vmatpush3.bf16.xpose.msk.msra.mxu1 %vm3067_vm2, %v2601_v11 }
 0x2a0   : > { %v2607_v17 = vpack.c.bf16 %v2727_v15, %v2726_v16  ;;  %v754_v15 = vld [vmem:[%s3455_s8 + $0x18] sm:$0xff] }
 0x2a1   : > { %v2730_v12 = vpop.permute.xlu1 %2729  ;;  %v922_v20 = vpop.permute.xlu0 %921 }
 0x2a2   : > { %v2732_v18 = vunpack.i.h.bf16 %v2730_v12  ;;  %v2731_v19 = vunpack.i.l.bf16 %v2730_v12  ;;  %2609 = vmatprep.subr.msk.bf16.mxu1 %vm3067_vm2, %v2607_v17 }
 0x2a4   : > { %v2621_v22 = vpack.c.bf16 %v2732_v18, %v2731_v19 }
 0x2a5   : > { %v2735_v23 = vpop.permute.xlu1 %2734 }
 0x2a6   : > { %v2737_v24 = vunpack.i.h.bf16 %v2735_v23  ;;  %v2736_v25 = vunpack.i.l.bf16 %v2735_v23  ;;  %v753_v23 = vld [vmem:[%s3455_s8 + $0x10] sm:$0xff] }
 0x2a7   : > { %2612 = vmatpush3.bf16.xpose.msk.msra.mxu1 %vm3067_vm2, %v2607_v17 }
 0x2a8   : > { %2623 = vmatprep.subr.msk.bf16.mxu1 %vm3067_vm2, %v2621_v22  ;;  %v2627_v26 = vpack.c.bf16 %v2737_v24, %v2736_v25 }
 0x2a9   : > { %v920_v28 = vpop.permute.xlu1 %919 }
 0x2ad   : > { %v924_v32 = vpop.permute.xlu1 %923 }
 0x2ae   : > { %2450 = vmatmul.mubr.msk.f32.vlgmr.msra.gmra.mrb[8].mxu1 %vm645_vm1, %v626_v5 }
 0x2af   : > { %2452 = vmatprep.mubr.msk.f32.mxu1 %vm645_vm1, %v627_v4  ;;  %2626 = vmatpush3.bf16.xpose.msk.msra.mxu1 %vm3067_vm2, %v2621_v22 }
 0x2b0   : > { %2629 = vmatprep.subr.msk.bf16.mxu1 %vm3067_vm2, %v2627_v26 }
 0x2b2   : > { %2453 = vmatmul.mubr.msk.f32.gmra.mrb[10].mxu1 %vm645_vm1, %v628_v6  ;;  %v751_v6 = vld [vmem:[%s3455_s8] sm:$0xff] }
 0x2b3   : > { %2477 = vmatprep.mubr.msk.f32.mxu1 %vm645_vm1, %v918_v27  ;;  %v3181_v27 = vld [vmem:[%s3452_s5 + $0x28] sm:$0xff] }
 0x2b7   : > { %2632 = vmatpush3.bf16.xpose.msk.msra.mxu1 %vm3067_vm2, %v2627_v26 }
 0x2be   : > { %v2437_v13 = vpop.f32.mrb[4].mxu1  ;;  %2478 = vmatmul.mubr.msk.f32.vlgmr.msra.gmra.mrb[12].mxu1 %vm645_vm1, %v920_v28  ;;  %v3186_v28 = vld [vmem:[%s3452_s5 + $0x20] sm:$0xff] }
 0x2bf   : > { %v607_v29 = vadd.f32 %v2437_v13, %v3042_v56  ;;  %v601_v30 = vpop.f32.mrb[5].mxu1  ;;  %2480 = vmatprep.mubr.msk.f32.mxu1 %vm645_vm1, %v922_v20 }
 0x2c0   : > { %v602_v31 = vadd.f32 %v3042_v56, %v601_v30 }
 0x2c1   : > { %v1400_v39 = vmul.f32 0.25, %v607_v29 }
 0x2c2   : > { %v2440_v33 = vpop.f32.mrb[6].mxu1  ;;  %2481 = vmatmul.mubr.msk.f32.gmra.mrb[14].mxu1 %vm645_vm1, %v924_v32  ;;  %v3096_v34 = vpack.i.bf16 %v607_v29, %v602_v31  ;;  %v1399_v35 = vmul.f32 0.25, %v602_v31  ;;  %v3193_v31 = vld [vmem:[%s3452_s5 + $0x38] sm:$0xff]  ;;  %v3198_v32 = vld [vmem:[%s3452_s5 + $0x30] sm:$0xff] }
 0x2c3   : > { %v617_v36 = vadd.f32 %v2440_v33, %v3042_v56  ;;  %v611_v21 = vpop.f32.mrb[7].mxu1 }
 0x2c4   : > { %v612_v37 = vadd.f32 %v3042_v56, %v611_v21  ;;  %2739 = vrot.lane.b32.xlu0 %v3096_v34, %s2886_s10  ;;  %2525 = vmatprep.mubr.msk.f32.mxu1 %vm645_vm1, %v1399_v35 }
 0x2c5   : > { %v1402_v41 = vmul.f32 0.25, %v617_v36 }
 0x2c6   : > { %v3103_v38 = vpack.i.bf16 %v617_v36, %v612_v37  ;;  %v1401_v40 = vmul.f32 0.25, %v612_v37 }
 0x2c8   : > { %2749 = vrot.lane.b32.xlu0 %v3096_v34, %s2888_s14  ;;  %2744 = vrot.lane.b32.xlu1 %v3103_v38, %s2886_s10 }
 0x2cc   : > { %1690 = vrot.lane.b32.xlu0 %v1399_v35, %s2887_s13  ;;  %2754 = vrot.lane.b32.xlu1 %v3103_v38, %s2888_s14 }
 0x2d0   : > { %1692 = vrot.lane.b32.xlu1 %v1400_v39, %s2887_s13  ;;  %1694 = vrot.lane.b32.xlu0 %v1401_v40, %s2887_s13 }
 0x2d4   : > { %1696 = vrot.lane.b32.xlu1 %v1402_v41, %s2887_s13 }
 0x336   : > { %v2740_v42 = vpop.permute.xlu0 %2739 }
 0x337   : > { %v2742_v43 = vunpack.i.h.bf16 %v2740_v42  ;;  %v2741_v44 = vunpack.i.l.bf16 %v2740_v42 }
 0x339   : > { %v2649_v45 = vpack.c.bf16 %v2742_v43, %v2741_v44 }
 0x33a   : > { %v2745_v46 = vpop.permute.xlu1 %2744  ;;  %v2750_v49 = vpop.permute.xlu0 %2749 }
 0x33b   : > { %v2747_v47 = vunpack.i.h.bf16 %v2745_v46  ;;  %v2746_v48 = vunpack.i.l.bf16 %v2745_v46  ;;  %2651 = vmatprep.subr.msk.bf16.mxu1 %vm3067_vm2, %v2649_v45  ;;  %v2752_v51 = vunpack.i.h.bf16 %v2750_v49  ;;  %v2751_v52 = vunpack.i.l.bf16 %v2750_v49 }
 0x33c   : > { %2654 = vmatpush3.bf16.xpose.msk.msra.mxu1 %vm3067_vm2, %v2649_v45 }
 0x33d   : > { %v2655_v50 = vpack.c.bf16 %v2747_v47, %v2746_v48  ;;  %v2669_v53 = vpack.c.bf16 %v2752_v51, %v2751_v52 }
 0x33e   : > { %v2755_v54 = vpop.permute.xlu1 %2754  ;;  %v1691_v58 = vpop.permute.xlu0 %1690 }
 0x33f   : > { %2657 = vmatprep.subr.msk.bf16.mxu1 %vm3067_vm2, %v2655_v50  ;;  %v2757_v55 = vunpack.i.h.bf16 %v2755_v54  ;;  %v2756_v56 = vunpack.i.l.bf16 %v2755_v54 }
 0x341   : > { %v2675_v57 = vpack.c.bf16 %v2757_v55, %v2756_v56 }
 0x342   : > { %v1693_v59 = vpop.permute.xlu1 %1692  ;;  %v1695_v60 = vpop.permute.xlu0 %1694 }
 0x344   : > { %2660 = vmatpush3.bf16.xpose.msk.msra.mxu1 %vm3067_vm2, %v2655_v50 }
 0x345   : > { %2671 = vmatprep.subr.msk.bf16.mxu1 %vm3067_vm2, %v2669_v53 }
 0x346   : > { %v1697_v61 = vpop.permute.xlu1 %1696 }
 0x34b   : > { %2526 = vmatmul.mubr.msk.f32.vlgmr.msra.gmra.mrb[16].mxu1 %vm645_vm1, %v1400_v39 }
 0x34c   : > { %2528 = vmatprep.mubr.msk.f32.mxu1 %vm645_vm1, %v1401_v40  ;;  %2674 = vmatpush3.bf16.xpose.msk.msra.mxu1 %vm3067_vm2, %v2669_v53 }
 0x34d   : > { %2677 = vmatprep.subr.msk.bf16.mxu1 %vm3067_vm2, %v2675_v57 }
 0x34f   : > { %2529 = vmatmul.mubr.msk.f32.gmra.mrb[18].mxu1 %vm645_vm1, %v1402_v41 }
 0x350   : > { %2553 = vmatprep.mubr.msk.f32.mxu1 %vm645_vm1, %v1691_v58 }
 0x354   : > { %2680 = vmatpush3.bf16.xpose.msk.msra.mxu1 %vm3067_vm2, %v2675_v57 }
 0x35b   : > { %2554 = vmatmul.mubr.msk.f32.vlgmr.msra.gmra.mrb[20].mxu1 %vm645_vm1, %v1693_v59 }
 0x35c   : > { %2556 = vmatprep.mubr.msk.f32.mxu1 %vm645_vm1, %v1695_v60 }
 0x35f   : > { %2557 = vmatmul.mubr.msk.f32.gmra.mrb[22].mxu1 %vm645_vm1, %v1697_v61 }
 0x381   : > { %v2451_v1 = vpop.f32.mrb[8].mxu1 }
 0x382   : > { %v738_v4 = vadd.f32 %v2451_v1, %v3141_v63  ;;  %v732_v5 = vpop.f32.mrb[9].mxu1 }
 0x383   : > { %v733_v7 = vadd.f32 %v732_v5, %v3146_v0 }
 0x384   : > { %v756_v10 = vadd.f32 %v752_v2, %v738_v4 }
 0x385   : > { %v2454_v11 = vpop.f32.mrb[10].mxu1  ;;  %v755_v14 = vadd.f32 %v751_v6, %v733_v7 }
 0x386   : > { %v748_v16 = vadd.f32 %v2454_v11, %v3159_v8  ;;  %v742_v17 = vpop.f32.mrb[11].mxu1  ;;  %v762_v12 = vsel %vm346_vm0, %v756_v10, -inf }
 0x387   : > { %v743_v18 = vadd.f32 %v742_v17, %v3164_v9  ;;  %763 = vmax.xlane.f32.xlu1 %v762_v12  ;;  %v759_v19 = vsel %vm346_vm0, %v755_v14, -inf }
 0x388   : > { %760 = vmax.xlane.f32.xlu0 %v759_v19  ;;  %v758_v22 = vadd.f32 %v754_v15, %v748_v16 }
 0x389   : > { %v757_v25 = vadd.f32 %v753_v23, %v743_v18 }
 0x38a   : > { %v768_v24 = vsel %vm346_vm0, %v758_v22, -inf }
 0x38b   : > { %v765_v26 = vsel %vm346_vm0, %v757_v25, -inf }
 0x38c   : > { %769 = vmax.xlane.f32.xlu0 %v768_v24 }
 0x390   : > { %766 = vmax.xlane.f32.xlu0 %v765_v26 }
 0x391   : > { %v2479_v20 = vpop.f32.mrb[12].mxu1 }
 0x392   : > { %v1021_v13 = vadd.f32 %v2479_v20, %v3181_v27  ;;  %v1015_v29 = vpop.f32.mrb[13].mxu1 }
 0x393   : > { %v1016_v30 = vadd.f32 %v3186_v28, %v1015_v29 }
 0x394   : > { %v1035_v33 = vadd.f32 %v1021_v13, %v752_v2 }
 0x395   : > { %v2482_v35 = vpop.f32.mrb[14].mxu1  ;;  %v1034_v36 = vadd.f32 %v1016_v30, %v751_v6 }
 0x396   : > { %v1031_v21 = vadd.f32 %v2482_v35, %v3193_v31  ;;  %v1025_v37 = vpop.f32.mrb[15].mxu1  ;;  %v1041_v39 = vsel %vm346_vm0, %v1035_v33, -inf }
 0x397   : > { %v1026_v40 = vadd.f32 %v3198_v32, %v1025_v37  ;;  %1042 = vmax.xlane.f32.xlu1 %v1041_v39  ;;  %v1038_v41 = vsel %vm346_vm0, %v1034_v36, -inf }
 0x398   : > { %1039 = vmax.xlane.f32.xlu0 %v1038_v41  ;;  %v1037_v42 = vadd.f32 %v1031_v21, %v754_v15 }
 0x399   : > { %v1036_v43 = vadd.f32 %v1026_v40, %v753_v23 }
 0x39a   : > { %v1047_v44 = vsel %vm346_vm0, %v1037_v42, -inf }
 0x39b   : > { %1048 = vmax.xlane.f32.xlu1 %v1047_v44  ;;  %v1044_v45 = vsel %vm346_vm0, %v1036_v43, -inf }
 0x39c   : > { %1045 = vmax.xlane.f32.xlu0 %v1044_v45 }
 0x414   : > { %v764_v46 = vpop.xlane.xlu1 %763 }
 0x415   : > { %v772_v47 = vsub.f32 %v756_v10, %v764_v46  ;;  %v761_v48 = vpop.xlane.xlu0 %760  ;;  %v2289_v46 = vld [vmem:[%s3455_s8 + $0x30] sm:$0xff] }
 0x416   : > { %v771_v49 = vsub.f32 %v755_v14, %v761_v48  ;;  %v2288_v48 = vld [vmem:[%s3455_s8 + $0x28] sm:$0xff] }
 0x417   : > { %v777_v50 = vmul.f32 1.442695, %v772_v47 }
 0x418   : > { %v775_v51 = vmul.f32 1.442695, %v771_v49 }
 0x419   : > { %2814 = vpow2.f32 %v777_v50  ;;  %v770_v52 = vpop.xlane.xlu0 %769 }
 0x41a   : > { %2816 = vpow2.f32 %v775_v51  ;;  %v774_v53 = vsub.f32 %v758_v22, %v770_v52 }
 0x41c   : > { %v781_v54 = vmul.f32 1.442695, %v774_v53 }
 0x41d   : > { %v767_v55 = vpop.xlane.xlu0 %766 }
 0x41e   : > { %2818 = vpow2.f32 %v781_v54  ;;  %v773_v56 = vsub.f32 %v757_v25, %v767_v55  ;;  %v2527_v57 = vpop.f32.mrb[16].mxu1 }
 0x41f   : > { %v1505_v58 = vpop.f32.mrb[17].mxu1  ;;  %v1511_v47 = vadd.f32 %v2527_v57, %v3141_v63 }
 0x420   : > { %v779_v59 = vmul.f32 1.442695, %v773_v56 }
 0x421   : > { %v3269_v50 = vadd.f32 %v2288_v48, %v1511_v47 }
 0x422   : > { %2820 = vpow2.f32 %v779_v59  ;;  %v2530_v60 = vpop.f32.mrb[18].mxu1 }
 0x423   : > { %v3206_v61 = vpop.eup %2814  ;;  %v1515_v1 = vpop.f32.mrb[19].mxu1  ;;  %v1536_v53 = vsel %vm346_vm0, %v3269_v50, -inf }
 0x424   : > { %v3208_v2 = vpop.eup %2816  ;;  %v1043_v4 = vpop.xlane.xlu1 %1042  ;;  %v786_v5 = vsel %vm346_vm0, %v3206_v61, 0.0  ;;  %v1516_v44 = vadd.f32 %v1515_v1, %v3164_v9  ;;  %v2290_v9 = vld [vmem:[%s3455_s8 + $0x38] sm:$0xff] }
 0x425   : > { %v1051_v6 = vsub.f32 %v1035_v33, %v1043_v4  ;;  %787 = vadd.xlane.f32.xlu1 %v786_v5  ;;  %v1040_v7 = vpop.xlane.xlu0 %1039  ;;  %v783_v10 = vsel %vm346_vm0, %v3208_v2, 0.0 }
 0x426   : > { %v1050_v11 = vsub.f32 %v1034_v36, %v1040_v7  ;;  %784 = vadd.xlane.f32.xlu0 %v783_v10 }
 0x427   : > { %v1056_v14 = vmul.f32 1.442695, %v1051_v6 }
 0x428   : > { %v3214_v15 = vpop.eup %2818  ;;  %v1054_v16 = vmul.f32 1.442695, %v1050_v11  ;;  %v1049_v17 = vpop.xlane.xlu1 %1048 }
 0x429   : > { %2822 = vpow2.f32 %v1056_v14  ;;  %v1053_v12 = vsub.f32 %v1037_v42, %v1049_v17  ;;  %v1046_v18 = vpop.xlane.xlu0 %1045  ;;  %v792_v19 = vsel %vm346_vm0, %v3214_v15, 0.0  ;;  %v1506_v42 = vadd.f32 %v1505_v58, %v3146_v0 }
 0x42a   : > { %2824 = vpow2.f32 %v1054_v16  ;;  %v1052_v22 = vsub.f32 %v1036_v43, %v1046_v18  ;;  %793 = vadd.xlane.f32.xlu1 %v792_v19  ;;  %v2287_v43 = vld [vmem:[%s3455_s8 + $0x20] sm:$0xff]  ;;  %v3260_v0 = vadd.f32 %v2289_v46, %v1516_v44 }
 0x42b   : > { %v1060_v23 = vmul.f32 1.442695, %v1053_v12  ;;  %v3251_v45 = vadd.f32 %v2287_v43, %v1506_v42 }
 0x42c   : > { %v3218_v24 = vpop.eup %2820  ;;  %v1058_v25 = vmul.f32 1.442695, %v1052_v22 }
 0x42d   : > { %2826 = vpow2.f32 %v1060_v23  ;;  %v789_v26 = vsel %vm346_vm0, %v3218_v24, 0.0 }
 0x42e   : > { %2828 = vpow2.f32 %v1058_v25  ;;  %v2555_v20 = vpop.f32.mrb[20].mxu1  ;;  %790 = vadd.xlane.f32.xlu0 %v789_v26 }
 0x42f   : > { %v1788_v13 = vpop.f32.mrb[21].mxu1  ;;  %v1794_v49 = vadd.f32 %v2555_v20, %v3181_v27 }
 0x430   : > { %v1789_v63 = vadd.f32 %v3186_v28, %v1788_v13 }
 0x431   : > { %v3279_v54 = vadd.f32 %v2288_v48, %v1794_v49 }
 0x432   : > { %v2558_v29 = vpop.f32.mrb[22].mxu1  ;;  %v3284_v28 = vadd.f32 %v2287_v43, %v1789_v63 }
 0x433   : > { %v3222_v30 = vpop.eup %2822  ;;  %v1798_v33 = vpop.f32.mrb[23].mxu1  ;;  %v1804_v52 = vadd.f32 %v2558_v29, %v3193_v31  ;;  %v1814_v56 = vsel %vm346_vm0, %v3279_v54, -inf }
 0x434   : > { %v3224_v35 = vpop.eup %2824  ;;  %v1065_v36 = vsel %vm346_vm0, %v3222_v30, 0.0  ;;  %v1799_v55 = vadd.f32 %v3198_v32, %v1798_v33  ;;  %v1811_v31 = vsel %vm346_vm0, %v3284_v28, -inf }
 0x435   : > { %1066 = vadd.xlane.f32.xlu1 %v1065_v36  ;;  %v1062_v21 = vsel %vm346_vm0, %v3224_v35, 0.0  ;;  %v3288_v57 = vadd.f32 %v2290_v9, %v1804_v52 }
 0x436   : > { %1063 = vadd.xlane.f32.xlu0 %v1062_v21  ;;  %v3292_v58 = vadd.f32 %v2289_v46, %v1799_v55 }
 0x437   : > { %v3230_v37 = vpop.eup %2826  ;;  %v1820_v32 = vsel %vm346_vm0, %v3288_v57, -inf }
 0x438   : > { %v3232_v39 = vpop.eup %2828  ;;  %v1071_v40 = vsel %vm346_vm0, %v3230_v37, 0.0  ;;  %v1817_v59 = vsel %vm346_vm0, %v3292_v58, -inf }
 0x439   : > { %1072 = vadd.xlane.f32.xlu1 %v1071_v40  ;;  %v1068_v41 = vsel %vm346_vm0, %v3232_v39, 0.0 }
 0x43a   : > { %1069 = vadd.xlane.f32.xlu0 %v1068_v41 }
 0x44a   : > { %2764 = vrot.lane.b32.xlu1 %v3053_v3, %s2889_s21 }
 0x44e   : > { %2769 = vrot.lane.b32.xlu1 %v3046_v62, %s2890_s22 }
 0x450   : > { %2759 = vrot.lane.b32.xlu0 %v3046_v62, %s2889_s21  ;;  %v1521_v62 = vadd.f32 %v2530_v60, %v3159_v8  ;;  %v1539_v8 = vsel %vm346_vm0, %v3260_v0, -inf }
 0x452   : > { %2774 = vrot.lane.b32.xlu1 %v3053_v3, %s2890_s22  ;;  %v1533_v3 = vsel %vm346_vm0, %v3251_v45, -inf  ;;  %v3274_v51 = vadd.f32 %v2290_v9, %v1521_v62 }
 0x454   : > { %v1542_v27 = vsel %vm346_vm0, %v3274_v51, -inf }
 0x46f   : > { %1534 = vmax.xlane.f32.xlu0 %v1533_v3 }
 0x473   : > { %1540 = vmax.xlane.f32.xlu0 %v1539_v8 }
 0x476   : > { %1537 = vmax.xlane.f32.xlu1 %v1536_v53 }
 0x477   : > { %1543 = vmax.xlane.f32.xlu0 %v1542_v27 }
 0x47a   : > { %1815 = vmax.xlane.f32.xlu1 %v1814_v56 }
 0x47b   : > { %1812 = vmax.xlane.f32.xlu0 %v1811_v31 }
 0x47e   : > { %1821 = vmax.xlane.f32.xlu1 %v1820_v32 }
 0x47f   : > { %1818 = vmax.xlane.f32.xlu0 %v1817_v59 }
 0x4b2   : > { %v788_v1 = vpop.xlane.xlu1 %787 }
 0x4b3   : > { %v785_v60 = vpop.xlane.xlu0 %784 }
 0x4b4   : > { %2830 = vrcp.f32 %v785_v60 }
 0x4b5   : > { %2832 = vrcp.f32 %v788_v1 }
 0x4b7   : > { %v794_v5 = vpop.xlane.xlu1 %793 }
 0x4bb   : > { %v791_v6 = vpop.xlane.xlu0 %790 }
 0x4bc   : > { %2834 = vrcp.f32 %v791_v6 }
 0x4bd   : > { %2836 = vrcp.f32 %v794_v5 }
 0x4be   : > { %v2831_v4 = vpop.eup %2830 }
 0x4bf   : > { %v796_v7 = vmul.f32 %v2831_v4, %v3208_v2  ;;  %v2833_v33 = vpop.eup %2832 }
 0x4c0   : > { %v798_v42 = vmul.f32 %v2833_v33, %v3206_v61  ;;  %v621_v33 = vld [vmem:[%s3453_s6 + $0x8] sm:$0xff] }
 0x4c1   : > { %2463 = vmatprep.mubr.msk.f32.mxu0 %vm346_vm0, %v796_v7 }
 0x4c2   : > { %v1067_v10 = vpop.xlane.xlu1 %1066 }
 0x4c3   : > { %v1064_v11 = vpop.xlane.xlu0 %1063 }
 0x4c4   : > { %2838 = vrcp.f32 %v1064_v11 }
 0x4c5   : > { %2840 = vrcp.f32 %v1067_v10 }
 0x4c6   : > { %v1073_v14 = vpop.xlane.xlu1 %1072  ;;  %v2835_v36 = vpop.eup %2834 }
 0x4c7   : > { %v1070_v16 = vpop.xlane.xlu0 %1069  ;;  %v2837_v43 = vpop.eup %2836  ;;  %v800_v44 = vmul.f32 %v2835_v36, %v3218_v24 }
 0x4c8   : > { %2842 = vrcp.f32 %v1070_v16  ;;  %v802_v62 = vmul.f32 %v2837_v43, %v3214_v15 }
 0x4c9   : > { %2844 = vrcp.f32 %v1073_v14 }
 0x4ca   : > { %v2765_v17 = vpop.permute.xlu1 %2764 }
 0x4cb   : > { %v2760_v12 = vpop.permute.xlu0 %2759  ;;  %v2767_v18 = vunpack.i.h.bf16 %v2765_v17  ;;  %v2766_v19 = vunpack.i.l.bf16 %v2765_v17 }
 0x4cc   : > { %v2762_v22 = vunpack.i.h.bf16 %v2760_v12  ;;  %v2761_v23 = vunpack.i.l.bf16 %v2760_v12 }
 0x4cd   : > { %v2617_v20 = vpack.c.bf16 %v2767_v18, %v2766_v19 }
 0x4ce   : > { %v2770_v25 = vpop.permute.xlu1 %2769  ;;  %v2613_v26 = vpack.c.bf16 %v2762_v22, %v2761_v23  ;;  %v2839_v46 = vpop.eup %2838 }
 0x4cf   : > { %v2772_v2 = vunpack.i.h.bf16 %v2770_v25  ;;  %v2771_v13 = vunpack.i.l.bf16 %v2770_v25  ;;  %v2841_v3 = vpop.eup %2840  ;;  %v1075_v48 = vmul.f32 %v2839_v46, %v3224_v35 }
 0x4d0   : > { %2614 = vmatprep.subr.bf16.mxu0 %v2613_v26  ;;  %v1077_v61 = vmul.f32 %v2841_v3, %v3222_v30 }
 0x4d1   : > { %2616 = vmatpush3.bf16.msra.mxu0 %v2613_v26  ;;  %v2633_v21 = vpack.c.bf16 %v2772_v2, %v2771_v13  ;;  %v623_v2 = vld [vmem:[%s3453_s6 + $0x18] sm:$0xff] }
 0x4d2   : > { %v2775_v29 = vpop.permute.xlu1 %2774  ;;  %2618 = vmatprep.subr.bf16.mxu0 %v2617_v20  ;;  %v2843_v9 = vpop.eup %2842 }
 0x4d3   : > { %v2777_v40 = vunpack.i.h.bf16 %v2775_v29  ;;  %v2776_v41 = vunpack.i.l.bf16 %v2775_v29  ;;  %v2845_v24 = vpop.eup %2844  ;;  %v1079_v49 = vmul.f32 %v2843_v9, %v3232_v39  ;;  %v620_v29 = vld [vmem:[%s3453_s6] sm:$0xff] }
 0x4d4   : > { %v1081_v15 = vmul.f32 %v2845_v24, %v3230_v37  ;;  %v3374_v36 = vpack.c.bf16 %v621_v33, %v620_v29 }
 0x4d5   : > { %2620 = vmatpush3.bf16.msra.mxu0 %v2617_v20  ;;  %v2637_v47 = vpack.c.bf16 %v2777_v40, %v2776_v41  ;;  %v622_v20 = vld [vmem:[%s3453_s6 + $0x10] sm:$0xff] }
 0x4d6   : > { %2634 = vmatprep.subr.bf16.mxu0 %v2633_v21  ;;  %v3360_v13 = vpack.c.bf16 %v623_v2, %v622_v20 }
 0x4d8   : > { %2464 = vmatmul.mubr.msk.f32.vlgmr.msra.gmra.mrb[0].mxu0 %vm346_vm0, %v798_v42 }
 0x4d9   : > { %2466 = vmatprep.mubr.msk.f32.mxu0 %vm346_vm0, %v800_v44  ;;  %2636 = vmatpush3.bf16.msra.mxu0 %v2633_v21 }
 0x4da   : > { %2638 = vmatprep.subr.bf16.mxu0 %v2637_v47 }
 0x4dc   : > { %2467 = vmatmul.mubr.msk.f32.gmra.mrb[2].mxu0 %vm346_vm0, %v802_v62 }
 0x4dd   : > { %2640 = vmatpush3.bf16.msra.mxu0 %v2637_v47  ;;  %2491 = vmatprep.mubr.msk.f32.mxu0 %vm346_vm0, %v1075_v48 }
 0x4de   : > { %2642 = vmatprep.subr.bf16.mxu0 %v3360_v13 }
 0x4e0   : > { %2492 = vmatmul.mubr.msk.f32.vlgmr.msra.gmra.mrb[4].mxu0 %vm346_vm0, %v1077_v61 }
 0x4e1   : > { %2494 = vmatprep.mubr.msk.f32.mxu0 %vm346_vm0, %v1079_v49  ;;  %2644 = vmatpush3.bf16.msra.mxu0 %v3360_v13 }
 0x4e2   : > { %2646 = vmatprep.subr.bf16.mxu0 %v3374_v36 }
 0x4e4   : > { %2495 = vmatmul.mubr.msk.f32.gmra.mrb[6].mxu0 %vm346_vm0, %v1081_v15 }
 0x4fc   : > { %v1535_v35 = vpop.xlane.xlu0 %1534 }
 0x4fd   : > { %v1545_v63 = vsub.f32 %v3251_v45, %v1535_v35 }
 0x4ff   : > { %v1549_v8 = vmul.f32 1.442695, %v1545_v63 }
 0x500   : > { %v1541_v52 = vpop.xlane.xlu0 %1540 }
 0x501   : > { %2846 = vpow2.f32 %v1549_v8  ;;  %v1547_v53 = vsub.f32 %v3260_v0, %v1541_v52 }
 0x503   : > { %v1553_v30 = vmul.f32 1.442695, %v1547_v53  ;;  %v1538_v55 = vpop.xlane.xlu1 %1537 }
 0x504   : > { %v1546_v39 = vsub.f32 %v3269_v50, %v1538_v55  ;;  %v1544_v27 = vpop.xlane.xlu0 %1543 }
 0x505   : > { %2848 = vpow2.f32 %v1553_v30  ;;  %v1548_v56 = vsub.f32 %v3274_v51, %v1544_v27 }
 0x506   : > { %v1551_v31 = vmul.f32 1.442695, %v1546_v39 }
 0x507   : > { %v1555_v37 = vmul.f32 1.442695, %v1548_v56  ;;  %v1816_v32 = vpop.xlane.xlu1 %1815 }
 0x508   : > { %2850 = vpow2.f32 %v1551_v31  ;;  %v1824_v59 = vsub.f32 %v3279_v54, %v1816_v32  ;;  %v1813_v45 = vpop.xlane.xlu0 %1812 }
 0x509   : > { %v1823_v60 = vsub.f32 %v3284_v28, %v1813_v45  ;;  %2852 = vpow2.f32 %v1555_v37 }
 0x50a   : > { %v1829_v1 = vmul.f32 1.442695, %v1824_v59 }
 0x50b   : > { %v3320_v0 = vpop.eup %2846  ;;  %v1827_v4 = vmul.f32 1.442695, %v1823_v60  ;;  %v1822_v5 = vpop.xlane.xlu1 %1821 }
 0x50c   : > { %v1826_v50 = vsub.f32 %v3288_v57, %v1822_v5  ;;  %v1819_v6 = vpop.xlane.xlu0 %1818  ;;  %v1557_v51 = vsel %vm346_vm0, %v3320_v0, 0.0 }
 0x50d   : > { %2854 = vpow2.f32 %v1827_v4  ;;  %v1825_v7 = vsub.f32 %v3292_v58, %v1819_v6  ;;  %1558 = vadd.xlane.f32.xlu0 %v1557_v51 }
 0x50e   : > { %2856 = vpow2.f32 %v1829_v1  ;;  %v1833_v54 = vmul.f32 1.442695, %v1826_v50 }
 0x50f   : > { %v3326_v10 = vpop.eup %2848  ;;  %v1831_v28 = vmul.f32 1.442695, %v1825_v7 }
 0x510   : > { %v1563_v11 = vsel %vm346_vm0, %v3326_v10, 0.0 }
 0x511   : > { %2858 = vpow2.f32 %v1831_v28  ;;  %1564 = vadd.xlane.f32.xlu0 %v1563_v11 }
 0x512   : > { %v3330_v14 = vpop.eup %2850  ;;  %2860 = vpow2.f32 %v1833_v54 }
 0x513   : > { %v1560_v57 = vsel %vm346_vm0, %v3330_v14, 0.0  ;;  %v3334_v16 = vpop.eup %2852 }
 0x514   : > { %1561 = vadd.xlane.f32.xlu1 %v1560_v57  ;;  %v1566_v17 = vsel %vm346_vm0, %v3334_v16, 0.0 }
 0x517   : > { %v3336_v58 = vpop.eup %2854 }
 0x518   : > { %v3340_v12 = vpop.eup %2856  ;;  %1567 = vadd.xlane.f32.xlu1 %v1566_v17  ;;  %v1835_v18 = vsel %vm346_vm0, %v3336_v58, 0.0 }
 0x519   : > { %1836 = vadd.xlane.f32.xlu0 %v1835_v18  ;;  %v1838_v22 = vsel %vm346_vm0, %v3340_v12, 0.0 }
 0x51b   : > { %v3344_v19 = vpop.eup %2858 }
 0x51c   : > { %v3348_v23 = vpop.eup %2860  ;;  %1839 = vadd.xlane.f32.xlu1 %v1838_v22  ;;  %v1841_v25 = vsel %vm346_vm0, %v3344_v19, 0.0 }
 0x51d   : > { %1842 = vadd.xlane.f32.xlu0 %v1841_v25  ;;  %v1844_v26 = vsel %vm346_vm0, %v3348_v23, 0.0 }
 0x520   : > { %1845 = vadd.xlane.f32.xlu1 %v1844_v26 }
 0x531   : > { %2784 = vrot.lane.b32.xlu1 %v3103_v38, %s2889_s21 }
 0x533   : > { %2779 = vrot.lane.b32.xlu0 %v3096_v34, %s2889_s21 }
 0x535   : > { %2789 = vrot.lane.b32.xlu1 %v3096_v34, %s2890_s22 }
 0x539   : > { %2794 = vrot.lane.b32.xlu1 %v3103_v38, %s2890_s22 }
 0x59a   : > { %v1559_v21 = vpop.xlane.xlu0 %1558 }
 0x59b   : > { %2862 = vrcp.f32 %v1559_v21 }
 0x59e   : > { %v1565_v41 = vpop.xlane.xlu0 %1564 }
 0x5a1   : > { %v1562_v40 = vpop.xlane.xlu1 %1561 }
 0x5a2   : > { %2864 = vrcp.f32 %v1562_v40 }
 0x5a3   : > { %2866 = vrcp.f32 %v1565_v41 }
 0x5a5   : > { %v1568_v42 = vpop.xlane.xlu1 %1567  ;;  %v2863_v55 = vpop.eup %2862 }
 0x5a6   : > { %v1837_v43 = vpop.xlane.xlu0 %1836  ;;  %2868 = vrcp.f32 %v1568_v42  ;;  %v1570_v32 = vmul.f32 %v2863_v55, %v3320_v0 }
 0x5a7   : > { %2870 = vrcp.f32 %v1837_v43 }
 0x5a9   : > { %v1840_v44 = vpop.xlane.xlu1 %1839 }
 0x5aa   : > { %v1843_v46 = vpop.xlane.xlu0 %1842  ;;  %2872 = vrcp.f32 %v1840_v44 }
 0x5ab   : > { %v2465_v47 = vpop.f32.mrb[0].mxu0  ;;  %2874 = vrcp.f32 %v1843_v46 }
 0x5ac   : > { %v893_v62 = vpop.f32.mrb[1].mxu0  ;;  %v2865_v37 = vpop.eup %2864 }
 0x5ad   : > { %v1846_v3 = vpop.xlane.xlu1 %1845  ;;  %v2867_v59 = vpop.eup %2866  ;;  %v1572_v4 = vmul.f32 %v2865_v37, %v3330_v14 }
 0x5ae   : > { %v2780_v48 = vpop.permute.xlu0 %2779  ;;  %2876 = vrcp.f32 %v1846_v3  ;;  %v1574_v50 = vmul.f32 %v2867_v59, %v3326_v10 }
 0x5af   : > { %v2468_v9 = vpop.f32.mrb[2].mxu0  ;;  %v2782_v24 = vunpack.i.h.bf16 %v2780_v48  ;;  %v2781_v34 = vunpack.i.l.bf16 %v2780_v48 }
 0x5b0   : > { %v903_v61 = vpop.f32.mrb[3].mxu0  ;;  %v2869_v5 = vpop.eup %2868 }
 0x5b1   : > { %v2785_v49 = vpop.permute.xlu1 %2784  ;;  %v2661_v38 = vpack.c.bf16 %v2782_v24, %v2781_v34  ;;  %v2871_v6 = vpop.eup %2870  ;;  %v1576_v0 = vmul.f32 %v2869_v5, %v3334_v16  ;;  %v2278_v16 = vld [vmem:[%s3454_s7] ss:$0 sm:$0xff] }
 0x5b2   : > { %v2787_v53 = vunpack.i.h.bf16 %v2785_v49  ;;  %v2786_v30 = vunpack.i.l.bf16 %v2785_v49  ;;  %v1848_v54 = vmul.f32 %v2871_v6, %v3336_v58 }
 0x5b3   : > { %v2493_v15 = vpop.f32.mrb[4].mxu0 }
 0x5b4   : > { %v1172_v35 = vpop.f32.mrb[5].mxu0  ;;  %v2665_v39 = vpack.c.bf16 %v2787_v53, %v2786_v30  ;;  %v2873_v7 = vpop.eup %2872 }
 0x5b5   : > { %2501 = vmatprep.mubr.msk.f32.mxu0 %vm645_vm1, %v1172_v35  ;;  %v2790_v52 = vpop.permute.xlu1 %2789  ;;  %v2875_v28 = vpop.eup %2874  ;;  %v1850_v10 = vmul.f32 %v2873_v7, %v3340_v12 }
 0x5b6   : > { %2502 = vmatmul.mubr.msk.f32.vlgmr.msra.gmra.mrb[8].mxu0 %vm645_vm1, %v2493_v15  ;;  %v2792_v27 = vunpack.i.h.bf16 %v2790_v52  ;;  %v2791_v56 = vunpack.i.l.bf16 %v2790_v52  ;;  %v1852_v14 = vmul.f32 %v2875_v28, %v3344_v19 }
 0x5b7   : > { %2648 = vmatpush3.bf16.msra.mxu0 %v3374_v36  ;;  %v2496_v63 = vpop.f32.mrb[6].mxu0 }
 0x5b8   : > { %2662 = vmatprep.subr.bf16.mxu0 %v2661_v38  ;;  %v1182_v8 = vpop.f32.mrb[7].mxu0  ;;  %v2681_v45 = vpack.c.bf16 %v2792_v27, %v2791_v56  ;;  %v2877_v11 = vpop.eup %2876 }
 0x5b9   : > { %2504 = vmatprep.mubr.msk.f32.mxu0 %vm645_vm1, %v1182_v8  ;;  %v2795_v31 = vpop.permute.xlu1 %2794  ;;  %v1854_v57 = vmul.f32 %v2877_v11, %v3348_v23 }
 0x5ba   : > { %2505 = vmatmul.mubr.msk.f32.gmra.mrb[10].mxu0 %vm645_vm1, %v2496_v63  ;;  %v2797_v60 = vunpack.i.h.bf16 %v2795_v31  ;;  %v2796_v1 = vunpack.i.l.bf16 %v2795_v31 }
 0x5bb   : > { %2511 = vmatprep.mubr.msk.f32.mxu0 %vm645_vm1, %v893_v62 }
 0x5bc   : > { %v2685_v51 = vpack.c.bf16 %v2797_v60, %v2796_v1 }
 0x5be   : > { %2512 = vmatmul.mubr.msk.f32.vlgmr.msra.gmra.mrb[8].mxu0 %vm645_vm1, %v2465_v47 }
 0x5bf   : > { %2664 = vmatpush3.bf16.msra.mxu0 %v2661_v38  ;;  %2514 = vmatprep.mubr.msk.f32.mxu0 %vm645_vm1, %v903_v61 }
 0x5c0   : > { %2666 = vmatprep.subr.bf16.mxu0 %v2665_v39 }
 0x5c2   : > { %2515 = vmatmul.mubr.msk.f32.gmra.mrb[10].mxu0 %vm645_vm1, %v2468_v9 }
 0x5c3   : > { %2668 = vmatpush3.bf16.msra.mxu0 %v2665_v39  ;;  %2539 = vmatprep.mubr.msk.f32.mxu0 %vm346_vm0, %v1570_v32 }
 0x5c4   : > { %2682 = vmatprep.subr.bf16.mxu0 %v2681_v45 }
 0x5c6   : > { %2540 = vmatmul.mubr.msk.f32.vlgmr.msra.gmra.mrb[12].mxu0 %vm346_vm0, %v1572_v4 }
 0x5c7   : > { %2684 = vmatpush3.bf16.msra.mxu0 %v2681_v45  ;;  %2542 = vmatprep.mubr.msk.f32.mxu0 %vm346_vm0, %v1574_v50 }
 0x5c8   : > { %2686 = vmatprep.subr.bf16.mxu0 %v2685_v51 }
 0x5ca   : > { %2543 = vmatmul.mubr.msk.f32.gmra.mrb[14].mxu0 %vm346_vm0, %v1576_v0 }
 0x5cb   : > { %2688 = vmatpush3.bf16.msra.mxu0 %v2685_v51  ;;  %2567 = vmatprep.mubr.msk.f32.mxu0 %vm346_vm0, %v1848_v54 }
 0x5cc   : > { %2690 = vmatprep.subr.bf16.mxu0 %v3360_v13 }
 0x5ce   : > { %2568 = vmatmul.mubr.msk.f32.vlgmr.msra.gmra.mrb[16].mxu0 %vm346_vm0, %v1850_v10 }
 0x5cf   : > { %2570 = vmatprep.mubr.msk.f32.mxu0 %vm346_vm0, %v1852_v14  ;;  %2692 = vmatpush3.bf16.msra.mxu0 %v3360_v13 }
 0x5d0   : > { %2694 = vmatprep.subr.bf16.mxu0 %v3374_v36 }
 0x5d2   : > { %2571 = vmatmul.mubr.msk.f32.gmra.mrb[18].mxu0 %vm346_vm0, %v1854_v57 }
 0x691   : > { %v2513_v58 = vpop.f32.mrb[8].mxu0 }
 0x692   : > { %v1392_v17 = vadd.f32 %v2513_v58, %v2278_v16  ;;  %v1366_v12 = vpop.f32.mrb[9].mxu0 }
 0x693   : > { %v1391_v18 = vadd.f32 %v2278_v16, %v1366_v12 }
 0x694   : > { %1396 = vst.msk [vmem:[%s3417_s25 + $0x8] sm:$0xff] %vm346_vm0, %v1392_v17 }
 0x695   : > { %1395 = vst.msk [vmem:[%s3417_s25] sm:$0xff] %vm346_vm0, %v1391_v18  ;;  %v2516_v19 = vpop.f32.mrb[10].mxu0 }
 0x696   : > { %v1394_v22 = vadd.f32 %v2516_v19, %v2278_v16  ;;  %v1376_v23 = vpop.f32.mrb[11].mxu0 }
 0x697   : > { %v1393_v25 = vadd.f32 %v2278_v16, %v1376_v23 }
 0x698   : > { %1398 = vst.msk [vmem:[%s3417_s25 + $0x18] sm:$0xff] %vm346_vm0, %v1394_v22 }
 0x699   : > { %1397 = vst.msk [vmem:[%s3417_s25 + $0x10] sm:$0xff] %vm346_vm0, %v1393_v25  ;;  %v2541_v26 = vpop.f32.mrb[12].mxu0 }
 0x69a   : > { %v1667_v20 = vpop.f32.mrb[13].mxu0 }
 0x69d   : > { %v2544_v2 = vpop.f32.mrb[14].mxu0 }
 0x69e   : > { %v1677_v13 = vpop.f32.mrb[15].mxu0 }
 0x6a1   : > { %v2569_v29 = vpop.f32.mrb[16].mxu0 }
 0x6a2   : > { %v1945_v33 = vpop.f32.mrb[17].mxu0 }
 0x6a3   : > { %2577 = vmatprep.mubr.msk.f32.mxu0 %vm645_vm1, %v1945_v33 }
 0x6a4   : > { %2578 = vmatmul.mubr.msk.f32.vlgmr.msra.gmra.mrb[20].mxu0 %vm645_vm1, %v2569_v29 }
 0x6a5   : > { %v2572_v21 = vpop.f32.mrb[18].mxu0  ;;  %2696 = vmatpush3.bf16.msra.mxu0 %v3374_v36 }
 0x6a6   : > { %v1955_v40 = vpop.f32.mrb[19].mxu0 }
 0x6a7   : > { %2580 = vmatprep.mubr.msk.f32.mxu0 %vm645_vm1, %v1955_v40 }
 0x6a8   : > { %2581 = vmatmul.mubr.msk.f32.gmra.mrb[22].mxu0 %vm645_vm1, %v2572_v21 }
 0x6a9   : > { %2587 = vmatprep.mubr.msk.f32.mxu0 %vm645_vm1, %v1667_v20 }
 0x6ac   : > { %2588 = vmatmul.mubr.msk.f32.vlgmr.msra.gmra.mrb[20].mxu0 %vm645_vm1, %v2541_v26 }
 0x6ad   : > { %2590 = vmatprep.mubr.msk.f32.mxu0 %vm645_vm1, %v1677_v13 }
 0x6b0   : > { %2591 = vmatmul.mubr.msk.f32.gmra.mrb[22].mxu0 %vm645_vm1, %v2544_v2 }
 0x77f   : > { %v2589_v41 = vpop.f32.mrb[20].mxu0 }
 0x780   : > { %v2159_v42 = vadd.f32 %v2589_v41, %v2278_v16  ;;  %v2139_v43 = vpop.f32.mrb[21].mxu0 }
 0x781   : > { %v2158_v44 = vadd.f32 %v2278_v16, %v2139_v43 }
 0x782   : > { %2163 = vst.msk [vmem:[%s3417_s25 + $0x28] sm:$0xff] %vm346_vm0, %v2159_v42 }
 0x783   : > { %2162 = vst.msk [vmem:[%s3417_s25 + $0x20] sm:$0xff] %vm346_vm0, %v2158_v44  ;;  %v2592_v36 = vpop.f32.mrb[22].mxu0 }
 0x784   : > { %v2161_v46 = vadd.f32 %v2592_v36, %v2278_v16  ;;  %v2149_v47 = vpop.f32.mrb[23].mxu0 }
 0x785   : > { %v2160_v62 = vadd.f32 %v2278_v16, %v2149_v47 }
 0x786   : > { %2165 = vst.msk [vmem:[%s3417_s25 + $0x38] sm:$0xff] %vm346_vm0, %v2161_v46 }
 0x787   : > { %2164 = vst.msk [vmem:[%s3417_s25 + $0x30] sm:$0xff] %vm346_vm0, %v2160_v62 }
 0x788 PF: > { %s19_s30 = sadd.s32 1, %s2884_s30  }
 0x789   : > { %p16_p4 = scmp.ge.s32.totalorder %s19_s30, 4  }
 0x78b   :  { %18 = sbr.rel (!%p16_p4) target bundleno = 1 (0x1), region = 88 }

// kernel: swin_forward.15
= control target key start
LH: loop header
LB: loop body
LE: loop exit
PB: predicated region body
PF: predicated region fallthrough
CT: control target
= control target key end

     0   :  { %12 = vsyncpa [#allocation3], 0  ;;  %s1313_s24 = smov 0   ;;  %s1671_s0 = inlined_call_operand.vmem [shape: f32[128,32], index: 0, kind: input, shape index: {}]   ;;  %s1672_s1 = inlined_call_operand.vmem [shape: f32[1,32], index: 1, kind: input, shape index: {}]   ;;  %s1673_s2 = inlined_call_operand.vmem [shape: f32[1,32], index: 2, kind: input, shape index: {}]   ;;  %s1674_s3 = inlined_call_operand.vmem [shape: f32[32,64], index: 3, kind: input, shape index: {}]   ;;  %s1675_s4 = inlined_call_operand.vmem [shape: f32[1,64], index: 4, kind: input, shape index: {}]   ;;  %s1676_s5 = inlined_call_operand.vmem [shape: f32[64,32], index: 5, kind: input, shape index: {}]   ;;  %s1677_s6 = inlined_call_operand.hbm [shape: f32[1,32], index: 6, kind: input, shape index: {}]   ;;  %s1678_s7 = inlined_call_operand.vmem [shape: f32[128,32], index: 7, kind: output, shape index: {}]  }
   0x1 LB: > { %s1024_s25 = sadd.s32 4294967295, %s1270_s24   ;;  %p1026_p0 = scmp.ge.s32.totalorder %s1270_s24, 1  ;;  %s1270_s24 = sphi %s1313_s24, %s18_s24  }
   0x2   : > { %p201_p1 = scmp.lt.s32.totalorder %s1270_s24, 3  ;;  %p1327_p3 = scmp.eq.s32.totalorder %s1024_s25, 0 }
   0x3   : > { %s1272_s28 = smov [#allocation2]   ;;  %s1232_s10 = scalar_lea.hbm %s1677_s6, 16 }
   0x4   : > { %p1321_p2 = pnand %p1026_p0, %p201_p1  ;;  %s229_s29 = sshll.u32 %s1272_s28, 4  ;;  %s230_s29 = int_to_ptr.vmem [resolvable:$true] %s229_s29 }
   0x5   : > { %s1683_s27 = scalar_select %p1327_p3, 1, 0 }
   0x6   : > { %s1682_s26 = scalar_select %p1321_p2, 1, 0 }
   0x7   : > { %p1169_p4 = pneg %p1321_p2  ;;  %p1233_p6 = scmp.ne.s32.totalorder %s1677_s6, %s1232_s10 }
   0x8   : > { %p1239_p10 = scmp.lt.u32.totalorder %s1232_s10, %s1677_s6 }
   0x9   : > { %p1335_p5 = pnand %p1327_p3, %p1169_p4 }
   0xb   : > { %p1234_p7 = pneg %p1335_p5 }
   0xd   : > { %p1235_p8 = pnand %p1234_p7, %p1233_p6 }
   0xf   : > { %p1236_p9 = pneg %p1235_p8 }
  0x11   : > { %p1241_p11 = pnand %p1239_p10, %p1236_p9 }
  0x13   : > { %1244 = shalt.err (!%p1241_p11)
}
  0x14   : > { %s1245_s15 = scalar_lea.vmem %s230_s29, 16  ;;  %s1252_s16 = scalar_lea.vmem %s230_s29, 32 }
  0x15   : > { %p1246_p12 = scmp.ne.s32.totalorder %s230_s29, %s1245_s15  ;;  %p1253_p1 = scmp.lt.s32.totalorder %s230_s29, %s230_s29 }
  0x16   : > { %p1254_p4 = scmp.lt.s32.totalorder %s1252_s16, %s1245_s15 }
  0x17   : > { %p1248_p13 = pnand %p1246_p12, %p1234_p7 }
  0x18   : > { %p1255_p3 = por %p1254_p4, %p1253_p1 }
  0x19   : > { %p1249_p0 = pneg %p1248_p13 }
  0x1b   : > { %p1256_p2 = pnand %p1255_p3, %p1249_p0 }
  0x1d   : > { %1259 = shalt.err (!%p1256_p2)
}
  0x1e   : > { %1172 = dma.hbm_to_vmem [thread:$0]  (!%p1335_p5), %s1677_s6, 16, %s230_s29, [#allocation3]  }
  0x1f   : > { %p1685_p6 = scmp.ne.s32.totalorder %s1682_s26, 0 }
  0x20   : > { %p1686_p8 = scmp.ne.s32.totalorder (!%p1685_p6), %s1683_s27, 0 }
  0x21   : > { %251 = sbr.rel (%p1685_p6) target bundleno = 863 (0x35f), region = 48 }
  0x28   : > { %1265 = dma.done.wait (%p1686_p8), [#allocation3], 16  }
  0x29   : > { %1267 = vsyncadd (%p1686_p8), [#allocation3], 4294967280  ;;  %s1031_s19 = sshll.u32 %s1024_s25, 3  ;;  %vm305_vm0 = vcmask 261120   ;;  %v439_v56 = vld [vmem:[%s1674_s3] sm:$0xff]  ;;  %v440_v57 = vld [vmem:[%s1674_s3 + $0x8] sm:$0xff] }
  0x2a   : > { %p284_p3 = scmp.lt.s32.totalorder %s1031_s19, 15  ;;  %v1133_v58 = vpack.c.bf16 %v440_v57, %v439_v56  ;;  %v441_v59 = vld [vmem:[%s1674_s3 + $0x10] sm:$0xff]  ;;  %v442_v60 = vld [vmem:[%s1674_s3 + $0x18] sm:$0xff]  ;;  %vm810_vm3 = vcmask 523264  }
  0x2b   : > { %v1137_v61 = vpack.c.bf16 %v442_v60, %v441_v59 }
  0x2c   : > { %s1688_s19 = smov (!%p284_p3, %s1031_s19), 15  ;;  %1134 = vmatprep.subr.bf16.mxu0 %v1133_v58 }
  0x2d   : > { %s1032_s20 = sshll.u32 %s1688_s19, 3  ;;  %1136 = vmatpush3.bf16.msra.mxu0 %v1133_v58 }
  0x2e   : > { %s287_s23 = scalar_lea.vmem %s1671_s0, %s1032_s20  ;;  %1138 = vmatprep.subr.bf16.mxu0 %v1137_v61  ;;  %s293_s14 = scalar_lea.vmem %s1678_s7, %s1032_s20 }
  0x2f   : > { %v1371_v0 = vld [vmem:[%s287_s23] sm:$0xff]  ;;  %v1373_v1 = vld [vmem:[%s287_s23 + $0x10] sm:$0xff]  ;;  %v1375_v2 = vld [vmem:[%s287_s23 + $0x8] sm:$0xff] }
  0x30   : > { %v306_v3 = vsel %vm305_vm0, %v1371_v0, 0.0  ;;  %v312_v4 = vsel %vm305_vm0, %v1373_v1, 0.0  ;;  %v1381_v5 = vld [vmem:[%s287_s23 + $0x18] sm:$0xff]  ;;  %v309_v6 = vsel %vm305_vm0, %v1375_v2, 0.0  ;;  %v1387_v8 = vld [vmem:[%s287_s23 + $0x20] sm:$0xff]  ;;  %v1389_v9 = vld [vmem:[%s287_s23 + $0x28] sm:$0xff] }
  0x31   : > { %307 = vadd.xlane.f32.xlu0 %v306_v3  ;;  %313 = vadd.xlane.f32.xlu1 %v312_v4  ;;  %v315_v7 = vsel %vm305_vm0, %v1381_v5, 0.0  ;;  %v318_v10 = vsel %vm305_vm0, %v1387_v8, 0.0  ;;  %v321_v11 = vsel %vm305_vm0, %v1389_v9, 0.0  ;;  %v1395_v12 = vld [vmem:[%s287_s23 + $0x30] sm:$0xff]  ;;  %v1397_v13 = vld [vmem:[%s287_s23 + $0x38] sm:$0xff] }
  0x32   : > { %v324_v14 = vsel %vm305_vm0, %v1395_v12, 0.0  ;;  %v327_v15 = vsel %vm305_vm0, %v1397_v13, 0.0  ;;  %1140 = vmatpush3.bf16.msra.mxu0 %v1137_v61 }
  0x35   : > { %310 = vadd.xlane.f32.xlu0 %v309_v6  ;;  %316 = vadd.xlane.f32.xlu1 %v315_v7 }
  0x39   : > { %319 = vadd.xlane.f32.xlu0 %v318_v10  ;;  %322 = vadd.xlane.f32.xlu1 %v321_v11 }
  0x3d   : > { %325 = vadd.xlane.f32.xlu0 %v324_v14  ;;  %328 = vadd.xlane.f32.xlu1 %v327_v15 }
  0xbe   : > { %v308_v16 = vpop.xlane.xlu0 %307  ;;  %v314_v17 = vpop.xlane.xlu1 %313 }
  0xbf   : > { %v331_v18 = vmul.f32 0.03125, %v308_v16  ;;  %v333_v19 = vmul.f32 0.03125, %v314_v17 }
  0xc1   : > { %v1404_v20 = vsub.f32 %v1371_v0, %v331_v18  ;;  %v1407_v21 = vsub.f32 %v1373_v1, %v333_v19 }
  0xc2   : > { %v311_v22 = vpop.xlane.xlu0 %310  ;;  %v317_v23 = vpop.xlane.xlu1 %316 }
  0xc3   : > { %v332_v24 = vmul.f32 0.03125, %v311_v22  ;;  %v334_v25 = vmul.f32 0.03125, %v317_v23  ;;  %v347_v26 = vmul.f32 %v1404_v20, %v1404_v20  ;;  %v349_v27 = vmul.f32 %v1407_v21, %v1407_v21 }
  0xc5   : > { %v1414_v28 = vsub.f32 %v1375_v2, %v332_v24  ;;  %v1417_v29 = vsub.f32 %v1381_v5, %v334_v25  ;;  %v355_v30 = vsel %vm305_vm0, %v347_v26, 0.0  ;;  %v361_v33 = vsel %vm305_vm0, %v349_v27, 0.0 }
  0xc6   : > { %356 = vadd.xlane.f32.xlu0 %v355_v30  ;;  %v320_v31 = vpop.xlane.xlu0 %319  ;;  %v323_v32 = vpop.xlane.xlu1 %322 }
  0xc7   : > { %v335_v34 = vmul.f32 0.03125, %v320_v31  ;;  %v336_v35 = vmul.f32 0.03125, %v323_v32  ;;  %v348_v36 = vmul.f32 %v1414_v28, %v1414_v28  ;;  %v350_v37 = vmul.f32 %v1417_v29, %v1417_v29  ;;  %v1035_v32 = vld [vmem:[%s1672_s1] ss:$0 sm:$0xff] }
  0xc9   : > { %v1426_v38 = vsub.f32 %v1387_v8, %v335_v34  ;;  %v1429_v39 = vsub.f32 %v1389_v9, %v336_v35  ;;  %v358_v40 = vsel %vm305_vm0, %v348_v36, 0.0  ;;  %v364_v43 = vsel %vm305_vm0, %v350_v37, 0.0  ;;  %v1036_v36 = vld [vmem:[%s1673_s2] ss:$0 sm:$0xff] }
  0xca   : > { %362 = vadd.xlane.f32.xlu0 %v361_v33  ;;  %359 = vadd.xlane.f32.xlu1 %v358_v40  ;;  %v326_v41 = vpop.xlane.xlu0 %325  ;;  %v329_v42 = vpop.xlane.xlu1 %328 }
  0xcb   : > { %v337_v44 = vmul.f32 0.03125, %v326_v41  ;;  %v338_v45 = vmul.f32 0.03125, %v329_v42  ;;  %v351_v46 = vmul.f32 %v1426_v38, %v1426_v38  ;;  %v352_v47 = vmul.f32 %v1429_v39, %v1429_v39 }
  0xcd   : > { %v1438_v48 = vsub.f32 %v1395_v12, %v337_v44  ;;  %v1441_v49 = vsub.f32 %v1397_v13, %v338_v45  ;;  %v367_v50 = vsel %vm305_vm0, %v351_v46, 0.0  ;;  %v370_v51 = vsel %vm305_vm0, %v352_v47, 0.0 }
  0xce   : > { %365 = vadd.xlane.f32.xlu1 %v364_v43  ;;  %368 = vadd.xlane.f32.xlu0 %v367_v50 }
  0xcf   : > { %v353_v52 = vmul.f32 %v1438_v48, %v1438_v48  ;;  %v354_v53 = vmul.f32 %v1441_v49, %v1441_v49 }
  0xd1   : > { %v373_v54 = vsel %vm305_vm0, %v353_v52, 0.0  ;;  %v376_v55 = vsel %vm305_vm0, %v354_v53, 0.0 }
  0xd2   : > { %371 = vadd.xlane.f32.xlu1 %v370_v51  ;;  %374 = vadd.xlane.f32.xlu0 %v373_v54 }
  0xd6   : > { %377 = vadd.xlane.f32.xlu1 %v376_v55 }
 0x153   : > { %v357_v62 = vpop.xlane.xlu0 %356 }
 0x154   : > { %v379_v63 = vmul.f32 0.03125, %v357_v62 }
 0x156   : > { %v387_v3 = vadd.f32 1e-05, %v379_v63 }
 0x157   : > { %v360_v4 = vpop.xlane.xlu1 %359  ;;  %v363_v6 = vpop.xlane.xlu0 %362 }
 0x158   : > { %1184 = vrsqrt.f32 %v387_v3  ;;  %v380_v7 = vmul.f32 0.03125, %v360_v4  ;;  %v381_v10 = vmul.f32 0.03125, %v363_v6  ;;  %v796_v6 = vld [vmem:[%s1676_s5 + $0x8] sm:$0xff] }
 0x15a   : > { %v388_v11 = vadd.f32 1e-05, %v380_v7  ;;  %v389_v14 = vadd.f32 1e-05, %v381_v10  ;;  %v798_v10 = vld [vmem:[%s1676_s5 + $0x18] sm:$0xff] }
 0x15b   : > { %v366_v15 = vpop.xlane.xlu1 %365  ;;  %v369_v16 = vpop.xlane.xlu0 %368 }
 0x15c   : > { %1186 = vrsqrt.f32 %v388_v11  ;;  %v382_v17 = vmul.f32 0.03125, %v366_v15  ;;  %v383_v18 = vmul.f32 0.03125, %v369_v16  ;;  %v800_v15 = vld [vmem:[%s1676_s5 + $0x28] sm:$0xff] }
 0x15d   : > { %1188 = vrsqrt.f32 %v389_v14  ;;  %v799_v14 = vld [vmem:[%s1676_s5 + $0x20] sm:$0xff] }
 0x15e   : > { %v390_v19 = vadd.f32 1e-05, %v382_v17  ;;  %v391_v22 = vadd.f32 1e-05, %v383_v18  ;;  %v1149_v16 = vpack.c.bf16 %v800_v15, %v799_v14  ;;  %v801_v17 = vld [vmem:[%s1676_s5 + $0x30] sm:$0xff]  ;;  %v802_v18 = vld [vmem:[%s1676_s5 + $0x38] sm:$0xff] }
 0x15f   : > { %v372_v23 = vpop.xlane.xlu1 %371  ;;  %v375_v24 = vpop.xlane.xlu0 %374 }
 0x160   : > { %1190 = vrsqrt.f32 %v390_v19  ;;  %v384_v25 = vmul.f32 0.03125, %v372_v23  ;;  %v385_v26 = vmul.f32 0.03125, %v375_v24  ;;  %v1153_v19 = vpack.c.bf16 %v802_v18, %v801_v17 }
 0x161   : > { %1192 = vrsqrt.f32 %v391_v22  ;;  %v1037_v22 = vld [vmem:[%s1675_s4] ss:$0 sm:$0xff] }
 0x162   : > { %v1185_v27 = vpop.eup %1184  ;;  %v392_v30 = vadd.f32 1e-05, %v384_v25  ;;  %v393_v31 = vadd.f32 1e-05, %v385_v26 }
 0x163   : > { %v378_v33 = vpop.xlane.xlu1 %377  ;;  %v403_v34 = vmul.f32 %v1185_v27, %v1404_v20 }
 0x164   : > { %1194 = vrsqrt.f32 %v392_v30  ;;  %v386_v35 = vmul.f32 0.03125, %v378_v33 }
 0x165   : > { %1196 = vrsqrt.f32 %v393_v31  ;;  %v417_v37 = vmul.f32 %v1035_v32, %v403_v34 }
 0x166   : > { %v1187_v40 = vpop.eup %1186  ;;  %v394_v41 = vadd.f32 1e-05, %v386_v35 }
 0x167   : > { %v1189_v42 = vpop.eup %1188  ;;  %v431_v43 = vadd.f32 %v1036_v36, %v417_v37  ;;  %v404_v44 = vmul.f32 %v1187_v40, %v1414_v28 }
 0x168   : > { %1198 = vrsqrt.f32 %v394_v41  ;;  %v405_v45 = vmul.f32 %v1189_v42, %v1407_v21 }
 0x169   : > { %1093 = vmatprep.mubr.msk.f32.mxu0 %vm305_vm0, %v431_v43  ;;  %v418_v20 = vmul.f32 %v1035_v32, %v404_v44 }
 0x16a   : > { %v1191_v46 = vpop.eup %1190  ;;  %v419_v47 = vmul.f32 %v1035_v32, %v405_v45 }
 0x16b   : > { %v1193_v50 = vpop.eup %1192  ;;  %v432_v51 = vadd.f32 %v1036_v36, %v418_v20  ;;  %v406_v52 = vmul.f32 %v1191_v46, %v1417_v29 }
 0x16c   : > { %v433_v53 = vadd.f32 %v1036_v36, %v419_v47  ;;  %v407_v54 = vmul.f32 %v1193_v50, %v1426_v38 }
 0x16d   : > { %1094 = vmatmul.mubr.msk.f32.vlgmr.msra.gmra.mrb[0].mxu0 %vm305_vm0, %v432_v51  ;;  %v420_v55 = vmul.f32 %v1035_v32, %v406_v52 }
 0x16e   : > { %v1195_v56 = vpop.eup %1194  ;;  %1096 = vmatprep.mubr.msk.f32.mxu0 %vm305_vm0, %v433_v53  ;;  %v421_v28 = vmul.f32 %v1035_v32, %v407_v54 }
 0x16f   : > { %v1197_v21 = vpop.eup %1196  ;;  %v434_v57 = vadd.f32 %v1036_v36, %v420_v55  ;;  %v408_v58 = vmul.f32 %v1195_v56, %v1429_v39 }
 0x170   : > { %v435_v59 = vadd.f32 %v1036_v36, %v421_v28  ;;  %v409_v60 = vmul.f32 %v1197_v21, %v1438_v48  ;;  %v795_v48 = vld [vmem:[%s1676_s5] sm:$0xff] }
 0x171   : > { %1097 = vmatmul.mubr.msk.f32.gmra.mrb[2].mxu0 %vm305_vm0, %v434_v57  ;;  %v422_v29 = vmul.f32 %v1035_v32, %v408_v58  ;;  %v1141_v7 = vpack.c.bf16 %v796_v6, %v795_v48 }
 0x172   : > { %v1199_v61 = vpop.eup %1198  ;;  %1099 = vmatprep.mubr.msk.f32.mxu0 %vm305_vm0, %v435_v59  ;;  %v423_v38 = vmul.f32 %v1035_v32, %v409_v60 }
 0x173   : > { %v436_v62 = vadd.f32 %v1036_v36, %v422_v29  ;;  %v410_v63 = vmul.f32 %v1199_v61, %v1441_v49  ;;  %1142 = vmatprep.subr.bf16.mxu0 %v1141_v7  ;;  %1157 = vmatprep.subr.bf16.mxu1 %v1141_v7  ;;  %v797_v49 = vld [vmem:[%s1676_s5 + $0x10] sm:$0xff] }
 0x174   : > { %v437_v3 = vadd.f32 %v1036_v36, %v423_v38  ;;  %1144 = vmatpush3.bf16.msra.mxu0 %v1141_v7  ;;  %1161 = vmatpush3.bf16.msra.mxu1 %v1141_v7  ;;  %v1145_v11 = vpack.c.bf16 %v798_v10, %v797_v49 }
 0x175   : > { %1100 = vmatmul.mubr.msk.f32.gmra.mrb[4].mxu0 %vm305_vm0, %v436_v62  ;;  %v424_v4 = vmul.f32 %v1035_v32, %v410_v63 }
 0x176   : > { %1102 = vmatprep.mubr.msk.f32.mxu0 %vm305_vm0, %v437_v3  ;;  %1146 = vmatprep.subr.bf16.mxu0 %v1145_v11 }
 0x177   : > { %v438_v39 = vadd.f32 %v1036_v36, %v424_v4  ;;  %1158 = vmatprep.subr.bf16.mxu1 %v1145_v11 }
 0x178   : > { %1148 = vmatpush3.bf16.msra.mxu0 %v1145_v11  ;;  %1162 = vmatpush3.bf16.msra.mxu1 %v1145_v11 }
 0x179   : > { %1103 = vmatmul.mubr.msk.f32.gmra.mrb[6].mxu0 %vm305_vm0, %v438_v39  ;;  %1150 = vmatprep.subr.bf16.mxu0 %v1149_v16 }
 0x17a   : > { %1159 = vmatprep.subr.bf16.mxu1 %v1149_v16 }
 0x17c   : > { %1152 = vmatpush3.bf16.msra.mxu0 %v1149_v16  ;;  %1163 = vmatpush3.bf16.msra.mxu1 %v1149_v16 }
 0x17d   : > { %1154 = vmatprep.subr.bf16.mxu0 %v1153_v19  ;;  %1160 = vmatprep.subr.bf16.mxu1 %v1153_v19 }
 0x180   : > { %1156 = vmatpush3.bf16.msra.mxu0 %v1153_v19  ;;  %1164 = vmatpush3.bf16.msra.mxu1 %v1153_v19 }
 0x240   : > { %v1095_v23 = vpop.f32.mrb[0].mxu0 }
 0x241   : > { %v1512_v24 = vadd.f32 %v1095_v23, %v1037_v22  ;;  %v540_v25 = vpop.f32.mrb[1].mxu0 }
 0x242   : > { %v1514_v26 = vadd.f32 %v1037_v22, %v540_v25 }
 0x243   : > { %v1517_v27 = vmul.f32 0.70710677, %v1512_v24 }
 0x244   : > { %v1520_v30 = vmul.f32 0.70710677, %v1514_v26  ;;  %v1098_v31 = vpop.f32.mrb[2].mxu0 }
 0x245   : > { %v596_v32 = vand.u32 2147483647, %v1517_v27  ;;  %v1523_v33 = vadd.f32 %v1098_v31, %v1037_v22  ;;  %v550_v34 = vpop.f32.mrb[3].mxu0  ;;  %vm756_vm1 = vcmp.lt.f32.partialorder %v1517_v27, 0.0  ;;  %v580_v27 = vmul.f32 0.5, %v1512_v24 }
 0x246   : > { %v595_v35 = vand.u32 2147483647, %v1520_v30  ;;  %v1526_v36 = vadd.f32 %v1037_v22, %v550_v34  ;;  %vm755_vm2 = vcmp.lt.f32.partialorder %v1520_v30, 0.0 }
 0x247   : > { %v604_v37 = vmul.f32 0.3275911, %v596_v32  ;;  %v1529_v40 = vmul.f32 0.70710677, %v1523_v33  ;;  %v708_v53 = vsub.f32 0.0, %v596_v32 }
 0x248   : > { %v603_v41 = vmul.f32 0.3275911, %v595_v35  ;;  %v1532_v42 = vmul.f32 0.70710677, %v1526_v36  ;;  %v1101_v45 = vpop.f32.mrb[4].mxu0  ;;  %v707_v58 = vsub.f32 0.0, %v595_v35 }
 0x249   : > { %v612_v43 = vadd.f32 1.0, %v604_v37  ;;  %v598_v44 = vand.u32 2147483647, %v1529_v40  ;;  %v560_v47 = vpop.f32.mrb[5].mxu0  ;;  %v1536_v55 = vadd.f32 %v1101_v45, %v1037_v22  ;;  %v716_v60 = vmul.f32 %v708_v53, %v596_v32 }
 0x24a   : > { %v611_v20 = vadd.f32 1.0, %v603_v41  ;;  %v597_v46 = vand.u32 2147483647, %v1532_v42  ;;  %v1538_v21 = vadd.f32 %v1037_v22, %v560_v47  ;;  %v715_v10 = vmul.f32 %v707_v58, %v595_v35 }
 0x24b   : > { %1200 = vrcp.f32 %v612_v43  ;;  %v606_v50 = vmul.f32 0.3275911, %v598_v44  ;;  %v1541_v57 = vmul.f32 0.70710677, %v1536_v55  ;;  %v710_v4 = vsub.f32 0.0, %v598_v44 }
 0x24c   : > { %1202 = vrcp.f32 %v611_v20  ;;  %v605_v51 = vmul.f32 0.3275911, %v597_v46  ;;  %v1104_v52 = vpop.f32.mrb[6].mxu0  ;;  %v1544_v59 = vmul.f32 0.70710677, %v1538_v21  ;;  %v709_v39 = vsub.f32 0.0, %v597_v46 }
 0x24d   : > { %v614_v54 = vadd.f32 1.0, %v606_v50  ;;  %v570_v56 = vpop.f32.mrb[7].mxu0  ;;  %v600_v29 = vand.u32 2147483647, %v1541_v57  ;;  %v1547_v61 = vadd.f32 %v1104_v52, %v1037_v22  ;;  %v725_v49 = vmul.f32 1.442695, %v716_v60 }
 0x24e   : > { %v613_v28 = vadd.f32 1.0, %v605_v51  ;;  %v599_v38 = vand.u32 2147483647, %v1544_v59  ;;  %v1550_v62 = vadd.f32 %v1037_v22, %v570_v56  ;;  %v718_v32 = vmul.f32 %v710_v4, %v598_v44 }
 0x24f   : > { %1204 = vrcp.f32 %v614_v54  ;;  %v608_v63 = vmul.f32 0.3275911, %v600_v29  ;;  %v1553_v3 = vmul.f32 0.70710677, %v1547_v61  ;;  %v712_v17 = vsub.f32 0.0, %v600_v29 }
 0x250   : > { %1206 = vrcp.f32 %v613_v28  ;;  %v607_v48 = vmul.f32 0.3275911, %v599_v38  ;;  %v1556_v6 = vmul.f32 0.70710677, %v1550_v62  ;;  %v711_v23 = vsub.f32 0.0, %v599_v38 }
 0x251   : > { %v616_v11 = vadd.f32 1.0, %v608_v63  ;;  %v602_v14 = vand.u32 2147483647, %v1553_v3  ;;  %v717_v34 = vmul.f32 %v709_v39, %v597_v46  ;;  %v723_v47 = vmul.f32 1.442695, %v715_v10 }
 0x252   : > { %v615_v18 = vadd.f32 1.0, %v607_v48  ;;  %v601_v19 = vand.u32 2147483647, %v1556_v6  ;;  %v720_v51 = vmul.f32 %v712_v17, %v600_v29  ;;  %v719_v54 = vmul.f32 %v711_v23, %v599_v38 }
 0x253   : > { %1208 = vrcp.f32 %v616_v11  ;;  %v610_v25 = vmul.f32 0.3275911, %v602_v14  ;;  %v714_v43 = vsub.f32 0.0, %v602_v14  ;;  %v729_v28 = vmul.f32 1.442695, %v718_v32 }
 0x254   : > { %1210 = vrcp.f32 %v615_v18  ;;  %v609_v45 = vmul.f32 0.3275911, %v601_v19  ;;  %v727_v60 = vmul.f32 1.442695, %v717_v34  ;;  %v733_v38 = vmul.f32 1.442695, %v720_v51 }
 0x255   : > { %v1558_v7 = vpop.eup %1200  ;;  %v618_v41 = vadd.f32 1.0, %v610_v25  ;;  %v722_v63 = vmul.f32 %v714_v43, %v602_v14  ;;  %v731_v10 = vmul.f32 1.442695, %v719_v54  ;;  %v713_v11 = vsub.f32 0.0, %v601_v19 }
 0x256   : > { %v1561_v15 = vpop.eup %1202  ;;  %v636_v16 = vmul.f32 1.0614054, %v1558_v7  ;;  %v617_v44 = vadd.f32 1.0, %v609_v45  ;;  %v1580_v14 = vmul.f32 0.5, %v1514_v26  ;;  %vm758_vm4 = vcmp.lt.f32.partialorder %v1529_v40, 0.0 }
 0x257   : > { %v635_v22 = vmul.f32 1.0614054, %v1561_v15  ;;  %1212 = vrcp.f32 %v618_v41  ;;  %v737_v23 = vmul.f32 1.442695, %v722_v63  ;;  %v721_v26 = vmul.f32 %v713_v11, %v601_v19 }
 0x258   : > { %v644_v31 = vadd.f32 -1.4531521, %v636_v16  ;;  %1214 = vpow2.f32 %v725_v49  ;;  %vm757_vm5 = vcmp.lt.f32.partialorder %v1532_v42, 0.0  ;;  %vm760_vm6 = vcmp.lt.f32.partialorder %v1541_v57, 0.0 }
 0x259   : > { %v1566_v35 = vpop.eup %1204  ;;  %v643_v37 = vadd.f32 -1.4531521, %v635_v22  ;;  %1216 = vrcp.f32 %v617_v44  ;;  %vm759_vm7 = vcmp.lt.f32.partialorder %v1544_v59, 0.0  ;;  %v583_v42 = vmul.f32 0.5, %v1538_v21 }
 0x25a   : > { %v652_v20 = vmul.f32 %v1558_v7, %v644_v31  ;;  %v638_v50 = vmul.f32 1.0614054, %v1566_v35  ;;  %v1570_v52 = vpop.eup %1206  ;;  %1218 = vpow2.f32 %v723_v47  ;;  %vm762_vm8 = vcmp.lt.f32.partialorder %v1553_v3, 0.0 }
 0x25b   : > { %v651_v53 = vmul.f32 %v1561_v15, %v643_v37  ;;  %v637_v39 = vmul.f32 1.0614054, %v1570_v52  ;;  %1220 = vpow2.f32 %v729_v28  ;;  %v584_v59 = vmul.f32 0.5, %v1536_v55 }
 0x25c   : > { %v660_v46 = vadd.f32 1.4214138, %v652_v20  ;;  %v646_v56 = vadd.f32 -1.4531521, %v638_v50  ;;  %1222 = vpow2.f32 %v727_v60  ;;  %vm761_vm9 = vcmp.lt.f32.partialorder %v1556_v6, 0.0 }
 0x25d   : > { %v659_v58 = vadd.f32 1.4214138, %v651_v53  ;;  %v645_v17 = vadd.f32 -1.4531521, %v637_v39  ;;  %v1577_v18 = vpop.eup %1208  ;;  %1224 = vpow2.f32 %v733_v38  ;;  %v585_v3 = vmul.f32 0.5, %v1550_v62 }
 0x25e   : > { %v668_v4 = vmul.f32 %v1558_v7, %v660_v46  ;;  %v654_v29 = vmul.f32 %v1566_v35, %v646_v56  ;;  %v1582_v25 = vpop.eup %1210  ;;  %v640_v34 = vmul.f32 1.0614054, %v1577_v18  ;;  %1226 = vpow2.f32 %v731_v10  ;;  %v1046_v6 = vld [vmem:[#allocation2] ss:$0 sm:$0xff] }
 0x25f   : > { %v667_v48 = vmul.f32 %v1561_v15, %v659_v58  ;;  %v653_v37 = vmul.f32 %v1570_v52, %v645_v17  ;;  %v639_v43 = vmul.f32 1.0614054, %v1582_v25  ;;  %1228 = vpow2.f32 %v737_v23 }
 0x260   : > { %v676_v16 = vadd.f32 -0.28449672, %v668_v4  ;;  %v662_v49 = vadd.f32 1.4214138, %v654_v29  ;;  %v648_v47 = vadd.f32 -1.4531521, %v640_v34 }
 0x261   : > { %v675_v22 = vadd.f32 -0.28449672, %v667_v48  ;;  %v1590_v50 = vpop.eup %1212  ;;  %v647_v53 = vadd.f32 -1.4531521, %v639_v43  ;;  %v661_v54 = vadd.f32 1.4214138, %v653_v37 }
 0x262   : > { %v684_v31 = vmul.f32 %v1558_v7, %v676_v16  ;;  %v670_v32 = vmul.f32 %v1566_v35, %v662_v49  ;;  %v1215_v44 = vpop.eup %1214  ;;  %v656_v19 = vmul.f32 %v1577_v18, %v648_v47  ;;  %v642_v28 = vmul.f32 1.0614054, %v1590_v50 }
 0x263   : > { %v683_v41 = vmul.f32 %v1561_v15, %v675_v22  ;;  %v1598_v58 = vpop.eup %1216  ;;  %v655_v63 = vmul.f32 %v1582_v25, %v647_v53  ;;  %v735_v4 = vmul.f32 1.442695, %v721_v26  ;;  %v669_v29 = vmul.f32 %v1570_v52, %v661_v54 }
 0x264   : > { %v692_v45 = vadd.f32 0.2548296, %v684_v31  ;;  %v678_v20 = vadd.f32 -0.28449672, %v670_v32  ;;  %v1219_v39 = vpop.eup %1218  ;;  %v664_v38 = vadd.f32 1.4214138, %v656_v19 }
 0x265   : > { %v691_v51 = vadd.f32 0.2548296, %v683_v41  ;;  %v650_v10 = vadd.f32 -1.4531521, %v642_v28  ;;  %v663_v16 = vadd.f32 1.4214138, %v655_v63  ;;  %v1221_v22 = vpop.eup %1220  ;;  %1230 = vpow2.f32 %v735_v4 }
 0x266   : > { %v700_v46 = vmul.f32 %v1558_v7, %v692_v45  ;;  %v686_v56 = vmul.f32 %v1566_v35, %v678_v20  ;;  %v641_v49 = vmul.f32 1.0614054, %v1598_v58  ;;  %v677_v17 = vadd.f32 -0.28449672, %v669_v29  ;;  %v1223_v34 = vpop.eup %1222 }
 0x267   : > { %v699_v60 = vmul.f32 %v1561_v15, %v691_v51  ;;  %v672_v31 = vmul.f32 %v1577_v18, %v664_v38  ;;  %v658_v32 = vmul.f32 %v1590_v50, %v650_v10  ;;  %v671_v41 = vmul.f32 %v1582_v25, %v663_v16  ;;  %v1225_v53 = vpop.eup %1224 }
 0x268   : > { %v740_v48 = vmul.f32 %v1215_v44, %v700_v46  ;;  %v694_v7 = vadd.f32 0.2548296, %v686_v56  ;;  %v649_v43 = vadd.f32 -1.4531521, %v641_v49  ;;  %v685_v26 = vmul.f32 %v1570_v52, %v677_v17  ;;  %v1227_v56 = vpop.eup %1226 }
 0x269   : > { %v739_v11 = vmul.f32 %v1219_v39, %v699_v60  ;;  %v680_v47 = vadd.f32 -0.28449672, %v672_v31  ;;  %v666_v51 = vadd.f32 1.4214138, %v658_v32  ;;  %v679_v44 = vadd.f32 -0.28449672, %v671_v41  ;;  %v1229_v29 = vpop.eup %1228 }
 0x26a   : > { %v748_v23 = vsub.f32 1.0, %v740_v48  ;;  %v702_v15 = vmul.f32 %v1566_v35, %v694_v7  ;;  %v657_v35 = vmul.f32 %v1598_v58, %v649_v43  ;;  %v693_v46 = vadd.f32 0.2548296, %v685_v26 }
 0x26b   : > { %v747_v37 = vsub.f32 1.0, %v739_v11  ;;  %v688_v60 = vmul.f32 %v1577_v18, %v680_v47  ;;  %v674_v63 = vmul.f32 %v1590_v50, %v666_v51  ;;  %v687_v7 = vmul.f32 %v1582_v25, %v679_v44 }
 0x26c   : > { %v764_v45 = vsub.f32 0.0, %v748_v23  ;;  %v742_v20 = vmul.f32 %v1221_v22, %v702_v15  ;;  %v665_v38 = vadd.f32 1.4214138, %v657_v35  ;;  %v701_v22 = vmul.f32 %v1570_v52, %v693_v46 }
 0x26d   : > { %v763_v54 = vsub.f32 0.0, %v747_v37  ;;  %v696_v11 = vadd.f32 0.2548296, %v688_v60  ;;  %v682_v16 = vadd.f32 -0.28449672, %v674_v63 }
 0x26e   : > { %v772_v19 = vsel %vm756_vm1, %v764_v45, %v748_v23  ;;  %v750_v28 = vsub.f32 1.0, %v742_v20  ;;  %v695_v49 = vadd.f32 0.2548296, %v687_v7  ;;  %v673_v17 = vmul.f32 %v1598_v58, %v665_v38 }
 0x26f   : > { %v780_v39 = vadd.f32 1.0, %v772_v19  ;;  %v771_v48 = vsel %vm755_vm2, %v763_v54, %v747_v37  ;;  %v704_v30 = vmul.f32 %v1577_v18, %v696_v11  ;;  %v690_v31 = vmul.f32 %v1590_v50, %v682_v16 }
 0x270   : > { %v779_v10 = vadd.f32 1.0, %v771_v48  ;;  %v766_v15 = vsub.f32 0.0, %v750_v28  ;;  %v703_v37 = vmul.f32 %v1582_v25, %v695_v49  ;;  %v681_v41 = vadd.f32 -0.28449672, %v673_v17 }
 0x271   : > { %v788_v32 = vmul.f32 %v780_v39, %v580_v27  ;;  %v741_v43 = vmul.f32 %v1223_v34, %v701_v22  ;;  %v744_v4 = vmul.f32 %v1225_v53, %v704_v30  ;;  %v698_v26 = vadd.f32 0.2548296, %v690_v31 }
 0x272   : > { %v787_v23 = vmul.f32 %v779_v10, %v1580_v14  ;;  %v743_v24 = vmul.f32 %v1227_v56, %v703_v37  ;;  %v689_v52 = vmul.f32 %v1598_v58, %v681_v41  ;;  %v774_v18 = vsel %vm758_vm4, %v766_v15, %v750_v28  ;;  %v1231_v56 = vpop.eup %1230 }
 0x273   : > { %v749_v14 = vsub.f32 1.0, %v741_v43  ;;  %v752_v45 = vsub.f32 1.0, %v744_v4  ;;  %v706_v20 = vmul.f32 %v1590_v50, %v698_v26  ;;  %v581_v25 = vmul.f32 0.5, %v1526_v36 }
 0x274   : > { %1121 = vmatprep.mubr.msk.f32.mxu0 %vm810_vm3, %v787_v23  ;;  %v751_v47 = vsub.f32 1.0, %v743_v24  ;;  %v697_v34 = vadd.f32 0.2548296, %v689_v52  ;;  %v782_v54 = vadd.f32 1.0, %v774_v18  ;;  %v582_v28 = vmul.f32 0.5, %v1523_v33 }
 0x275   : > { %1122 = vmatmul.mubr.msk.f32.vlgmr.msra.gmra.mrb[8].mxu0 %vm810_vm3, %v788_v32  ;;  %v765_v51 = vsub.f32 0.0, %v749_v14  ;;  %v768_v40 = vsub.f32 0.0, %v752_v45  ;;  %v746_v53 = vmul.f32 %v1229_v29, %v706_v20  ;;  %v586_v49 = vmul.f32 0.5, %v1547_v61 }
 0x276   : > { %v767_v44 = vsub.f32 0.0, %v751_v47  ;;  %v705_v35 = vmul.f32 %v1598_v58, %v697_v34  ;;  %v790_v48 = vmul.f32 %v782_v54, %v582_v28 }
 0x277   : > { %v773_v46 = vsel %vm757_vm5, %v765_v51, %v749_v14  ;;  %v776_v19 = vsel %vm760_vm6, %v768_v40, %v752_v45  ;;  %v754_v50 = vsub.f32 1.0, %v746_v53 }
 0x278   : > { %v781_v36 = vadd.f32 1.0, %v773_v46  ;;  %v775_v60 = vsel %vm759_vm7, %v767_v44, %v751_v47  ;;  %v745_v63 = vmul.f32 %v1231_v56, %v705_v35  ;;  %v784_v7 = vadd.f32 1.0, %v776_v19 }
 0x279   : > { %v783_v57 = vadd.f32 1.0, %v775_v60  ;;  %v770_v39 = vsub.f32 0.0, %v754_v50 }
 0x27a   : > { %v789_v29 = vmul.f32 %v781_v36, %v581_v25  ;;  %v753_v58 = vsub.f32 1.0, %v745_v63  ;;  %v792_v33 = vmul.f32 %v784_v7, %v584_v59 }
 0x27b   : > { %v791_v38 = vmul.f32 %v783_v57, %v583_v42  ;;  %v778_v10 = vsel %vm762_vm8, %v770_v39, %v754_v50 }
 0x27c   : > { %1124 = vmatprep.mubr.msk.f32.mxu1 %vm810_vm3, %v789_v29  ;;  %v769_v11 = vsub.f32 0.0, %v753_v58  ;;  %v786_v21 = vadd.f32 1.0, %v778_v10 }
 0x27d   : > { %1125 = vmatmul.mubr.msk.f32.vlgmr.msra.gmra.mrb[0].mxu1 %vm810_vm3, %v790_v48 }
 0x27e   : > { %1127 = vmatprep.mubr.msk.f32.mxu1 %vm810_vm3, %v791_v38  ;;  %v777_v16 = vsel %vm761_vm9, %v769_v11, %v753_v58  ;;  %v794_v55 = vmul.f32 %v786_v21, %v586_v49 }
 0x27f   : > { %v785_v27 = vadd.f32 1.0, %v777_v16 }
 0x281   : > { %1128 = vmatmul.mubr.msk.f32.gmra.mrb[2].mxu1 %vm810_vm3, %v792_v33  ;;  %v793_v17 = vmul.f32 %v785_v27, %v585_v3 }
 0x283   : > { %1130 = vmatprep.mubr.msk.f32.mxu1 %vm810_vm3, %v793_v17 }
 0x285   : > { %1131 = vmatmul.mubr.msk.f32.gmra.mrb[4].mxu1 %vm810_vm3, %v794_v55 }
 0x348   : > { %v1123_v22 = vpop.f32.mrb[8].mxu0 }
 0x349   : > { %v907_v23 = vadd.f32 %v1123_v22, %v1046_v6  ;;  %v901_v15 = vpop.f32.mrb[9].mxu0 }
 0x34a   : > { %v902_v62 = vadd.f32 %v1046_v6, %v901_v15 }
 0x34b   : > { %v941_v61 = vadd.f32 %v907_v23, %v1375_v2 }
 0x34c   : > { %v940_v30 = vadd.f32 %v902_v62, %v1371_v0 }
 0x34d   : > { %949 = vst.msk [vmem:[%s293_s14 + $0x8] sm:$0xff] %vm305_vm0, %v941_v61 }
 0x34e   : > { %948 = vst.msk [vmem:[%s293_s14] sm:$0xff] %vm305_vm0, %v940_v30 }
 0x350   : > { %v1126_v31 = vpop.f32.mrb[0].mxu1 }
 0x351   : > { %v917_v32 = vadd.f32 %v1126_v31, %v1046_v6  ;;  %v911_v37 = vpop.f32.mrb[1].mxu1 }
 0x352   : > { %v912_v41 = vadd.f32 %v1046_v6, %v911_v37 }
 0x353   : > { %v943_v43 = vadd.f32 %v917_v32, %v1381_v5 }
 0x354   : > { %v942_v4 = vadd.f32 %v912_v41, %v1373_v1  ;;  %v1129_v26 = vpop.f32.mrb[2].mxu1 }
 0x355   : > { %951 = vst.msk [vmem:[%s293_s14 + $0x18] sm:$0xff] %vm305_vm0, %v943_v43  ;;  %v927_v24 = vadd.f32 %v1129_v26, %v1046_v6  ;;  %v921_v52 = vpop.f32.mrb[3].mxu1 }
 0x356   : > { %950 = vst.msk [vmem:[%s293_s14 + $0x10] sm:$0xff] %vm305_vm0, %v942_v4  ;;  %v922_v0 = vadd.f32 %v1046_v6, %v921_v52 }
 0x357   : > { %v945_v2 = vadd.f32 %v927_v24, %v1389_v9 }
 0x358   : > { %v944_v14 = vadd.f32 %v922_v0, %v1387_v8  ;;  %v1132_v18 = vpop.f32.mrb[4].mxu1 }
 0x359   : > { %953 = vst.msk [vmem:[%s293_s14 + $0x28] sm:$0xff] %vm305_vm0, %v945_v2  ;;  %v937_v45 = vadd.f32 %v1132_v18, %v1046_v6  ;;  %v931_v20 = vpop.f32.mrb[5].mxu1 }
 0x35a   : > { %952 = vst.msk [vmem:[%s293_s14 + $0x20] sm:$0xff] %vm305_vm0, %v944_v14  ;;  %v932_v1 = vadd.f32 %v1046_v6, %v931_v20 }
 0x35b   : > { %v947_v5 = vadd.f32 %v937_v45, %v1397_v13 }
 0x35c   : > { %v946_v25 = vadd.f32 %v932_v1, %v1395_v12 }
 0x35d   : > { %955 = vst.msk [vmem:[%s293_s14 + $0x38] sm:$0xff] %vm305_vm0, %v947_v5 }
 0x35e   : > { %954 = vst.msk [vmem:[%s293_s14 + $0x30] sm:$0xff] %vm305_vm0, %v946_v25 }
 0x35f PF: > { %s18_s24 = sadd.s32 1, %s1270_s24  }
 0x360   : > { %p15_p2 = scmp.ge.s32.totalorder %s18_s24, 4  }
 0x362   :  { %17 = sbr.rel (!%p15_p2) target bundleno = 1 (0x1), region = 83 }
 0x369   :  { %978 = vsyncpa [#allocation3], 1 }
 0x36a   :  { %980 = vsyncpa [#allocation3 + $0x1], 1 }

// kernel: swin_forward.16
= control target key start
LH: loop header
LB: loop body
LE: loop exit
PB: predicated region body
PF: predicated region fallthrough
CT: control target
= control target key end

     0   :  { %s537_s15 = smov 0   ;;  %s615_s0 = inlined_call_operand.vmem [shape: f32[32,128], index: 0, kind: input, shape index: {}]   ;;  %s616_s1 = inlined_call_operand.vmem [shape: f32[1,128], index: 1, kind: input, shape index: {}]   ;;  %s617_s2 = inlined_call_operand.vmem [shape: f32[1,128], index: 2, kind: input, shape index: {}]   ;;  %s618_s3 = inlined_call_operand.vmem [shape: f32[128,64], index: 3, kind: input, shape index: {}]   ;;  %s619_s4 = inlined_call_operand.vmem [shape: f32[32,64], index: 4, kind: output, shape index: {}]  }
   0x1 LB: > { %s394_s16 = sadd.s32 4294967295, %s510_s15   ;;  %p398_p0 = scmp.ge.s32.totalorder %s510_s15, 1  ;;  %s510_s15 = sphi %s537_s15, %s14_s15  }
   0x2   : > { %p163_p1 = scmp.lt.s32.totalorder %s510_s15, 3 }
   0x4   : > { %p164_p2 = pnand %p398_p0, %p163_p1 }
   0x5   : > { %s399_s17 = sshll.u32 (!%p164_p2), %s394_s16, 1  ;;  %v244_v2 = vld [vmem:[%s618_s3] sm:$0xff] (!%p164_p2)  ;;  %v245_v3 = vld [vmem:[%s618_s3 + $0x8] sm:$0xff] (!%p164_p2)  ;;  %v246_v4 = vld [vmem:[%s618_s3 + $0x10] sm:$0xff] (!%p164_p2)  ;;  %vm335_vm0 = vcmask (!%p164_p2), 523264  }
   0x6   : > { %167 = sbr.rel (%p164_p2) target bundleno = 546 (0x222), region = 36  ;;  %p190_p3 = scmp.lt.s32.totalorder (!%p164_p2), %s399_s17, 3  ;;  %v460_v5 = vpack.c.bf16 (!%p164_p2), %v245_v3, %v244_v2  ;;  %v247_v6 = vld [vmem:[%s618_s3 + $0x18] sm:$0xff] (!%p164_p2)  ;;  %v248_v16 = vld [vmem:[%s618_s3 + $0x20] sm:$0xff] (!%p164_p2)  ;;  %v249_v17 = vld [vmem:[%s618_s3 + $0x28] sm:$0xff] (!%p164_p2) }
   0x7   : > { %v464_v7 = vpack.c.bf16 (!%p164_p2), %v247_v6, %v246_v4  ;;  %v468_v18 = vpack.c.bf16 (!%p164_p2), %v249_v17, %v248_v16  ;;  %v250_v19 = vld [vmem:[%s618_s3 + $0x30] sm:$0xff] (!%p164_p2)  ;;  %v251_v20 = vld [vmem:[%s618_s3 + $0x38] sm:$0xff] (!%p164_p2)  ;;  %v252_v22 = vld [vmem:[%s618_s3 + $0x40] sm:$0xff] (!%p164_p2) }
   0x8   : > { %461 = vmatprep.subr.bf16.mxu0 (!%p164_p2), %v460_v5  ;;  %v472_v21 = vpack.c.bf16 (!%p164_p2), %v251_v20, %v250_v19  ;;  %v253_v23 = vld [vmem:[%s618_s3 + $0x48] sm:$0xff] (!%p164_p2)  ;;  %v254_v25 = vld [vmem:[%s618_s3 + $0x50] sm:$0xff] (!%p164_p2)  ;;  %v255_v26 = vld [vmem:[%s618_s3 + $0x58] sm:$0xff] (!%p164_p2) }
   0x9   : > { %463 = vmatpush3.bf16.msra.mxu0 (!%p164_p2), %v460_v5  ;;  %v476_v24 = vpack.c.bf16 (!%p164_p2), %v253_v23, %v252_v22  ;;  %v256_v27 = vld [vmem:[%s618_s3 + $0x60] sm:$0xff] (!%p164_p2)  ;;  %v480_v28 = vpack.c.bf16 (!%p164_p2), %v255_v26, %v254_v25  ;;  %v257_v29 = vld [vmem:[%s618_s3 + $0x68] sm:$0xff] (!%p164_p2)  ;;  %v258_v31 = vld [vmem:[%s618_s3 + $0x70] sm:$0xff] (!%p164_p2) }
   0xa   : > { %465 = vmatprep.subr.bf16.mxu0 (!%p164_p2), %v464_v7  ;;  %v484_v30 = vpack.c.bf16 (!%p164_p2), %v257_v29, %v256_v27  ;;  %v259_v32 = vld [vmem:[%s618_s3 + $0x78] sm:$0xff] (!%p164_p2)  ;;  %v403_v41 = vld [vmem:[%s616_s1] ss:$0 sm:$0xff] (!%p164_p2) }
   0xb   : > { %v488_v33 = vpack.c.bf16 (!%p164_p2), %v259_v32, %v258_v31  ;;  %v404_v43 = vld [vmem:[%s617_s2] ss:$0 sm:$0xff] (!%p164_p2) }
   0xd   : > { %s621_s17 = smov (!%p190_p3, %s399_s17), 3  ;;  %467 = vmatpush3.bf16.msra.mxu0 %v464_v7 }
   0xe   : > { %s400_s18 = sshll.u32 %s621_s17, 3  ;;  %469 = vmatprep.subr.bf16.mxu0 %v468_v18 }
   0xf   : > { %s193_s21 = scalar_lea.vmem %s615_s0, %s400_s18  ;;  %s199_s11 = scalar_lea.vmem %s619_s4, %s400_s18 }
  0x10   : > { %v201_v0 = vld [vmem:[%s193_s21] sm:$0xff]  ;;  %v202_v1 = vld [vmem:[%s193_s21 + $0x8] sm:$0xff] }
  0x11   : > { %205 = vadd.xlane.f32.xlu0 %v201_v0  ;;  %471 = vmatpush3.bf16.msra.mxu0 %v468_v18 }
  0x12   : > { %473 = vmatprep.subr.bf16.mxu0 %v472_v21 }
  0x15   : > { %207 = vadd.xlane.f32.xlu0 %v202_v1  ;;  %475 = vmatpush3.bf16.msra.mxu0 %v472_v21 }
  0x16   : > { %477 = vmatprep.subr.bf16.mxu0 %v476_v24 }
  0x19   : > { %479 = vmatpush3.bf16.msra.mxu0 %v476_v24 }
  0x1a   : > { %481 = vmatprep.subr.bf16.mxu0 %v480_v28 }
  0x1d   : > { %483 = vmatpush3.bf16.msra.mxu0 %v480_v28 }
  0x1e   : > { %485 = vmatprep.subr.bf16.mxu0 %v484_v30 }
  0x21   : > { %487 = vmatpush3.bf16.msra.mxu0 %v484_v30 }
  0x22   : > { %489 = vmatprep.subr.bf16.mxu0 %v488_v33 }
  0x25   : > { %491 = vmatpush3.bf16.msra.mxu0 %v488_v33 }
  0x9e   : > { %v206_v8 = vpop.xlane.xlu0 %205 }
  0x9f   : > { %v210_v9 = vmul.f32 0.0078125, %v206_v8 }
  0xa1   : > { %v212_v10 = vsub.f32 %v201_v0, %v210_v9 }
  0xa2   : > { %v208_v11 = vpop.xlane.xlu0 %207 }
  0xa3   : > { %v211_v12 = vmul.f32 0.0078125, %v208_v11  ;;  %v214_v13 = vmul.f32 %v212_v10, %v212_v10 }
  0xa5   : > { %v213_v14 = vsub.f32 %v202_v1, %v211_v12  ;;  %216 = vadd.xlane.f32.xlu1 %v214_v13 }
  0xa7   : > { %v215_v15 = vmul.f32 %v213_v14, %v213_v14 }
  0xa9   : > { %218 = vadd.xlane.f32.xlu1 %v215_v15 }
 0x132   : > { %v217_v34 = vpop.xlane.xlu1 %216 }
 0x133   : > { %v220_v35 = vmul.f32 0.0078125, %v217_v34 }
 0x135   : > { %v222_v36 = vadd.f32 1e-05, %v220_v35 }
 0x136   : > { %v219_v37 = vpop.xlane.xlu1 %218 }
 0x137   : > { %500 = vrsqrt.f32 %v222_v36  ;;  %v221_v38 = vmul.f32 0.0078125, %v219_v37 }
 0x139   : > { %v223_v39 = vadd.f32 1e-05, %v221_v38 }
 0x13b   : > { %502 = vrsqrt.f32 %v223_v39 }
 0x141   : > { %v501_v40 = vpop.eup %500 }
 0x142   : > { %v226_v42 = vmul.f32 %v501_v40, %v212_v10 }
 0x144   : > { %v234_v44 = vmul.f32 %v403_v41, %v226_v42 }
 0x145   : > { %v503_v45 = vpop.eup %502 }
 0x146   : > { %v227_v46 = vmul.f32 %v503_v45, %v213_v14  ;;  %v242_v47 = vadd.f32 %v404_v43, %v234_v44 }
 0x148   : > { %v235_v48 = vmul.f32 %v403_v41, %v227_v46  ;;  %457 = vmatprep.mubr.f32.mxu0 %v242_v47 }
 0x14a   : > { %v243_v49 = vadd.f32 %v404_v43, %v235_v48 }
 0x14c   : > { %458 = vmatmul.mubr.f32.vlgmr.msra.gmra.mrb[0].mxu0 %v243_v49 }
 0x21f   : > { %v459_v50 = vpop.f32.mrb[0].mxu0 }
 0x220   : > { %v326_v51 = vpop.f32.mrb[1].mxu0  ;;  %337 = vst.msk [vmem:[%s199_s11 + $0x8] sm:$0xff] %vm335_vm0, %v459_v50 }
 0x221   : > { %336 = vst.msk [vmem:[%s199_s11] sm:$0xff] %vm335_vm0, %v326_v51 }
 0x222 PF: > { %s14_s15 = sadd.s32 1, %s510_s15  }
 0x223   : > { %p11_p4 = scmp.ge.s32.totalorder %s14_s15, 4  }
 0x225   :  { %13 = sbr.rel (!%p11_p4) target bundleno = 1 (0x1), region = 66 }

// kernel: swin_forward.18
= control target key start
LH: loop header
LB: loop body
LE: loop exit
PB: predicated region body
PF: predicated region fallthrough
CT: control target
= control target key end

     0   :  { %s853_s24 = smov 0   ;;  %s979_s0 = inlined_call_operand.vmem [shape: f32[32,64], index: 0, kind: input, shape index: {}]   ;;  %s980_s1 = inlined_call_operand.vmem [shape: f32[1,64], index: 1, kind: input, shape index: {}]   ;;  %s981_s2 = inlined_call_operand.vmem [shape: f32[1,64], index: 2, kind: input, shape index: {}]   ;;  %s982_s3 = inlined_call_operand.vmem [shape: f32[64,128], index: 3, kind: input, shape index: {}]   ;;  %s983_s4 = inlined_call_operand.vmem [shape: f32[1,128], index: 4, kind: input, shape index: {}]   ;;  %s984_s5 = inlined_call_operand.vmem [shape: f32[128,64], index: 5, kind: input, shape index: {}]   ;;  %s985_s6 = inlined_call_operand.vmem [shape: f32[1,64], index: 6, kind: input, shape index: {}]   ;;  %s986_s7 = inlined_call_operand.vmem [shape: f32[32,64], index: 7, kind: output, shape index: {}]  }
   0x1 LB: > { %s638_s25 = sadd.s32 4294967295, %s811_s24   ;;  %p642_p0 = scmp.ge.s32.totalorder %s811_s24, 1  ;;  %s811_s24 = sphi %s853_s24, %s17_s24  }
   0x2   : > { %p238_p1 = scmp.lt.s32.totalorder %s811_s24, 3 }
   0x4   : > { %p239_p2 = pnand %p642_p0, %p238_p1 }
   0x5   : > { %s643_s26 = sshll.u32 (!%p239_p2), %s638_s25, 1  ;;  %vm286_vm0 = vcmask (!%p239_p2), 523264   ;;  %v330_v14 = vld [vmem:[%s982_s3] sm:$0xff] (!%p239_p2)  ;;  %v331_v15 = vld [vmem:[%s982_s3 + $0x8] sm:$0xff] (!%p239_p2)  ;;  %v332_v17 = vld [vmem:[%s982_s3 + $0x10] sm:$0xff] (!%p239_p2) }
   0x6   : > { %242 = sbr.rel (%p239_p2) target bundleno = 816 (0x330), region = 48  ;;  %p271_p3 = scmp.lt.s32.totalorder (!%p239_p2), %s643_s26, 3  ;;  %v737_v16 = vpack.c.bf16 (!%p239_p2), %v331_v15, %v330_v14  ;;  %v333_v18 = vld [vmem:[%s982_s3 + $0x18] sm:$0xff] (!%p239_p2)  ;;  %v334_v19 = vld [vmem:[%s982_s3 + $0x20] sm:$0xff] (!%p239_p2)  ;;  %v335_v21 = vld [vmem:[%s982_s3 + $0x28] sm:$0xff] (!%p239_p2) }
   0x7   : > { %v741_v20 = vpack.c.bf16 (!%p239_p2), %v333_v18, %v332_v17  ;;  %v745_v22 = vpack.c.bf16 (!%p239_p2), %v335_v21, %v334_v19  ;;  %v336_v23 = vld [vmem:[%s982_s3 + $0x30] sm:$0xff] (!%p239_p2)  ;;  %v337_v24 = vld [vmem:[%s982_s3 + $0x38] sm:$0xff] (!%p239_p2)  ;;  %v647_v33 = vld [vmem:[%s980_s1] ss:$0 sm:$0xff] (!%p239_p2) }
   0x8   : > { %738 = vmatprep.subr.bf16.mxu0 (!%p239_p2), %v737_v16  ;;  %v749_v25 = vpack.c.bf16 (!%p239_p2), %v337_v24, %v336_v23  ;;  %v648_v35 = vld [vmem:[%s981_s2] ss:$0 sm:$0xff] (!%p239_p2)  ;;  %v481_v43 = vld [vmem:[%s984_s5 + $0x8] sm:$0xff] (!%p239_p2)  ;;  %v482_v44 = vld [vmem:[%s984_s5 + $0x10] sm:$0xff] (!%p239_p2) }
   0x9   : > { %740 = vmatpush3.bf16.msra.mxu0 (!%p239_p2), %v737_v16  ;;  %v480_v42 = vld [vmem:[%s984_s5] sm:$0xff] (!%p239_p2)  ;;  %v483_v46 = vld [vmem:[%s984_s5 + $0x18] sm:$0xff] (!%p239_p2)  ;;  %v485_v49 = vld [vmem:[%s984_s5 + $0x28] sm:$0xff] (!%p239_p2) }
   0xa   : > { %742 = vmatprep.subr.bf16.mxu0 (!%p239_p2), %v741_v20  ;;  %v753_v45 = vpack.c.bf16 (!%p239_p2), %v481_v43, %v480_v42  ;;  %v757_v47 = vpack.c.bf16 (!%p239_p2), %v483_v46, %v482_v44  ;;  %v484_v48 = vld [vmem:[%s984_s5 + $0x20] sm:$0xff] (!%p239_p2)  ;;  %v486_v51 = vld [vmem:[%s984_s5 + $0x30] sm:$0xff] (!%p239_p2)  ;;  %v487_v52 = vld [vmem:[%s984_s5 + $0x38] sm:$0xff] (!%p239_p2) }
   0xb   : > { %v761_v50 = vpack.c.bf16 (!%p239_p2), %v485_v49, %v484_v48  ;;  %v765_v53 = vpack.c.bf16 (!%p239_p2), %v487_v52, %v486_v51  ;;  %v488_v54 = vld [vmem:[%s984_s5 + $0x40] sm:$0xff] (!%p239_p2)  ;;  %v489_v55 = vld [vmem:[%s984_s5 + $0x48] sm:$0xff] (!%p239_p2)  ;;  %v490_v57 = vld [vmem:[%s984_s5 + $0x50] sm:$0xff] (!%p239_p2) }
   0xc   : > { %754 = vmatprep.subr.bf16.mxu1 (!%p239_p2), %v753_v45  ;;  %v769_v56 = vpack.c.bf16 (!%p239_p2), %v489_v55, %v488_v54  ;;  %v491_v58 = vld [vmem:[%s984_s5 + $0x58] sm:$0xff] (!%p239_p2)  ;;  %v492_v60 = vld [vmem:[%s984_s5 + $0x60] sm:$0xff] (!%p239_p2)  ;;  %v493_v61 = vld [vmem:[%s984_s5 + $0x68] sm:$0xff] (!%p239_p2) }
   0xd   : > { %s988_s26 = smov (!%p271_p3, %s643_s26), 3  ;;  %744 = vmatpush3.bf16.msra.mxu0 %v741_v20  ;;  %756 = vmatpush3.bf16.msra.mxu1 %v753_v45  ;;  %v773_v59 = vpack.c.bf16 %v491_v58, %v490_v57  ;;  %v777_v62 = vpack.c.bf16 %v493_v61, %v492_v60  ;;  %v494_v63 = vld [vmem:[%s984_s5 + $0x70] sm:$0xff] }
   0xe   : > { %s644_s27 = sshll.u32 %s988_s26, 3  ;;  %746 = vmatprep.subr.bf16.mxu0 %v745_v22  ;;  %758 = vmatprep.subr.bf16.mxu1 %v757_v47 }
   0xf   : > { %s274_s30 = scalar_lea.vmem %s979_s0, %s644_s27  ;;  %s280_s29 = scalar_lea.vmem %s986_s7, %s644_s27 }
  0x10   : > { %v869_v0 = vld [vmem:[%s274_s30] sm:$0xff]  ;;  %v871_v1 = vld [vmem:[%s274_s30 + $0x8] sm:$0xff] }
  0x11   : > { %v287_v2 = vsel %vm286_vm0, %v869_v0, 0.0  ;;  %v290_v3 = vsel %vm286_vm0, %v871_v1, 0.0  ;;  %748 = vmatpush3.bf16.msra.mxu0 %v745_v22  ;;  %760 = vmatpush3.bf16.msra.mxu1 %v757_v47 }
  0x12   : > { %288 = vadd.xlane.f32.xlu0 %v287_v2  ;;  %750 = vmatprep.subr.bf16.mxu0 %v749_v25  ;;  %v495_v2 = vld [vmem:[%s984_s5 + $0x78] sm:$0xff] }
  0x13   : > { %762 = vmatprep.subr.bf16.mxu1 %v761_v50 }
  0x15   : > { %752 = vmatpush3.bf16.msra.mxu0 %v749_v25  ;;  %764 = vmatpush3.bf16.msra.mxu1 %v761_v50 }
  0x16   : > { %291 = vadd.xlane.f32.xlu0 %v290_v3  ;;  %766 = vmatprep.subr.bf16.mxu1 %v765_v53  ;;  %v781_v3 = vpack.c.bf16 %v495_v2, %v494_v63 }
  0x19   : > { %768 = vmatpush3.bf16.msra.mxu1 %v765_v53 }
  0x1a   : > { %770 = vmatprep.subr.bf16.mxu1 %v769_v56 }
  0x1d   : > { %772 = vmatpush3.bf16.msra.mxu1 %v769_v56 }
  0x1e   : > { %774 = vmatprep.subr.bf16.mxu1 %v773_v59 }
  0x21   : > { %776 = vmatpush3.bf16.msra.mxu1 %v773_v59  ;;  %v652_v59 = vld [vmem:[%s985_s6] ss:$0 sm:$0xff] }
  0x22   : > { %778 = vmatprep.subr.bf16.mxu1 %v777_v62 }
  0x25   : > { %780 = vmatpush3.bf16.msra.mxu1 %v777_v62 }
  0x26   : > { %782 = vmatprep.subr.bf16.mxu1 %v781_v3 }
  0x29   : > { %784 = vmatpush3.bf16.msra.mxu1 %v781_v3 }
  0x9f   : > { %v289_v4 = vpop.xlane.xlu0 %288 }
  0xa0   : > { %v294_v5 = vmul.f32 0.015625, %v289_v4  ;;  %v649_v4 = vld [vmem:[%s983_s4] ss:$0 sm:$0xff] }
  0xa2   : > { %v296_v6 = vsub.f32 %v869_v0, %v294_v5 }
  0xa3   : > { %v292_v7 = vpop.xlane.xlu0 %291 }
  0xa4   : > { %v295_v8 = vmul.f32 0.015625, %v292_v7  ;;  %v298_v9 = vmul.f32 %v296_v6, %v296_v6 }
  0xa6   : > { %v297_v10 = vsub.f32 %v871_v1, %v295_v8  ;;  %v300_v11 = vsel %vm286_vm0, %v298_v9, 0.0 }
  0xa7   : > { %301 = vadd.xlane.f32.xlu1 %v300_v11 }
  0xa8   : > { %v299_v12 = vmul.f32 %v297_v10, %v297_v10 }
  0xaa   : > { %v303_v13 = vsel %vm286_vm0, %v299_v12, 0.0 }
  0xab   : > { %304 = vadd.xlane.f32.xlu1 %v303_v13 }
 0x134   : > { %v302_v26 = vpop.xlane.xlu1 %301 }
 0x135   : > { %v306_v27 = vmul.f32 0.015625, %v302_v26 }
 0x137   : > { %v308_v28 = vadd.f32 1e-05, %v306_v27 }
 0x138   : > { %v305_v29 = vpop.xlane.xlu1 %304 }
 0x139   : > { %793 = vrsqrt.f32 %v308_v28  ;;  %v307_v30 = vmul.f32 0.015625, %v305_v29 }
 0x13b   : > { %v309_v31 = vadd.f32 1e-05, %v307_v30 }
 0x13d   : > { %795 = vrsqrt.f32 %v309_v31 }
 0x143   : > { %v794_v32 = vpop.eup %793 }
 0x144   : > { %v312_v34 = vmul.f32 %v794_v32, %v296_v6 }
 0x146   : > { %v320_v36 = vmul.f32 %v647_v33, %v312_v34 }
 0x147   : > { %v796_v37 = vpop.eup %795 }
 0x148   : > { %v313_v38 = vmul.f32 %v796_v37, %v297_v10  ;;  %v328_v39 = vadd.f32 %v648_v35, %v320_v36 }
 0x14a   : > { %v321_v40 = vmul.f32 %v647_v33, %v313_v38  ;;  %699 = vmatprep.mubr.msk.f32.mxu0 %vm286_vm0, %v328_v39 }
 0x14c   : > { %v329_v41 = vadd.f32 %v648_v35, %v321_v40 }
 0x14e   : > { %700 = vmatmul.mubr.msk.f32.vlgmr.msra.gmra.mrb[0].mxu0 %vm286_vm0, %v329_v41 }
 0x221   : > { %v701_v5 = vpop.f32.mrb[0].mxu0 }
 0x222   : > { %v423_v6 = vadd.f32 %v701_v5, %v649_v4  ;;  %v417_v7 = vpop.f32.mrb[1].mxu0 }
 0x223   : > { %v418_v8 = vadd.f32 %v649_v4, %v417_v7 }
 0x224   : > { %v429_v9 = vmul.f32 0.70710677, %v423_v6  ;;  %v427_v56 = vmul.f32 0.5, %v423_v6 }
 0x225   : > { %v428_v10 = vmul.f32 0.70710677, %v418_v8  ;;  %v426_v54 = vmul.f32 0.5, %v418_v8 }
 0x226   : > { %v431_v11 = vand.u32 2147483647, %v429_v9  ;;  %vm471_vm1 = vcmp.lt.f32.partialorder %v429_v9, 0.0 }
 0x227   : > { %v430_v12 = vand.u32 2147483647, %v428_v10  ;;  %vm470_vm2 = vcmp.lt.f32.partialorder %v428_v10, 0.0 }
 0x228   : > { %v433_v13 = vmul.f32 0.3275911, %v431_v11  ;;  %v459_v17 = vsub.f32 0.0, %v431_v11 }
 0x229   : > { %v432_v14 = vmul.f32 0.3275911, %v430_v12  ;;  %v458_v18 = vsub.f32 0.0, %v430_v12 }
 0x22a   : > { %v435_v15 = vadd.f32 1.0, %v433_v13  ;;  %v461_v20 = vmul.f32 %v459_v17, %v431_v11 }
 0x22b   : > { %v434_v16 = vadd.f32 1.0, %v432_v14  ;;  %v460_v22 = vmul.f32 %v458_v18, %v430_v12 }
 0x22c   : > { %797 = vrcp.f32 %v435_v15  ;;  %v464_v26 = vmul.f32 1.442695, %v461_v20 }
 0x22d   : > { %799 = vrcp.f32 %v434_v16  ;;  %v462_v28 = vmul.f32 1.442695, %v460_v22 }
 0x22e   : > { %801 = vpow2.f32 %v464_v26 }
 0x22f   : > { %803 = vpow2.f32 %v462_v28 }
 0x236   : > { %v798_v19 = vpop.eup %797 }
 0x237   : > { %v800_v21 = vpop.eup %799  ;;  %v441_v23 = vmul.f32 1.0614054, %v798_v19 }
 0x238   : > { %v440_v24 = vmul.f32 1.0614054, %v800_v21  ;;  %v802_v42 = vpop.eup %801 }
 0x239   : > { %v443_v25 = vadd.f32 -1.4531521, %v441_v23  ;;  %v804_v44 = vpop.eup %803 }
 0x23a   : > { %v442_v27 = vadd.f32 -1.4531521, %v440_v24 }
 0x23b   : > { %v445_v29 = vmul.f32 %v798_v19, %v443_v25 }
 0x23c   : > { %v444_v30 = vmul.f32 %v800_v21, %v442_v27 }
 0x23d   : > { %v447_v31 = vadd.f32 1.4214138, %v445_v29 }
 0x23e   : > { %v446_v32 = vadd.f32 1.4214138, %v444_v30 }
 0x23f   : > { %v449_v33 = vmul.f32 %v798_v19, %v447_v31 }
 0x240   : > { %v448_v34 = vmul.f32 %v800_v21, %v446_v32 }
 0x241   : > { %v451_v35 = vadd.f32 -0.28449672, %v449_v33 }
 0x242   : > { %v450_v36 = vadd.f32 -0.28449672, %v448_v34 }
 0x243   : > { %v453_v37 = vmul.f32 %v798_v19, %v451_v35 }
 0x244   : > { %v452_v38 = vmul.f32 %v800_v21, %v450_v36 }
 0x245   : > { %v455_v39 = vadd.f32 0.2548296, %v453_v37 }
 0x246   : > { %v454_v40 = vadd.f32 0.2548296, %v452_v38 }
 0x247   : > { %v457_v41 = vmul.f32 %v798_v19, %v455_v39 }
 0x248   : > { %v456_v43 = vmul.f32 %v800_v21, %v454_v40 }
 0x249   : > { %v467_v45 = vmul.f32 %v802_v42, %v457_v41 }
 0x24a   : > { %v466_v46 = vmul.f32 %v804_v44, %v456_v43 }
 0x24b   : > { %v469_v47 = vsub.f32 1.0, %v467_v45 }
 0x24c   : > { %v468_v48 = vsub.f32 1.0, %v466_v46 }
 0x24d   : > { %v473_v49 = vsub.f32 0.0, %v469_v47 }
 0x24e   : > { %v472_v50 = vsub.f32 0.0, %v468_v48 }
 0x24f   : > { %v475_v51 = vsel %vm471_vm1, %v473_v49, %v469_v47 }
 0x250   : > { %v474_v52 = vsel %vm470_vm2, %v472_v50, %v468_v48  ;;  %v477_v53 = vadd.f32 1.0, %v475_v51 }
 0x251   : > { %v476_v55 = vadd.f32 1.0, %v474_v52 }
 0x252   : > { %v479_v58 = vmul.f32 %v477_v53, %v427_v56 }
 0x253   : > { %v478_v57 = vmul.f32 %v476_v55, %v426_v54 }
 0x255   : > { %734 = vmatprep.mubr.f32.mxu1 %v478_v57 }
 0x256   : > { %735 = vmatmul.mubr.f32.vlgmr.msra.gmra.mrb[0].mxu1 %v479_v58 }
 0x329   : > { %v736_v60 = vpop.f32.mrb[0].mxu1 }
 0x32a   : > { %v575_v61 = vadd.f32 %v736_v60, %v652_v59  ;;  %v569_v62 = vpop.f32.mrb[1].mxu1 }
 0x32b   : > { %v570_v63 = vadd.f32 %v652_v59, %v569_v62 }
 0x32c   : > { %v579_v3 = vadd.f32 %v575_v61, %v871_v1 }
 0x32d   : > { %v578_v2 = vadd.f32 %v570_v63, %v869_v0 }
 0x32e   : > { %581 = vst.msk [vmem:[%s280_s29 + $0x8] sm:$0xff] %vm286_vm0, %v579_v3 }
 0x32f   : > { %580 = vst.msk [vmem:[%s280_s29] sm:$0xff] %vm286_vm0, %v578_v2 }
 0x330 PF: > { %s17_s24 = sadd.s32 1, %s811_s24  }
 0x331   : > { %p14_p4 = scmp.ge.s32.totalorder %s17_s24, 4  }
 0x333   :  { %16 = sbr.rel (!%p14_p4) target bundleno = 1 (0x1), region = 78 }

// kernel: swin_forward.17
= control target key start
LH: loop header
LB: loop body
LE: loop exit
PB: predicated region body
PF: predicated region fallthrough
CT: control target
= control target key end

     0   :  { %s2865_s27 = smov 0   ;;  %s3239_s0 = inlined_call_operand.vmem [shape: f32[32,64], index: 0, kind: input, shape index: {}]   ;;  %s3240_s1 = inlined_call_operand.vmem [shape: f32[1,64], index: 1, kind: input, shape index: {}]   ;;  %s3241_s2 = inlined_call_operand.vmem [shape: f32[1,64], index: 2, kind: input, shape index: {}]   ;;  %s3242_s3 = inlined_call_operand.vmem [shape: f32[64,192], index: 3, kind: input, shape index: {}]   ;;  %s3243_s4 = inlined_call_operand.vmem [shape: f32[1,192], index: 4, kind: input, shape index: {}]   ;;  %s3244_s5 = inlined_call_operand.vmem [shape: f32[4,8,8], index: 5, kind: input, shape index: {}]   ;;  %s3245_s6 = inlined_call_operand.vmem [shape: f32[64,64], index: 6, kind: input, shape index: {}]   ;;  %s3246_s7 = inlined_call_operand.vmem [shape: f32[1,64], index: 7, kind: input, shape index: {}]   ;;  %s3247_s8 = inlined_call_operand.vmem [shape: f32[32,64], index: 8, kind: output, shape index: {}]  }
   0x1 LB: > { %s2462_s28 = sadd.s32 4294967295, %s2808_s27   ;;  %p2466_p0 = scmp.ge.s32.totalorder %s2808_s27, 1  ;;  %s2808_s27 = sphi %s2865_s27, %s18_s27  }
   0x2   : > { %p263_p1 = scmp.lt.s32.totalorder %s2808_s27, 3 }
   0x4   : > { %p264_p2 = pnand %p2466_p0, %p263_p1 }
   0x5   : > { %s2467_s29 = sshll.u32 (!%p264_p2), %s2462_s28, 1  ;;  %vm313_vm0 = vcmask (!%p264_p2), 523264   ;;  %v358_v7 = vld [vmem:[%s3242_s3 + $0x8] sm:$0xff] (!%p264_p2)  ;;  %v360_v8 = vld [vmem:[%s3242_s3 + $0x18] sm:$0xff] (!%p264_p2)  ;;  %v357_v10 = vld [vmem:[%s3242_s3] sm:$0xff] (!%p264_p2)  ;;  %v2810_v20 = vmov (!%p264_p2), 0.0   ;;  %v375_v41 = vlaneseq (!%p264_p2) }
   0x6   : > { %267 = sbr.rel (%p264_p2) target bundleno = 5239 (0x1477), region = 52  ;;  %p298_p3 = scmp.lt.s32.totalorder (!%p264_p2), %s2467_s29, 3  ;;  %v2708_v9 = vpack.c.bf16 (!%p264_p2), %v360_v8, %v358_v7  ;;  %v359_v11 = vld [vmem:[%s3242_s3 + $0x10] sm:$0xff] (!%p264_p2)  ;;  %v362_v13 = vld [vmem:[%s3242_s3 + $0x28] sm:$0xff] (!%p264_p2)  ;;  %v364_v14 = vld [vmem:[%s3242_s3 + $0x38] sm:$0xff] (!%p264_p2)  ;;  %455 = vmatprep.mubr.f32.mxu0 (!%p264_p2), %v2810_v20  ;;  %2572 = vmatprep.subr.mxu1 (!%p264_p2), %v2810_v20  ;;  %vm2811_vm1 = vmmov (!%p264_p2), 0  }
   0x7   : > { %v2710_v12 = vpack.c.bf16 (!%p264_p2), %v359_v11, %v357_v10  ;;  %v361_v15 = vld [vmem:[%s3242_s3 + $0x20] sm:$0xff] (!%p264_p2)  ;;  %v2712_v16 = vpack.c.bf16 (!%p264_p2), %v364_v14, %v362_v13  ;;  %v363_v17 = vld [vmem:[%s3242_s3 + $0x30] sm:$0xff] (!%p264_p2)  ;;  %v366_v18 = vld [vmem:[%s3242_s3 + $0x48] sm:$0xff] (!%p264_p2)  ;;  %v376_v42 = vshrl.u32 (!%p264_p2), %v375_v41, 7  ;;  %2574 = vmatprep.mubr.msk.f32.mxu1 (!%p264_p2), %vm2811_vm1, %v2810_v20  ;;  %s2812_s14 = smov (!%p264_p2), 48   ;;  %s2813_s15 = smov (!%p264_p2), 64  }
   0x8   : > { %2709 = vmatprep.subr.bf16.mxu0 (!%p264_p2), %v2708_v9  ;;  %v368_v19 = vld [vmem:[%s3242_s3 + $0x58] sm:$0xff] (!%p264_p2)  ;;  %v2714_v21 = vpack.c.bf16 (!%p264_p2), %v363_v17, %v361_v15  ;;  %v365_v23 = vld [vmem:[%s3242_s3 + $0x40] sm:$0xff] (!%p264_p2)  ;;  %v367_v24 = vld [vmem:[%s3242_s3 + $0x50] sm:$0xff] (!%p264_p2)  ;;  %vm482_vm2 = vcmask (!%p264_p2), 130048   ;;  %vm558_vm3 = vcmask (!%p264_p2), 64512   ;;  %s2814_s18 = smov (!%p264_p2), 112  }
   0x9   : > { %2711 = vmatpush1.bf16.msra.mxu0 (!%p264_p2), %v2710_v12  ;;  %v2716_v22 = vpack.c.bf16 (!%p264_p2), %v368_v19, %v366_v18  ;;  %v370_v25 = vld [vmem:[%s3242_s3 + $0x68] sm:$0xff] (!%p264_p2)  ;;  %v372_v26 = vld [vmem:[%s3242_s3 + $0x78] sm:$0xff] (!%p264_p2)  ;;  %v2718_v27 = vpack.c.bf16 (!%p264_p2), %v367_v24, %v365_v23  ;;  %v369_v29 = vld [vmem:[%s3242_s3 + $0x60] sm:$0xff] (!%p264_p2)  ;;  %v377_v43 = vsub.s32 (!%p264_p2), 0, %v376_v42  ;;  %v381_v49 = vsub.s32 (!%p264_p2), 1, %v376_v42  ;;  %s2816_s21 = smov (!%p264_p2), 32  }
   0xa   : > { %2713 = vmatprep.subr.bf16.mxu0 (!%p264_p2), %v2712_v16  ;;  %v2720_v28 = vpack.c.bf16 (!%p264_p2), %v372_v26, %v370_v25  ;;  %v371_v30 = vld [vmem:[%s3242_s3 + $0x70] sm:$0xff] (!%p264_p2)  ;;  %v2939_v36 = vld [vmem:[%s3240_s1] ss:$0 sm:$0xff] (!%p264_p2)  ;;  %v3001_v7 = vld [vmem:[%s3244_s5 + $0x8] sm:$0xff] (!%p264_p2)  ;;  %v2817_v25 = vmov (!%p264_p2), 0.0|0.0   ;;  %s2818_s16 = smov (!%p264_p2), 80  }
   0xb   : > { %v2722_v31 = vpack.c.bf16 (!%p264_p2), %v371_v30, %v369_v29  ;;  %v2944_v38 = vld [vmem:[%s3241_s2] ss:$0 sm:$0xff] (!%p264_p2)  ;;  %s2819_s17 = smov (!%p264_p2), 16  }
   0xc   : > { %v373_v44 = vld [vmem:[%s3243_s4] sm:$0x3] (!%p264_p2) }
   0xd   : > { %s3249_s29 = smov (!%p298_p3, %s2467_s29), 3  ;;  %2715 = vmatpush1.bf16.msra.mxu0 %v2714_v21  ;;  %v2955_v45 = vrot.slane %v373_v44, %v377_v43  ;;  %v2964_v50 = vrot.slane %v373_v44, %v381_v49  ;;  %v2983_v54 = vld [vmem:[%s3244_s5] sm:$0xff] }
   0xe   : > { %s2468_s30 = sshll.u32 %s3249_s29, 3  ;;  %2717 = vmatprep.subr.bf16.mxu0 %v2716_v22  ;;  %v468_v26 = vld [vmem:[%s3245_s6] sm:$0xff] }
   0xf   : > { %s2881_s11 = scalar_lea.vmem %s3239_s0, %s2468_s30  ;;  %s3177_s13 = scalar_lea.vmem %s3247_s8, %s2468_s30 }
  0x10   : > { %v309_v0 = vld [vmem:[%s2881_s11] sm:$0xff]  ;;  %v310_v11 = vld [vmem:[%s2881_s11 + $0x8] sm:$0xff]  ;;  %s2815_s11 = smov 96  }
  0x11   : > { %v314_v1 = vsel %vm313_vm0, %v309_v0, 0.0  ;;  %2719 = vmatpush1.bf16.msra.mxu0 %v2718_v27  ;;  %v317_v13 = vsel %vm313_vm0, %v310_v11, 0.0  ;;  %v469_v27 = vld [vmem:[%s3245_s6 + $0x8] sm:$0xff] }
  0x12   : > { %315 = vadd.xlane.f32.xlu0 %v314_v1  ;;  %2721 = vmatprep.subr.bf16.mxu0 %v2720_v28  ;;  %v3024_v28 = vpack.c.bf16 %v469_v27, %v468_v26 }
  0x15   : > { %2723 = vmatpush1.bf16.msra.mxu0 %v2722_v31 }
  0x16   : > { %2727 = vmatprep.subr.bf16.mxu0 %v2817_v25 }
  0x9f   : > { %v316_v2 = vpop.xlane.xlu0 %315 }
  0xa0   : > { %v321_v3 = vmul.f32 0.015625, %v316_v2 }
  0xa2   : > { %v323_v4 = vsub.f32 %v309_v0, %v321_v3 }
  0xa4   : > { %v325_v5 = vmul.f32 %v323_v4, %v323_v4 }
  0xa6   : > { %v327_v6 = vsel %vm313_vm0, %v325_v5, 0.0 }
  0xa7   : > { %328 = vadd.xlane.f32.xlu0 %v327_v6 }
 0x134   : > { %v329_v32 = vpop.xlane.xlu0 %328 }
 0x135   : > { %v333_v33 = vmul.f32 0.015625, %v329_v32 }
 0x137   : > { %v335_v34 = vadd.f32 1e-05, %v333_v33 }
 0x139   : > { %2766 = vrsqrt.f32 %v335_v34  ;;  %v470_v34 = vld [vmem:[%s3245_s6 + $0x10] sm:$0xff] }
 0x143   : > { %v2767_v35 = vpop.eup %2766 }
 0x144   : > { %v339_v37 = vmul.f32 %v2767_v35, %v323_v4  ;;  %v471_v35 = vld [vmem:[%s3245_s6 + $0x18] sm:$0xff] }
 0x145   : > { %v3035_v41 = vpack.c.bf16 %v471_v35, %v470_v34 }
 0x146   : > { %v347_v39 = vmul.f32 %v2939_v36, %v339_v37 }
 0x148   : > { %v355_v40 = vadd.f32 %v2944_v38, %v347_v39 }
 0x14a   : > { %2473 = vmatmul.mubr.msk.f32.vlgmr.msra.gmra.mrb[0].mxu0 %vm313_vm0, %v355_v40 }
 0x14b   : > { %461 = vmatprep.mubr.f32.mxu0 %v2810_v20  ;;  %2729 = vmatpush3.bf16.msra.mxu0 %v3024_v28 }
 0x14c   : > { %2611 = vmatprep.subr.mxu0 %v2810_v20 }
 0x21d   : > { %v457_v46 = vpop.f32.mrb[0].mxu0 }
 0x21e   : > { %v2958_v47 = vadd.f32 %v457_v46, %v2955_v45  ;;  %v459_v48 = vpop.f32.mrb[1].mxu0 }
 0x21f   : > { %v2972_v53 = vadd.f32 %v459_v48, %v2964_v50 }
 0x220   : > { %647 = vrot.lane.b32.xlu0 %v2958_v47, %s2812_s14  ;;  %480 = vrot.lane.b32.xlu1 %v2958_v47, %s2813_s15  ;;  %v2968_v52 = vmul.f32 0.25, %v2958_v47 }
 0x292   : > { %v481_v51 = vpop.permute.xlu1 %480  ;;  %v648_v0 = vpop.permute.xlu0 %647 }
 0x293   : > { %2573 = vmatpush3.xpose.msk.msra.mxu1 %vm482_vm2, %v481_v51 }
 0x294   : > { %2577 = vmatprep.subr.mxu1 %v2810_v20 }
 0x296   : > { %2575 = vmatmul.mubr.msk.f32.vlgmr.msra.gmra.mrb[0].mxu1 %vm482_vm2, %v2968_v52 }
 0x297   : > { %2578 = vmatpush3.msra.mxu1 %v2972_v53  ;;  %2579 = vmatprep.mubr.msk.f32.mxu1 %vm2811_vm1, %v2810_v20 }
 0x298   : > { %2582 = vmatprep.subr.mxu1 %v2810_v20 }
 0x369   : > { %v554_v55 = vpop.f32.mrb[0].mxu1 }
 0x36a   : > { %v555_v56 = vadd.f32 %v554_v55, %v2983_v54  ;;  %v2576_v57 = vpop.f32.mrb[1].mxu1 }
 0x36c   : > { %v559_v58 = vsel %vm558_vm3, %v555_v56, -inf }
 0x36d   : > { %560 = vmax.xlane.f32.xlu1 %v559_v58 }
 0x3fa   : > { %v561_v59 = vpop.xlane.xlu1 %560 }
 0x3fb   : > { %v562_v60 = vsub.f32 %v555_v56, %v561_v59 }
 0x3fd   : > { %v563_v61 = vmul.f32 1.442695, %v562_v60 }
 0x3ff   : > { %2768 = vpow2.f32 %v563_v61  ;;  %v3066_v61 = vld [vmem:[%s3244_s5 + $0x10] sm:$0xff] }
 0x409   : > { %v2769_v62 = vpop.eup %2768 }
 0x40a   : > { %v565_v63 = vsel %vm558_vm3, %v2769_v62, 0.0 }
 0x40b   : > { %566 = vadd.xlane.f32.xlu0 %v565_v63 }
 0x421   : > { %645 = vrot.lane.b32.xlu0 %v2968_v52, %s2814_s18 }
 0x498   : > { %v567_v1 = vpop.xlane.xlu0 %566 }
 0x499   : > { %2770 = vrcp.f32 %v567_v1 }
 0x49c   : > { %v646_v4 = vpop.permute.xlu0 %645 }
 0x4a3   : > { %v2771_v2 = vpop.eup %2770 }
 0x4a4   : > { %v569_v3 = vmul.f32 %v2771_v2, %v2769_v62 }
 0x4a6   : > { %2580 = vmatmul.mubr.msk.f32.vlgmr.msra.gmra.mrb[2].mxu1 %vm558_vm3, %v569_v3 }
 0x4a7   : > { %2583 = vmatpush3.xpose.msk.msra.mxu1 %vm482_vm2, %v648_v0  ;;  %2584 = vmatprep.mubr.msk.f32.mxu1 %vm2811_vm1, %v2810_v20 }
 0x4a8   : > { %2587 = vmatprep.subr.mxu1 %v2810_v20 }
 0x4aa   : > { %2585 = vmatmul.mubr.msk.f32.vlgmr.msra.gmra.mrb[4].mxu1 %vm482_vm2, %v646_v4 }
 0x4ab   : > { %2589 = vmatprep.mubr.msk.f32.mxu1 %vm2811_vm1, %v2810_v20 }
 0x579   : > { %v639_v5 = vpop.f32.mrb[2].mxu1 }
 0x57a   : > { %v2581_v6 = vpop.f32.mrb[3].mxu1 }
 0x57d   : > { %v719_v8 = vpop.f32.mrb[4].mxu1 }
 0x57e   : > { %v720_v9 = vadd.f32 %v3001_v7, %v719_v8  ;;  %v2586_v10 = vpop.f32.mrb[5].mxu1  ;;  %v472_v8 = vld [vmem:[%s3245_s6 + $0x20] sm:$0xff] }
 0x580   : > { %v723_v12 = vsel %vm558_vm3, %v720_v9, -inf }
 0x581   : > { %724 = vmax.xlane.f32.xlu0 %v723_v12 }
 0x585   : > { %318 = vadd.xlane.f32.xlu0 %v317_v13 }
 0x60e   : > { %v725_v14 = vpop.xlane.xlu0 %724 }
 0x60f   : > { %v726_v15 = vsub.f32 %v720_v9, %v725_v14 }
 0x611   : > { %v727_v16 = vmul.f32 1.442695, %v726_v15 }
 0x612   : > { %v319_v17 = vpop.xlane.xlu0 %318 }
 0x613   : > { %2772 = vpow2.f32 %v727_v16  ;;  %v322_v18 = vmul.f32 0.015625, %v319_v17  ;;  %v3097_v16 = vld [vmem:[%s3244_s5 + $0x18] sm:$0xff] }
 0x615   : > { %v324_v19 = vsub.f32 %v310_v11, %v322_v18 }
 0x617   : > { %v326_v21 = vmul.f32 %v324_v19, %v324_v19 }
 0x619   : > { %v330_v22 = vsel %vm313_vm0, %v326_v21, 0.0 }
 0x61a   : > { %331 = vadd.xlane.f32.xlu0 %v330_v22 }
 0x61d   : > { %v2773_v23 = vpop.eup %2772 }
 0x61e   : > { %v729_v24 = vsel %vm558_vm3, %v2773_v23, 0.0 }
 0x61f   : > { %730 = vadd.xlane.f32.xlu1 %v729_v24 }
 0x630   : > { %735 = vrot.lane.b32.xlu1 %v2972_v53, %s2814_s18  ;;  %1048 = vrot.lane.b32.xlu0 %v2972_v53, %s2815_s11 }
 0x634   : > { %961 = vrot.lane.b32.xlu1 %v2958_v47, %s2816_s21 }
 0x638   : > { %959 = vrot.lane.b32.xlu1 %v2968_v52, %s2815_s11 }
 0x6a7   : > { %v332_v29 = vpop.xlane.xlu0 %331 }
 0x6a8   : > { %v334_v30 = vmul.f32 0.015625, %v332_v29 }
 0x6aa   : > { %v336_v31 = vadd.f32 1e-05, %v334_v30  ;;  %v474_v30 = vld [vmem:[%s3245_s6 + $0x30] sm:$0xff] }
 0x6ab   : > { %v1049_v46 = vpop.permute.xlu0 %1048 }
 0x6ac   : > { %2774 = vrsqrt.f32 %v336_v31  ;;  %v731_v32 = vpop.xlane.xlu1 %730  ;;  %v475_v31 = vld [vmem:[%s3245_s6 + $0x38] sm:$0xff] }
 0x6ad   : > { %2776 = vrcp.f32 %v731_v32  ;;  %v3125_v32 = vpack.c.bf16 %v475_v31, %v474_v30 }
 0x6b0   : > { %v736_v33 = vpop.permute.xlu1 %735 }
 0x6b1   : > { %2588 = vmatpush3.msra.mxu1 %v736_v33 }
 0x6b2   : > { %2724 = vmatprep.subr.bf16.mxu1 %v2817_v25 }
 0x6b6   : > { %v2775_v37 = vpop.eup %2774 }
 0x6b7   : > { %v2777_v39 = vpop.eup %2776  ;;  %v340_v40 = vmul.f32 %v2775_v37, %v324_v19 }
 0x6b8   : > { %v733_v42 = vmul.f32 %v2777_v39, %v2773_v23 }
 0x6b9   : > { %v348_v43 = vmul.f32 %v2939_v36, %v340_v40  ;;  %v962_v36 = vpop.permute.xlu1 %961 }
 0x6ba   : > { %2590 = vmatmul.mubr.msk.f32.vlgmr.msra.gmra.mrb[6].mxu1 %vm558_vm3, %v733_v42 }
 0x6bb   : > { %v356_v44 = vadd.f32 %v2944_v38, %v348_v43  ;;  %2726 = vmatpush3.bf16.msra.mxu1 %v3035_v41  ;;  %2596 = vmatprep.mubr.msk.f32.mxu1 %vm2811_vm1, %v2810_v20 }
 0x6bc   : > { %2606 = vmatprep.subr.mxu1 %v2810_v20 }
 0x6bd   : > { %2474 = vmatmul.mubr.msk.f32.gmra.mrb[2].mxu0 %vm313_vm0, %v356_v44  ;;  %v960_v51 = vpop.permute.xlu1 %959 }
 0x6be   : > { %2603 = vmatprep.mubr.msk.f32.mxu0 %vm2811_vm1, %v2810_v20 }
 0x6c1   : > { %2604 = vmatmul.mubr.msk.f32.vlgmr.msra.gmra.mrb[4].mxu0 %vm482_vm2, %v639_v5 }
 0x6c2   : > { %2612 = vmatpush3.msra.mxu0 %v1049_v46  ;;  %2613 = vmatprep.mubr.msk.f32.mxu0 %vm2811_vm1, %v2810_v20 }
 0x6c3   : > { %2623 = vmatprep.subr.mxu0 %v2810_v20 }
 0x78d   : > { %v807_v38 = vpop.f32.mrb[6].mxu1 }
 0x78e   : > { %v2591_v48 = vpop.f32.mrb[7].mxu1  ;;  %2597 = vmatmul.mubr.msk.f32.vlgmr.msra.gmra.mrb[8].mxu1 %vm482_vm2, %v807_v38 }
 0x78f   : > { %2607 = vmatpush3.xpose.msk.msra.mxu1 %vm482_vm2, %v962_v36  ;;  %2608 = vmatprep.mubr.msk.f32.mxu1 %vm2811_vm1, %v2810_v20 }
 0x790   : > { %v463_v49 = vpop.f32.mrb[2].mxu0  ;;  %2730 = vmatprep.subr.bf16.mxu1 %v2817_v25 }
 0x791   : > { %v3056_v55 = vpop.f32.mrb[3].mxu0  ;;  %v3106_v22 = vadd.f32 %v463_v49, %v2955_v45 }
 0x792   : > { %2609 = vmatmul.mubr.msk.f32.vlgmr.msra.gmra.mrb[10].mxu1 %vm482_vm2, %v960_v51  ;;  %v3148_v46 = vadd.f32 %v3056_v55, %v2964_v50 }
 0x793   : > { %2620 = vmatprep.mubr.msk.f32.mxu1 %vm2811_vm1, %v2810_v20  ;;  %v3111_v23 = vmul.f32 0.25, %v3106_v22 }
 0x794   : > { %v953_v56 = vpop.f32.mrb[4].mxu0 }
 0x795   : > { %v2605_v57 = vpop.f32.mrb[5].mxu0 }
 0x861   : > { %v880_v58 = vpop.f32.mrb[8].mxu1 }
 0x862   : > { %v3061_v59 = vadd.f32 %v953_v56, %v880_v58  ;;  %v2598_v60 = vpop.f32.mrb[9].mxu1 }
 0x865   : > { %v1033_v62 = vpop.f32.mrb[10].mxu1 }
 0x866   : > { %v1034_v63 = vadd.f32 %v3066_v61, %v1033_v62  ;;  %v2610_v0 = vpop.f32.mrb[11].mxu1 }
 0x868   : > { %v1037_v1 = vsel %vm558_vm3, %v1034_v63, -inf }
 0x869   : > { %1038 = vmax.xlane.f32.xlu1 %v1037_v1 }
 0x87a   : > { %1200 = vrot.lane.b32.xlu1 %v2968_v52, %s2818_s16  ;;  %v473_v52 = vld [vmem:[%s3245_s6 + $0x28] sm:$0xff] }
 0x87b   : > { %v3081_v9 = vpack.c.bf16 %v473_v52, %v472_v8 }
 0x87d   : > { %2732 = vmatpush3.bf16.msra.mxu1 %v3081_v9 }
 0x87e   : > { %2628 = vmatprep.subr.mxu1 %v2810_v20 }
 0x8f6   : > { %v1039_v2 = vpop.xlane.xlu1 %1038 }
 0x8f7   : > { %v1040_v3 = vsub.f32 %v1034_v63, %v1039_v2 }
 0x8f9   : > { %v1041_v4 = vmul.f32 1.442695, %v1040_v3  ;;  %v3170_v3 = vld [vmem:[%s3246_s7] ss:$0 sm:$0xff] }
 0x8fb   : > { %2778 = vpow2.f32 %v1041_v4 }
 0x905   : > { %v2779_v5 = vpop.eup %2778 }
 0x906   : > { %v1043_v6 = vsel %vm558_vm3, %v2779_v5, 0.0 }
 0x907   : > { %1044 = vadd.xlane.f32.xlu0 %v1043_v6 }
 0x91d   : > { %1202 = vrot.lane.b32.xlu0 %v2958_v47, %s2819_s17  ;;  %v1201_v47 = vpop.permute.xlu1 %1200 }
 0x994   : > { %v1045_v10 = vpop.xlane.xlu0 %1044 }
 0x995   : > { %2780 = vrcp.f32 %v1045_v10 }
 0x998   : > { %v1203_v13 = vpop.permute.xlu0 %1202 }
 0x99f   : > { %v2781_v11 = vpop.eup %2780 }
 0x9a0   : > { %v1047_v12 = vmul.f32 %v2781_v11, %v2779_v5 }
 0x9a2   : > { %2614 = vmatmul.mubr.msk.f32.vlgmr.msra.gmra.mrb[6].mxu0 %vm558_vm3, %v1047_v12 }
 0x9a3   : > { %2624 = vmatpush3.xpose.msk.msra.mxu0 %vm482_vm2, %v1203_v13  ;;  %2625 = vmatprep.mubr.msk.f32.mxu0 %vm2811_vm1, %v2810_v20 }
 0x9a4   : > { %2733 = vmatprep.subr.bf16.mxu0 %v2817_v25 }
 0x9a6   : > { %2626 = vmatmul.mubr.msk.f32.vlgmr.msra.gmra.mrb[8].mxu0 %vm482_vm2, %v1201_v47 }
 0x9a7   : > { %2637 = vmatprep.mubr.msk.f32.mxu0 %vm2811_vm1, %v2810_v20  ;;  %2735 = vmatpush3.bf16.msra.mxu0 %v3125_v32 }
 0x9a8   : > { %2645 = vmatprep.subr.mxu0 %v2810_v20 }
 0xa75   : > { %v1120_v14 = vpop.f32.mrb[6].mxu0 }
 0xa76   : > { %v2615_v15 = vpop.f32.mrb[7].mxu0  ;;  %2621 = vmatmul.mubr.msk.f32.vlgmr.msra.gmra.mrb[12].mxu1 %vm482_vm2, %v1120_v14 }
 0xa77   : > { %2630 = vmatprep.mubr.msk.f32.mxu1 %vm2811_vm1, %v2810_v20 }
 0xa79   : > { %v1274_v17 = vpop.f32.mrb[8].mxu0 }
 0xa7a   : > { %v1275_v18 = vadd.f32 %v3097_v16, %v1274_v17  ;;  %v2627_v19 = vpop.f32.mrb[9].mxu0 }
 0xa7c   : > { %v1278_v21 = vsel %vm558_vm3, %v1275_v18, -inf }
 0xa7d   : > { %1279 = vmax.xlane.f32.xlu0 %v1278_v21 }
 0xa93   : > { %1289 = vrot.lane.b32.xlu0 %v2972_v53, %s2818_s16 }
 0xa97   : > { %1614 = vrot.lane.b32.xlu0 %v3106_v22, %s2812_s14 }
 0xa9b   : > { %1612 = vrot.lane.b32.xlu0 %v3111_v23, %s2814_s18 }
 0xb0a   : > { %v1280_v24 = vpop.xlane.xlu0 %1279 }
 0xb0b   : > { %v1281_v26 = vsub.f32 %v1275_v18, %v1280_v24 }
 0xb0d   : > { %v1282_v27 = vmul.f32 1.442695, %v1281_v26 }
 0xb0e   : > { %v1290_v29 = vpop.permute.xlu0 %1289 }
 0xb0f   : > { %2782 = vpow2.f32 %v1282_v27  ;;  %2629 = vmatpush3.msra.mxu1 %v1290_v29 }
 0xb10   : > { %2640 = vmatprep.subr.mxu1 %v2810_v20 }
 0xb12   : > { %v1615_v43 = vpop.permute.xlu0 %1614 }
 0xb16   : > { %v1613_v44 = vpop.permute.xlu0 %1612 }
 0xb19   : > { %v2783_v53 = vpop.eup %2782 }
 0xb1a   : > { %v1284_v45 = vsel %vm558_vm3, %v2783_v53, 0.0 }
 0xb1b   : > { %1285 = vadd.xlane.f32.xlu1 %v1284_v45 }
 0xb2c   : > { %1450 = vrot.lane.b32.xlu1 %v3106_v22, %s2813_s15 }
 0xb49   : > { %v1193_v33 = vpop.f32.mrb[12].mxu1 }
 0xb4a   : > { %v1197_v34 = vadd.f32 %v1193_v33, %v3061_v59  ;;  %v2622_v35 = vpop.f32.mrb[13].mxu1 }
 0xba8   : > { %v1286_v37 = vpop.xlane.xlu1 %1285 }
 0xba9   : > { %2784 = vrcp.f32 %v1286_v37 }
 0xbac   : > { %v1451_v42 = vpop.permute.xlu1 %1450 }
 0xbb3   : > { %v2785_v39 = vpop.eup %2784 }
 0xbb4   : > { %v1288_v40 = vmul.f32 %v2785_v39, %v2783_v53 }
 0xbb6   : > { %2631 = vmatmul.mubr.msk.f32.vlgmr.msra.gmra.mrb[14].mxu1 %vm558_vm3, %v1288_v40 }
 0xbb7   : > { %2641 = vmatpush3.xpose.msk.msra.mxu1 %vm482_vm2, %v1451_v42  ;;  %2642 = vmatprep.mubr.msk.f32.mxu1 %vm2811_vm1, %v2810_v20 }
 0xbb8   : > { %2650 = vmatprep.subr.mxu1 %v2810_v20 }
 0xbba   : > { %2643 = vmatmul.mubr.msk.f32.vlgmr.msra.gmra.mrb[16].mxu1 %vm482_vm2, %v3111_v23 }
 0xbbb   : > { %2651 = vmatpush3.xpose.msk.msra.mxu1 %vm482_vm2, %v1615_v43  ;;  %2652 = vmatprep.mubr.msk.f32.mxu1 %vm2811_vm1, %v2810_v20 }
 0xbbc   : > { %2736 = vmatprep.subr.bf16.mxu1 %v2817_v25 }
 0xbbe   : > { %2653 = vmatmul.mubr.msk.f32.vlgmr.msra.gmra.mrb[18].mxu1 %vm482_vm2, %v1613_v44 }
 0xbbf   : > { %2738 = vmatpush3.bf16.msra.mxu1 %v3035_v41  ;;  %2664 = vmatprep.mubr.msk.f32.mxu1 %vm2811_vm1, %v2810_v20 }
 0xbc0   : > { %2674 = vmatprep.subr.mxu1 %v2810_v20 }
 0xc89   : > { %v1361_v36 = vpop.f32.mrb[14].mxu1 }
 0xc8a   : > { %v2632_v38 = vpop.f32.mrb[15].mxu1  ;;  %2638 = vmatmul.mubr.msk.f32.vlgmr.msra.gmra.mrb[10].mxu0 %vm482_vm2, %v1361_v36 }
 0xc8b   : > { %2646 = vmatpush3.msra.mxu0 %v3148_v46  ;;  %2647 = vmatprep.mubr.msk.f32.mxu0 %vm2811_vm1, %v2810_v20 }
 0xc8c   : > { %2655 = vmatprep.subr.mxu0 %v2810_v20 }
 0xc8d   : > { %v1523_v41 = vpop.f32.mrb[16].mxu1 }
 0xc8e   : > { %v1524_v48 = vadd.f32 %v1523_v41, %v2983_v54  ;;  %v2644_v49 = vpop.f32.mrb[17].mxu1 }
 0xc90   : > { %v1527_v51 = vsel %vm558_vm3, %v1524_v48, -inf }
 0xc91   : > { %1528 = vmax.xlane.f32.xlu0 %v1527_v51  ;;  %v1686_v50 = vpop.f32.mrb[18].mxu1 }
 0xc92   : > { %v1687_v55 = vadd.f32 %v3001_v7, %v1686_v50  ;;  %v2654_v56 = vpop.f32.mrb[19].mxu1 }
 0xc94   : > { %v1690_v57 = vsel %vm558_vm3, %v1687_v55, -inf }
 0xc95   : > { %1691 = vmax.xlane.f32.xlu1 %v1690_v57 }
 0xca6   : > { %1927 = vrot.lane.b32.xlu1 %v3106_v22, %s2816_s21 }
 0xcaa   : > { %1925 = vrot.lane.b32.xlu1 %v3111_v23, %s2815_s11 }
 0xd1e   : > { %v1529_v58 = vpop.xlane.xlu0 %1528 }
 0xd1f   : > { %v1530_v59 = vsub.f32 %v1524_v48, %v1529_v58 }
 0xd21   : > { %v1531_v54 = vmul.f32 1.442695, %v1530_v59 }
 0xd22   : > { %v1692_v60 = vpop.xlane.xlu1 %1691 }
 0xd23   : > { %2786 = vpow2.f32 %v1531_v54  ;;  %v1693_v62 = vsub.f32 %v1687_v55, %v1692_v60 }
 0xd25   : > { %v1694_v63 = vmul.f32 1.442695, %v1693_v62 }
 0xd26   : > { %v1928_v18 = vpop.permute.xlu1 %1927 }
 0xd27   : > { %2788 = vpow2.f32 %v1694_v63 }
 0xd2d   : > { %v2787_v7 = vpop.eup %2786 }
 0xd2e   : > { %v1533_v0 = vsel %vm558_vm3, %v2787_v7, 0.0 }
 0xd2f   : > { %1534 = vadd.xlane.f32.xlu0 %v1533_v0 }
 0xd31   : > { %v2789_v1 = vpop.eup %2788 }
 0xd32   : > { %v1696_v2 = vsel %vm558_vm3, %v2789_v1, 0.0 }
 0xd33   : > { %1697 = vadd.xlane.f32.xlu0 %v1696_v2 }
 0xd49   : > { %1702 = vrot.lane.b32.xlu0 %v3148_v46, %s2814_s18 }
 0xd5d   : > { %v1434_v4 = vpop.f32.mrb[10].mxu0 }
 0xd5e   : > { %v1438_v5 = vadd.f32 %v1434_v4, %v1197_v34  ;;  %v2639_v6 = vpop.f32.mrb[11].mxu0 }
 0xd60   : > { %v1445_v8 = vadd.f32 %v3170_v3, %v1438_v5 }
 0xd62   : > { %1446 = vst.msk [vmem:[%s3177_s13] sm:$0xff] %vm313_vm0, %v1445_v8 }
 0xdbc   : > { %v1535_v52 = vpop.xlane.xlu0 %1534 }
 0xdbd   : > { %2790 = vrcp.f32 %v1535_v52 }
 0xdc0   : > { %v1698_v10 = vpop.xlane.xlu0 %1697 }
 0xdc1   : > { %2792 = vrcp.f32 %v1698_v10 }
 0xdc4   : > { %v1703_v13 = vpop.permute.xlu0 %1702 }
 0xdc7   : > { %v2791_v11 = vpop.eup %2790 }
 0xdc8   : > { %v1537_v12 = vmul.f32 %v2791_v11, %v2787_v7 }
 0xdca   : > { %2648 = vmatmul.mubr.msk.f32.vlgmr.msra.gmra.mrb[12].mxu0 %vm558_vm3, %v1537_v12 }
 0xdcb   : > { %v2793_v47 = vpop.eup %2792  ;;  %2656 = vmatpush3.msra.mxu0 %v1703_v13  ;;  %2657 = vmatprep.mubr.msk.f32.mxu0 %vm2811_vm1, %v2810_v20 }
 0xdcc   : > { %v1700_v14 = vmul.f32 %v2793_v47, %v2789_v1  ;;  %2739 = vmatprep.subr.bf16.mxu0 %v2817_v25 }
 0xdce   : > { %2658 = vmatmul.mubr.msk.f32.vlgmr.msra.gmra.mrb[14].mxu0 %vm558_vm3, %v1700_v14 }
 0xdcf   : > { %2741 = vmatpush3.bf16.msra.mxu0 %v3024_v28  ;;  %2671 = vmatprep.mubr.msk.f32.mxu0 %vm2811_vm1, %v2810_v20  ;;  %v1926_v28 = vpop.permute.xlu1 %1925 }
 0xdd0   : > { %2679 = vmatprep.subr.mxu0 %v2810_v20 }
 0xe9d   : > { %v1607_v15 = vpop.f32.mrb[12].mxu0 }
 0xe9e   : > { %v2649_v17 = vpop.f32.mrb[13].mxu0  ;;  %2672 = vmatmul.mubr.msk.f32.vlgmr.msra.gmra.mrb[16].mxu0 %vm482_vm2, %v1607_v15 }
 0xe9f   : > { %2681 = vmatprep.mubr.msk.f32.mxu0 %vm2811_vm1, %v2810_v20 }
 0xea1   : > { %v1774_v19 = vpop.f32.mrb[14].mxu0 }
 0xea2   : > { %v2659_v21 = vpop.f32.mrb[15].mxu0  ;;  %2665 = vmatmul.mubr.msk.f32.vlgmr.msra.gmra.mrb[20].mxu1 %vm482_vm2, %v1774_v19 }
 0xea3   : > { %2675 = vmatpush3.xpose.msk.msra.mxu1 %vm482_vm2, %v1928_v18  ;;  %2676 = vmatprep.mubr.msk.f32.mxu1 %vm2811_vm1, %v2810_v20 }
 0xea4   : > { %2742 = vmatprep.subr.bf16.mxu1 %v2817_v25 }
 0xea6   : > { %2677 = vmatmul.mubr.msk.f32.vlgmr.msra.gmra.mrb[22].mxu1 %vm482_vm2, %v1926_v28 }
 0xea7   : > { %2744 = vmatpush3.bf16.msra.mxu1 %v3081_v9  ;;  %2688 = vmatprep.mubr.msk.f32.mxu1 %vm2811_vm1, %v2810_v20 }
 0xea8   : > { %2696 = vmatprep.subr.mxu1 %v2810_v20 }
 0xf71   : > { %v1920_v24 = vpop.f32.mrb[16].mxu0 }
 0xf72   : > { %v2673_v26 = vpop.f32.mrb[17].mxu0 }
 0xf75   : > { %v1847_v27 = vpop.f32.mrb[20].mxu1 }
 0xf76   : > { %v1921_v29 = vadd.f32 %v1920_v24, %v1847_v27  ;;  %v2666_v53 = vpop.f32.mrb[21].mxu1 }
 0xf79   : > { %v1999_v45 = vpop.f32.mrb[22].mxu1 }
 0xf7a   : > { %v2000_v30 = vadd.f32 %v3066_v61, %v1999_v45  ;;  %v2678_v31 = vpop.f32.mrb[23].mxu1 }
 0xf7c   : > { %v2003_v33 = vsel %vm558_vm3, %v2000_v30, -inf }
 0xf7d   : > { %2004 = vmax.xlane.f32.xlu0 %v2003_v33 }
 0xf93   : > { %2014 = vrot.lane.b32.xlu0 %v3148_v46, %s2815_s11 }
 0xf97   : > { %2165 = vrot.lane.b32.xlu0 %v3111_v23, %s2818_s16 }
0x100a   : > { %v2005_v9 = vpop.xlane.xlu0 %2004 }
0x100b   : > { %v2006_v34 = vsub.f32 %v2000_v30, %v2005_v9 }
0x100d   : > { %v2007_v35 = vmul.f32 1.442695, %v2006_v34 }
0x100e   : > { %v2015_v37 = vpop.permute.xlu0 %2014 }
0x100f   : > { %2794 = vpow2.f32 %v2007_v35  ;;  %2680 = vmatpush3.msra.mxu0 %v2015_v37 }
0x1010   : > { %2691 = vmatprep.subr.mxu0 %v2810_v20 }
0x1012   : > { %v2166_v44 = vpop.permute.xlu0 %2165 }
0x1019   : > { %v2795_v39 = vpop.eup %2794 }
0x101a   : > { %v2009_v61 = vsel %vm558_vm3, %v2795_v39, 0.0 }
0x101b   : > { %2010 = vadd.xlane.f32.xlu1 %v2009_v61 }
0x102c   : > { %2167 = vrot.lane.b32.xlu1 %v3106_v22, %s2819_s17 }
0x10a8   : > { %v2011_v40 = vpop.xlane.xlu1 %2010 }
0x10a9   : > { %2796 = vrcp.f32 %v2011_v40 }
0x10ac   : > { %v2168_v23 = vpop.permute.xlu1 %2167 }
0x10b3   : > { %v2797_v42 = vpop.eup %2796 }
0x10b4   : > { %v2013_v43 = vmul.f32 %v2797_v42, %v2795_v39 }
0x10b6   : > { %2682 = vmatmul.mubr.msk.f32.vlgmr.msra.gmra.mrb[18].mxu0 %vm558_vm3, %v2013_v43 }
0x10b7   : > { %2692 = vmatpush3.xpose.msk.msra.mxu0 %vm482_vm2, %v2168_v23  ;;  %2693 = vmatprep.mubr.msk.f32.mxu0 %vm2811_vm1, %v2810_v20 }
0x10b8   : > { %2745 = vmatprep.subr.bf16.mxu0 %v2817_v25 }
0x10ba   : > { %2694 = vmatmul.mubr.msk.f32.vlgmr.msra.gmra.mrb[20].mxu0 %vm482_vm2, %v2166_v44 }
0x10bb   : > { %2747 = vmatpush3.bf16.msra.mxu0 %v3125_v32  ;;  %2705 = vmatprep.mubr.msk.f32.mxu0 %vm2811_vm1, %v2810_v20 }
0x1189   : > { %v2086_v22 = vpop.f32.mrb[18].mxu0 }
0x118a   : > { %v2683_v36 = vpop.f32.mrb[19].mxu0  ;;  %2689 = vmatmul.mubr.msk.f32.vlgmr.msra.gmra.mrb[24].mxu1 %vm482_vm2, %v2086_v22 }
0x118b   : > { %2698 = vmatprep.mubr.msk.f32.mxu1 %vm2811_vm1, %v2810_v20 }
0x118d   : > { %v2239_v38 = vpop.f32.mrb[20].mxu0 }
0x118e   : > { %v2240_v41 = vadd.f32 %v3097_v16, %v2239_v38  ;;  %v2695_v48 = vpop.f32.mrb[21].mxu0 }
0x1190   : > { %v2243_v25 = vsel %vm558_vm3, %v2240_v41, -inf }
0x1191   : > { %2244 = vmax.xlane.f32.xlu1 %v2243_v25 }
0x121e   : > { %v2245_v49 = vpop.xlane.xlu1 %2244 }
0x121f   : > { %v2246_v51 = vsub.f32 %v2240_v41, %v2245_v49 }
0x1221   : > { %v2247_v32 = vmul.f32 1.442695, %v2246_v51 }
0x1223   : > { %2798 = vpow2.f32 %v2247_v32 }
0x122d   : > { %v2799_v50 = vpop.eup %2798 }
0x122e   : > { %v2249_v55 = vsel %vm558_vm3, %v2799_v50, 0.0 }
0x122f   : > { %2250 = vadd.xlane.f32.xlu0 %v2249_v55 }
0x1245   : > { %2254 = vrot.lane.b32.xlu0 %v3148_v46, %s2818_s16 }
0x125d   : > { %v2159_v56 = vpop.f32.mrb[24].mxu1 }
0x125e   : > { %v2163_v20 = vadd.f32 %v2159_v56, %v1921_v29  ;;  %v2690_v57 = vpop.f32.mrb[25].mxu1 }
0x12bc   : > { %v2251_v16 = vpop.xlane.xlu0 %2250 }
0x12bd   : > { %2800 = vrcp.f32 %v2251_v16 }
0x12c0   : > { %v2255_v58 = vpop.permute.xlu0 %2254 }
0x12c1   : > { %2697 = vmatpush3.msra.mxu1 %v2255_v58 }
0x12c7   : > { %v2801_v59 = vpop.eup %2800 }
0x12c8   : > { %v2253_v54 = vmul.f32 %v2801_v59, %v2799_v50 }
0x12ca   : > { %2699 = vmatmul.mubr.msk.f32.vlgmr.msra.gmra.mrb[26].mxu1 %vm558_vm3, %v2253_v54 }
0x139d   : > { %v2326_v60 = vpop.f32.mrb[26].mxu1 }
0x139e   : > { %v2700_v62 = vpop.f32.mrb[27].mxu1  ;;  %2706 = vmatmul.mubr.msk.f32.vlgmr.msra.gmra.mrb[22].mxu0 %vm482_vm2, %v2326_v60 }
0x1471   : > { %v2399_v63 = vpop.f32.mrb[22].mxu0 }
0x1472   : > { %v2403_v7 = vadd.f32 %v2399_v63, %v2163_v20  ;;  %v2707_v0 = vpop.f32.mrb[23].mxu0 }
0x1474   : > { %v2404_v46 = vadd.f32 %v3170_v3, %v2403_v7 }
0x1476   : > { %2405 = vst.msk [vmem:[%s3177_s13 + $0x8] sm:$0xff] %vm313_vm0, %v2404_v46 }
0x1477 PF: > { %s18_s27 = sadd.s32 1, %s2808_s27  }
0x1478   : > { %p15_p4 = scmp.ge.s32.totalorder %s18_s27, 4  }
0x147a   :  { %17 = sbr.rel (!%p15_p4) target bundleno = 1 (0x1), region = 85 }

// kernel: swin_forward.21
= control target key start
LH: loop header
LB: loop body
LE: loop exit
PB: predicated region body
PF: predicated region fallthrough
CT: control target
= control target key end

     0   :  { %8 = vsyncpa [#allocation3], 0  ;;  %s559_s0 = inlined_call_operand.vmem [shape: f32[32,64], index: 0, kind: input, shape index: {}]   ;;  %s560_s1 = inlined_call_operand.vmem [shape: f32[1,64], index: 1, kind: input, shape index: {}]   ;;  %s561_s2 = inlined_call_operand.vmem [shape: f32[1,64], index: 2, kind: input, shape index: {}]   ;;  %s562_s3 = inlined_call_operand.hbm [shape: f32[32,64], index: 3, kind: output, shape index: {}]  }
   0x1   :  { %10 = vsyncpa [#allocation3 + $0x1], 0  ;;  %s445_s12 = smov 0   ;;  %s447_s13 = smov 0  }
   0x2   :  { %s449_s14 = smov 0   ;;  %s451_s15 = smov 0  }
   0x3 LB: > { %s466_s16 = sadd.s32 4294967295, %s420_s15   ;;  %s298_s17 = sadd.s32 4294967294, %s420_s15   ;;  %s420_s15 = sphi %s451_s15, %s568_s15   ;;  %s416_s14 = sphi %s449_s14, %s567_s14   ;;  %s412_s13 = sphi %s447_s13, %s566_s13   ;;  %s408_s12 = sphi %s445_s12, %s565_s12  }
   0x4   : > { %s470_s18 = sadd.s32 1, %s420_s15   ;;  %s91_s19 = sadd.s32 1, %s416_s14 }
   0x5   : > { %s88_s20 = ssub.s32 %s420_s15, %s470_s18  ;;  %p101_p0 = scmp.ne.s32.totalorder %s416_s14, %s412_s13 }
   0x6   : > { %p89_p1 = scmp.eq.s32.totalorder %s88_s20, 0  ;;  %p102_p2 = scmp.eq.s32.totalorder %s466_s16, 1 }
   0x7   : > { %p107_p3 = scmp.ne.s32.totalorder %s412_s13, %s408_s12  ;;  %p108_p4 = scmp.eq.s32.totalorder %s298_s17, 1 }
   0x8   : > { %s481_s21 = scalar_select %p89_p1, %s416_s14, %s91_s19  }
   0x9   : > { %p483_p5 = por %p102_p2, %p101_p0  ;;  %p487_p6 = por %p108_p4, %p107_p3 }
   0xa   : > { %p301_p7 = scmp.ge.s32.totalorder %s420_s15, 1  ;;  %p141_p8 = scmp.lt.s32.totalorder %s420_s15, 3 }
   0xc   : > { %p142_p9 = pnand %p301_p7, %p141_p8 }
   0xd   : > { %s303_s24 = sshll.u32 (!%p142_p9), %s466_s16, 1  ;;  %vm176_vm0 = vcmask (!%p142_p9), 523264   ;;  %s162_s29 = sand.u32 (!%p142_p9), 1, %s412_s13   ;;  %v305_v21 = vld [vmem:[%s560_s1] ss:$0 sm:$0xff] (!%p142_p9) }
   0xe   : > { %145 = sbr.rel (%p142_p9) target bundleno = 357 (0x165), region = 32  ;;  %p166_p10 = scmp.lt.s32.totalorder (!%p142_p9), %s303_s24, 3  ;;  %v306_v23 = vld [vmem:[%s561_s2] ss:$0 sm:$0xff] (!%p142_p9) }
   0xf   : > { %s302_s5 = sshll.u32 (!%p142_p9), %s162_s29, 4  ;;  %s312_s8 = sshll.u32 (!%p142_p9), %s466_s16, 8 }
  0x10   : > { %s164_s9 = scalar_lea.vmem (!%p142_p9), [#allocation2], %s302_s5  ;;  %s513_s19 = scalar_lea.hbm (!%p142_p9), %s562_s3, %s312_s8 }
  0x11   : > { %s236_s10 = sshll.u32 (!%p142_p9), %s164_s9, 4  ;;  %s518_s20 = scalar_lea.sflag (!%p142_p9), [#allocation3], %s162_s29  ;;  %s515_s10 = int_to_ptr.vmem [resolvable:$true] %s236_s10 }
  0x12   : > { %s358_s16 = scalar_lea.vmem (!%p142_p9), %s515_s10, 256 }
  0x13   : > { %p359_p11 = scmp.ne.s32.totalorder (!%p142_p9), %s515_s10, %s358_s16 }
  0x15   : > { %s570_s24 = smov (!%p166_p10, %s303_s24), 3  ;;  %p360_p12 = pnand %p359_p11, %p483_p5 }
  0x16   : > { %s304_s25 = sshll.u32 %s570_s24, 3  ;;  %s422_s24 = smov [#allocation2]  }
  0x17   : > { %s169_s28 = scalar_lea.vmem %s559_s0, %s304_s25  ;;  %p361_p13 = pneg %p360_p12 }
  0x18   : > { %v172_v0 = vld [vmem:[%s169_s28] sm:$0xff]  ;;  %v173_v1 = vld [vmem:[%s169_s28 + $0x8] sm:$0xff]  ;;  %s362_s25 = sshll.u32 %s422_s24, 4  ;;  %s363_s25 = int_to_ptr.vmem [resolvable:$false] %s362_s25 }
  0x19   : > { %v177_v2 = vsel %vm176_vm0, %v172_v0, 0.0  ;;  %v180_v3 = vsel %vm176_vm0, %v173_v1, 0.0  ;;  %s364_s26 = scalar_lea.vmem %s363_s25, 512  ;;  %p365_p0 = scmp.lt.s32.totalorder %s515_s10, %s363_s25 }
  0x1a   : > { %178 = vadd.xlane.f32.xlu0 %v177_v2  ;;  %p366_p1 = scmp.lt.s32.totalorder %s364_s26, %s358_s16 }
  0x1c   : > { %p367_p2 = por %p366_p1, %p365_p0 }
  0x1e   : > { %181 = vadd.xlane.f32.xlu0 %v180_v3  ;;  %p368_p3 = pnand %p367_p2, %p361_p13 }
  0xa7   : > { %v179_v4 = vpop.xlane.xlu0 %178 }
  0xa8   : > { %v184_v5 = vmul.f32 0.015625, %v179_v4 }
  0xaa   : > { %v186_v6 = vsub.f32 %v172_v0, %v184_v5 }
  0xab   : > { %v182_v7 = vpop.xlane.xlu0 %181 }
  0xac   : > { %v185_v8 = vmul.f32 0.015625, %v182_v7  ;;  %v188_v9 = vmul.f32 %v186_v6, %v186_v6 }
  0xae   : > { %v187_v10 = vsub.f32 %v173_v1, %v185_v8  ;;  %v190_v11 = vsel %vm176_vm0, %v188_v9, 0.0 }
  0xaf   : > { %191 = vadd.xlane.f32.xlu1 %v190_v11 }
  0xb0   : > { %v189_v12 = vmul.f32 %v187_v10, %v187_v10 }
  0xb2   : > { %v193_v13 = vsel %vm176_vm0, %v189_v12, 0.0 }
  0xb3   : > { %194 = vadd.xlane.f32.xlu1 %v193_v13 }
 0x13c   : > { %v192_v14 = vpop.xlane.xlu1 %191 }
 0x13d   : > { %v196_v15 = vmul.f32 0.015625, %v192_v14 }
 0x13f   : > { %v198_v16 = vadd.f32 1e-05, %v196_v15 }
 0x140   : > { %v195_v17 = vpop.xlane.xlu1 %194 }
 0x141   : > { %354 = vrsqrt.f32 %v198_v16  ;;  %v197_v18 = vmul.f32 0.015625, %v195_v17 }
 0x143   : > { %v199_v19 = vadd.f32 1e-05, %v197_v18 }
 0x145   : > { %356 = vrsqrt.f32 %v199_v19 }
 0x14b   : > { %v355_v20 = vpop.eup %354 }
 0x14c   : > { %v202_v22 = vmul.f32 %v355_v20, %v186_v6 }
 0x14e   : > { %v210_v24 = vmul.f32 %v305_v21, %v202_v22 }
 0x14f   : > { %v357_v25 = vpop.eup %356 }
 0x150   : > { %v203_v26 = vmul.f32 %v357_v25, %v187_v10  ;;  %v218_v27 = vadd.f32 %v306_v23, %v210_v24 }
 0x152   : > { %v211_v28 = vmul.f32 %v305_v21, %v203_v26  ;;  %220 = vst.msk [vmem:[%s164_s9] sm:$0xff] %vm176_vm0, %v218_v27 }
 0x154   : > { %v219_v29 = vadd.f32 %v306_v23, %v211_v28 }
 0x156   : > { %221 = vst.msk [vmem:[%s164_s9 + $0x8] sm:$0xff] %vm176_vm0, %v219_v29 }
 0x157   : > { %371 = shalt.err (!%p368_p3)
}
 0x158   : > { %s372_s27 = scalar_lea.hbm %s513_s19, 256  ;;  %s376_s30 = scalar_lea.hbm %s562_s3, 512 }
 0x159   : > { %p373_p4 = scmp.ne.s32.totalorder %s513_s19, %s372_s27  ;;  %p377_p9 = scmp.lt.u32.totalorder %s513_s19, %s562_s3 }
 0x15a   : > { %p378_p10 = scmp.lt.u32.totalorder %s376_s30, %s372_s27  ;;  %p380_p12 = scmp.lt.u32.totalorder %s372_s27, %s513_s19 }
 0x15b   : > { %p374_p7 = pnand %p373_p4, %p483_p5 }
 0x15c   : > { %p379_p11 = por %p378_p10, %p377_p9 }
 0x15d   : > { %p375_p8 = pneg %p374_p7 }
 0x15e   : > { %p381_p13 = por %p380_p12, %p379_p11 }
 0x160   : > { %p382_p0 = pnand %p381_p13, %p375_p8 }
 0x162   : > { %385 = shalt.err (!%p382_p0)
}
 0x163   : > { %s423_s6 = smov 128   ;;  %s424_s7 = smov 8  }
 0x164   : > { %313 = dma.vmem_to_hbm [thread:$0]  (%p483_p5), %s515_s10, 256, %s513_s19, %s518_s20, %s423_s6, %s423_s6, %s424_s7  }
 0x165 PF: > { %p319_p1 = scmp.ge.s32.totalorder %s420_s15, 2  ;;  %s251_s8 = sand.u32 1, %s408_s12  }
 0x166   : > { %s252_s9 = scalar_lea.sflag [#allocation3], %s251_s8 }
 0x167   : > { %p316_p2 = pnand %p319_p1, %p487_p6 }
 0x169   : > { %403 = dma.done.wait (!%p316_p2), %s252_s9, 256  }
 0x16a   : > { %405 = vsyncadd (!%p316_p2), %s252_s9, 4294967040  ;;  %p13_p3 = scmp.ge.s32.totalorder %s470_s18, 4   ;;  %s565_s12 = smov %s412_s13 }
 0x16b   : > { %s566_s13 = smov %s416_s14  ;;  %s567_s14 = smov %s481_s21 }
 0x16c   : > { %s568_s15 = smov %s470_s18  ;;  %15 = sbr.rel (!%p13_p3) target bundleno = 3 (0x3), region = 67 }
 0x173   :  { %257 = vsyncpa [#allocation3], 1 }
 0x174   :  { %259 = vsyncpa [#allocation3 + $0x1], 1 }

// kernel: swin_forward.19
= control target key start
LH: loop header
LB: loop body
LE: loop exit
PB: predicated region body
PF: predicated region fallthrough
CT: control target
= control target key end

     0   :  { %s2909_s30 = smov 0   ;;  %s3304_s0 = inlined_call_operand.vmem [shape: f32[32,64], index: 0, kind: input, shape index: {}]   ;;  %s3305_s1 = inlined_call_operand.vmem [shape: f32[1,64], index: 1, kind: input, shape index: {}]   ;;  %s3306_s2 = inlined_call_operand.vmem [shape: f32[1,64], index: 2, kind: input, shape index: {}]   ;;  %s3307_s3 = inlined_call_operand.vmem [shape: f32[64,192], index: 3, kind: input, shape index: {}]   ;;  %s3308_s4 = inlined_call_operand.vmem [shape: f32[1,192], index: 4, kind: input, shape index: {}]   ;;  %s3309_s5 = inlined_call_operand.vmem [shape: f32[4,8,8], index: 5, kind: input, shape index: {}]   ;;  %s3310_s6 = inlined_call_operand.vmem [shape: f32[64,64], index: 6, kind: input, shape index: {}]   ;;  %s3311_s7 = inlined_call_operand.vmem [shape: f32[1,64], index: 7, kind: input, shape index: {}]   ;;  %s3312_s8 = inlined_call_operand.vmem [shape: f32[2,8,8], index: 8, kind: input, shape index: {}]   ;;  %s3313_s9 = inlined_call_operand.vmem [shape: f32[32,64], index: 9, kind: output, shape index: {}]  }
   0x1 LB: > { %s2500_s10 = sadd.s32 4294967295, %s2847_s30   ;;  %p2504_p0 = scmp.ge.s32.totalorder %s2847_s30, 1  ;;  %s2847_s30 = sphi %s2909_s30, %s19_s30  }
   0x2   : > { %p288_p1 = scmp.lt.s32.totalorder %s2847_s30, 3 }
   0x4   : > { %p289_p2 = pnand %p2504_p0, %p288_p1 }
   0x5   : > { %s2505_s11 = sshll.u32 (!%p289_p2), %s2500_s10, 1  ;;  %vm340_vm0 = vcmask (!%p289_p2), 523264   ;;  %v385_v7 = vld [vmem:[%s3307_s3 + $0x8] sm:$0xff] (!%p289_p2)  ;;  %v387_v8 = vld [vmem:[%s3307_s3 + $0x18] sm:$0xff] (!%p289_p2)  ;;  %v384_v10 = vld [vmem:[%s3307_s3] sm:$0xff] (!%p289_p2)  ;;  %v2849_v20 = vmov (!%p289_p2), 0.0   ;;  %v402_v41 = vlaneseq (!%p289_p2) }
   0x6   : > { %292 = sbr.rel (%p289_p2) target bundleno = 5253 (0x1485), region = 56  ;;  %p325_p3 = scmp.lt.s32.totalorder (!%p289_p2), %s2505_s11, 3  ;;  %v2747_v9 = vpack.c.bf16 (!%p289_p2), %v387_v8, %v385_v7  ;;  %v386_v11 = vld [vmem:[%s3307_s3 + $0x10] sm:$0xff] (!%p289_p2)  ;;  %v389_v13 = vld [vmem:[%s3307_s3 + $0x28] sm:$0xff] (!%p289_p2)  ;;  %v391_v14 = vld [vmem:[%s3307_s3 + $0x38] sm:$0xff] (!%p289_p2)  ;;  %482 = vmatprep.mubr.f32.mxu0 (!%p289_p2), %v2849_v20  ;;  %2611 = vmatprep.subr.mxu1 (!%p289_p2), %v2849_v20  ;;  %vm2850_vm1 = vmmov (!%p289_p2), 0  }
   0x7   : > { %v2749_v12 = vpack.c.bf16 (!%p289_p2), %v386_v11, %v384_v10  ;;  %v388_v15 = vld [vmem:[%s3307_s3 + $0x20] sm:$0xff] (!%p289_p2)  ;;  %v2751_v16 = vpack.c.bf16 (!%p289_p2), %v391_v14, %v389_v13  ;;  %v390_v17 = vld [vmem:[%s3307_s3 + $0x30] sm:$0xff] (!%p289_p2)  ;;  %v393_v18 = vld [vmem:[%s3307_s3 + $0x48] sm:$0xff] (!%p289_p2)  ;;  %v403_v42 = vshrl.u32 (!%p289_p2), %v402_v41, 7  ;;  %2613 = vmatprep.mubr.msk.f32.mxu1 (!%p289_p2), %vm2850_vm1, %v2849_v20  ;;  %s2851_s20 = smov (!%p289_p2), 48   ;;  %s2852_s21 = smov (!%p289_p2), 64  }
   0x8   : > { %2748 = vmatprep.subr.bf16.mxu0 (!%p289_p2), %v2747_v9  ;;  %v395_v19 = vld [vmem:[%s3307_s3 + $0x58] sm:$0xff] (!%p289_p2)  ;;  %v2753_v21 = vpack.c.bf16 (!%p289_p2), %v390_v17, %v388_v15  ;;  %v392_v23 = vld [vmem:[%s3307_s3 + $0x40] sm:$0xff] (!%p289_p2)  ;;  %v394_v24 = vld [vmem:[%s3307_s3 + $0x50] sm:$0xff] (!%p289_p2)  ;;  %vm509_vm2 = vcmask (!%p289_p2), 130048   ;;  %vm587_vm3 = vcmask (!%p289_p2), 64512   ;;  %s2853_s26 = smov (!%p289_p2), 112  }
   0x9   : > { %2750 = vmatpush1.bf16.msra.mxu0 (!%p289_p2), %v2749_v12  ;;  %v2755_v22 = vpack.c.bf16 (!%p289_p2), %v395_v19, %v393_v18  ;;  %v397_v25 = vld [vmem:[%s3307_s3 + $0x68] sm:$0xff] (!%p289_p2)  ;;  %v399_v26 = vld [vmem:[%s3307_s3 + $0x78] sm:$0xff] (!%p289_p2)  ;;  %v2757_v27 = vpack.c.bf16 (!%p289_p2), %v394_v24, %v392_v23  ;;  %v396_v29 = vld [vmem:[%s3307_s3 + $0x60] sm:$0xff] (!%p289_p2)  ;;  %v404_v43 = vsub.s32 (!%p289_p2), 0, %v403_v42  ;;  %v408_v49 = vsub.s32 (!%p289_p2), 1, %v403_v42  ;;  %s2855_s29 = smov (!%p289_p2), 32  }
   0xa   : > { %2752 = vmatprep.subr.bf16.mxu0 (!%p289_p2), %v2751_v16  ;;  %v2759_v28 = vpack.c.bf16 (!%p289_p2), %v399_v26, %v397_v25  ;;  %v398_v30 = vld [vmem:[%s3307_s3 + $0x70] sm:$0xff] (!%p289_p2)  ;;  %v2983_v36 = vld [vmem:[%s3305_s1] ss:$0 sm:$0xff] (!%p289_p2)  ;;  %v3053_v9 = vld [vmem:[%s3309_s5 + $0x8] sm:$0xff] (!%p289_p2)  ;;  %s2857_s25 = smov (!%p289_p2), 80   ;;  %s2858_s27 = smov (!%p289_p2), 16  }
   0xb   : > { %v2761_v31 = vpack.c.bf16 (!%p289_p2), %v398_v30, %v396_v29  ;;  %v2988_v38 = vld [vmem:[%s3306_s2] ss:$0 sm:$0xff] (!%p289_p2)  ;;  %v496_v30 = vld [vmem:[%s3310_s6 + $0x8] sm:$0xff] (!%p289_p2) }
   0xc   : > { %v400_v44 = vld [vmem:[%s3308_s4] sm:$0x3] (!%p289_p2) }
   0xd   : > { %s3315_s11 = smov (!%p325_p3, %s2505_s11), 3  ;;  %2754 = vmatpush1.bf16.msra.mxu0 %v2753_v21  ;;  %v2999_v45 = vrot.slane %v400_v44, %v404_v43  ;;  %v3008_v50 = vrot.slane %v400_v44, %v408_v49  ;;  %v3027_v54 = vld [vmem:[%s3309_s5] sm:$0xff] }
   0xe   : > { %s2506_s12 = sshll.u32 %s3315_s11, 3  ;;  %2756 = vmatprep.subr.bf16.mxu0 %v2755_v22  ;;  %v3032_v56 = vld [vmem:[%s3312_s8] sm:$0xff] }
   0xf   : > { %s2925_s15 = scalar_lea.vmem %s3304_s0, %s2506_s12  ;;  %v495_v29 = vld [vmem:[%s3310_s6] sm:$0xff]  ;;  %s3240_s13 = scalar_lea.vmem %s3313_s9, %s2506_s12 }
  0x10   : > { %v336_v0 = vld [vmem:[%s2925_s15] sm:$0xff]  ;;  %v337_v14 = vld [vmem:[%s2925_s15 + $0x8] sm:$0xff]  ;;  %s2854_s15 = smov 96  }
  0x11   : > { %v341_v1 = vsel %vm340_vm0, %v336_v0, 0.0  ;;  %2758 = vmatpush1.bf16.msra.mxu0 %v2757_v27  ;;  %v344_v16 = vsel %vm340_vm0, %v337_v14, 0.0 }
  0x12   : > { %342 = vadd.xlane.f32.xlu0 %v341_v1  ;;  %2760 = vmatprep.subr.bf16.mxu0 %v2759_v28  ;;  %v2856_v28 = vmov 0.0|0.0  }
  0x15   : > { %2762 = vmatpush1.bf16.msra.mxu0 %v2761_v31  ;;  %v3077_v31 = vpack.c.bf16 %v496_v30, %v495_v29 }
  0x16   : > { %2766 = vmatprep.subr.bf16.mxu0 %v2856_v28 }
  0x9f   : > { %v343_v2 = vpop.xlane.xlu0 %342 }
  0xa0   : > { %v348_v3 = vmul.f32 0.015625, %v343_v2 }
  0xa2   : > { %v350_v4 = vsub.f32 %v336_v0, %v348_v3 }
  0xa4   : > { %v352_v5 = vmul.f32 %v350_v4, %v350_v4 }
  0xa6   : > { %v354_v6 = vsel %vm340_vm0, %v352_v5, 0.0 }
  0xa7   : > { %355 = vadd.xlane.f32.xlu0 %v354_v6 }
 0x134   : > { %v356_v32 = vpop.xlane.xlu0 %355 }
 0x135   : > { %v360_v33 = vmul.f32 0.015625, %v356_v32 }
 0x137   : > { %v362_v34 = vadd.f32 1e-05, %v360_v33 }
 0x139   : > { %2805 = vrsqrt.f32 %v362_v34 }
 0x143   : > { %v2806_v35 = vpop.eup %2805 }
 0x144   : > { %v366_v37 = vmul.f32 %v2806_v35, %v350_v4 }
 0x146   : > { %v374_v39 = vmul.f32 %v2983_v36, %v366_v37 }
 0x148   : > { %v382_v40 = vadd.f32 %v2988_v38, %v374_v39  ;;  %v497_v39 = vld [vmem:[%s3310_s6 + $0x10] sm:$0xff] }
 0x14a   : > { %2511 = vmatmul.mubr.msk.f32.vlgmr.msra.gmra.mrb[0].mxu0 %vm340_vm0, %v382_v40  ;;  %v498_v40 = vld [vmem:[%s3310_s6 + $0x18] sm:$0xff] }
 0x14b   : > { %488 = vmatprep.mubr.f32.mxu0 %v2849_v20  ;;  %2768 = vmatpush3.bf16.msra.mxu0 %v3077_v31  ;;  %v3088_v44 = vpack.c.bf16 %v498_v40, %v497_v39 }
 0x14c   : > { %2650 = vmatprep.subr.mxu0 %v2849_v20 }
 0x21d   : > { %v484_v46 = vpop.f32.mrb[0].mxu0 }
 0x21e   : > { %v3002_v47 = vadd.f32 %v484_v46, %v2999_v45  ;;  %v486_v48 = vpop.f32.mrb[1].mxu0 }
 0x21f   : > { %v3016_v53 = vadd.f32 %v486_v48, %v3008_v50 }
 0x220   : > { %676 = vrot.lane.b32.xlu0 %v3002_v47, %s2851_s20  ;;  %507 = vrot.lane.b32.xlu1 %v3002_v47, %s2852_s21  ;;  %v3012_v52 = vmul.f32 0.25, %v3002_v47 }
 0x292   : > { %v508_v51 = vpop.permute.xlu1 %507  ;;  %v677_v2 = vpop.permute.xlu0 %676 }
 0x293   : > { %2612 = vmatpush3.xpose.msk.msra.mxu1 %vm509_vm2, %v508_v51 }
 0x294   : > { %2616 = vmatprep.subr.mxu1 %v2849_v20 }
 0x296   : > { %2614 = vmatmul.mubr.msk.f32.vlgmr.msra.gmra.mrb[0].mxu1 %vm509_vm2, %v3012_v52 }
 0x297   : > { %2617 = vmatpush3.msra.mxu1 %v3016_v53  ;;  %2618 = vmatprep.mubr.msk.f32.mxu1 %vm2850_vm1, %v2849_v20 }
 0x298   : > { %2621 = vmatprep.subr.mxu1 %v2849_v20 }
 0x369   : > { %v581_v55 = vpop.f32.mrb[0].mxu1 }
 0x36a   : > { %v582_v57 = vadd.f32 %v581_v55, %v3027_v54  ;;  %v2615_v58 = vpop.f32.mrb[1].mxu1 }
 0x36c   : > { %v586_v59 = vadd.f32 %v3032_v56, %v582_v57 }
 0x36e   : > { %v588_v60 = vsel %vm587_vm3, %v586_v59, -inf }
 0x36f   : > { %589 = vmax.xlane.f32.xlu1 %v588_v60 }
 0x3fc   : > { %v590_v61 = vpop.xlane.xlu1 %589 }
 0x3fd   : > { %v591_v62 = vsub.f32 %v586_v59, %v590_v61 }
 0x3ff   : > { %v592_v63 = vmul.f32 1.442695, %v591_v62 }
 0x401   : > { %2807 = vpow2.f32 %v592_v63 }
 0x40b   : > { %v2808_v0 = vpop.eup %2807 }
 0x40c   : > { %v594_v1 = vsel %vm587_vm3, %v2808_v0, 0.0 }
 0x40d   : > { %595 = vadd.xlane.f32.xlu0 %v594_v1  ;;  %v3120_v1 = vld [vmem:[%s3309_s5 + $0x10] sm:$0xff] }
 0x423   : > { %674 = vrot.lane.b32.xlu0 %v3012_v52, %s2853_s26 }
 0x49a   : > { %v596_v3 = vpop.xlane.xlu0 %595 }
 0x49b   : > { %2809 = vrcp.f32 %v596_v3 }
 0x49e   : > { %v675_v6 = vpop.permute.xlu0 %674 }
 0x4a5   : > { %v2810_v4 = vpop.eup %2809 }
 0x4a6   : > { %v598_v5 = vmul.f32 %v2810_v4, %v2808_v0 }
 0x4a8   : > { %2619 = vmatmul.mubr.msk.f32.vlgmr.msra.gmra.mrb[2].mxu1 %vm587_vm3, %v598_v5 }
 0x4a9   : > { %2622 = vmatpush3.xpose.msk.msra.mxu1 %vm509_vm2, %v677_v2  ;;  %2623 = vmatprep.mubr.msk.f32.mxu1 %vm2850_vm1, %v2849_v20 }
 0x4aa   : > { %2626 = vmatprep.subr.mxu1 %v2849_v20 }
 0x4ac   : > { %2624 = vmatmul.mubr.msk.f32.vlgmr.msra.gmra.mrb[4].mxu1 %vm509_vm2, %v675_v6 }
 0x4ad   : > { %2628 = vmatprep.mubr.msk.f32.mxu1 %vm2850_vm1, %v2849_v20 }
 0x57b   : > { %v3048_v7 = vpop.f32.mrb[2].mxu1 }
 0x57c   : > { %v2620_v8 = vpop.f32.mrb[3].mxu1 }
 0x57f   : > { %v748_v10 = vpop.f32.mrb[4].mxu1 }
 0x580   : > { %v749_v11 = vadd.f32 %v3053_v9, %v748_v10  ;;  %v2625_v12 = vpop.f32.mrb[5].mxu1 }
 0x582   : > { %v752_v13 = vadd.f32 %v749_v11, %v3032_v56 }
 0x584   : > { %v753_v15 = vsel %vm587_vm3, %v752_v13, -inf }
 0x585   : > { %754 = vmax.xlane.f32.xlu0 %v753_v15 }
 0x589   : > { %345 = vadd.xlane.f32.xlu0 %v344_v16 }
 0x612   : > { %v755_v17 = vpop.xlane.xlu0 %754 }
 0x613   : > { %v756_v18 = vsub.f32 %v752_v13, %v755_v17  ;;  %v499_v13 = vld [vmem:[%s3310_s6 + $0x20] sm:$0xff] }
 0x615   : > { %v757_v19 = vmul.f32 1.442695, %v756_v18 }
 0x616   : > { %v346_v21 = vpop.xlane.xlu0 %345 }
 0x617   : > { %2811 = vpow2.f32 %v757_v19  ;;  %v349_v22 = vmul.f32 0.015625, %v346_v21 }
 0x619   : > { %v351_v23 = vsub.f32 %v337_v14, %v349_v22  ;;  %v3152_v22 = vld [vmem:[%s3309_s5 + $0x18] sm:$0xff] }
 0x61b   : > { %v353_v24 = vmul.f32 %v351_v23, %v351_v23 }
 0x61d   : > { %v357_v25 = vsel %vm340_vm0, %v353_v24, 0.0 }
 0x61e   : > { %358 = vadd.xlane.f32.xlu0 %v357_v25 }
 0x621   : > { %v2812_v26 = vpop.eup %2811 }
 0x622   : > { %v759_v27 = vsel %vm587_vm3, %v2812_v26, 0.0 }
 0x623   : > { %760 = vadd.xlane.f32.xlu1 %v759_v27 }
 0x634   : > { %765 = vrot.lane.b32.xlu1 %v3016_v53, %s2853_s26  ;;  %1079 = vrot.lane.b32.xlu0 %v3016_v53, %s2854_s15 }
 0x638   : > { %991 = vrot.lane.b32.xlu1 %v3002_v47, %s2855_s29 }
 0x63c   : > { %989 = vrot.lane.b32.xlu1 %v3012_v52, %s2854_s15 }
 0x6ab   : > { %v359_v32 = vpop.xlane.xlu0 %358 }
 0x6ac   : > { %v361_v33 = vmul.f32 0.015625, %v359_v32 }
 0x6ae   : > { %v363_v34 = vadd.f32 1e-05, %v361_v33 }
 0x6af   : > { %v1080_v51 = vpop.permute.xlu0 %1079 }
 0x6b0   : > { %2813 = vrsqrt.f32 %v363_v34  ;;  %v761_v35 = vpop.xlane.xlu1 %760 }
 0x6b1   : > { %2815 = vrcp.f32 %v761_v35  ;;  %v501_v35 = vld [vmem:[%s3310_s6 + $0x30] sm:$0xff] }
 0x6b4   : > { %v766_v37 = vpop.permute.xlu1 %765 }
 0x6b5   : > { %2627 = vmatpush3.msra.mxu1 %v766_v37  ;;  %v502_v37 = vld [vmem:[%s3310_s6 + $0x38] sm:$0xff] }
 0x6b6   : > { %2763 = vmatprep.subr.bf16.mxu1 %v2856_v28  ;;  %v3181_v39 = vpack.c.bf16 %v502_v37, %v501_v35 }
 0x6ba   : > { %v2814_v41 = vpop.eup %2813 }
 0x6bb   : > { %v2816_v42 = vpop.eup %2815  ;;  %v367_v43 = vmul.f32 %v2814_v41, %v351_v23 }
 0x6bc   : > { %v763_v46 = vmul.f32 %v2816_v42, %v2812_v26 }
 0x6bd   : > { %v375_v48 = vmul.f32 %v2983_v36, %v367_v43  ;;  %v992_v36 = vpop.permute.xlu1 %991 }
 0x6be   : > { %2629 = vmatmul.mubr.msk.f32.vlgmr.msra.gmra.mrb[6].mxu1 %vm587_vm3, %v763_v46 }
 0x6bf   : > { %v383_v49 = vadd.f32 %v2988_v38, %v375_v48  ;;  %2765 = vmatpush3.bf16.msra.mxu1 %v3088_v44  ;;  %2635 = vmatprep.mubr.msk.f32.mxu1 %vm2850_vm1, %v2849_v20 }
 0x6c0   : > { %2645 = vmatprep.subr.mxu1 %v2849_v20 }
 0x6c1   : > { %2512 = vmatmul.mubr.msk.f32.gmra.mrb[2].mxu0 %vm340_vm0, %v383_v49  ;;  %v990_v58 = vpop.permute.xlu1 %989 }
 0x6c2   : > { %2642 = vmatprep.mubr.msk.f32.mxu0 %vm2850_vm1, %v2849_v20 }
 0x6c5   : > { %2643 = vmatmul.mubr.msk.f32.vlgmr.msra.gmra.mrb[4].mxu0 %vm509_vm2, %v3048_v7 }
 0x6c6   : > { %2651 = vmatpush3.msra.mxu0 %v1080_v51  ;;  %2652 = vmatprep.mubr.msk.f32.mxu0 %vm2850_vm1, %v2849_v20 }
 0x6c7   : > { %2662 = vmatprep.subr.mxu0 %v2849_v20 }
 0x791   : > { %v837_v38 = vpop.f32.mrb[6].mxu1 }
 0x792   : > { %v2630_v55 = vpop.f32.mrb[7].mxu1  ;;  %2636 = vmatmul.mubr.msk.f32.vlgmr.msra.gmra.mrb[8].mxu1 %vm509_vm2, %v837_v38 }
 0x793   : > { %2646 = vmatpush3.xpose.msk.msra.mxu1 %vm509_vm2, %v992_v36  ;;  %2647 = vmatprep.mubr.msk.f32.mxu1 %vm2850_vm1, %v2849_v20 }
 0x794   : > { %v490_v57 = vpop.f32.mrb[2].mxu0  ;;  %2769 = vmatprep.subr.bf16.mxu1 %v2856_v28 }
 0x795   : > { %v3110_v59 = vpop.f32.mrb[3].mxu0  ;;  %v3162_v29 = vadd.f32 %v490_v57, %v2999_v45 }
 0x796   : > { %2648 = vmatmul.mubr.msk.f32.vlgmr.msra.gmra.mrb[10].mxu1 %vm509_vm2, %v990_v58  ;;  %v3204_v38 = vadd.f32 %v3110_v59, %v3008_v50  ;;  %v3214_v58 = vld [vmem:[%s3312_s8 + $0x8] sm:$0xff] }
 0x797   : > { %2659 = vmatprep.mubr.msk.f32.mxu1 %vm2850_vm1, %v2849_v20  ;;  %v3167_v30 = vmul.f32 0.25, %v3162_v29 }
 0x798   : > { %v983_v60 = vpop.f32.mrb[4].mxu0 }
 0x799   : > { %v2644_v61 = vpop.f32.mrb[5].mxu0 }
 0x865   : > { %v910_v62 = vpop.f32.mrb[8].mxu1 }
 0x866   : > { %v3115_v63 = vadd.f32 %v983_v60, %v910_v62  ;;  %v2637_v0 = vpop.f32.mrb[9].mxu1 }
 0x869   : > { %v1063_v2 = vpop.f32.mrb[10].mxu1 }
 0x86a   : > { %v1064_v3 = vadd.f32 %v3120_v1, %v1063_v2  ;;  %v2649_v4 = vpop.f32.mrb[11].mxu1 }
 0x86c   : > { %v1067_v5 = vadd.f32 %v1064_v3, %v3032_v56 }
 0x86e   : > { %v1068_v6 = vsel %vm587_vm3, %v1067_v5, -inf }
 0x86f   : > { %1069 = vmax.xlane.f32.xlu1 %v1068_v6 }
 0x880   : > { %1231 = vrot.lane.b32.xlu1 %v3012_v52, %s2857_s25  ;;  %v500_v52 = vld [vmem:[%s3310_s6 + $0x28] sm:$0xff] }
 0x881   : > { %v3136_v14 = vpack.c.bf16 %v500_v52, %v499_v13  ;;  %v3233_v13 = vld [vmem:[%s3311_s7] ss:$0 sm:$0xff] }
 0x883   : > { %2771 = vmatpush3.bf16.msra.mxu1 %v3136_v14 }
 0x884   : > { %2667 = vmatprep.subr.mxu1 %v2849_v20 }
 0x8fc   : > { %v1070_v7 = vpop.xlane.xlu1 %1069 }
 0x8fd   : > { %v1071_v8 = vsub.f32 %v1067_v5, %v1070_v7 }
 0x8ff   : > { %v1072_v10 = vmul.f32 1.442695, %v1071_v8 }
 0x901   : > { %2817 = vpow2.f32 %v1072_v10 }
 0x90b   : > { %v2818_v11 = vpop.eup %2817 }
 0x90c   : > { %v1074_v12 = vsel %vm587_vm3, %v2818_v11, 0.0 }
 0x90d   : > { %1075 = vadd.xlane.f32.xlu0 %v1074_v12 }
 0x923   : > { %1233 = vrot.lane.b32.xlu0 %v3002_v47, %s2858_s27  ;;  %v1232_v47 = vpop.permute.xlu1 %1231 }
 0x99a   : > { %v1076_v15 = vpop.xlane.xlu0 %1075 }
 0x99b   : > { %2819 = vrcp.f32 %v1076_v15 }
 0x99e   : > { %v1234_v18 = vpop.permute.xlu0 %1233 }
 0x9a5   : > { %v2820_v16 = vpop.eup %2819 }
 0x9a6   : > { %v1078_v17 = vmul.f32 %v2820_v16, %v2818_v11 }
 0x9a8   : > { %2653 = vmatmul.mubr.msk.f32.vlgmr.msra.gmra.mrb[6].mxu0 %vm587_vm3, %v1078_v17 }
 0x9a9   : > { %2663 = vmatpush3.xpose.msk.msra.mxu0 %vm509_vm2, %v1234_v18  ;;  %2664 = vmatprep.mubr.msk.f32.mxu0 %vm2850_vm1, %v2849_v20 }
 0x9aa   : > { %2772 = vmatprep.subr.bf16.mxu0 %v2856_v28 }
 0x9ac   : > { %2665 = vmatmul.mubr.msk.f32.vlgmr.msra.gmra.mrb[8].mxu0 %vm509_vm2, %v1232_v47 }
 0x9ad   : > { %2676 = vmatprep.mubr.msk.f32.mxu0 %vm2850_vm1, %v2849_v20  ;;  %2774 = vmatpush3.bf16.msra.mxu0 %v3181_v39 }
 0x9ae   : > { %2684 = vmatprep.subr.mxu0 %v2849_v20 }
 0xa7b   : > { %v1151_v19 = vpop.f32.mrb[6].mxu0 }
 0xa7c   : > { %v2654_v21 = vpop.f32.mrb[7].mxu0  ;;  %2660 = vmatmul.mubr.msk.f32.vlgmr.msra.gmra.mrb[12].mxu1 %vm509_vm2, %v1151_v19 }
 0xa7d   : > { %2669 = vmatprep.mubr.msk.f32.mxu1 %vm2850_vm1, %v2849_v20 }
 0xa7f   : > { %v1305_v23 = vpop.f32.mrb[8].mxu0 }
 0xa80   : > { %v1306_v24 = vadd.f32 %v3152_v22, %v1305_v23  ;;  %v2666_v25 = vpop.f32.mrb[9].mxu0 }
 0xa82   : > { %v1309_v26 = vadd.f32 %v1306_v24, %v3032_v56 }
 0xa84   : > { %v1310_v27 = vsel %vm587_vm3, %v1309_v26, -inf }
 0xa85   : > { %1311 = vmax.xlane.f32.xlu0 %v1310_v27 }
 0xa9b   : > { %1321 = vrot.lane.b32.xlu0 %v3016_v53, %s2857_s25 }
 0xa9f   : > { %1649 = vrot.lane.b32.xlu0 %v3162_v29, %s2851_s20 }
 0xaa3   : > { %1647 = vrot.lane.b32.xlu0 %v3167_v30, %s2853_s26 }
 0xb12   : > { %v1312_v32 = vpop.xlane.xlu0 %1311 }
 0xb13   : > { %v1313_v56 = vsub.f32 %v1309_v26, %v1312_v32 }
 0xb15   : > { %v1314_v33 = vmul.f32 1.442695, %v1313_v56 }
 0xb16   : > { %v1322_v34 = vpop.permute.xlu0 %1321 }
 0xb17   : > { %2821 = vpow2.f32 %v1314_v33  ;;  %2668 = vmatpush3.msra.mxu1 %v1322_v34 }
 0xb18   : > { %2679 = vmatprep.subr.mxu1 %v2849_v20 }
 0xb1a   : > { %v1650_v51 = vpop.permute.xlu0 %1649 }
 0xb1e   : > { %v1648_v36 = vpop.permute.xlu0 %1647 }
 0xb21   : > { %v2822_v53 = vpop.eup %2821 }
 0xb22   : > { %v1316_v45 = vsel %vm587_vm3, %v2822_v53, 0.0 }
 0xb23   : > { %1317 = vadd.xlane.f32.xlu1 %v1316_v45 }
 0xb34   : > { %1482 = vrot.lane.b32.xlu1 %v3162_v29, %s2852_s21 }
 0xb4f   : > { %v1224_v40 = vpop.f32.mrb[12].mxu1 }
 0xb50   : > { %v1228_v41 = vadd.f32 %v1224_v40, %v3115_v63  ;;  %v2661_v42 = vpop.f32.mrb[13].mxu1 }
 0xbb0   : > { %v1318_v43 = vpop.xlane.xlu1 %1317 }
 0xbb1   : > { %2823 = vrcp.f32 %v1318_v43 }
 0xbb4   : > { %v1483_v49 = vpop.permute.xlu1 %1482 }
 0xbbb   : > { %v2824_v46 = vpop.eup %2823 }
 0xbbc   : > { %v1320_v48 = vmul.f32 %v2824_v46, %v2822_v53 }
 0xbbe   : > { %2670 = vmatmul.mubr.msk.f32.vlgmr.msra.gmra.mrb[14].mxu1 %vm587_vm3, %v1320_v48 }
 0xbbf   : > { %2680 = vmatpush3.xpose.msk.msra.mxu1 %vm509_vm2, %v1483_v49  ;;  %2681 = vmatprep.mubr.msk.f32.mxu1 %vm2850_vm1, %v2849_v20 }
 0xbc0   : > { %2689 = vmatprep.subr.mxu1 %v2849_v20 }
 0xbc2   : > { %2682 = vmatmul.mubr.msk.f32.vlgmr.msra.gmra.mrb[16].mxu1 %vm509_vm2, %v3167_v30 }
 0xbc3   : > { %2690 = vmatpush3.xpose.msk.msra.mxu1 %vm509_vm2, %v1650_v51  ;;  %2691 = vmatprep.mubr.msk.f32.mxu1 %vm2850_vm1, %v2849_v20 }
 0xbc4   : > { %2775 = vmatprep.subr.bf16.mxu1 %v2856_v28 }
 0xbc6   : > { %2692 = vmatmul.mubr.msk.f32.vlgmr.msra.gmra.mrb[18].mxu1 %vm509_vm2, %v1648_v36 }
 0xbc7   : > { %2777 = vmatpush3.bf16.msra.mxu1 %v3088_v44  ;;  %2703 = vmatprep.mubr.msk.f32.mxu1 %vm2850_vm1, %v2849_v20 }
 0xbc8   : > { %2713 = vmatprep.subr.mxu1 %v2849_v20 }
 0xc91   : > { %v1393_v55 = vpop.f32.mrb[14].mxu1 }
 0xc92   : > { %v2671_v57 = vpop.f32.mrb[15].mxu1  ;;  %2677 = vmatmul.mubr.msk.f32.vlgmr.msra.gmra.mrb[10].mxu0 %vm509_vm2, %v1393_v55 }
 0xc93   : > { %2685 = vmatpush3.msra.mxu0 %v3204_v38  ;;  %2686 = vmatprep.mubr.msk.f32.mxu0 %vm2850_vm1, %v2849_v20 }
 0xc94   : > { %2694 = vmatprep.subr.mxu0 %v2849_v20 }
 0xc95   : > { %v1555_v44 = vpop.f32.mrb[16].mxu1 }
 0xc96   : > { %v1556_v50 = vadd.f32 %v1555_v44, %v3027_v54  ;;  %v2683_v59 = vpop.f32.mrb[17].mxu1 }
 0xc98   : > { %v1561_v60 = vadd.f32 %v3214_v58, %v1556_v50 }
 0xc99   : > { %v1721_v61 = vpop.f32.mrb[18].mxu1 }
 0xc9a   : > { %v1722_v62 = vadd.f32 %v3053_v9, %v1721_v61  ;;  %v2693_v63 = vpop.f32.mrb[19].mxu1  ;;  %v1562_v0 = vsel %vm587_vm3, %v1561_v60, -inf }
 0xc9b   : > { %1563 = vmax.xlane.f32.xlu0 %v1562_v0 }
 0xc9c   : > { %v1725_v2 = vadd.f32 %v3214_v58, %v1722_v62 }
 0xc9e   : > { %v1726_v3 = vsel %vm587_vm3, %v1725_v2, -inf }
 0xc9f   : > { %1727 = vmax.xlane.f32.xlu1 %v1726_v3 }
 0xcb0   : > { %1963 = vrot.lane.b32.xlu1 %v3162_v29, %s2855_s29 }
 0xcb4   : > { %1961 = vrot.lane.b32.xlu1 %v3167_v30, %s2854_s15 }
 0xd28   : > { %v1564_v54 = vpop.xlane.xlu0 %1563 }
 0xd29   : > { %v1565_v4 = vsub.f32 %v1561_v60, %v1564_v54 }
 0xd2b   : > { %v1566_v5 = vmul.f32 1.442695, %v1565_v4 }
 0xd2c   : > { %v1728_v6 = vpop.xlane.xlu1 %1727 }
 0xd2d   : > { %2825 = vpow2.f32 %v1566_v5  ;;  %v1729_v9 = vsub.f32 %v1725_v2, %v1728_v6 }
 0xd2f   : > { %v1730_v7 = vmul.f32 1.442695, %v1729_v9 }
 0xd30   : > { %v1964_v32 = vpop.permute.xlu1 %1963 }
 0xd31   : > { %2827 = vpow2.f32 %v1730_v7 }
 0xd37   : > { %v2826_v8 = vpop.eup %2825 }
 0xd38   : > { %v1568_v10 = vsel %vm587_vm3, %v2826_v8, 0.0 }
 0xd39   : > { %1569 = vadd.xlane.f32.xlu0 %v1568_v10 }
 0xd3b   : > { %v2828_v11 = vpop.eup %2827 }
 0xd3c   : > { %v1732_v12 = vsel %vm587_vm3, %v2828_v11, 0.0 }
 0xd3d   : > { %1733 = vadd.xlane.f32.xlu0 %v1732_v12 }
 0xd53   : > { %1738 = vrot.lane.b32.xlu0 %v3204_v38, %s2853_s26 }
 0xd65   : > { %v1466_v52 = vpop.f32.mrb[10].mxu0 }
 0xd66   : > { %v1470_v15 = vadd.f32 %v1466_v52, %v1228_v41  ;;  %v2678_v16 = vpop.f32.mrb[11].mxu0 }
 0xd68   : > { %v1477_v17 = vadd.f32 %v3233_v13, %v1470_v15 }
 0xd6a   : > { %1478 = vst.msk [vmem:[%s3240_s13] sm:$0xff] %vm340_vm0, %v1477_v17 }
 0xdc6   : > { %v1570_v18 = vpop.xlane.xlu0 %1569 }
 0xdc7   : > { %2829 = vrcp.f32 %v1570_v18 }
 0xdca   : > { %v1734_v47 = vpop.xlane.xlu0 %1733 }
 0xdcb   : > { %2831 = vrcp.f32 %v1734_v47 }
 0xdce   : > { %v1739_v23 = vpop.permute.xlu0 %1738 }
 0xdd1   : > { %v2830_v19 = vpop.eup %2829 }
 0xdd2   : > { %v1572_v21 = vmul.f32 %v2830_v19, %v2826_v8 }
 0xdd4   : > { %2687 = vmatmul.mubr.msk.f32.vlgmr.msra.gmra.mrb[12].mxu0 %vm587_vm3, %v1572_v21 }
 0xdd5   : > { %v2832_v24 = vpop.eup %2831  ;;  %2695 = vmatpush3.msra.mxu0 %v1739_v23  ;;  %2696 = vmatprep.mubr.msk.f32.mxu0 %vm2850_vm1, %v2849_v20 }
 0xdd6   : > { %v1736_v25 = vmul.f32 %v2832_v24, %v2828_v11  ;;  %2778 = vmatprep.subr.bf16.mxu0 %v2856_v28 }
 0xdd8   : > { %2697 = vmatmul.mubr.msk.f32.vlgmr.msra.gmra.mrb[14].mxu0 %vm587_vm3, %v1736_v25 }
 0xdd9   : > { %2780 = vmatpush3.bf16.msra.mxu0 %v3077_v31  ;;  %2710 = vmatprep.mubr.msk.f32.mxu0 %vm2850_vm1, %v2849_v20  ;;  %v1962_v31 = vpop.permute.xlu1 %1961 }
 0xdda   : > { %2718 = vmatprep.subr.mxu0 %v2849_v20 }
 0xea7   : > { %v1642_v26 = vpop.f32.mrb[12].mxu0 }
 0xea8   : > { %v2688_v27 = vpop.f32.mrb[13].mxu0  ;;  %2711 = vmatmul.mubr.msk.f32.vlgmr.msra.gmra.mrb[16].mxu0 %vm509_vm2, %v1642_v26 }
 0xea9   : > { %2720 = vmatprep.mubr.msk.f32.mxu0 %vm2850_vm1, %v2849_v20 }
 0xeab   : > { %v1810_v56 = vpop.f32.mrb[14].mxu0 }
 0xeac   : > { %v2698_v33 = vpop.f32.mrb[15].mxu0  ;;  %2704 = vmatmul.mubr.msk.f32.vlgmr.msra.gmra.mrb[20].mxu1 %vm509_vm2, %v1810_v56 }
 0xead   : > { %2714 = vmatpush3.xpose.msk.msra.mxu1 %vm509_vm2, %v1964_v32  ;;  %2715 = vmatprep.mubr.msk.f32.mxu1 %vm2850_vm1, %v2849_v20 }
 0xeae   : > { %2781 = vmatprep.subr.bf16.mxu1 %v2856_v28 }
 0xeb0   : > { %2716 = vmatmul.mubr.msk.f32.vlgmr.msra.gmra.mrb[22].mxu1 %vm509_vm2, %v1962_v31 }
 0xeb1   : > { %2783 = vmatpush3.bf16.msra.mxu1 %v3136_v14  ;;  %2727 = vmatprep.mubr.msk.f32.mxu1 %vm2850_vm1, %v2849_v20 }
 0xeb2   : > { %2735 = vmatprep.subr.mxu1 %v2849_v20 }
 0xf7b   : > { %v1956_v34 = vpop.f32.mrb[16].mxu0 }
 0xf7c   : > { %v2712_v53 = vpop.f32.mrb[17].mxu0 }
 0xf7f   : > { %v1883_v45 = vpop.f32.mrb[20].mxu1 }
 0xf80   : > { %v1957_v35 = vadd.f32 %v1956_v34, %v1883_v45  ;;  %v2705_v37 = vpop.f32.mrb[21].mxu1 }
 0xf83   : > { %v2035_v40 = vpop.f32.mrb[22].mxu1 }
 0xf84   : > { %v2036_v41 = vadd.f32 %v3120_v1, %v2035_v40  ;;  %v2717_v42 = vpop.f32.mrb[23].mxu1 }
 0xf86   : > { %v2039_v43 = vadd.f32 %v3214_v58, %v2036_v41 }
 0xf88   : > { %v2040_v46 = vsel %vm587_vm3, %v2039_v43, -inf }
 0xf89   : > { %2041 = vmax.xlane.f32.xlu0 %v2040_v46 }
 0xf9f   : > { %2051 = vrot.lane.b32.xlu0 %v3204_v38, %s2854_s15 }
 0xfa3   : > { %2202 = vrot.lane.b32.xlu0 %v3167_v30, %s2857_s25 }
0x1016   : > { %v2042_v14 = vpop.xlane.xlu0 %2041 }
0x1017   : > { %v2043_v48 = vsub.f32 %v2039_v43, %v2042_v14 }
0x1019   : > { %v2044_v49 = vmul.f32 1.442695, %v2043_v48 }
0x101a   : > { %v2052_v51 = vpop.permute.xlu0 %2051 }
0x101b   : > { %2833 = vpow2.f32 %v2044_v49  ;;  %2719 = vmatpush3.msra.mxu0 %v2052_v51 }
0x101c   : > { %2730 = vmatprep.subr.mxu0 %v2849_v20 }
0x101e   : > { %v2203_v50 = vpop.permute.xlu0 %2202 }
0x1025   : > { %v2834_v1 = vpop.eup %2833 }
0x1026   : > { %v2046_v36 = vsel %vm587_vm3, %v2834_v1, 0.0 }
0x1027   : > { %2047 = vadd.xlane.f32.xlu1 %v2046_v36 }
0x1038   : > { %2204 = vrot.lane.b32.xlu1 %v3162_v29, %s2858_s27 }
0x10b4   : > { %v2048_v55 = vpop.xlane.xlu1 %2047 }
0x10b5   : > { %2835 = vrcp.f32 %v2048_v55 }
0x10b8   : > { %v2205_v30 = vpop.permute.xlu1 %2204 }
0x10bf   : > { %v2836_v57 = vpop.eup %2835 }
0x10c0   : > { %v2050_v44 = vmul.f32 %v2836_v57, %v2834_v1 }
0x10c2   : > { %2721 = vmatmul.mubr.msk.f32.vlgmr.msra.gmra.mrb[18].mxu0 %vm587_vm3, %v2050_v44 }
0x10c3   : > { %2731 = vmatpush3.xpose.msk.msra.mxu0 %vm509_vm2, %v2205_v30  ;;  %2732 = vmatprep.mubr.msk.f32.mxu0 %vm2850_vm1, %v2849_v20 }
0x10c4   : > { %2784 = vmatprep.subr.bf16.mxu0 %v2856_v28 }
0x10c6   : > { %2733 = vmatmul.mubr.msk.f32.vlgmr.msra.gmra.mrb[20].mxu0 %vm509_vm2, %v2203_v50 }
0x10c7   : > { %2786 = vmatpush3.bf16.msra.mxu0 %v3181_v39  ;;  %2744 = vmatprep.mubr.msk.f32.mxu0 %vm2850_vm1, %v2849_v20 }
0x1195   : > { %v2123_v29 = vpop.f32.mrb[18].mxu0 }
0x1196   : > { %v2722_v59 = vpop.f32.mrb[19].mxu0  ;;  %2728 = vmatmul.mubr.msk.f32.vlgmr.msra.gmra.mrb[24].mxu1 %vm509_vm2, %v2123_v29 }
0x1197   : > { %2737 = vmatprep.mubr.msk.f32.mxu1 %vm2850_vm1, %v2849_v20 }
0x1199   : > { %v2276_v60 = vpop.f32.mrb[20].mxu0 }
0x119a   : > { %v2277_v61 = vadd.f32 %v3152_v22, %v2276_v60  ;;  %v2734_v62 = vpop.f32.mrb[21].mxu0 }
0x119c   : > { %v2280_v28 = vadd.f32 %v3214_v58, %v2277_v61 }
0x119e   : > { %v2281_v63 = vsel %vm587_vm3, %v2280_v28, -inf }
0x119f   : > { %2282 = vmax.xlane.f32.xlu1 %v2281_v63 }
0x122c   : > { %v2283_v39 = vpop.xlane.xlu1 %2282 }
0x122d   : > { %v2284_v0 = vsub.f32 %v2280_v28, %v2283_v39 }
0x122f   : > { %v2285_v2 = vmul.f32 1.442695, %v2284_v0 }
0x1231   : > { %2837 = vpow2.f32 %v2285_v2 }
0x123b   : > { %v2838_v3 = vpop.eup %2837 }
0x123c   : > { %v2287_v54 = vsel %vm587_vm3, %v2838_v3, 0.0 }
0x123d   : > { %2288 = vadd.xlane.f32.xlu0 %v2287_v54 }
0x1253   : > { %2292 = vrot.lane.b32.xlu0 %v3204_v38, %s2857_s25 }
0x1269   : > { %v2196_v20 = vpop.f32.mrb[24].mxu1 }
0x126a   : > { %v2200_v4 = vadd.f32 %v2196_v20, %v1957_v35  ;;  %v2729_v22 = vpop.f32.mrb[25].mxu1 }
0x12ca   : > { %v2289_v5 = vpop.xlane.xlu0 %2288 }
0x12cb   : > { %2839 = vrcp.f32 %v2289_v5 }
0x12ce   : > { %v2293_v58 = vpop.permute.xlu0 %2292 }
0x12cf   : > { %2736 = vmatpush3.msra.mxu1 %v2293_v58 }
0x12d5   : > { %v2840_v6 = vpop.eup %2839 }
0x12d6   : > { %v2291_v9 = vmul.f32 %v2840_v6, %v2838_v3 }
0x12d8   : > { %2738 = vmatmul.mubr.msk.f32.vlgmr.msra.gmra.mrb[26].mxu1 %vm587_vm3, %v2291_v9 }
0x13ab   : > { %v2364_v7 = vpop.f32.mrb[26].mxu1 }
0x13ac   : > { %v2739_v8 = vpop.f32.mrb[27].mxu1  ;;  %2745 = vmatmul.mubr.msk.f32.vlgmr.msra.gmra.mrb[22].mxu0 %vm509_vm2, %v2364_v7 }
0x147f   : > { %v2437_v10 = vpop.f32.mrb[22].mxu0 }
0x1480   : > { %v2441_v11 = vadd.f32 %v2437_v10, %v2200_v4  ;;  %v2746_v12 = vpop.f32.mrb[23].mxu0 }
0x1482   : > { %v2442_v38 = vadd.f32 %v3233_v13, %v2441_v11 }
0x1484   : > { %2443 = vst.msk [vmem:[%s3240_s13 + $0x8] sm:$0xff] %vm340_vm0, %v2442_v38 }
0x1485 PF: > { %s19_s30 = sadd.s32 1, %s2847_s30  }
0x1486   : > { %p16_p4 = scmp.ge.s32.totalorder %s19_s30, 4  }
0x1488   :  { %18 = sbr.rel (!%p16_p4) target bundleno = 1 (0x1), region = 90 }

</bundles_post_ra>
